<compile_context>
chip_gen: v7x
topology: tpu7x:2x2x1
jax: 0.10.0
libtpu: 0.0.40
codegen_flags: <defaults>
</compile_context>

<pallas_src>
import numpy as np
import jax
import jax.numpy as jnp
from jax.experimental import pallas as pl
from jax.experimental.pallas import tpu as pltpu

# ----------------------------- model config (small) -----------------------------
IN_CHANS = 3
IMG = 64                       # input spatial size (/32 by the 4-stage backbone -> 2x2)
DEPTHS = (1, 1, 1, 1)          # ConvNeXt structure, scaled down from convnext_base
DIMS = (8, 16, 32, 64)         # channel dims per stage; features = DIMS[-1]
WS = (16, 8, 4, 2)             # spatial width (== height) per stage; WS[i]*DIMS[i] == 128
NUM_CLASSES = 6
BATCH = 2

NIMG = 2                       # images packed per grid step (x_full + x_roi of one sample)
LANES = 128                    # lane-dense activation width (W*C) at every stage
PAD_OFF = 8                    # aligned sublane offset of an image inside its pad slab
PAD_ROWS = 32                  # per-image slab height; >= PAD_OFF + max(H) + halo(3)
STEM_FEAT = WS[0] * 4 * 4 * IN_CHANS      # 768 = 16 patches/row * 48 features/patch
N_VECS = 3 + 4 * 5 + 3 * 3     # packed (1,128) vectors: stem(3) + blocks(4*5) + downsamples(3*3)

LN_EPS = 1e-6                  # timm ConvNeXt LayerNorm eps
BN_EPS = 1e-5                  # nn.BatchNorm1d default eps
BF16 = jnp.bfloat16


# ----------------------------- in-kernel math helpers -----------------------------
def _erf(x):
    # Abramowitz & Stegun 7.1.26, |error| < 1.5e-7 (exact-GELU semantics at f32 precision)
    a1, a2, a3, a4, a5 = 0.254829592, -0.284496736, 1.421413741, -1.453152027, 1.061405429
    p = 0.3275911
    s = jnp.where(x >= 0.0, 1.0, -1.0)
    ax = jnp.abs(x)
    t = 1.0 / (1.0 + p * ax)
    poly = ((((a5 * t + a4) * t + a3) * t + a2) * t + a1) * t
    return s * (1.0 - poly * jnp.exp(-ax * ax))


def _gelu(x):
    # exact GELU: 0.5 * x * (1 + erf(x / sqrt(2)))   (PyTorch nn.GELU default)
    return 0.5 * x * (1.0 + _erf(x * 0.7071067811865476))


# ----------------------------- fused backbone + head kernel -----------------------------
def _fused_kernel(x_ref, stemw_ref, gm_ref, vec_ref, b1_ref, mdw_ref, w1_ref,
                  w2_ref, mds_ref, pool_ref,
                  w1a_ref, w1b_ref, cb1_ref, bnw_ref, bnb_ref, bnm_ref, bnv_ref,
                  cw2_ref, cb2_ref, cw3_ref, cb3_ref,
                  o_ref, pad_ref, ds_ref, dwin_ref):
    """ConvNeXt backbone + classifier head for one (x_full, x_roi) pair.

    Both images are packed along sublanes: every activation is (NIMG*H, 128) with
    lane = w*C + c, rows [0:H] = full image, rows [H:2H] = roi image.
    All large matmul operands are bf16 (f32 accumulate); LN/GELU/BN/head stay f32.
    """
    f32 = jnp.float32

    def V(i):                                        # packed (1, 128) parameter row
        return vec_ref[pl.ds(i, 1), :]

    def mm(a, w):                                    # bf16 MXU matmul, f32 accumulate
        return jnp.dot(a.astype(BF16), w, preferred_element_type=f32)

    def ln128(x, gm, g, b):
        # LayerNorm over channel groups of the 128-lane axis; gm = block-diag(1/C)
        mu = mm(x, gm)
        xc = x - mu
        var = mm(xc * xc, gm)
        return xc * jax.lax.rsqrt(var + LN_EPS) * g + b

    # ---- stem: 4x4/s4 conv (block-diagonal matmul over patches) + LN(C=8) ----
    x = mm(x_ref[0], stemw_ref[...]) + V(0)          # (NIMG*16, 128), lane = w*8 + c
    x = ln128(x, gm_ref[0], V(1), V(2))

    zero3 = jnp.zeros((3, LANES), f32)

    for si in range(4):
        H, C = WS[si], DIMS[si]
        M = NIMG * H

        if si > 0:
            # ---- downsample: LN (previous-stage channel groups) + 2x2/s2 conv ----
            j = si - 1
            Hin = WS[j]
            vd = 3 + 4 * 5 + j * 3
            xl = ln128(x, gm_ref[j], V(vd), V(vd + 1))       # (NIMG*Hin, 128)
            ds_ref[pl.ds(0, NIMG * Hin), :] = xl
            # packed even/odd row pick: out row (n*H + r) <- in row (n*Hin + 2r + dh)
            x = (V(vd + 2)
                 + mm(ds_ref[pl.ds(0, M, stride=2), :], mds_ref[j, 0])
                 + mm(ds_ref[pl.ds(1, M, stride=2), :], mds_ref[j, 1]))

        # ---------------- ConvNeXt block ----------------
        vb = 3 + si * 5
        # depthwise 7x7: each image gets its own 32-row slab in pad_ref; only the
        # 3-row halos above/below the live window are (re)zeroed each stage.
        for n in range(NIMG):
            base = n * PAD_ROWS
            pad_ref[pl.ds(base + PAD_OFF - 3, 3), :] = zero3
            pad_ref[pl.ds(base + PAD_OFF + H, 3), :] = zero3
            pad_ref[pl.ds(base + PAD_OFF, H), :] = x[n * H:(n + 1) * H, :]
        # stage the 7 kh-shifted windows side by side (lanes kh*128..) and run the
        # whole depthwise conv as ONE (M, 896) @ (896, 128) MXU matmul; the kw lane
        # shift + zero-pad edge masking are folded into the banded weight matrix.
        for kh in range(7):
            for n in range(NIMG):
                dwin_ref[pl.ds(n * H, H), pl.ds(kh * LANES, LANES)] = (
                    pad_ref[pl.ds(n * PAD_ROWS + PAD_OFF - 3 + kh, H), :])
        acc = mm(dwin_ref[pl.ds(0, M), :], mdw_ref[si]) + V(vb)

        # LN + pointwise MLP (block-diagonal matmuls) + layer scale + residual
        t = ln128(acc, gm_ref[si], V(vb + 1), V(vb + 2))
        h = mm(t, w1_ref[si]) + b1_ref[pl.ds(si, 1), :]
        h = _gelu(h)
        h = mm(h, w2_ref[si]) + V(vb + 3)
        x = x + V(vb + 4) * h

    # ---- global average pool (per image) + classifier head (f32) ----
    # x: (NIMG*2, 128) with lane = w*64 + c; rows [0:2] = full image, [2:4] = roi.
    s_full = x[0:1, :] + x[1:2, :]
    s_roi = x[2:3, :] + x[3:4, :]
    pf = jnp.dot(s_full, pool_ref[...], preferred_element_type=f32)   # (1, 64)
    pr = jnp.dot(s_roi, pool_ref[...], preferred_element_type=f32)    # (1, 64)
    # Dropout layers are identity at inference; BatchNorm1d uses running statistics.
    h1 = (jnp.dot(pf, w1a_ref[...], preferred_element_type=f32)
          + jnp.dot(pr, w1b_ref[...], preferred_element_type=f32) + cb1_ref[...])
    h1 = _gelu(h1)
    h1 = (h1 - bnm_ref[...]) * jax.lax.rsqrt(bnv_ref[...] + BN_EPS) * bnw_ref[...] + bnb_ref[...]
    h2 = jnp.dot(h1, cw2_ref[...], preferred_element_type=f32) + cb2_ref[...]
    h2 = _gelu(h2)
    o_ref[0] = jnp.dot(h2, cw3_ref[...], preferred_element_type=f32) + cb3_ref[...]


# ----------------------------- pallas_call wrapper -----------------------------
def _fused_call(patches, fp):
    B = patches.shape[0]

    def _const_spec(a):
        nd = a.ndim
        return pl.BlockSpec(a.shape, lambda b, _nd=nd: (0,) * _nd)

    c = fp["cls"]
    weights = (fp["stem_w"], fp["gm"], fp["vecs"], fp["b1"], fp["mdw"], fp["w1"],
               fp["w2"], fp["mds"], fp["pool"],
               c["w1a"], c["w1b"], c["b1"], c["bn_w"], c["bn_b"], c["bn_mean"],
               c["bn_var"], c["w2"], c["b2"], c["w3"], c["b3"])
    return pl.pallas_call(
        _fused_kernel,
        out_shape=jax.ShapeDtypeStruct((B, 1, NUM_CLASSES), jnp.float32),
        grid=(B,),
        in_specs=[pl.BlockSpec((1, NIMG * WS[0], STEM_FEAT), lambda b: (b, 0, 0))]
                 + [_const_spec(a) for a in weights],
        out_specs=pl.BlockSpec((1, 1, NUM_CLASSES), lambda b: (b, 0, 0)),
        scratch_shapes=[pltpu.VMEM((NIMG * PAD_ROWS, LANES), jnp.float32),
                        pltpu.VMEM((NIMG * WS[0], LANES), jnp.float32),
                        pltpu.VMEM((NIMG * WS[0], 7 * LANES), jnp.float32)],
        compiler_params=pltpu.CompilerParams(dimension_semantics=("parallel",)),
    )(patches, *weights)


def _stem_patches(x_nchw):
    # NCHW -> lane-dense stem patches: (N, 16, 768); row h', lane = w'*48 + (kh*12 + kw*3 + cin)
    N = x_nchw.shape[0]
    x = jnp.transpose(x_nchw, (0, 2, 3, 1))
    x = x.reshape(N, WS[0], 4, WS[0], 4, IN_CHANS)
    x = x.transpose(0, 1, 3, 2, 4, 5)
    return x.reshape(N, WS[0], STEM_FEAT)


def forward(x_full, x_roi, fp):
    # Each grid step handles one sample's (full, roi) pair packed along sublanes.
    B = x_full.shape[0]
    xs = jnp.stack([x_full, x_roi], axis=1).reshape(NIMG * B, IN_CHANS, IMG, IMG)
    patches = _stem_patches(xs).reshape(B, NIMG * WS[0], STEM_FEAT)
    out = _fused_call(patches, fp)                       # (B, 1, NUM_CLASSES)
    return out.reshape(B, NUM_CLASSES)


# ----------------------------- parameter expansion (done once) -----------------------------
def _tile_row(v, reps):
    # (1, C) -> (1, C*reps): lane w*C + c holds v[0, c]
    return jnp.tile(v, (1, reps))


def _make_dw_mats(dw_w, W, C):
    # 49-tap depthwise weights -> stacked banded (7*128, 128) lane matrix (rows kh*128 + lane_in)
    dw = np.asarray(dw_w, np.float32).reshape(7, 7, C)
    M = np.zeros((7, LANES, LANES), np.float32)
    for kh in range(7):
        for kw in range(7):
            off = kw - 3
            for w in range(W):
                wsrc = w + off
                if 0 <= wsrc < W:
                    M[kh, wsrc * C:(wsrc + 1) * C, w * C:(w + 1) * C] = np.diag(dw[kh, kw])
    return jnp.asarray(M.reshape(7 * LANES, LANES))


def _make_ds_mats(ds_w, Cin, Cout, Wout):
    # 2x2/s2 conv -> 2 banded (128,128) lane matrices (one per kh); rows ordered (kh, kw, cin)
    w = np.asarray(ds_w, np.float32)
    M = np.zeros((2, LANES, LANES), np.float32)
    for kh in range(2):
        for kw in range(2):
            blk = w[(kh * 2 + kw) * Cin:(kh * 2 + kw + 1) * Cin, :]
            for wo in range(Wout):
                wi = 2 * wo + kw
                M[kh, wi * Cin:(wi + 1) * Cin, wo * Cout:(wo + 1) * Cout] = blk
    return jnp.asarray(M)


def prepare_fused_params(p):
    """Expand the tiny PyTorch-layout params into lane-dense operands for the fused
    kernel.  Large matmul weights are stored bf16 (f32 accumulation in-kernel);
    biases / LN affine / layer scale / BN / classifier head stay f32.  Done once."""
    f = {}
    f["stem_w"] = jnp.kron(jnp.eye(WS[0], dtype=jnp.float32), p["stem_w"]).astype(BF16)

    vec_rows = [_tile_row(p["stem_b"], WS[0]),
                _tile_row(p["stem_ln_g"], WS[0]),
                _tile_row(p["stem_ln_b"], WS[0])]
    gm, mdw, w1, w2, b1 = [], [], [], [], []
    for si in range(4):
        W, C = WS[si], DIMS[si]
        bl = p["stages"][si]["blocks"][0]
        gm.append(jnp.kron(jnp.eye(W, dtype=jnp.float32),
                           jnp.full((C, C), 1.0 / C, jnp.float32)))            # (128, 128)
        mdw.append(_make_dw_mats(bl["dw_w"], W, C))                            # (896, 128)
        w1.append(jnp.kron(jnp.eye(W, dtype=jnp.float32), bl["fc1_w"]))        # (128, 512)
        w2.append(jnp.kron(jnp.eye(W, dtype=jnp.float32), bl["fc2_w"]))        # (512, 128)
        b1.append(_tile_row(bl["fc1_b"], W))                                   # (1, 512)
        vec_rows += [_tile_row(bl["dw_b"], W), _tile_row(bl["ln_g"], W),
                     _tile_row(bl["ln_b"], W), _tile_row(bl["fc2_b"], W),
                     _tile_row(bl["gamma"], W)]
    mds = []
    for j in range(3):
        st = p["stages"][j + 1]
        mds.append(_make_ds_mats(st["ds_w"], DIMS[j], DIMS[j + 1], WS[j + 1]))
        vec_rows += [_tile_row(st["ds_ln_g"], WS[j]), _tile_row(st["ds_ln_b"], WS[j]),
                     _tile_row(st["ds_b"], WS[j + 1])]

    f["gm"] = jnp.stack(gm).astype(BF16)        # (4, 128, 128)
    f["mdw"] = jnp.stack(mdw).astype(BF16)      # (4, 896, 128)
    f["w1"] = jnp.stack(w1).astype(BF16)        # (4, 128, 512)
    f["w2"] = jnp.stack(w2).astype(BF16)        # (4, 512, 128)
    f["b1"] = jnp.concatenate(b1, axis=0)       # (4, 512)  f32
    f["mds"] = jnp.stack(mds).astype(BF16)      # (3, 2, 128, 128)
    f["vecs"] = jnp.concatenate(vec_rows, axis=0)
    assert f["vecs"].shape == (N_VECS, LANES)

    pool = np.zeros((LANES, DIMS[-1]), np.float32)   # global-avg-pool over w (h summed in-kernel)
    for w in range(WS[3]):
        pool[w * DIMS[-1] + np.arange(DIMS[-1]), np.arange(DIMS[-1])] = 1.0 / (WS[3] * WS[3])
    f["pool"] = jnp.asarray(pool)

    F = DIMS[-1]
    f["cls"] = dict(w1a=p["cls_w1"][:F], w1b=p["cls_w1"][F:], b1=p["cls_b1"],
                    bn_w=p["bn_w"], bn_b=p["bn_b"], bn_mean=p["bn_mean"],
                    bn_var=p["bn_var"], w2=p["cls_w2"], b2=p["cls_b2"],
                    w3=p["cls_w3"], b3=p["cls_b3"])
    return f


# ----------------------------- deterministic parameter init -----------------------------
def _init(key, shape, scale=0.05):
    return scale * jax.random.normal(key, shape, jnp.float32)


def init_params(key):
    keys = iter(jax.random.split(key, 256))
    nk = lambda: next(keys)
    p = {}
    p["stem_w"] = _init(nk(), (4 * 4 * IN_CHANS, DIMS[0]))
    p["stem_b"] = _init(nk(), (1, DIMS[0]))
    p["stem_ln_g"] = 1.0 + _init(nk(), (1, DIMS[0]))
    p["stem_ln_b"] = _init(nk(), (1, DIMS[0]))
    p["stages"] = []
    for si in range(4):
        dim = DIMS[si]
        st = {}
        if si > 0:
            cin = DIMS[si - 1]
            st["ds_ln_g"] = 1.0 + _init(nk(), (1, cin))
            st["ds_ln_b"] = _init(nk(), (1, cin))
            st["ds_w"] = _init(nk(), (2 * 2 * cin, dim))
            st["ds_b"] = _init(nk(), (1, dim))
        st["blocks"] = []
        for _ in range(DEPTHS[si]):
            st["blocks"].append(dict(
                dw_w=_init(nk(), (49, dim)),
                dw_b=_init(nk(), (1, dim)),
                ln_g=1.0 + _init(nk(), (1, dim)),
                ln_b=_init(nk(), (1, dim)),
                fc1_w=_init(nk(), (dim, 4 * dim)),
                fc1_b=_init(nk(), (1, 4 * dim)),
                fc2_w=_init(nk(), (4 * dim, dim)),
                fc2_b=_init(nk(), (1, dim)),
                gamma=jnp.full((1, dim), 0.1, jnp.float32),   # layer scale
            ))
        p["stages"].append(st)
    F = DIMS[-1]
    p["cls_w1"] = _init(nk(), (2 * F, F))
    p["cls_b1"] = _init(nk(), (1, F))
    p["bn_w"] = 1.0 + _init(nk(), (1, F))
    p["bn_b"] = _init(nk(), (1, F))
    p["bn_mean"] = _init(nk(), (1, F))
    p["bn_var"] = jax.random.uniform(nk(), (1, F), jnp.float32, 0.5, 1.5)
    p["cls_w2"] = _init(nk(), (F, F // 2))
    p["cls_b2"] = _init(nk(), (1, F // 2))
    p["cls_w3"] = _init(nk(), (F // 2, NUM_CLASSES))
    p["cls_b3"] = _init(nk(), (1, NUM_CLASSES))
    return p


# TODO(synk): original module uses pretrained timm convnext_base weights; here the same
# architecture is scaled down and initialized deterministically from PRNGKey(0).

if __name__ == "__main__":
    key = jax.random.PRNGKey(0)
    kp, kf, kr = jax.random.split(key, 3)
    params = init_params(kp)
    fused = prepare_fused_params(params)

    x_full = jax.random.normal(kf, (BATCH, IN_CHANS, IMG, IMG), jnp.float32)
    x_roi = jax.random.normal(kr, (BATCH, IN_CHANS, IMG, IMG), jnp.float32)

    out = jax.jit(forward)(x_full, x_roi, fused)
    out = jax.block_until_ready(out)
    assert out.shape == (BATCH, NUM_CLASSES) and out.dtype == jnp.float32
    assert bool(jnp.all(jnp.isfinite(out)))
    print("KERNEL_OK")
</pallas_src>

<mosaic_0001>
module attributes {stable_mosaic.version = 11 : i64} {
  func.func @_fused_kernel(%arg0: i32, %arg1: memref<1x32x768xf32, #tpu.memory_space<vmem>>, %arg2: memref<768x128xbf16, #tpu.memory_space<vmem>>, %arg3: memref<4x128x128xbf16, #tpu.memory_space<vmem>>, %arg4: memref<32x128xf32, #tpu.memory_space<vmem>>, %arg5: memref<4x512xf32, #tpu.memory_space<vmem>>, %arg6: memref<4x896x128xbf16, #tpu.memory_space<vmem>>, %arg7: memref<4x128x512xbf16, #tpu.memory_space<vmem>>, %arg8: memref<4x512x128xbf16, #tpu.memory_space<vmem>>, %arg9: memref<3x2x128x128xbf16, #tpu.memory_space<vmem>>, %arg10: memref<128x64xf32, #tpu.memory_space<vmem>>, %arg11: memref<64x64xf32, #tpu.memory_space<vmem>>, %arg12: memref<64x64xf32, #tpu.memory_space<vmem>>, %arg13: memref<1x64xf32, #tpu.memory_space<vmem>>, %arg14: memref<1x64xf32, #tpu.memory_space<vmem>>, %arg15: memref<1x64xf32, #tpu.memory_space<vmem>>, %arg16: memref<1x64xf32, #tpu.memory_space<vmem>>, %arg17: memref<1x64xf32, #tpu.memory_space<vmem>>, %arg18: memref<64x32xf32, #tpu.memory_space<vmem>>, %arg19: memref<1x32xf32, #tpu.memory_space<vmem>>, %arg20: memref<32x6xf32, #tpu.memory_space<vmem>>, %arg21: memref<1x6xf32, #tpu.memory_space<vmem>>, %arg22: memref<1x1x6xf32, #tpu.memory_space<vmem>>, %arg23: memref<64x128xf32, #tpu.memory_space<vmem>>, %arg24: memref<32x128xf32, #tpu.memory_space<vmem>>, %arg25: memref<32x896xf32, #tpu.memory_space<vmem>>) attributes {dimension_semantics = [#tpu.dimension_semantics<parallel>], iteration_bounds = array<i64: 2>, scalar_prefetch = 0 : i64, scratch_operands = 3 : i64, tpu.core_type = #tpu.core_type<tc>, window_params = [{transform_indices = @transform_0, window_bounds = array<i64: 1, 32, 768>}, {pipeline_mode = #tpu.pipeline_mode<synchronous>, transform_indices = @transform_1, window_bounds = array<i64: 768, 128>}, {pipeline_mode = #tpu.pipeline_mode<synchronous>, transform_indices = @transform_2, window_bounds = array<i64: 4, 128, 128>}, {pipeline_mode = #tpu.pipeline_mode<synchronous>, transform_indices = @transform_3, window_bounds = array<i64: 32, 128>}, {pipeline_mode = #tpu.pipeline_mode<synchronous>, transform_indices = @transform_4, window_bounds = array<i64: 4, 512>}, {pipeline_mode = #tpu.pipeline_mode<synchronous>, transform_indices = @transform_5, window_bounds = array<i64: 4, 896, 128>}, {pipeline_mode = #tpu.pipeline_mode<synchronous>, transform_indices = @transform_6, window_bounds = array<i64: 4, 128, 512>}, {pipeline_mode = #tpu.pipeline_mode<synchronous>, transform_indices = @transform_7, window_bounds = array<i64: 4, 512, 128>}, {pipeline_mode = #tpu.pipeline_mode<synchronous>, transform_indices = @transform_8, window_bounds = array<i64: 3, 2, 128, 128>}, {pipeline_mode = #tpu.pipeline_mode<synchronous>, transform_indices = @transform_9, window_bounds = array<i64: 128, 64>}, {pipeline_mode = #tpu.pipeline_mode<synchronous>, transform_indices = @transform_10, window_bounds = array<i64: 64, 64>}, {pipeline_mode = #tpu.pipeline_mode<synchronous>, transform_indices = @transform_11, window_bounds = array<i64: 64, 64>}, {pipeline_mode = #tpu.pipeline_mode<synchronous>, transform_indices = @transform_12, window_bounds = array<i64: 1, 64>}, {pipeline_mode = #tpu.pipeline_mode<synchronous>, transform_indices = @transform_13, window_bounds = array<i64: 1, 64>}, {pipeline_mode = #tpu.pipeline_mode<synchronous>, transform_indices = @transform_14, window_bounds = array<i64: 1, 64>}, {pipeline_mode = #tpu.pipeline_mode<synchronous>, transform_indices = @transform_15, window_bounds = array<i64: 1, 64>}, {pipeline_mode = #tpu.pipeline_mode<synchronous>, transform_indices = @transform_16, window_bounds = array<i64: 1, 64>}, {pipeline_mode = #tpu.pipeline_mode<synchronous>, transform_indices = @transform_17, window_bounds = array<i64: 64, 32>}, {pipeline_mode = #tpu.pipeline_mode<synchronous>, transform_indices = @transform_18, window_bounds = array<i64: 1, 32>}, {pipeline_mode = #tpu.pipeline_mode<synchronous>, transform_indices = @transform_19, window_bounds = array<i64: 32, 6>}, {pipeline_mode = #tpu.pipeline_mode<synchronous>, transform_indices = @transform_20, window_bounds = array<i64: 1, 6>}, {transform_indices = @transform_21, window_bounds = array<i64: 1, 1, 6>}]} {
    %c0 = arith.constant 0 : index
    %c0_0 = arith.constant 0 : index
    %c0_1 = arith.constant 0 : index
    %0 = vector.load %arg1[%c0, %c0_0, %c0_1] : memref<1x32x768xf32, #tpu.memory_space<vmem>>, vector<1x32x768xf32>
    %1 = vector.shape_cast %0 : vector<1x32x768xf32> to vector<32x768xf32>
    %c0_2 = arith.constant 0 : index
    %c0_3 = arith.constant 0 : index
    %2 = vector.load %arg2[%c0_2, %c0_3] : memref<768x128xbf16, #tpu.memory_space<vmem>>, vector<768x128xbf16>
    %3 = arith.truncf %1 : vector<32x768xf32> to vector<32x768xbf16>
    %cst = arith.constant dense<0.000000e+00> : vector<32x128xf32>
    %4 = tpu.matmul %3, %2, %cst {dimension_numbers = #tpu.dot_dimension_numbers<[1], [0], [0], [1], [0, 0, 1, 1], [], []>} : vector<32x768xbf16>, vector<768x128xbf16>, vector<32x128xf32> -> vector<32x128xf32>
    %c0_4 = arith.constant 0 : index
    %c0_5 = arith.constant 0 : index
    %5 = vector.load %arg4[%c0_4, %c0_5] : memref<32x128xf32, #tpu.memory_space<vmem>>, vector<1x128xf32>
    %6 = vector.broadcast %5 : vector<1x128xf32> to vector<32x128xf32>
    %7 = arith.addf %4, %6 : vector<32x128xf32>
    %c0_6 = arith.constant 0 : index
    %c0_7 = arith.constant 0 : index
    %c0_8 = arith.constant 0 : index
    %8 = vector.load %arg3[%c0_6, %c0_7, %c0_8] : memref<4x128x128xbf16, #tpu.memory_space<vmem>>, vector<1x128x128xbf16>
    %9 = vector.shape_cast %8 : vector<1x128x128xbf16> to vector<128x128xbf16>
    %c1 = arith.constant 1 : index
    %c0_9 = arith.constant 0 : index
    %10 = vector.load %arg4[%c1, %c0_9] : memref<32x128xf32, #tpu.memory_space<vmem>>, vector<1x128xf32>
    %c2 = arith.constant 2 : index
    %c0_10 = arith.constant 0 : index
    %11 = vector.load %arg4[%c2, %c0_10] : memref<32x128xf32, #tpu.memory_space<vmem>>, vector<1x128xf32>
    %12 = arith.truncf %7 : vector<32x128xf32> to vector<32x128xbf16>
    %cst_11 = arith.constant dense<0.000000e+00> : vector<32x128xf32>
    %13 = tpu.matmul %12, %9, %cst_11 {dimension_numbers = #tpu.dot_dimension_numbers<[1], [0], [0], [1], [0, 0, 1, 1], [], []>} : vector<32x128xbf16>, vector<128x128xbf16>, vector<32x128xf32> -> vector<32x128xf32>
    %14 = arith.subf %7, %13 : vector<32x128xf32>
    %15 = arith.mulf %14, %14 : vector<32x128xf32>
    %16 = arith.truncf %15 : vector<32x128xf32> to vector<32x128xbf16>
    %cst_12 = arith.constant dense<0.000000e+00> : vector<32x128xf32>
    %17 = tpu.matmul %16, %9, %cst_12 {dimension_numbers = #tpu.dot_dimension_numbers<[1], [0], [0], [1], [0, 0, 1, 1], [], []>} : vector<32x128xbf16>, vector<128x128xbf16>, vector<32x128xf32> -> vector<32x128xf32>
    %cst_13 = arith.constant 9.99999997E-7 : f32
    %18 = vector.broadcast %cst_13 : f32 to vector<32x128xf32>
    %19 = arith.addf %17, %18 : vector<32x128xf32>
    %20 = math.rsqrt %19 : vector<32x128xf32>
    %21 = arith.mulf %14, %20 : vector<32x128xf32>
    %22 = vector.broadcast %10 : vector<1x128xf32> to vector<32x128xf32>
    %23 = arith.mulf %21, %22 : vector<32x128xf32>
    %24 = vector.broadcast %11 : vector<1x128xf32> to vector<32x128xf32>
    %25 = arith.addf %23, %24 : vector<32x128xf32>
    %cst_14 = arith.constant 0.000000e+00 : f32
    %26 = vector.broadcast %cst_14 : f32 to vector<3x128xf32>
    %c5 = arith.constant 5 : index
    %c0_15 = arith.constant 0 : index
    %27 = vector.load %arg23[%c5, %c0_15] : memref<64x128xf32, #tpu.memory_space<vmem>>, vector<3x128xf32>
    tpu.vector_store %arg23[%c5, %c0_15], %26 {strides = array<i32>} : memref<64x128xf32, #tpu.memory_space<vmem>>, vector<3x128xf32>,
    %c24 = arith.constant 24 : index
    %c0_16 = arith.constant 0 : index
    %28 = vector.load %arg23[%c24, %c0_16] : memref<64x128xf32, #tpu.memory_space<vmem>>, vector<3x128xf32>
    tpu.vector_store %arg23[%c24, %c0_16], %26 {strides = array<i32>} : memref<64x128xf32, #tpu.memory_space<vmem>>, vector<3x128xf32>,
    %29 = vector.extract_strided_slice %25 {offsets = [0, 0], sizes = [16, 128], strides = [1, 1]} : vector<32x128xf32> to vector<16x128xf32>
    %c8 = arith.constant 8 : index
    %c0_17 = arith.constant 0 : index
    %30 = vector.load %arg23[%c8, %c0_17] : memref<64x128xf32, #tpu.memory_space<vmem>>, vector<16x128xf32>
    tpu.vector_store %arg23[%c8, %c0_17], %29 {strides = array<i32>} : memref<64x128xf32, #tpu.memory_space<vmem>>, vector<16x128xf32>,
    %c37 = arith.constant 37 : index
    %c0_18 = arith.constant 0 : index
    %31 = vector.load %arg23[%c37, %c0_18] : memref<64x128xf32, #tpu.memory_space<vmem>>, vector<3x128xf32>
    tpu.vector_store %arg23[%c37, %c0_18], %26 {strides = array<i32>} : memref<64x128xf32, #tpu.memory_space<vmem>>, vector<3x128xf32>,
    %c56 = arith.constant 56 : index
    %c0_19 = arith.constant 0 : index
    %32 = vector.load %arg23[%c56, %c0_19] : memref<64x128xf32, #tpu.memory_space<vmem>>, vector<3x128xf32>
    tpu.vector_store %arg23[%c56, %c0_19], %26 {strides = array<i32>} : memref<64x128xf32, #tpu.memory_space<vmem>>, vector<3x128xf32>,
    %33 = vector.extract_strided_slice %25 {offsets = [16, 0], sizes = [16, 128], strides = [1, 1]} : vector<32x128xf32> to vector<16x128xf32>
    %c40 = arith.constant 40 : index
    %c0_20 = arith.constant 0 : index
    %34 = vector.load %arg23[%c40, %c0_20] : memref<64x128xf32, #tpu.memory_space<vmem>>, vector<16x128xf32>
    tpu.vector_store %arg23[%c40, %c0_20], %33 {strides = array<i32>} : memref<64x128xf32, #tpu.memory_space<vmem>>, vector<16x128xf32>,
    %c5_21 = arith.constant 5 : index
    %c0_22 = arith.constant 0 : index
    %35 = vector.load %arg23[%c5_21, %c0_22] : memref<64x128xf32, #tpu.memory_space<vmem>>, vector<16x128xf32>
    %c0_23 = arith.constant 0 : index
    %c0_24 = arith.constant 0 : index
    %36 = vector.load %arg25[%c0_23, %c0_24] : memref<32x896xf32, #tpu.memory_space<vmem>>, vector<16x128xf32>
    tpu.vector_store %arg25[%c0_23, %c0_24], %35 {strides = array<i32>} : memref<32x896xf32, #tpu.memory_space<vmem>>, vector<16x128xf32>,
    %c37_25 = arith.constant 37 : index
    %c0_26 = arith.constant 0 : index
    %37 = vector.load %arg23[%c37_25, %c0_26] : memref<64x128xf32, #tpu.memory_space<vmem>>, vector<16x128xf32>
    %c16 = arith.constant 16 : index
    %c0_27 = arith.constant 0 : index
    %38 = vector.load %arg25[%c16, %c0_27] : memref<32x896xf32, #tpu.memory_space<vmem>>, vector<16x128xf32>
    tpu.vector_store %arg25[%c16, %c0_27], %37 {strides = array<i32>} : memref<32x896xf32, #tpu.memory_space<vmem>>, vector<16x128xf32>,
    %c6 = arith.constant 6 : index
    %c0_28 = arith.constant 0 : index
    %39 = vector.load %arg23[%c6, %c0_28] : memref<64x128xf32, #tpu.memory_space<vmem>>, vector<16x128xf32>
    %c0_29 = arith.constant 0 : index
    %c128 = arith.constant 128 : index
    %40 = vector.load %arg25[%c0_29, %c128] : memref<32x896xf32, #tpu.memory_space<vmem>>, vector<16x128xf32>
    tpu.vector_store %arg25[%c0_29, %c128], %39 {strides = array<i32>} : memref<32x896xf32, #tpu.memory_space<vmem>>, vector<16x128xf32>,
    %c38 = arith.constant 38 : index
    %c0_30 = arith.constant 0 : index
    %41 = vector.load %arg23[%c38, %c0_30] : memref<64x128xf32, #tpu.memory_space<vmem>>, vector<16x128xf32>
    %c16_31 = arith.constant 16 : index
    %c128_32 = arith.constant 128 : index
    %42 = vector.load %arg25[%c16_31, %c128_32] : memref<32x896xf32, #tpu.memory_space<vmem>>, vector<16x128xf32>
    tpu.vector_store %arg25[%c16_31, %c128_32], %41 {strides = array<i32>} : memref<32x896xf32, #tpu.memory_space<vmem>>, vector<16x128xf32>,
    %c7 = arith.constant 7 : index
    %c0_33 = arith.constant 0 : index
    %43 = vector.load %arg23[%c7, %c0_33] : memref<64x128xf32, #tpu.memory_space<vmem>>, vector<16x128xf32>
    %c0_34 = arith.constant 0 : index
    %c256 = arith.constant 256 : index
    %44 = vector.load %arg25[%c0_34, %c256] : memref<32x896xf32, #tpu.memory_space<vmem>>, vector<16x128xf32>
    tpu.vector_store %arg25[%c0_34, %c256], %43 {strides = array<i32>} : memref<32x896xf32, #tpu.memory_space<vmem>>, vector<16x128xf32>,
    %c39 = arith.constant 39 : index
    %c0_35 = arith.constant 0 : index
    %45 = vector.load %arg23[%c39, %c0_35] : memref<64x128xf32, #tpu.memory_space<vmem>>, vector<16x128xf32>
    %c16_36 = arith.constant 16 : index
    %c256_37 = arith.constant 256 : index
    %46 = vector.load %arg25[%c16_36, %c256_37] : memref<32x896xf32, #tpu.memory_space<vmem>>, vector<16x128xf32>
    tpu.vector_store %arg25[%c16_36, %c256_37], %45 {strides = array<i32>} : memref<32x896xf32, #tpu.memory_space<vmem>>, vector<16x128xf32>,
    %c8_38 = arith.constant 8 : index
    %c0_39 = arith.constant 0 : index
    %47 = vector.load %arg23[%c8_38, %c0_39] : memref<64x128xf32, #tpu.memory_space<vmem>>, vector<16x128xf32>
    %c0_40 = arith.constant 0 : index
    %c384 = arith.constant 384 : index
    %48 = vector.load %arg25[%c0_40, %c384] : memref<32x896xf32, #tpu.memory_space<vmem>>, vector<16x128xf32>
    tpu.vector_store %arg25[%c0_40, %c384], %47 {strides = array<i32>} : memref<32x896xf32, #tpu.memory_space<vmem>>, vector<16x128xf32>,
    %c40_41 = arith.constant 40 : index
    %c0_42 = arith.constant 0 : index
    %49 = vector.load %arg23[%c40_41, %c0_42] : memref<64x128xf32, #tpu.memory_space<vmem>>, vector<16x128xf32>
    %c16_43 = arith.constant 16 : index
    %c384_44 = arith.constant 384 : index
    %50 = vector.load %arg25[%c16_43, %c384_44] : memref<32x896xf32, #tpu.memory_space<vmem>>, vector<16x128xf32>
    tpu.vector_store %arg25[%c16_43, %c384_44], %49 {strides = array<i32>} : memref<32x896xf32, #tpu.memory_space<vmem>>, vector<16x128xf32>,
    %c9 = arith.constant 9 : index
    %c0_45 = arith.constant 0 : index
    %51 = vector.load %arg23[%c9, %c0_45] : memref<64x128xf32, #tpu.memory_space<vmem>>, vector<16x128xf32>
    %c0_46 = arith.constant 0 : index
    %c512 = arith.constant 512 : index
    %52 = vector.load %arg25[%c0_46, %c512] : memref<32x896xf32, #tpu.memory_space<vmem>>, vector<16x128xf32>
    tpu.vector_store %arg25[%c0_46, %c512], %51 {strides = array<i32>} : memref<32x896xf32, #tpu.memory_space<vmem>>, vector<16x128xf32>,
    %c41 = arith.constant 41 : index
    %c0_47 = arith.constant 0 : index
    %53 = vector.load %arg23[%c41, %c0_47] : memref<64x128xf32, #tpu.memory_space<vmem>>, vector<16x128xf32>
    %c16_48 = arith.constant 16 : index
    %c512_49 = arith.constant 512 : index
    %54 = vector.load %arg25[%c16_48, %c512_49] : memref<32x896xf32, #tpu.memory_space<vmem>>, vector<16x128xf32>
    tpu.vector_store %arg25[%c16_48, %c512_49], %53 {strides = array<i32>} : memref<32x896xf32, #tpu.memory_space<vmem>>, vector<16x128xf32>,
    %c10 = arith.constant 10 : index
    %c0_50 = arith.constant 0 : index
    %55 = vector.load %arg23[%c10, %c0_50] : memref<64x128xf32, #tpu.memory_space<vmem>>, vector<16x128xf32>
    %c0_51 = arith.constant 0 : index
    %c640 = arith.constant 640 : index
    %56 = vector.load %arg25[%c0_51, %c640] : memref<32x896xf32, #tpu.memory_space<vmem>>, vector<16x128xf32>
    tpu.vector_store %arg25[%c0_51, %c640], %55 {strides = array<i32>} : memref<32x896xf32, #tpu.memory_space<vmem>>, vector<16x128xf32>,
    %c42 = arith.constant 42 : index
    %c0_52 = arith.constant 0 : index
    %57 = vector.load %arg23[%c42, %c0_52] : memref<64x128xf32, #tpu.memory_space<vmem>>, vector<16x128xf32>
    %c16_53 = arith.constant 16 : index
    %c640_54 = arith.constant 640 : index
    %58 = vector.load %arg25[%c16_53, %c640_54] : memref<32x896xf32, #tpu.memory_space<vmem>>, vector<16x128xf32>
    tpu.vector_store %arg25[%c16_53, %c640_54], %57 {strides = array<i32>} : memref<32x896xf32, #tpu.memory_space<vmem>>, vector<16x128xf32>,
    %c11 = arith.constant 11 : index
    %c0_55 = arith.constant 0 : index
    %59 = vector.load %arg23[%c11, %c0_55] : memref<64x128xf32, #tpu.memory_space<vmem>>, vector<16x128xf32>
    %c0_56 = arith.constant 0 : index
    %c768 = arith.constant 768 : index
    %60 = vector.load %arg25[%c0_56, %c768] : memref<32x896xf32, #tpu.memory_space<vmem>>, vector<16x128xf32>
    tpu.vector_store %arg25[%c0_56, %c768], %59 {strides = array<i32>} : memref<32x896xf32, #tpu.memory_space<vmem>>, vector<16x128xf32>,
    %c43 = arith.constant 43 : index
    %c0_57 = arith.constant 0 : index
    %61 = vector.load %arg23[%c43, %c0_57] : memref<64x128xf32, #tpu.memory_space<vmem>>, vector<16x128xf32>
    %c16_58 = arith.constant 16 : index
    %c768_59 = arith.constant 768 : index
    %62 = vector.load %arg25[%c16_58, %c768_59] : memref<32x896xf32, #tpu.memory_space<vmem>>, vector<16x128xf32>
    tpu.vector_store %arg25[%c16_58, %c768_59], %61 {strides = array<i32>} : memref<32x896xf32, #tpu.memory_space<vmem>>, vector<16x128xf32>,
    %c0_60 = arith.constant 0 : index
    %c0_61 = arith.constant 0 : index
    %63 = vector.load %arg25[%c0_60, %c0_61] : memref<32x896xf32, #tpu.memory_space<vmem>>, vector<32x896xf32>
    %c0_62 = arith.constant 0 : index
    %c0_63 = arith.constant 0 : index
    %c0_64 = arith.constant 0 : index
    %64 = vector.load %arg6[%c0_62, %c0_63, %c0_64] : memref<4x896x128xbf16, #tpu.memory_space<vmem>>, vector<1x896x128xbf16>
    %65 = vector.shape_cast %64 : vector<1x896x128xbf16> to vector<896x128xbf16>
    %66 = arith.truncf %63 : vector<32x896xf32> to vector<32x896xbf16>
    %cst_65 = arith.constant dense<0.000000e+00> : vector<32x128xf32>
    %67 = tpu.matmul %66, %65, %cst_65 {dimension_numbers = #tpu.dot_dimension_numbers<[1], [0], [0], [1], [0, 0, 1, 1], [], []>} : vector<32x896xbf16>, vector<896x128xbf16>, vector<32x128xf32> -> vector<32x128xf32>
    %c3 = arith.constant 3 : index
    %c0_66 = arith.constant 0 : index
    %68 = vector.load %arg4[%c3, %c0_66] : memref<32x128xf32, #tpu.memory_space<vmem>>, vector<1x128xf32>
    %69 = vector.broadcast %68 : vector<1x128xf32> to vector<32x128xf32>
    %70 = arith.addf %67, %69 : vector<32x128xf32>
    %c0_67 = arith.constant 0 : index
    %c0_68 = arith.constant 0 : index
    %c0_69 = arith.constant 0 : index
    %71 = vector.load %arg3[%c0_67, %c0_68, %c0_69] : memref<4x128x128xbf16, #tpu.memory_space<vmem>>, vector<1x128x128xbf16>
    %72 = vector.shape_cast %71 : vector<1x128x128xbf16> to vector<128x128xbf16>
    %c4 = arith.constant 4 : index
    %c0_70 = arith.constant 0 : index
    %73 = vector.load %arg4[%c4, %c0_70] : memref<32x128xf32, #tpu.memory_space<vmem>>, vector<1x128xf32>
    %c5_71 = arith.constant 5 : index
    %c0_72 = arith.constant 0 : index
    %74 = vector.load %arg4[%c5_71, %c0_72] : memref<32x128xf32, #tpu.memory_space<vmem>>, vector<1x128xf32>
    %75 = arith.truncf %70 : vector<32x128xf32> to vector<32x128xbf16>
    %cst_73 = arith.constant dense<0.000000e+00> : vector<32x128xf32>
    %76 = tpu.matmul %75, %72, %cst_73 {dimension_numbers = #tpu.dot_dimension_numbers<[1], [0], [0], [1], [0, 0, 1, 1], [], []>} : vector<32x128xbf16>, vector<128x128xbf16>, vector<32x128xf32> -> vector<32x128xf32>
    %77 = arith.subf %70, %76 : vector<32x128xf32>
    %78 = arith.mulf %77, %77 : vector<32x128xf32>
    %79 = arith.truncf %78 : vector<32x128xf32> to vector<32x128xbf16>
    %cst_74 = arith.constant dense<0.000000e+00> : vector<32x128xf32>
    %80 = tpu.matmul %79, %72, %cst_74 {dimension_numbers = #tpu.dot_dimension_numbers<[1], [0], [0], [1], [0, 0, 1, 1], [], []>} : vector<32x128xbf16>, vector<128x128xbf16>, vector<32x128xf32> -> vector<32x128xf32>
    %cst_75 = arith.constant 9.99999997E-7 : f32
    %81 = vector.broadcast %cst_75 : f32 to vector<32x128xf32>
    %82 = arith.addf %80, %81 : vector<32x128xf32>
    %83 = math.rsqrt %82 : vector<32x128xf32>
    %84 = arith.mulf %77, %83 : vector<32x128xf32>
    %85 = vector.broadcast %73 : vector<1x128xf32> to vector<32x128xf32>
    %86 = arith.mulf %84, %85 : vector<32x128xf32>
    %87 = vector.broadcast %74 : vector<1x128xf32> to vector<32x128xf32>
    %88 = arith.addf %86, %87 : vector<32x128xf32>
    %c0_76 = arith.constant 0 : index
    %c0_77 = arith.constant 0 : index
    %c0_78 = arith.constant 0 : index
    %89 = vector.load %arg7[%c0_76, %c0_77, %c0_78] : memref<4x128x512xbf16, #tpu.memory_space<vmem>>, vector<1x128x512xbf16>
    %90 = vector.shape_cast %89 : vector<1x128x512xbf16> to vector<128x512xbf16>
    %91 = arith.truncf %88 : vector<32x128xf32> to vector<32x128xbf16>
    %cst_79 = arith.constant dense<0.000000e+00> : vector<32x512xf32>
    %92 = tpu.matmul %91, %90, %cst_79 {dimension_numbers = #tpu.dot_dimension_numbers<[1], [0], [0], [1], [0, 0, 1, 1], [], []>} : vector<32x128xbf16>, vector<128x512xbf16>, vector<32x512xf32> -> vector<32x512xf32>
    %c0_80 = arith.constant 0 : index
    %c0_81 = arith.constant 0 : index
    %93 = vector.load %arg5[%c0_80, %c0_81] : memref<4x512xf32, #tpu.memory_space<vmem>>, vector<1x512xf32>
    %94 = vector.broadcast %93 : vector<1x512xf32> to vector<32x512xf32>
    %95 = arith.addf %92, %94 : vector<32x512xf32>
    %cst_82 = arith.constant 5.000000e-01 : f32
    %96 = vector.broadcast %cst_82 : f32 to vector<32x512xf32>
    %97 = arith.mulf %96, %95 : vector<32x512xf32>
    %cst_83 = arith.constant 0.707106769 : f32
    %98 = vector.broadcast %cst_83 : f32 to vector<32x512xf32>
    %99 = arith.mulf %95, %98 : vector<32x512xf32>
    %cst_84 = arith.constant 0.000000e+00 : f32
    %100 = vector.broadcast %cst_84 : f32 to vector<32x512xf32>
    %101 = arith.cmpf oge, %99, %100 : vector<32x512xf32>
    %cst_85 = arith.constant 1.000000e+00 : f32
    %cst_86 = arith.constant -1.000000e+00 : f32
    %102 = vector.broadcast %cst_85 : f32 to vector<32x512xf32>
    %103 = vector.broadcast %cst_86 : f32 to vector<32x512xf32>
    %104 = arith.select %101, %102, %103 : vector<32x512xi1>, vector<32x512xf32>
    %105 = math.absf %99 : vector<32x512xf32>
    %cst_87 = arith.constant 0.327591091 : f32
    %106 = vector.broadcast %cst_87 : f32 to vector<32x512xf32>
    %107 = arith.mulf %106, %105 : vector<32x512xf32>
    %cst_88 = arith.constant 1.000000e+00 : f32
    %108 = vector.broadcast %cst_88 : f32 to vector<32x512xf32>
    %109 = arith.addf %108, %107 : vector<32x512xf32>
    %cst_89 = arith.constant 1.000000e+00 : f32
    %110 = vector.broadcast %cst_89 : f32 to vector<32x512xf32>
    %111 = arith.divf %110, %109 : vector<32x512xf32>
    %cst_90 = arith.constant 1.06140542 : f32
    %112 = vector.broadcast %cst_90 : f32 to vector<32x512xf32>
    %113 = arith.mulf %112, %111 : vector<32x512xf32>
    %cst_91 = arith.constant -1.45315206 : f32
    %114 = vector.broadcast %cst_91 : f32 to vector<32x512xf32>
    %115 = arith.addf %113, %114 : vector<32x512xf32>
    %116 = arith.mulf %115, %111 : vector<32x512xf32>
    %cst_92 = arith.constant 1.42141378 : f32
    %117 = vector.broadcast %cst_92 : f32 to vector<32x512xf32>
    %118 = arith.addf %116, %117 : vector<32x512xf32>
    %119 = arith.mulf %118, %111 : vector<32x512xf32>
    %cst_93 = arith.constant -0.284496725 : f32
    %120 = vector.broadcast %cst_93 : f32 to vector<32x512xf32>
    %121 = arith.addf %119, %120 : vector<32x512xf32>
    %122 = arith.mulf %121, %111 : vector<32x512xf32>
    %cst_94 = arith.constant 0.254829586 : f32
    %123 = vector.broadcast %cst_94 : f32 to vector<32x512xf32>
    %124 = arith.addf %122, %123 : vector<32x512xf32>
    %125 = arith.mulf %124, %111 : vector<32x512xf32>
    %cst_95 = arith.constant 0.000000e+00 : f32
    %126 = vector.broadcast %cst_95 : f32 to vector<32x512xf32>
    %127 = arith.subf %126, %105 : vector<32x512xf32>
    %128 = arith.mulf %127, %105 : vector<32x512xf32>
    %129 = math.exp %128 : vector<32x512xf32>
    %130 = arith.mulf %125, %129 : vector<32x512xf32>
    %cst_96 = arith.constant 1.000000e+00 : f32
    %131 = vector.broadcast %cst_96 : f32 to vector<32x512xf32>
    %132 = arith.subf %131, %130 : vector<32x512xf32>
    %133 = arith.mulf %104, %132 : vector<32x512xf32>
    %cst_97 = arith.constant 1.000000e+00 : f32
    %134 = vector.broadcast %cst_97 : f32 to vector<32x512xf32>
    %135 = arith.addf %134, %133 : vector<32x512xf32>
    %136 = arith.mulf %97, %135 : vector<32x512xf32>
    %c0_98 = arith.constant 0 : index
    %c0_99 = arith.constant 0 : index
    %c0_100 = arith.constant 0 : index
    %137 = vector.load %arg8[%c0_98, %c0_99, %c0_100] : memref<4x512x128xbf16, #tpu.memory_space<vmem>>, vector<1x512x128xbf16>
    %138 = vector.shape_cast %137 : vector<1x512x128xbf16> to vector<512x128xbf16>
    %139 = arith.truncf %136 : vector<32x512xf32> to vector<32x512xbf16>
    %cst_101 = arith.constant dense<0.000000e+00> : vector<32x128xf32>
    %140 = tpu.matmul %139, %138, %cst_101 {dimension_numbers = #tpu.dot_dimension_numbers<[1], [0], [0], [1], [0, 0, 1, 1], [], []>} : vector<32x512xbf16>, vector<512x128xbf16>, vector<32x128xf32> -> vector<32x128xf32>
    %c6_102 = arith.constant 6 : index
    %c0_103 = arith.constant 0 : index
    %141 = vector.load %arg4[%c6_102, %c0_103] : memref<32x128xf32, #tpu.memory_space<vmem>>, vector<1x128xf32>
    %142 = vector.broadcast %141 : vector<1x128xf32> to vector<32x128xf32>
    %143 = arith.addf %140, %142 : vector<32x128xf32>
    %c7_104 = arith.constant 7 : index
    %c0_105 = arith.constant 0 : index
    %144 = vector.load %arg4[%c7_104, %c0_105] : memref<32x128xf32, #tpu.memory_space<vmem>>, vector<1x128xf32>
    %145 = vector.broadcast %144 : vector<1x128xf32> to vector<32x128xf32>
    %146 = arith.mulf %145, %143 : vector<32x128xf32>
    %147 = arith.addf %25, %146 : vector<32x128xf32>
    %c0_106 = arith.constant 0 : index
    %c0_107 = arith.constant 0 : index
    %c0_108 = arith.constant 0 : index
    %148 = vector.load %arg3[%c0_106, %c0_107, %c0_108] : memref<4x128x128xbf16, #tpu.memory_space<vmem>>, vector<1x128x128xbf16>
    %149 = vector.shape_cast %148 : vector<1x128x128xbf16> to vector<128x128xbf16>
    %c23 = arith.constant 23 : index
    %c0_109 = arith.constant 0 : index
    %150 = vector.load %arg4[%c23, %c0_109] : memref<32x128xf32, #tpu.memory_space<vmem>>, vector<1x128xf32>
    %c24_110 = arith.constant 24 : index
    %c0_111 = arith.constant 0 : index
    %151 = vector.load %arg4[%c24_110, %c0_111] : memref<32x128xf32, #tpu.memory_space<vmem>>, vector<1x128xf32>
    %152 = arith.truncf %147 : vector<32x128xf32> to vector<32x128xbf16>
    %cst_112 = arith.constant dense<0.000000e+00> : vector<32x128xf32>
    %153 = tpu.matmul %152, %149, %cst_112 {dimension_numbers = #tpu.dot_dimension_numbers<[1], [0], [0], [1], [0, 0, 1, 1], [], []>} : vector<32x128xbf16>, vector<128x128xbf16>, vector<32x128xf32> -> vector<32x128xf32>
    %154 = arith.subf %147, %153 : vector<32x128xf32>
    %155 = arith.mulf %154, %154 : vector<32x128xf32>
    %156 = arith.truncf %155 : vector<32x128xf32> to vector<32x128xbf16>
    %cst_113 = arith.constant dense<0.000000e+00> : vector<32x128xf32>
    %157 = tpu.matmul %156, %149, %cst_113 {dimension_numbers = #tpu.dot_dimension_numbers<[1], [0], [0], [1], [0, 0, 1, 1], [], []>} : vector<32x128xbf16>, vector<128x128xbf16>, vector<32x128xf32> -> vector<32x128xf32>
    %cst_114 = arith.constant 9.99999997E-7 : f32
    %158 = vector.broadcast %cst_114 : f32 to vector<32x128xf32>
    %159 = arith.addf %157, %158 : vector<32x128xf32>
    %160 = math.rsqrt %159 : vector<32x128xf32>
    %161 = arith.mulf %154, %160 : vector<32x128xf32>
    %162 = vector.broadcast %150 : vector<1x128xf32> to vector<32x128xf32>
    %163 = arith.mulf %161, %162 : vector<32x128xf32>
    %164 = vector.broadcast %151 : vector<1x128xf32> to vector<32x128xf32>
    %165 = arith.addf %163, %164 : vector<32x128xf32>
    %c0_115 = arith.constant 0 : index
    %c0_116 = arith.constant 0 : index
    %166 = vector.load %arg24[%c0_115, %c0_116] : memref<32x128xf32, #tpu.memory_space<vmem>>, vector<32x128xf32>
    tpu.vector_store %arg24[%c0_115, %c0_116], %165 {strides = array<i32>} : memref<32x128xf32, #tpu.memory_space<vmem>>, vector<32x128xf32>,
    %c25 = arith.constant 25 : index
    %c0_117 = arith.constant 0 : index
    %167 = vector.load %arg4[%c25, %c0_117] : memref<32x128xf32, #tpu.memory_space<vmem>>, vector<1x128xf32>
    %c0_118 = arith.constant 0 : index
    %c0_119 = arith.constant 0 : index
    %168 = tpu.strided_load %arg24[%c0_118, %c0_119] {strides = array<i32: 2, 1>} : memref<32x128xf32, #tpu.memory_space<vmem>>, vector<16x128xf32>
    %c0_120 = arith.constant 0 : index
    %c0_121 = arith.constant 0 : index
    %c0_122 = arith.constant 0 : index
    %c0_123 = arith.constant 0 : index
    %169 = vector.load %arg9[%c0_120, %c0_121, %c0_122, %c0_123] : memref<3x2x128x128xbf16, #tpu.memory_space<vmem>>, vector<1x1x128x128xbf16>
    %170 = vector.shape_cast %169 : vector<1x1x128x128xbf16> to vector<128x128xbf16>
    %171 = arith.truncf %168 : vector<16x128xf32> to vector<16x128xbf16>
    %cst_124 = arith.constant dense<0.000000e+00> : vector<16x128xf32>
    %172 = tpu.matmul %171, %170, %cst_124 {dimension_numbers = #tpu.dot_dimension_numbers<[1], [0], [0], [1], [0, 0, 1, 1], [], []>} : vector<16x128xbf16>, vector<128x128xbf16>, vector<16x128xf32> -> vector<16x128xf32>
    %173 = vector.broadcast %167 : vector<1x128xf32> to vector<16x128xf32>
    %174 = arith.addf %173, %172 : vector<16x128xf32>
    %c1_125 = arith.constant 1 : index
    %c0_126 = arith.constant 0 : index
    %175 = tpu.strided_load %arg24[%c1_125, %c0_126] {strides = array<i32: 2, 1>} : memref<32x128xf32, #tpu.memory_space<vmem>>, vector<16x128xf32>
    %c0_127 = arith.constant 0 : index
    %c1_128 = arith.constant 1 : index
    %c0_129 = arith.constant 0 : index
    %c0_130 = arith.constant 0 : index
    %176 = vector.load %arg9[%c0_127, %c1_128, %c0_129, %c0_130] : memref<3x2x128x128xbf16, #tpu.memory_space<vmem>>, vector<1x1x128x128xbf16>
    %177 = vector.shape_cast %176 : vector<1x1x128x128xbf16> to vector<128x128xbf16>
    %178 = arith.truncf %175 : vector<16x128xf32> to vector<16x128xbf16>
    %cst_131 = arith.constant dense<0.000000e+00> : vector<16x128xf32>
    %179 = tpu.matmul %178, %177, %cst_131 {dimension_numbers = #tpu.dot_dimension_numbers<[1], [0], [0], [1], [0, 0, 1, 1], [], []>} : vector<16x128xbf16>, vector<128x128xbf16>, vector<16x128xf32> -> vector<16x128xf32>
    %180 = arith.addf %174, %179 : vector<16x128xf32>
    %c5_132 = arith.constant 5 : index
    %c0_133 = arith.constant 0 : index
    %181 = vector.load %arg23[%c5_132, %c0_133] : memref<64x128xf32, #tpu.memory_space<vmem>>, vector<3x128xf32>
    tpu.vector_store %arg23[%c5_132, %c0_133], %26 {strides = array<i32>} : memref<64x128xf32, #tpu.memory_space<vmem>>, vector<3x128xf32>,
    %c16_134 = arith.constant 16 : index
    %c0_135 = arith.constant 0 : index
    %182 = vector.load %arg23[%c16_134, %c0_135] : memref<64x128xf32, #tpu.memory_space<vmem>>, vector<3x128xf32>
    tpu.vector_store %arg23[%c16_134, %c0_135], %26 {strides = array<i32>} : memref<64x128xf32, #tpu.memory_space<vmem>>, vector<3x128xf32>,
    %183 = vector.extract_strided_slice %180 {offsets = [0, 0], sizes = [8, 128], strides = [1, 1]} : vector<16x128xf32> to vector<8x128xf32>
    %c8_136 = arith.constant 8 : index
    %c0_137 = arith.constant 0 : index
    %184 = vector.load %arg23[%c8_136, %c0_137] : memref<64x128xf32, #tpu.memory_space<vmem>>, vector<8x128xf32>
    tpu.vector_store %arg23[%c8_136, %c0_137], %183 {strides = array<i32>} : memref<64x128xf32, #tpu.memory_space<vmem>>, vector<8x128xf32>,
    %c37_138 = arith.constant 37 : index
    %c0_139 = arith.constant 0 : index
    %185 = vector.load %arg23[%c37_138, %c0_139] : memref<64x128xf32, #tpu.memory_space<vmem>>, vector<3x128xf32>
    tpu.vector_store %arg23[%c37_138, %c0_139], %26 {strides = array<i32>} : memref<64x128xf32, #tpu.memory_space<vmem>>, vector<3x128xf32>,
    %c48 = arith.constant 48 : index
    %c0_140 = arith.constant 0 : index
    %186 = vector.load %arg23[%c48, %c0_140] : memref<64x128xf32, #tpu.memory_space<vmem>>, vector<3x128xf32>
    tpu.vector_store %arg23[%c48, %c0_140], %26 {strides = array<i32>} : memref<64x128xf32, #tpu.memory_space<vmem>>, vector<3x128xf32>,
    %187 = vector.extract_strided_slice %180 {offsets = [8, 0], sizes = [8, 128], strides = [1, 1]} : vector<16x128xf32> to vector<8x128xf32>
    %c40_141 = arith.constant 40 : index
    %c0_142 = arith.constant 0 : index
    %188 = vector.load %arg23[%c40_141, %c0_142] : memref<64x128xf32, #tpu.memory_space<vmem>>, vector<8x128xf32>
    tpu.vector_store %arg23[%c40_141, %c0_142], %187 {strides = array<i32>} : memref<64x128xf32, #tpu.memory_space<vmem>>, vector<8x128xf32>,
    %c5_143 = arith.constant 5 : index
    %c0_144 = arith.constant 0 : index
    %189 = vector.load %arg23[%c5_143, %c0_144] : memref<64x128xf32, #tpu.memory_space<vmem>>, vector<8x128xf32>
    %c0_145 = arith.constant 0 : index
    %c0_146 = arith.constant 0 : index
    %190 = vector.load %arg25[%c0_145, %c0_146] : memref<32x896xf32, #tpu.memory_space<vmem>>, vector<8x128xf32>
    tpu.vector_store %arg25[%c0_145, %c0_146], %189 {strides = array<i32>} : memref<32x896xf32, #tpu.memory_space<vmem>>, vector<8x128xf32>,
    %c37_147 = arith.constant 37 : index
    %c0_148 = arith.constant 0 : index
    %191 = vector.load %arg23[%c37_147, %c0_148] : memref<64x128xf32, #tpu.memory_space<vmem>>, vector<8x128xf32>
    %c8_149 = arith.constant 8 : index
    %c0_150 = arith.constant 0 : index
    %192 = vector.load %arg25[%c8_149, %c0_150] : memref<32x896xf32, #tpu.memory_space<vmem>>, vector<8x128xf32>
    tpu.vector_store %arg25[%c8_149, %c0_150], %191 {strides = array<i32>} : memref<32x896xf32, #tpu.memory_space<vmem>>, vector<8x128xf32>,
    %c6_151 = arith.constant 6 : index
    %c0_152 = arith.constant 0 : index
    %193 = vector.load %arg23[%c6_151, %c0_152] : memref<64x128xf32, #tpu.memory_space<vmem>>, vector<8x128xf32>
    %c0_153 = arith.constant 0 : index
    %c128_154 = arith.constant 128 : index
    %194 = vector.load %arg25[%c0_153, %c128_154] : memref<32x896xf32, #tpu.memory_space<vmem>>, vector<8x128xf32>
    tpu.vector_store %arg25[%c0_153, %c128_154], %193 {strides = array<i32>} : memref<32x896xf32, #tpu.memory_space<vmem>>, vector<8x128xf32>,
    %c38_155 = arith.constant 38 : index
    %c0_156 = arith.constant 0 : index
    %195 = vector.load %arg23[%c38_155, %c0_156] : memref<64x128xf32, #tpu.memory_space<vmem>>, vector<8x128xf32>
    %c8_157 = arith.constant 8 : index
    %c128_158 = arith.constant 128 : index
    %196 = vector.load %arg25[%c8_157, %c128_158] : memref<32x896xf32, #tpu.memory_space<vmem>>, vector<8x128xf32>
    tpu.vector_store %arg25[%c8_157, %c128_158], %195 {strides = array<i32>} : memref<32x896xf32, #tpu.memory_space<vmem>>, vector<8x128xf32>,
    %c7_159 = arith.constant 7 : index
    %c0_160 = arith.constant 0 : index
    %197 = vector.load %arg23[%c7_159, %c0_160] : memref<64x128xf32, #tpu.memory_space<vmem>>, vector<8x128xf32>
    %c0_161 = arith.constant 0 : index
    %c256_162 = arith.constant 256 : index
    %198 = vector.load %arg25[%c0_161, %c256_162] : memref<32x896xf32, #tpu.memory_space<vmem>>, vector<8x128xf32>
    tpu.vector_store %arg25[%c0_161, %c256_162], %197 {strides = array<i32>} : memref<32x896xf32, #tpu.memory_space<vmem>>, vector<8x128xf32>,
    %c39_163 = arith.constant 39 : index
    %c0_164 = arith.constant 0 : index
    %199 = vector.load %arg23[%c39_163, %c0_164] : memref<64x128xf32, #tpu.memory_space<vmem>>, vector<8x128xf32>
    %c8_165 = arith.constant 8 : index
    %c256_166 = arith.constant 256 : index
    %200 = vector.load %arg25[%c8_165, %c256_166] : memref<32x896xf32, #tpu.memory_space<vmem>>, vector<8x128xf32>
    tpu.vector_store %arg25[%c8_165, %c256_166], %199 {strides = array<i32>} : memref<32x896xf32, #tpu.memory_space<vmem>>, vector<8x128xf32>,
    %c8_167 = arith.constant 8 : index
    %c0_168 = arith.constant 0 : index
    %201 = vector.load %arg23[%c8_167, %c0_168] : memref<64x128xf32, #tpu.memory_space<vmem>>, vector<8x128xf32>
    %c0_169 = arith.constant 0 : index
    %c384_170 = arith.constant 384 : index
    %202 = vector.load %arg25[%c0_169, %c384_170] : memref<32x896xf32, #tpu.memory_space<vmem>>, vector<8x128xf32>
    tpu.vector_store %arg25[%c0_169, %c384_170], %201 {strides = array<i32>} : memref<32x896xf32, #tpu.memory_space<vmem>>, vector<8x128xf32>,
    %c40_171 = arith.constant 40 : index
    %c0_172 = arith.constant 0 : index
    %203 = vector.load %arg23[%c40_171, %c0_172] : memref<64x128xf32, #tpu.memory_space<vmem>>, vector<8x128xf32>
    %c8_173 = arith.constant 8 : index
    %c384_174 = arith.constant 384 : index
    %204 = vector.load %arg25[%c8_173, %c384_174] : memref<32x896xf32, #tpu.memory_space<vmem>>, vector<8x128xf32>
    tpu.vector_store %arg25[%c8_173, %c384_174], %203 {strides = array<i32>} : memref<32x896xf32, #tpu.memory_space<vmem>>, vector<8x128xf32>,
    %c9_175 = arith.constant 9 : index
    %c0_176 = arith.constant 0 : index
    %205 = vector.load %arg23[%c9_175, %c0_176] : memref<64x128xf32, #tpu.memory_space<vmem>>, vector<8x128xf32>
    %c0_177 = arith.constant 0 : index
    %c512_178 = arith.constant 512 : index
    %206 = vector.load %arg25[%c0_177, %c512_178] : memref<32x896xf32, #tpu.memory_space<vmem>>, vector<8x128xf32>
    tpu.vector_store %arg25[%c0_177, %c512_178], %205 {strides = array<i32>} : memref<32x896xf32, #tpu.memory_space<vmem>>, vector<8x128xf32>,
    %c41_179 = arith.constant 41 : index
    %c0_180 = arith.constant 0 : index
    %207 = vector.load %arg23[%c41_179, %c0_180] : memref<64x128xf32, #tpu.memory_space<vmem>>, vector<8x128xf32>
    %c8_181 = arith.constant 8 : index
    %c512_182 = arith.constant 512 : index
    %208 = vector.load %arg25[%c8_181, %c512_182] : memref<32x896xf32, #tpu.memory_space<vmem>>, vector<8x128xf32>
    tpu.vector_store %arg25[%c8_181, %c512_182], %207 {strides = array<i32>} : memref<32x896xf32, #tpu.memory_space<vmem>>, vector<8x128xf32>,
    %c10_183 = arith.constant 10 : index
    %c0_184 = arith.constant 0 : index
    %209 = vector.load %arg23[%c10_183, %c0_184] : memref<64x128xf32, #tpu.memory_space<vmem>>, vector<8x128xf32>
    %c0_185 = arith.constant 0 : index
    %c640_186 = arith.constant 640 : index
    %210 = vector.load %arg25[%c0_185, %c640_186] : memref<32x896xf32, #tpu.memory_space<vmem>>, vector<8x128xf32>
    tpu.vector_store %arg25[%c0_185, %c640_186], %209 {strides = array<i32>} : memref<32x896xf32, #tpu.memory_space<vmem>>, vector<8x128xf32>,
    %c42_187 = arith.constant 42 : index
    %c0_188 = arith.constant 0 : index
    %211 = vector.load %arg23[%c42_187, %c0_188] : memref<64x128xf32, #tpu.memory_space<vmem>>, vector<8x128xf32>
    %c8_189 = arith.constant 8 : index
    %c640_190 = arith.constant 640 : index
    %212 = vector.load %arg25[%c8_189, %c640_190] : memref<32x896xf32, #tpu.memory_space<vmem>>, vector<8x128xf32>
    tpu.vector_store %arg25[%c8_189, %c640_190], %211 {strides = array<i32>} : memref<32x896xf32, #tpu.memory_space<vmem>>, vector<8x128xf32>,
    %c11_191 = arith.constant 11 : index
    %c0_192 = arith.constant 0 : index
    %213 = vector.load %arg23[%c11_191, %c0_192] : memref<64x128xf32, #tpu.memory_space<vmem>>, vector<8x128xf32>
    %c0_193 = arith.constant 0 : index
    %c768_194 = arith.constant 768 : index
    %214 = vector.load %arg25[%c0_193, %c768_194] : memref<32x896xf32, #tpu.memory_space<vmem>>, vector<8x128xf32>
    tpu.vector_store %arg25[%c0_193, %c768_194], %213 {strides = array<i32>} : memref<32x896xf32, #tpu.memory_space<vmem>>, vector<8x128xf32>,
    %c43_195 = arith.constant 43 : index
    %c0_196 = arith.constant 0 : index
    %215 = vector.load %arg23[%c43_195, %c0_196] : memref<64x128xf32, #tpu.memory_space<vmem>>, vector<8x128xf32>
    %c8_197 = arith.constant 8 : index
    %c768_198 = arith.constant 768 : index
    %216 = vector.load %arg25[%c8_197, %c768_198] : memref<32x896xf32, #tpu.memory_space<vmem>>, vector<8x128xf32>
    tpu.vector_store %arg25[%c8_197, %c768_198], %215 {strides = array<i32>} : memref<32x896xf32, #tpu.memory_space<vmem>>, vector<8x128xf32>,
    %c0_199 = arith.constant 0 : index
    %c0_200 = arith.constant 0 : index
    %217 = vector.load %arg25[%c0_199, %c0_200] : memref<32x896xf32, #tpu.memory_space<vmem>>, vector<16x896xf32>
    %c1_201 = arith.constant 1 : index
    %c0_202 = arith.constant 0 : index
    %c0_203 = arith.constant 0 : index
    %218 = vector.load %arg6[%c1_201, %c0_202, %c0_203] : memref<4x896x128xbf16, #tpu.memory_space<vmem>>, vector<1x896x128xbf16>
    %219 = vector.shape_cast %218 : vector<1x896x128xbf16> to vector<896x128xbf16>
    %220 = arith.truncf %217 : vector<16x896xf32> to vector<16x896xbf16>
    %cst_204 = arith.constant dense<0.000000e+00> : vector<16x128xf32>
    %221 = tpu.matmul %220, %219, %cst_204 {dimension_numbers = #tpu.dot_dimension_numbers<[1], [0], [0], [1], [0, 0, 1, 1], [], []>} : vector<16x896xbf16>, vector<896x128xbf16>, vector<16x128xf32> -> vector<16x128xf32>
    %c8_205 = arith.constant 8 : index
    %c0_206 = arith.constant 0 : index
    %222 = vector.load %arg4[%c8_205, %c0_206] : memref<32x128xf32, #tpu.memory_space<vmem>>, vector<1x128xf32>
    %223 = vector.broadcast %222 : vector<1x128xf32> to vector<16x128xf32>
    %224 = arith.addf %221, %223 : vector<16x128xf32>
    %c1_207 = arith.constant 1 : index
    %c0_208 = arith.constant 0 : index
    %c0_209 = arith.constant 0 : index
    %225 = vector.load %arg3[%c1_207, %c0_208, %c0_209] : memref<4x128x128xbf16, #tpu.memory_space<vmem>>, vector<1x128x128xbf16>
    %226 = vector.shape_cast %225 : vector<1x128x128xbf16> to vector<128x128xbf16>
    %c9_210 = arith.constant 9 : index
    %c0_211 = arith.constant 0 : index
    %227 = vector.load %arg4[%c9_210, %c0_211] : memref<32x128xf32, #tpu.memory_space<vmem>>, vector<1x128xf32>
    %c10_212 = arith.constant 10 : index
    %c0_213 = arith.constant 0 : index
    %228 = vector.load %arg4[%c10_212, %c0_213] : memref<32x128xf32, #tpu.memory_space<vmem>>, vector<1x128xf32>
    %229 = arith.truncf %224 : vector<16x128xf32> to vector<16x128xbf16>
    %cst_214 = arith.constant dense<0.000000e+00> : vector<16x128xf32>
    %230 = tpu.matmul %229, %226, %cst_214 {dimension_numbers = #tpu.dot_dimension_numbers<[1], [0], [0], [1], [0, 0, 1, 1], [], []>} : vector<16x128xbf16>, vector<128x128xbf16>, vector<16x128xf32> -> vector<16x128xf32>
    %231 = arith.subf %224, %230 : vector<16x128xf32>
    %232 = arith.mulf %231, %231 : vector<16x128xf32>
    %233 = arith.truncf %232 : vector<16x128xf32> to vector<16x128xbf16>
    %cst_215 = arith.constant dense<0.000000e+00> : vector<16x128xf32>
    %234 = tpu.matmul %233, %226, %cst_215 {dimension_numbers = #tpu.dot_dimension_numbers<[1], [0], [0], [1], [0, 0, 1, 1], [], []>} : vector<16x128xbf16>, vector<128x128xbf16>, vector<16x128xf32> -> vector<16x128xf32>
    %cst_216 = arith.constant 9.99999997E-7 : f32
    %235 = vector.broadcast %cst_216 : f32 to vector<16x128xf32>
    %236 = arith.addf %234, %235 : vector<16x128xf32>
    %237 = math.rsqrt %236 : vector<16x128xf32>
    %238 = arith.mulf %231, %237 : vector<16x128xf32>
    %239 = vector.broadcast %227 : vector<1x128xf32> to vector<16x128xf32>
    %240 = arith.mulf %238, %239 : vector<16x128xf32>
    %241 = vector.broadcast %228 : vector<1x128xf32> to vector<16x128xf32>
    %242 = arith.addf %240, %241 : vector<16x128xf32>
    %c1_217 = arith.constant 1 : index
    %c0_218 = arith.constant 0 : index
    %c0_219 = arith.constant 0 : index
    %243 = vector.load %arg7[%c1_217, %c0_218, %c0_219] : memref<4x128x512xbf16, #tpu.memory_space<vmem>>, vector<1x128x512xbf16>
    %244 = vector.shape_cast %243 : vector<1x128x512xbf16> to vector<128x512xbf16>
    %245 = arith.truncf %242 : vector<16x128xf32> to vector<16x128xbf16>
    %cst_220 = arith.constant dense<0.000000e+00> : vector<16x512xf32>
    %246 = tpu.matmul %245, %244, %cst_220 {dimension_numbers = #tpu.dot_dimension_numbers<[1], [0], [0], [1], [0, 0, 1, 1], [], []>} : vector<16x128xbf16>, vector<128x512xbf16>, vector<16x512xf32> -> vector<16x512xf32>
    %c1_221 = arith.constant 1 : index
    %c0_222 = arith.constant 0 : index
    %247 = vector.load %arg5[%c1_221, %c0_222] : memref<4x512xf32, #tpu.memory_space<vmem>>, vector<1x512xf32>
    %248 = vector.broadcast %247 : vector<1x512xf32> to vector<16x512xf32>
    %249 = arith.addf %246, %248 : vector<16x512xf32>
    %cst_223 = arith.constant 5.000000e-01 : f32
    %250 = vector.broadcast %cst_223 : f32 to vector<16x512xf32>
    %251 = arith.mulf %250, %249 : vector<16x512xf32>
    %cst_224 = arith.constant 0.707106769 : f32
    %252 = vector.broadcast %cst_224 : f32 to vector<16x512xf32>
    %253 = arith.mulf %249, %252 : vector<16x512xf32>
    %cst_225 = arith.constant 0.000000e+00 : f32
    %254 = vector.broadcast %cst_225 : f32 to vector<16x512xf32>
    %255 = arith.cmpf oge, %253, %254 : vector<16x512xf32>
    %cst_226 = arith.constant 1.000000e+00 : f32
    %cst_227 = arith.constant -1.000000e+00 : f32
    %256 = vector.broadcast %cst_226 : f32 to vector<16x512xf32>
    %257 = vector.broadcast %cst_227 : f32 to vector<16x512xf32>
    %258 = arith.select %255, %256, %257 : vector<16x512xi1>, vector<16x512xf32>
    %259 = math.absf %253 : vector<16x512xf32>
    %cst_228 = arith.constant 0.327591091 : f32
    %260 = vector.broadcast %cst_228 : f32 to vector<16x512xf32>
    %261 = arith.mulf %260, %259 : vector<16x512xf32>
    %cst_229 = arith.constant 1.000000e+00 : f32
    %262 = vector.broadcast %cst_229 : f32 to vector<16x512xf32>
    %263 = arith.addf %262, %261 : vector<16x512xf32>
    %cst_230 = arith.constant 1.000000e+00 : f32
    %264 = vector.broadcast %cst_230 : f32 to vector<16x512xf32>
    %265 = arith.divf %264, %263 : vector<16x512xf32>
    %cst_231 = arith.constant 1.06140542 : f32
    %266 = vector.broadcast %cst_231 : f32 to vector<16x512xf32>
    %267 = arith.mulf %266, %265 : vector<16x512xf32>
    %cst_232 = arith.constant -1.45315206 : f32
    %268 = vector.broadcast %cst_232 : f32 to vector<16x512xf32>
    %269 = arith.addf %267, %268 : vector<16x512xf32>
    %270 = arith.mulf %269, %265 : vector<16x512xf32>
    %cst_233 = arith.constant 1.42141378 : f32
    %271 = vector.broadcast %cst_233 : f32 to vector<16x512xf32>
    %272 = arith.addf %270, %271 : vector<16x512xf32>
    %273 = arith.mulf %272, %265 : vector<16x512xf32>
    %cst_234 = arith.constant -0.284496725 : f32
    %274 = vector.broadcast %cst_234 : f32 to vector<16x512xf32>
    %275 = arith.addf %273, %274 : vector<16x512xf32>
    %276 = arith.mulf %275, %265 : vector<16x512xf32>
    %cst_235 = arith.constant 0.254829586 : f32
    %277 = vector.broadcast %cst_235 : f32 to vector<16x512xf32>
    %278 = arith.addf %276, %277 : vector<16x512xf32>
    %279 = arith.mulf %278, %265 : vector<16x512xf32>
    %cst_236 = arith.constant 0.000000e+00 : f32
    %280 = vector.broadcast %cst_236 : f32 to vector<16x512xf32>
    %281 = arith.subf %280, %259 : vector<16x512xf32>
    %282 = arith.mulf %281, %259 : vector<16x512xf32>
    %283 = math.exp %282 : vector<16x512xf32>
    %284 = arith.mulf %279, %283 : vector<16x512xf32>
    %cst_237 = arith.constant 1.000000e+00 : f32
    %285 = vector.broadcast %cst_237 : f32 to vector<16x512xf32>
    %286 = arith.subf %285, %284 : vector<16x512xf32>
    %287 = arith.mulf %258, %286 : vector<16x512xf32>
    %cst_238 = arith.constant 1.000000e+00 : f32
    %288 = vector.broadcast %cst_238 : f32 to vector<16x512xf32>
    %289 = arith.addf %288, %287 : vector<16x512xf32>
    %290 = arith.mulf %251, %289 : vector<16x512xf32>
    %c1_239 = arith.constant 1 : index
    %c0_240 = arith.constant 0 : index
    %c0_241 = arith.constant 0 : index
    %291 = vector.load %arg8[%c1_239, %c0_240, %c0_241] : memref<4x512x128xbf16, #tpu.memory_space<vmem>>, vector<1x512x128xbf16>
    %292 = vector.shape_cast %291 : vector<1x512x128xbf16> to vector<512x128xbf16>
    %293 = arith.truncf %290 : vector<16x512xf32> to vector<16x512xbf16>
    %cst_242 = arith.constant dense<0.000000e+00> : vector<16x128xf32>
    %294 = tpu.matmul %293, %292, %cst_242 {dimension_numbers = #tpu.dot_dimension_numbers<[1], [0], [0], [1], [0, 0, 1, 1], [], []>} : vector<16x512xbf16>, vector<512x128xbf16>, vector<16x128xf32> -> vector<16x128xf32>
    %c11_243 = arith.constant 11 : index
    %c0_244 = arith.constant 0 : index
    %295 = vector.load %arg4[%c11_243, %c0_244] : memref<32x128xf32, #tpu.memory_space<vmem>>, vector<1x128xf32>
    %296 = vector.broadcast %295 : vector<1x128xf32> to vector<16x128xf32>
    %297 = arith.addf %294, %296 : vector<16x128xf32>
    %c12 = arith.constant 12 : index
    %c0_245 = arith.constant 0 : index
    %298 = vector.load %arg4[%c12, %c0_245] : memref<32x128xf32, #tpu.memory_space<vmem>>, vector<1x128xf32>
    %299 = vector.broadcast %298 : vector<1x128xf32> to vector<16x128xf32>
    %300 = arith.mulf %299, %297 : vector<16x128xf32>
    %301 = arith.addf %180, %300 : vector<16x128xf32>
    %c1_246 = arith.constant 1 : index
    %c0_247 = arith.constant 0 : index
    %c0_248 = arith.constant 0 : index
    %302 = vector.load %arg3[%c1_246, %c0_247, %c0_248] : memref<4x128x128xbf16, #tpu.memory_space<vmem>>, vector<1x128x128xbf16>
    %303 = vector.shape_cast %302 : vector<1x128x128xbf16> to vector<128x128xbf16>
    %c26 = arith.constant 26 : index
    %c0_249 = arith.constant 0 : index
    %304 = vector.load %arg4[%c26, %c0_249] : memref<32x128xf32, #tpu.memory_space<vmem>>, vector<1x128xf32>
    %c27 = arith.constant 27 : index
    %c0_250 = arith.constant 0 : index
    %305 = vector.load %arg4[%c27, %c0_250] : memref<32x128xf32, #tpu.memory_space<vmem>>, vector<1x128xf32>
    %306 = arith.truncf %301 : vector<16x128xf32> to vector<16x128xbf16>
    %cst_251 = arith.constant dense<0.000000e+00> : vector<16x128xf32>
    %307 = tpu.matmul %306, %303, %cst_251 {dimension_numbers = #tpu.dot_dimension_numbers<[1], [0], [0], [1], [0, 0, 1, 1], [], []>} : vector<16x128xbf16>, vector<128x128xbf16>, vector<16x128xf32> -> vector<16x128xf32>
    %308 = arith.subf %301, %307 : vector<16x128xf32>
    %309 = arith.mulf %308, %308 : vector<16x128xf32>
    %310 = arith.truncf %309 : vector<16x128xf32> to vector<16x128xbf16>
    %cst_252 = arith.constant dense<0.000000e+00> : vector<16x128xf32>
    %311 = tpu.matmul %310, %303, %cst_252 {dimension_numbers = #tpu.dot_dimension_numbers<[1], [0], [0], [1], [0, 0, 1, 1], [], []>} : vector<16x128xbf16>, vector<128x128xbf16>, vector<16x128xf32> -> vector<16x128xf32>
    %cst_253 = arith.constant 9.99999997E-7 : f32
    %312 = vector.broadcast %cst_253 : f32 to vector<16x128xf32>
    %313 = arith.addf %311, %312 : vector<16x128xf32>
    %314 = math.rsqrt %313 : vector<16x128xf32>
    %315 = arith.mulf %308, %314 : vector<16x128xf32>
    %316 = vector.broadcast %304 : vector<1x128xf32> to vector<16x128xf32>
    %317 = arith.mulf %315, %316 : vector<16x128xf32>
    %318 = vector.broadcast %305 : vector<1x128xf32> to vector<16x128xf32>
    %319 = arith.addf %317, %318 : vector<16x128xf32>
    %c0_254 = arith.constant 0 : index
    %c0_255 = arith.constant 0 : index
    %320 = vector.load %arg24[%c0_254, %c0_255] : memref<32x128xf32, #tpu.memory_space<vmem>>, vector<16x128xf32>
    tpu.vector_store %arg24[%c0_254, %c0_255], %319 {strides = array<i32>} : memref<32x128xf32, #tpu.memory_space<vmem>>, vector<16x128xf32>,
    %c28 = arith.constant 28 : index
    %c0_256 = arith.constant 0 : index
    %321 = vector.load %arg4[%c28, %c0_256] : memref<32x128xf32, #tpu.memory_space<vmem>>, vector<1x128xf32>
    %c0_257 = arith.constant 0 : index
    %c0_258 = arith.constant 0 : index
    %322 = tpu.strided_load %arg24[%c0_257, %c0_258] {strides = array<i32: 2, 1>} : memref<32x128xf32, #tpu.memory_space<vmem>>, vector<8x128xf32>
    %c1_259 = arith.constant 1 : index
    %c0_260 = arith.constant 0 : index
    %c0_261 = arith.constant 0 : index
    %c0_262 = arith.constant 0 : index
    %323 = vector.load %arg9[%c1_259, %c0_260, %c0_261, %c0_262] : memref<3x2x128x128xbf16, #tpu.memory_space<vmem>>, vector<1x1x128x128xbf16>
    %324 = vector.shape_cast %323 : vector<1x1x128x128xbf16> to vector<128x128xbf16>
    %325 = arith.truncf %322 : vector<8x128xf32> to vector<8x128xbf16>
    %cst_263 = arith.constant dense<0.000000e+00> : vector<8x128xf32>
    %326 = tpu.matmul %325, %324, %cst_263 {dimension_numbers = #tpu.dot_dimension_numbers<[1], [0], [0], [1], [0, 0, 1, 1], [], []>} : vector<8x128xbf16>, vector<128x128xbf16>, vector<8x128xf32> -> vector<8x128xf32>
    %327 = vector.broadcast %321 : vector<1x128xf32> to vector<8x128xf32>
    %328 = arith.addf %327, %326 : vector<8x128xf32>
    %c1_264 = arith.constant 1 : index
    %c0_265 = arith.constant 0 : index
    %329 = tpu.strided_load %arg24[%c1_264, %c0_265] {strides = array<i32: 2, 1>} : memref<32x128xf32, #tpu.memory_space<vmem>>, vector<8x128xf32>
    %c1_266 = arith.constant 1 : index
    %c1_267 = arith.constant 1 : index
    %c0_268 = arith.constant 0 : index
    %c0_269 = arith.constant 0 : index
    %330 = vector.load %arg9[%c1_266, %c1_267, %c0_268, %c0_269] : memref<3x2x128x128xbf16, #tpu.memory_space<vmem>>, vector<1x1x128x128xbf16>
    %331 = vector.shape_cast %330 : vector<1x1x128x128xbf16> to vector<128x128xbf16>
    %332 = arith.truncf %329 : vector<8x128xf32> to vector<8x128xbf16>
    %cst_270 = arith.constant dense<0.000000e+00> : vector<8x128xf32>
    %333 = tpu.matmul %332, %331, %cst_270 {dimension_numbers = #tpu.dot_dimension_numbers<[1], [0], [0], [1], [0, 0, 1, 1], [], []>} : vector<8x128xbf16>, vector<128x128xbf16>, vector<8x128xf32> -> vector<8x128xf32>
    %334 = arith.addf %328, %333 : vector<8x128xf32>
    %c5_271 = arith.constant 5 : index
    %c0_272 = arith.constant 0 : index
    %335 = vector.load %arg23[%c5_271, %c0_272] : memref<64x128xf32, #tpu.memory_space<vmem>>, vector<3x128xf32>
    tpu.vector_store %arg23[%c5_271, %c0_272], %26 {strides = array<i32>} : memref<64x128xf32, #tpu.memory_space<vmem>>, vector<3x128xf32>,
    %c12_273 = arith.constant 12 : index
    %c0_274 = arith.constant 0 : index
    %336 = vector.load %arg23[%c12_273, %c0_274] : memref<64x128xf32, #tpu.memory_space<vmem>>, vector<3x128xf32>
    tpu.vector_store %arg23[%c12_273, %c0_274], %26 {strides = array<i32>} : memref<64x128xf32, #tpu.memory_space<vmem>>, vector<3x128xf32>,
    %337 = vector.extract_strided_slice %334 {offsets = [0, 0], sizes = [4, 128], strides = [1, 1]} : vector<8x128xf32> to vector<4x128xf32>
    %c8_275 = arith.constant 8 : index
    %c0_276 = arith.constant 0 : index
    %338 = vector.load %arg23[%c8_275, %c0_276] : memref<64x128xf32, #tpu.memory_space<vmem>>, vector<4x128xf32>
    tpu.vector_store %arg23[%c8_275, %c0_276], %337 {strides = array<i32>} : memref<64x128xf32, #tpu.memory_space<vmem>>, vector<4x128xf32>,
    %c37_277 = arith.constant 37 : index
    %c0_278 = arith.constant 0 : index
    %339 = vector.load %arg23[%c37_277, %c0_278] : memref<64x128xf32, #tpu.memory_space<vmem>>, vector<3x128xf32>
    tpu.vector_store %arg23[%c37_277, %c0_278], %26 {strides = array<i32>} : memref<64x128xf32, #tpu.memory_space<vmem>>, vector<3x128xf32>,
    %c44 = arith.constant 44 : index
    %c0_279 = arith.constant 0 : index
    %340 = vector.load %arg23[%c44, %c0_279] : memref<64x128xf32, #tpu.memory_space<vmem>>, vector<3x128xf32>
    tpu.vector_store %arg23[%c44, %c0_279], %26 {strides = array<i32>} : memref<64x128xf32, #tpu.memory_space<vmem>>, vector<3x128xf32>,
    %341 = vector.extract_strided_slice %334 {offsets = [4, 0], sizes = [4, 128], strides = [1, 1]} : vector<8x128xf32> to vector<4x128xf32>
    %c40_280 = arith.constant 40 : index
    %c0_281 = arith.constant 0 : index
    %342 = vector.load %arg23[%c40_280, %c0_281] : memref<64x128xf32, #tpu.memory_space<vmem>>, vector<4x128xf32>
    tpu.vector_store %arg23[%c40_280, %c0_281], %341 {strides = array<i32>} : memref<64x128xf32, #tpu.memory_space<vmem>>, vector<4x128xf32>,
    %c5_282 = arith.constant 5 : index
    %c0_283 = arith.constant 0 : index
    %343 = vector.load %arg23[%c5_282, %c0_283] : memref<64x128xf32, #tpu.memory_space<vmem>>, vector<4x128xf32>
    %c0_284 = arith.constant 0 : index
    %c0_285 = arith.constant 0 : index
    %344 = vector.load %arg25[%c0_284, %c0_285] : memref<32x896xf32, #tpu.memory_space<vmem>>, vector<4x128xf32>
    tpu.vector_store %arg25[%c0_284, %c0_285], %343 {strides = array<i32>} : memref<32x896xf32, #tpu.memory_space<vmem>>, vector<4x128xf32>,
    %c37_286 = arith.constant 37 : index
    %c0_287 = arith.constant 0 : index
    %345 = vector.load %arg23[%c37_286, %c0_287] : memref<64x128xf32, #tpu.memory_space<vmem>>, vector<4x128xf32>
    %c4_288 = arith.constant 4 : index
    %c0_289 = arith.constant 0 : index
    %346 = vector.load %arg25[%c4_288, %c0_289] : memref<32x896xf32, #tpu.memory_space<vmem>>, vector<4x128xf32>
    tpu.vector_store %arg25[%c4_288, %c0_289], %345 {strides = array<i32>} : memref<32x896xf32, #tpu.memory_space<vmem>>, vector<4x128xf32>,
    %c6_290 = arith.constant 6 : index
    %c0_291 = arith.constant 0 : index
    %347 = vector.load %arg23[%c6_290, %c0_291] : memref<64x128xf32, #tpu.memory_space<vmem>>, vector<4x128xf32>
    %c0_292 = arith.constant 0 : index
    %c128_293 = arith.constant 128 : index
    %348 = vector.load %arg25[%c0_292, %c128_293] : memref<32x896xf32, #tpu.memory_space<vmem>>, vector<4x128xf32>
    tpu.vector_store %arg25[%c0_292, %c128_293], %347 {strides = array<i32>} : memref<32x896xf32, #tpu.memory_space<vmem>>, vector<4x128xf32>,
    %c38_294 = arith.constant 38 : index
    %c0_295 = arith.constant 0 : index
    %349 = vector.load %arg23[%c38_294, %c0_295] : memref<64x128xf32, #tpu.memory_space<vmem>>, vector<4x128xf32>
    %c4_296 = arith.constant 4 : index
    %c128_297 = arith.constant 128 : index
    %350 = vector.load %arg25[%c4_296, %c128_297] : memref<32x896xf32, #tpu.memory_space<vmem>>, vector<4x128xf32>
    tpu.vector_store %arg25[%c4_296, %c128_297], %349 {strides = array<i32>} : memref<32x896xf32, #tpu.memory_space<vmem>>, vector<4x128xf32>,
    %c7_298 = arith.constant 7 : index
    %c0_299 = arith.constant 0 : index
    %351 = vector.load %arg23[%c7_298, %c0_299] : memref<64x128xf32, #tpu.memory_space<vmem>>, vector<4x128xf32>
    %c0_300 = arith.constant 0 : index
    %c256_301 = arith.constant 256 : index
    %352 = vector.load %arg25[%c0_300, %c256_301] : memref<32x896xf32, #tpu.memory_space<vmem>>, vector<4x128xf32>
    tpu.vector_store %arg25[%c0_300, %c256_301], %351 {strides = array<i32>} : memref<32x896xf32, #tpu.memory_space<vmem>>, vector<4x128xf32>,
    %c39_302 = arith.constant 39 : index
    %c0_303 = arith.constant 0 : index
    %353 = vector.load %arg23[%c39_302, %c0_303] : memref<64x128xf32, #tpu.memory_space<vmem>>, vector<4x128xf32>
    %c4_304 = arith.constant 4 : index
    %c256_305 = arith.constant 256 : index
    %354 = vector.load %arg25[%c4_304, %c256_305] : memref<32x896xf32, #tpu.memory_space<vmem>>, vector<4x128xf32>
    tpu.vector_store %arg25[%c4_304, %c256_305], %353 {strides = array<i32>} : memref<32x896xf32, #tpu.memory_space<vmem>>, vector<4x128xf32>,
    %c8_306 = arith.constant 8 : index
    %c0_307 = arith.constant 0 : index
    %355 = vector.load %arg23[%c8_306, %c0_307] : memref<64x128xf32, #tpu.memory_space<vmem>>, vector<4x128xf32>
    %c0_308 = arith.constant 0 : index
    %c384_309 = arith.constant 384 : index
    %356 = vector.load %arg25[%c0_308, %c384_309] : memref<32x896xf32, #tpu.memory_space<vmem>>, vector<4x128xf32>
    tpu.vector_store %arg25[%c0_308, %c384_309], %355 {strides = array<i32>} : memref<32x896xf32, #tpu.memory_space<vmem>>, vector<4x128xf32>,
    %c40_310 = arith.constant 40 : index
    %c0_311 = arith.constant 0 : index
    %357 = vector.load %arg23[%c40_310, %c0_311] : memref<64x128xf32, #tpu.memory_space<vmem>>, vector<4x128xf32>
    %c4_312 = arith.constant 4 : index
    %c384_313 = arith.constant 384 : index
    %358 = vector.load %arg25[%c4_312, %c384_313] : memref<32x896xf32, #tpu.memory_space<vmem>>, vector<4x128xf32>
    tpu.vector_store %arg25[%c4_312, %c384_313], %357 {strides = array<i32>} : memref<32x896xf32, #tpu.memory_space<vmem>>, vector<4x128xf32>,
    %c9_314 = arith.constant 9 : index
    %c0_315 = arith.constant 0 : index
    %359 = vector.load %arg23[%c9_314, %c0_315] : memref<64x128xf32, #tpu.memory_space<vmem>>, vector<4x128xf32>
    %c0_316 = arith.constant 0 : index
    %c512_317 = arith.constant 512 : index
    %360 = vector.load %arg25[%c0_316, %c512_317] : memref<32x896xf32, #tpu.memory_space<vmem>>, vector<4x128xf32>
    tpu.vector_store %arg25[%c0_316, %c512_317], %359 {strides = array<i32>} : memref<32x896xf32, #tpu.memory_space<vmem>>, vector<4x128xf32>,
    %c41_318 = arith.constant 41 : index
    %c0_319 = arith.constant 0 : index
    %361 = vector.load %arg23[%c41_318, %c0_319] : memref<64x128xf32, #tpu.memory_space<vmem>>, vector<4x128xf32>
    %c4_320 = arith.constant 4 : index
    %c512_321 = arith.constant 512 : index
    %362 = vector.load %arg25[%c4_320, %c512_321] : memref<32x896xf32, #tpu.memory_space<vmem>>, vector<4x128xf32>
    tpu.vector_store %arg25[%c4_320, %c512_321], %361 {strides = array<i32>} : memref<32x896xf32, #tpu.memory_space<vmem>>, vector<4x128xf32>,
    %c10_322 = arith.constant 10 : index
    %c0_323 = arith.constant 0 : index
    %363 = vector.load %arg23[%c10_322, %c0_323] : memref<64x128xf32, #tpu.memory_space<vmem>>, vector<4x128xf32>
    %c0_324 = arith.constant 0 : index
    %c640_325 = arith.constant 640 : index
    %364 = vector.load %arg25[%c0_324, %c640_325] : memref<32x896xf32, #tpu.memory_space<vmem>>, vector<4x128xf32>
    tpu.vector_store %arg25[%c0_324, %c640_325], %363 {strides = array<i32>} : memref<32x896xf32, #tpu.memory_space<vmem>>, vector<4x128xf32>,
    %c42_326 = arith.constant 42 : index
    %c0_327 = arith.constant 0 : index
    %365 = vector.load %arg23[%c42_326, %c0_327] : memref<64x128xf32, #tpu.memory_space<vmem>>, vector<4x128xf32>
    %c4_328 = arith.constant 4 : index
    %c640_329 = arith.constant 640 : index
    %366 = vector.load %arg25[%c4_328, %c640_329] : memref<32x896xf32, #tpu.memory_space<vmem>>, vector<4x128xf32>
    tpu.vector_store %arg25[%c4_328, %c640_329], %365 {strides = array<i32>} : memref<32x896xf32, #tpu.memory_space<vmem>>, vector<4x128xf32>,
    %c11_330 = arith.constant 11 : index
    %c0_331 = arith.constant 0 : index
    %367 = vector.load %arg23[%c11_330, %c0_331] : memref<64x128xf32, #tpu.memory_space<vmem>>, vector<4x128xf32>
    %c0_332 = arith.constant 0 : index
    %c768_333 = arith.constant 768 : index
    %368 = vector.load %arg25[%c0_332, %c768_333] : memref<32x896xf32, #tpu.memory_space<vmem>>, vector<4x128xf32>
    tpu.vector_store %arg25[%c0_332, %c768_333], %367 {strides = array<i32>} : memref<32x896xf32, #tpu.memory_space<vmem>>, vector<4x128xf32>,
    %c43_334 = arith.constant 43 : index
    %c0_335 = arith.constant 0 : index
    %369 = vector.load %arg23[%c43_334, %c0_335] : memref<64x128xf32, #tpu.memory_space<vmem>>, vector<4x128xf32>
    %c4_336 = arith.constant 4 : index
    %c768_337 = arith.constant 768 : index
    %370 = vector.load %arg25[%c4_336, %c768_337] : memref<32x896xf32, #tpu.memory_space<vmem>>, vector<4x128xf32>
    tpu.vector_store %arg25[%c4_336, %c768_337], %369 {strides = array<i32>} : memref<32x896xf32, #tpu.memory_space<vmem>>, vector<4x128xf32>,
    %c0_338 = arith.constant 0 : index
    %c0_339 = arith.constant 0 : index
    %371 = vector.load %arg25[%c0_338, %c0_339] : memref<32x896xf32, #tpu.memory_space<vmem>>, vector<8x896xf32>
    %c2_340 = arith.constant 2 : index
    %c0_341 = arith.constant 0 : index
    %c0_342 = arith.constant 0 : index
    %372 = vector.load %arg6[%c2_340, %c0_341, %c0_342] : memref<4x896x128xbf16, #tpu.memory_space<vmem>>, vector<1x896x128xbf16>
    %373 = vector.shape_cast %372 : vector<1x896x128xbf16> to vector<896x128xbf16>
    %374 = arith.truncf %371 : vector<8x896xf32> to vector<8x896xbf16>
    %cst_343 = arith.constant dense<0.000000e+00> : vector<8x128xf32>
    %375 = tpu.matmul %374, %373, %cst_343 {dimension_numbers = #tpu.dot_dimension_numbers<[1], [0], [0], [1], [0, 0, 1, 1], [], []>} : vector<8x896xbf16>, vector<896x128xbf16>, vector<8x128xf32> -> vector<8x128xf32>
    %c13 = arith.constant 13 : index
    %c0_344 = arith.constant 0 : index
    %376 = vector.load %arg4[%c13, %c0_344] : memref<32x128xf32, #tpu.memory_space<vmem>>, vector<1x128xf32>
    %377 = vector.broadcast %376 : vector<1x128xf32> to vector<8x128xf32>
    %378 = arith.addf %375, %377 : vector<8x128xf32>
    %c2_345 = arith.constant 2 : index
    %c0_346 = arith.constant 0 : index
    %c0_347 = arith.constant 0 : index
    %379 = vector.load %arg3[%c2_345, %c0_346, %c0_347] : memref<4x128x128xbf16, #tpu.memory_space<vmem>>, vector<1x128x128xbf16>
    %380 = vector.shape_cast %379 : vector<1x128x128xbf16> to vector<128x128xbf16>
    %c14 = arith.constant 14 : index
    %c0_348 = arith.constant 0 : index
    %381 = vector.load %arg4[%c14, %c0_348] : memref<32x128xf32, #tpu.memory_space<vmem>>, vector<1x128xf32>
    %c15 = arith.constant 15 : index
    %c0_349 = arith.constant 0 : index
    %382 = vector.load %arg4[%c15, %c0_349] : memref<32x128xf32, #tpu.memory_space<vmem>>, vector<1x128xf32>
    %383 = arith.truncf %378 : vector<8x128xf32> to vector<8x128xbf16>
    %cst_350 = arith.constant dense<0.000000e+00> : vector<8x128xf32>
    %384 = tpu.matmul %383, %380, %cst_350 {dimension_numbers = #tpu.dot_dimension_numbers<[1], [0], [0], [1], [0, 0, 1, 1], [], []>} : vector<8x128xbf16>, vector<128x128xbf16>, vector<8x128xf32> -> vector<8x128xf32>
    %385 = arith.subf %378, %384 : vector<8x128xf32>
    %386 = arith.mulf %385, %385 : vector<8x128xf32>
    %387 = arith.truncf %386 : vector<8x128xf32> to vector<8x128xbf16>
    %cst_351 = arith.constant dense<0.000000e+00> : vector<8x128xf32>
    %388 = tpu.matmul %387, %380, %cst_351 {dimension_numbers = #tpu.dot_dimension_numbers<[1], [0], [0], [1], [0, 0, 1, 1], [], []>} : vector<8x128xbf16>, vector<128x128xbf16>, vector<8x128xf32> -> vector<8x128xf32>
    %cst_352 = arith.constant 9.99999997E-7 : f32
    %389 = vector.broadcast %cst_352 : f32 to vector<8x128xf32>
    %390 = arith.addf %388, %389 : vector<8x128xf32>
    %391 = math.rsqrt %390 : vector<8x128xf32>
    %392 = arith.mulf %385, %391 : vector<8x128xf32>
    %393 = vector.broadcast %381 : vector<1x128xf32> to vector<8x128xf32>
    %394 = arith.mulf %392, %393 : vector<8x128xf32>
    %395 = vector.broadcast %382 : vector<1x128xf32> to vector<8x128xf32>
    %396 = arith.addf %394, %395 : vector<8x128xf32>
    %c2_353 = arith.constant 2 : index
    %c0_354 = arith.constant 0 : index
    %c0_355 = arith.constant 0 : index
    %397 = vector.load %arg7[%c2_353, %c0_354, %c0_355] : memref<4x128x512xbf16, #tpu.memory_space<vmem>>, vector<1x128x512xbf16>
    %398 = vector.shape_cast %397 : vector<1x128x512xbf16> to vector<128x512xbf16>
    %399 = arith.truncf %396 : vector<8x128xf32> to vector<8x128xbf16>
    %cst_356 = arith.constant dense<0.000000e+00> : vector<8x512xf32>
    %400 = tpu.matmul %399, %398, %cst_356 {dimension_numbers = #tpu.dot_dimension_numbers<[1], [0], [0], [1], [0, 0, 1, 1], [], []>} : vector<8x128xbf16>, vector<128x512xbf16>, vector<8x512xf32> -> vector<8x512xf32>
    %c2_357 = arith.constant 2 : index
    %c0_358 = arith.constant 0 : index
    %401 = vector.load %arg5[%c2_357, %c0_358] : memref<4x512xf32, #tpu.memory_space<vmem>>, vector<1x512xf32>
    %402 = vector.broadcast %401 : vector<1x512xf32> to vector<8x512xf32>
    %403 = arith.addf %400, %402 : vector<8x512xf32>
    %cst_359 = arith.constant 5.000000e-01 : f32
    %404 = vector.broadcast %cst_359 : f32 to vector<8x512xf32>
    %405 = arith.mulf %404, %403 : vector<8x512xf32>
    %cst_360 = arith.constant 0.707106769 : f32
    %406 = vector.broadcast %cst_360 : f32 to vector<8x512xf32>
    %407 = arith.mulf %403, %406 : vector<8x512xf32>
    %cst_361 = arith.constant 0.000000e+00 : f32
    %408 = vector.broadcast %cst_361 : f32 to vector<8x512xf32>
    %409 = arith.cmpf oge, %407, %408 : vector<8x512xf32>
    %cst_362 = arith.constant 1.000000e+00 : f32
    %cst_363 = arith.constant -1.000000e+00 : f32
    %410 = vector.broadcast %cst_362 : f32 to vector<8x512xf32>
    %411 = vector.broadcast %cst_363 : f32 to vector<8x512xf32>
    %412 = arith.select %409, %410, %411 : vector<8x512xi1>, vector<8x512xf32>
    %413 = math.absf %407 : vector<8x512xf32>
    %cst_364 = arith.constant 0.327591091 : f32
    %414 = vector.broadcast %cst_364 : f32 to vector<8x512xf32>
    %415 = arith.mulf %414, %413 : vector<8x512xf32>
    %cst_365 = arith.constant 1.000000e+00 : f32
    %416 = vector.broadcast %cst_365 : f32 to vector<8x512xf32>
    %417 = arith.addf %416, %415 : vector<8x512xf32>
    %cst_366 = arith.constant 1.000000e+00 : f32
    %418 = vector.broadcast %cst_366 : f32 to vector<8x512xf32>
    %419 = arith.divf %418, %417 : vector<8x512xf32>
    %cst_367 = arith.constant 1.06140542 : f32
    %420 = vector.broadcast %cst_367 : f32 to vector<8x512xf32>
    %421 = arith.mulf %420, %419 : vector<8x512xf32>
    %cst_368 = arith.constant -1.45315206 : f32
    %422 = vector.broadcast %cst_368 : f32 to vector<8x512xf32>
    %423 = arith.addf %421, %422 : vector<8x512xf32>
    %424 = arith.mulf %423, %419 : vector<8x512xf32>
    %cst_369 = arith.constant 1.42141378 : f32
    %425 = vector.broadcast %cst_369 : f32 to vector<8x512xf32>
    %426 = arith.addf %424, %425 : vector<8x512xf32>
    %427 = arith.mulf %426, %419 : vector<8x512xf32>
    %cst_370 = arith.constant -0.284496725 : f32
    %428 = vector.broadcast %cst_370 : f32 to vector<8x512xf32>
    %429 = arith.addf %427, %428 : vector<8x512xf32>
    %430 = arith.mulf %429, %419 : vector<8x512xf32>
    %cst_371 = arith.constant 0.254829586 : f32
    %431 = vector.broadcast %cst_371 : f32 to vector<8x512xf32>
    %432 = arith.addf %430, %431 : vector<8x512xf32>
    %433 = arith.mulf %432, %419 : vector<8x512xf32>
    %cst_372 = arith.constant 0.000000e+00 : f32
    %434 = vector.broadcast %cst_372 : f32 to vector<8x512xf32>
    %435 = arith.subf %434, %413 : vector<8x512xf32>
    %436 = arith.mulf %435, %413 : vector<8x512xf32>
    %437 = math.exp %436 : vector<8x512xf32>
    %438 = arith.mulf %433, %437 : vector<8x512xf32>
    %cst_373 = arith.constant 1.000000e+00 : f32
    %439 = vector.broadcast %cst_373 : f32 to vector<8x512xf32>
    %440 = arith.subf %439, %438 : vector<8x512xf32>
    %441 = arith.mulf %412, %440 : vector<8x512xf32>
    %cst_374 = arith.constant 1.000000e+00 : f32
    %442 = vector.broadcast %cst_374 : f32 to vector<8x512xf32>
    %443 = arith.addf %442, %441 : vector<8x512xf32>
    %444 = arith.mulf %405, %443 : vector<8x512xf32>
    %c2_375 = arith.constant 2 : index
    %c0_376 = arith.constant 0 : index
    %c0_377 = arith.constant 0 : index
    %445 = vector.load %arg8[%c2_375, %c0_376, %c0_377] : memref<4x512x128xbf16, #tpu.memory_space<vmem>>, vector<1x512x128xbf16>
    %446 = vector.shape_cast %445 : vector<1x512x128xbf16> to vector<512x128xbf16>
    %447 = arith.truncf %444 : vector<8x512xf32> to vector<8x512xbf16>
    %cst_378 = arith.constant dense<0.000000e+00> : vector<8x128xf32>
    %448 = tpu.matmul %447, %446, %cst_378 {dimension_numbers = #tpu.dot_dimension_numbers<[1], [0], [0], [1], [0, 0, 1, 1], [], []>} : vector<8x512xbf16>, vector<512x128xbf16>, vector<8x128xf32> -> vector<8x128xf32>
    %c16_379 = arith.constant 16 : index
    %c0_380 = arith.constant 0 : index
    %449 = vector.load %arg4[%c16_379, %c0_380] : memref<32x128xf32, #tpu.memory_space<vmem>>, vector<1x128xf32>
    %450 = vector.broadcast %449 : vector<1x128xf32> to vector<8x128xf32>
    %451 = arith.addf %448, %450 : vector<8x128xf32>
    %c17 = arith.constant 17 : index
    %c0_381 = arith.constant 0 : index
    %452 = vector.load %arg4[%c17, %c0_381] : memref<32x128xf32, #tpu.memory_space<vmem>>, vector<1x128xf32>
    %453 = vector.broadcast %452 : vector<1x128xf32> to vector<8x128xf32>
    %454 = arith.mulf %453, %451 : vector<8x128xf32>
    %455 = arith.addf %334, %454 : vector<8x128xf32>
    %c2_382 = arith.constant 2 : index
    %c0_383 = arith.constant 0 : index
    %c0_384 = arith.constant 0 : index
    %456 = vector.load %arg3[%c2_382, %c0_383, %c0_384] : memref<4x128x128xbf16, #tpu.memory_space<vmem>>, vector<1x128x128xbf16>
    %457 = vector.shape_cast %456 : vector<1x128x128xbf16> to vector<128x128xbf16>
    %c29 = arith.constant 29 : index
    %c0_385 = arith.constant 0 : index
    %458 = vector.load %arg4[%c29, %c0_385] : memref<32x128xf32, #tpu.memory_space<vmem>>, vector<1x128xf32>
    %c30 = arith.constant 30 : index
    %c0_386 = arith.constant 0 : index
    %459 = vector.load %arg4[%c30, %c0_386] : memref<32x128xf32, #tpu.memory_space<vmem>>, vector<1x128xf32>
    %460 = arith.truncf %455 : vector<8x128xf32> to vector<8x128xbf16>
    %cst_387 = arith.constant dense<0.000000e+00> : vector<8x128xf32>
    %461 = tpu.matmul %460, %457, %cst_387 {dimension_numbers = #tpu.dot_dimension_numbers<[1], [0], [0], [1], [0, 0, 1, 1], [], []>} : vector<8x128xbf16>, vector<128x128xbf16>, vector<8x128xf32> -> vector<8x128xf32>
    %462 = arith.subf %455, %461 : vector<8x128xf32>
    %463 = arith.mulf %462, %462 : vector<8x128xf32>
    %464 = arith.truncf %463 : vector<8x128xf32> to vector<8x128xbf16>
    %cst_388 = arith.constant dense<0.000000e+00> : vector<8x128xf32>
    %465 = tpu.matmul %464, %457, %cst_388 {dimension_numbers = #tpu.dot_dimension_numbers<[1], [0], [0], [1], [0, 0, 1, 1], [], []>} : vector<8x128xbf16>, vector<128x128xbf16>, vector<8x128xf32> -> vector<8x128xf32>
    %cst_389 = arith.constant 9.99999997E-7 : f32
    %466 = vector.broadcast %cst_389 : f32 to vector<8x128xf32>
    %467 = arith.addf %465, %466 : vector<8x128xf32>
    %468 = math.rsqrt %467 : vector<8x128xf32>
    %469 = arith.mulf %462, %468 : vector<8x128xf32>
    %470 = vector.broadcast %458 : vector<1x128xf32> to vector<8x128xf32>
    %471 = arith.mulf %469, %470 : vector<8x128xf32>
    %472 = vector.broadcast %459 : vector<1x128xf32> to vector<8x128xf32>
    %473 = arith.addf %471, %472 : vector<8x128xf32>
    %c0_390 = arith.constant 0 : index
    %c0_391 = arith.constant 0 : index
    %474 = vector.load %arg24[%c0_390, %c0_391] : memref<32x128xf32, #tpu.memory_space<vmem>>, vector<8x128xf32>
    tpu.vector_store %arg24[%c0_390, %c0_391], %473 {strides = array<i32>} : memref<32x128xf32, #tpu.memory_space<vmem>>, vector<8x128xf32>,
    %c31 = arith.constant 31 : index
    %c0_392 = arith.constant 0 : index
    %475 = vector.load %arg4[%c31, %c0_392] : memref<32x128xf32, #tpu.memory_space<vmem>>, vector<1x128xf32>
    %c0_393 = arith.constant 0 : index
    %c0_394 = arith.constant 0 : index
    %476 = tpu.strided_load %arg24[%c0_393, %c0_394] {strides = array<i32: 2, 1>} : memref<32x128xf32, #tpu.memory_space<vmem>>, vector<4x128xf32>
    %c2_395 = arith.constant 2 : index
    %c0_396 = arith.constant 0 : index
    %c0_397 = arith.constant 0 : index
    %c0_398 = arith.constant 0 : index
    %477 = vector.load %arg9[%c2_395, %c0_396, %c0_397, %c0_398] : memref<3x2x128x128xbf16, #tpu.memory_space<vmem>>, vector<1x1x128x128xbf16>
    %478 = vector.shape_cast %477 : vector<1x1x128x128xbf16> to vector<128x128xbf16>
    %479 = arith.truncf %476 : vector<4x128xf32> to vector<4x128xbf16>
    %cst_399 = arith.constant dense<0.000000e+00> : vector<4x128xf32>
    %480 = tpu.matmul %479, %478, %cst_399 {dimension_numbers = #tpu.dot_dimension_numbers<[1], [0], [0], [1], [0, 0, 1, 1], [], []>} : vector<4x128xbf16>, vector<128x128xbf16>, vector<4x128xf32> -> vector<4x128xf32>
    %481 = vector.broadcast %475 : vector<1x128xf32> to vector<4x128xf32>
    %482 = arith.addf %481, %480 : vector<4x128xf32>
    %c1_400 = arith.constant 1 : index
    %c0_401 = arith.constant 0 : index
    %483 = tpu.strided_load %arg24[%c1_400, %c0_401] {strides = array<i32: 2, 1>} : memref<32x128xf32, #tpu.memory_space<vmem>>, vector<4x128xf32>
    %c2_402 = arith.constant 2 : index
    %c1_403 = arith.constant 1 : index
    %c0_404 = arith.constant 0 : index
    %c0_405 = arith.constant 0 : index
    %484 = vector.load %arg9[%c2_402, %c1_403, %c0_404, %c0_405] : memref<3x2x128x128xbf16, #tpu.memory_space<vmem>>, vector<1x1x128x128xbf16>
    %485 = vector.shape_cast %484 : vector<1x1x128x128xbf16> to vector<128x128xbf16>
    %486 = arith.truncf %483 : vector<4x128xf32> to vector<4x128xbf16>
    %cst_406 = arith.constant dense<0.000000e+00> : vector<4x128xf32>
    %487 = tpu.matmul %486, %485, %cst_406 {dimension_numbers = #tpu.dot_dimension_numbers<[1], [0], [0], [1], [0, 0, 1, 1], [], []>} : vector<4x128xbf16>, vector<128x128xbf16>, vector<4x128xf32> -> vector<4x128xf32>
    %488 = arith.addf %482, %487 : vector<4x128xf32>
    %c5_407 = arith.constant 5 : index
    %c0_408 = arith.constant 0 : index
    %489 = vector.load %arg23[%c5_407, %c0_408] : memref<64x128xf32, #tpu.memory_space<vmem>>, vector<3x128xf32>
    tpu.vector_store %arg23[%c5_407, %c0_408], %26 {strides = array<i32>} : memref<64x128xf32, #tpu.memory_space<vmem>>, vector<3x128xf32>,
    %c10_409 = arith.constant 10 : index
    %c0_410 = arith.constant 0 : index
    %490 = vector.load %arg23[%c10_409, %c0_410] : memref<64x128xf32, #tpu.memory_space<vmem>>, vector<3x128xf32>
    tpu.vector_store %arg23[%c10_409, %c0_410], %26 {strides = array<i32>} : memref<64x128xf32, #tpu.memory_space<vmem>>, vector<3x128xf32>,
    %491 = vector.extract_strided_slice %488 {offsets = [0, 0], sizes = [2, 128], strides = [1, 1]} : vector<4x128xf32> to vector<2x128xf32>
    %c8_411 = arith.constant 8 : index
    %c0_412 = arith.constant 0 : index
    %492 = vector.load %arg23[%c8_411, %c0_412] : memref<64x128xf32, #tpu.memory_space<vmem>>, vector<2x128xf32>
    tpu.vector_store %arg23[%c8_411, %c0_412], %491 {strides = array<i32>} : memref<64x128xf32, #tpu.memory_space<vmem>>, vector<2x128xf32>,
    %c37_413 = arith.constant 37 : index
    %c0_414 = arith.constant 0 : index
    %493 = vector.load %arg23[%c37_413, %c0_414] : memref<64x128xf32, #tpu.memory_space<vmem>>, vector<3x128xf32>
    tpu.vector_store %arg23[%c37_413, %c0_414], %26 {strides = array<i32>} : memref<64x128xf32, #tpu.memory_space<vmem>>, vector<3x128xf32>,
    %c42_415 = arith.constant 42 : index
    %c0_416 = arith.constant 0 : index
    %494 = vector.load %arg23[%c42_415, %c0_416] : memref<64x128xf32, #tpu.memory_space<vmem>>, vector<3x128xf32>
    tpu.vector_store %arg23[%c42_415, %c0_416], %26 {strides = array<i32>} : memref<64x128xf32, #tpu.memory_space<vmem>>, vector<3x128xf32>,
    %495 = vector.extract_strided_slice %488 {offsets = [2, 0], sizes = [2, 128], strides = [1, 1]} : vector<4x128xf32> to vector<2x128xf32>
    %c40_417 = arith.constant 40 : index
    %c0_418 = arith.constant 0 : index
    %496 = vector.load %arg23[%c40_417, %c0_418] : memref<64x128xf32, #tpu.memory_space<vmem>>, vector<2x128xf32>
    tpu.vector_store %arg23[%c40_417, %c0_418], %495 {strides = array<i32>} : memref<64x128xf32, #tpu.memory_space<vmem>>, vector<2x128xf32>,
    %c5_419 = arith.constant 5 : index
    %c0_420 = arith.constant 0 : index
    %497 = vector.load %arg23[%c5_419, %c0_420] : memref<64x128xf32, #tpu.memory_space<vmem>>, vector<2x128xf32>
    %c0_421 = arith.constant 0 : index
    %c0_422 = arith.constant 0 : index
    %498 = vector.load %arg25[%c0_421, %c0_422] : memref<32x896xf32, #tpu.memory_space<vmem>>, vector<2x128xf32>
    tpu.vector_store %arg25[%c0_421, %c0_422], %497 {strides = array<i32>} : memref<32x896xf32, #tpu.memory_space<vmem>>, vector<2x128xf32>,
    %c37_423 = arith.constant 37 : index
    %c0_424 = arith.constant 0 : index
    %499 = vector.load %arg23[%c37_423, %c0_424] : memref<64x128xf32, #tpu.memory_space<vmem>>, vector<2x128xf32>
    %c2_425 = arith.constant 2 : index
    %c0_426 = arith.constant 0 : index
    %500 = vector.load %arg25[%c2_425, %c0_426] : memref<32x896xf32, #tpu.memory_space<vmem>>, vector<2x128xf32>
    tpu.vector_store %arg25[%c2_425, %c0_426], %499 {strides = array<i32>} : memref<32x896xf32, #tpu.memory_space<vmem>>, vector<2x128xf32>,
    %c6_427 = arith.constant 6 : index
    %c0_428 = arith.constant 0 : index
    %501 = vector.load %arg23[%c6_427, %c0_428] : memref<64x128xf32, #tpu.memory_space<vmem>>, vector<2x128xf32>
    %c0_429 = arith.constant 0 : index
    %c128_430 = arith.constant 128 : index
    %502 = vector.load %arg25[%c0_429, %c128_430] : memref<32x896xf32, #tpu.memory_space<vmem>>, vector<2x128xf32>
    tpu.vector_store %arg25[%c0_429, %c128_430], %501 {strides = array<i32>} : memref<32x896xf32, #tpu.memory_space<vmem>>, vector<2x128xf32>,
    %c38_431 = arith.constant 38 : index
    %c0_432 = arith.constant 0 : index
    %503 = vector.load %arg23[%c38_431, %c0_432] : memref<64x128xf32, #tpu.memory_space<vmem>>, vector<2x128xf32>
    %c2_433 = arith.constant 2 : index
    %c128_434 = arith.constant 128 : index
    %504 = vector.load %arg25[%c2_433, %c128_434] : memref<32x896xf32, #tpu.memory_space<vmem>>, vector<2x128xf32>
    tpu.vector_store %arg25[%c2_433, %c128_434], %503 {strides = array<i32>} : memref<32x896xf32, #tpu.memory_space<vmem>>, vector<2x128xf32>,
    %c7_435 = arith.constant 7 : index
    %c0_436 = arith.constant 0 : index
    %505 = vector.load %arg23[%c7_435, %c0_436] : memref<64x128xf32, #tpu.memory_space<vmem>>, vector<2x128xf32>
    %c0_437 = arith.constant 0 : index
    %c256_438 = arith.constant 256 : index
    %506 = vector.load %arg25[%c0_437, %c256_438] : memref<32x896xf32, #tpu.memory_space<vmem>>, vector<2x128xf32>
    tpu.vector_store %arg25[%c0_437, %c256_438], %505 {strides = array<i32>} : memref<32x896xf32, #tpu.memory_space<vmem>>, vector<2x128xf32>,
    %c39_439 = arith.constant 39 : index
    %c0_440 = arith.constant 0 : index
    %507 = vector.load %arg23[%c39_439, %c0_440] : memref<64x128xf32, #tpu.memory_space<vmem>>, vector<2x128xf32>
    %c2_441 = arith.constant 2 : index
    %c256_442 = arith.constant 256 : index
    %508 = vector.load %arg25[%c2_441, %c256_442] : memref<32x896xf32, #tpu.memory_space<vmem>>, vector<2x128xf32>
    tpu.vector_store %arg25[%c2_441, %c256_442], %507 {strides = array<i32>} : memref<32x896xf32, #tpu.memory_space<vmem>>, vector<2x128xf32>,
    %c8_443 = arith.constant 8 : index
    %c0_444 = arith.constant 0 : index
    %509 = vector.load %arg23[%c8_443, %c0_444] : memref<64x128xf32, #tpu.memory_space<vmem>>, vector<2x128xf32>
    %c0_445 = arith.constant 0 : index
    %c384_446 = arith.constant 384 : index
    %510 = vector.load %arg25[%c0_445, %c384_446] : memref<32x896xf32, #tpu.memory_space<vmem>>, vector<2x128xf32>
    tpu.vector_store %arg25[%c0_445, %c384_446], %509 {strides = array<i32>} : memref<32x896xf32, #tpu.memory_space<vmem>>, vector<2x128xf32>,
    %c40_447 = arith.constant 40 : index
    %c0_448 = arith.constant 0 : index
    %511 = vector.load %arg23[%c40_447, %c0_448] : memref<64x128xf32, #tpu.memory_space<vmem>>, vector<2x128xf32>
    %c2_449 = arith.constant 2 : index
    %c384_450 = arith.constant 384 : index
    %512 = vector.load %arg25[%c2_449, %c384_450] : memref<32x896xf32, #tpu.memory_space<vmem>>, vector<2x128xf32>
    tpu.vector_store %arg25[%c2_449, %c384_450], %511 {strides = array<i32>} : memref<32x896xf32, #tpu.memory_space<vmem>>, vector<2x128xf32>,
    %c9_451 = arith.constant 9 : index
    %c0_452 = arith.constant 0 : index
    %513 = vector.load %arg23[%c9_451, %c0_452] : memref<64x128xf32, #tpu.memory_space<vmem>>, vector<2x128xf32>
    %c0_453 = arith.constant 0 : index
    %c512_454 = arith.constant 512 : index
    %514 = vector.load %arg25[%c0_453, %c512_454] : memref<32x896xf32, #tpu.memory_space<vmem>>, vector<2x128xf32>
    tpu.vector_store %arg25[%c0_453, %c512_454], %513 {strides = array<i32>} : memref<32x896xf32, #tpu.memory_space<vmem>>, vector<2x128xf32>,
    %c41_455 = arith.constant 41 : index
    %c0_456 = arith.constant 0 : index
    %515 = vector.load %arg23[%c41_455, %c0_456] : memref<64x128xf32, #tpu.memory_space<vmem>>, vector<2x128xf32>
    %c2_457 = arith.constant 2 : index
    %c512_458 = arith.constant 512 : index
    %516 = vector.load %arg25[%c2_457, %c512_458] : memref<32x896xf32, #tpu.memory_space<vmem>>, vector<2x128xf32>
    tpu.vector_store %arg25[%c2_457, %c512_458], %515 {strides = array<i32>} : memref<32x896xf32, #tpu.memory_space<vmem>>, vector<2x128xf32>,
    %c10_459 = arith.constant 10 : index
    %c0_460 = arith.constant 0 : index
    %517 = vector.load %arg23[%c10_459, %c0_460] : memref<64x128xf32, #tpu.memory_space<vmem>>, vector<2x128xf32>
    %c0_461 = arith.constant 0 : index
    %c640_462 = arith.constant 640 : index
    %518 = vector.load %arg25[%c0_461, %c640_462] : memref<32x896xf32, #tpu.memory_space<vmem>>, vector<2x128xf32>
    tpu.vector_store %arg25[%c0_461, %c640_462], %517 {strides = array<i32>} : memref<32x896xf32, #tpu.memory_space<vmem>>, vector<2x128xf32>,
    %c42_463 = arith.constant 42 : index
    %c0_464 = arith.constant 0 : index
    %519 = vector.load %arg23[%c42_463, %c0_464] : memref<64x128xf32, #tpu.memory_space<vmem>>, vector<2x128xf32>
    %c2_465 = arith.constant 2 : index
    %c640_466 = arith.constant 640 : index
    %520 = vector.load %arg25[%c2_465, %c640_466] : memref<32x896xf32, #tpu.memory_space<vmem>>, vector<2x128xf32>
    tpu.vector_store %arg25[%c2_465, %c640_466], %519 {strides = array<i32>} : memref<32x896xf32, #tpu.memory_space<vmem>>, vector<2x128xf32>,
    %c11_467 = arith.constant 11 : index
    %c0_468 = arith.constant 0 : index
    %521 = vector.load %arg23[%c11_467, %c0_468] : memref<64x128xf32, #tpu.memory_space<vmem>>, vector<2x128xf32>
    %c0_469 = arith.constant 0 : index
    %c768_470 = arith.constant 768 : index
    %522 = vector.load %arg25[%c0_469, %c768_470] : memref<32x896xf32, #tpu.memory_space<vmem>>, vector<2x128xf32>
    tpu.vector_store %arg25[%c0_469, %c768_470], %521 {strides = array<i32>} : memref<32x896xf32, #tpu.memory_space<vmem>>, vector<2x128xf32>,
    %c43_471 = arith.constant 43 : index
    %c0_472 = arith.constant 0 : index
    %523 = vector.load %arg23[%c43_471, %c0_472] : memref<64x128xf32, #tpu.memory_space<vmem>>, vector<2x128xf32>
    %c2_473 = arith.constant 2 : index
    %c768_474 = arith.constant 768 : index
    %524 = vector.load %arg25[%c2_473, %c768_474] : memref<32x896xf32, #tpu.memory_space<vmem>>, vector<2x128xf32>
    tpu.vector_store %arg25[%c2_473, %c768_474], %523 {strides = array<i32>} : memref<32x896xf32, #tpu.memory_space<vmem>>, vector<2x128xf32>,
    %c0_475 = arith.constant 0 : index
    %c0_476 = arith.constant 0 : index
    %525 = vector.load %arg25[%c0_475, %c0_476] : memref<32x896xf32, #tpu.memory_space<vmem>>, vector<4x896xf32>
    %c3_477 = arith.constant 3 : index
    %c0_478 = arith.constant 0 : index
    %c0_479 = arith.constant 0 : index
    %526 = vector.load %arg6[%c3_477, %c0_478, %c0_479] : memref<4x896x128xbf16, #tpu.memory_space<vmem>>, vector<1x896x128xbf16>
    %527 = vector.shape_cast %526 : vector<1x896x128xbf16> to vector<896x128xbf16>
    %528 = arith.truncf %525 : vector<4x896xf32> to vector<4x896xbf16>
    %cst_480 = arith.constant dense<0.000000e+00> : vector<4x128xf32>
    %529 = tpu.matmul %528, %527, %cst_480 {dimension_numbers = #tpu.dot_dimension_numbers<[1], [0], [0], [1], [0, 0, 1, 1], [], []>} : vector<4x896xbf16>, vector<896x128xbf16>, vector<4x128xf32> -> vector<4x128xf32>
    %c18 = arith.constant 18 : index
    %c0_481 = arith.constant 0 : index
    %530 = vector.load %arg4[%c18, %c0_481] : memref<32x128xf32, #tpu.memory_space<vmem>>, vector<1x128xf32>
    %531 = vector.broadcast %530 : vector<1x128xf32> to vector<4x128xf32>
    %532 = arith.addf %529, %531 : vector<4x128xf32>
    %c3_482 = arith.constant 3 : index
    %c0_483 = arith.constant 0 : index
    %c0_484 = arith.constant 0 : index
    %533 = vector.load %arg3[%c3_482, %c0_483, %c0_484] : memref<4x128x128xbf16, #tpu.memory_space<vmem>>, vector<1x128x128xbf16>
    %534 = vector.shape_cast %533 : vector<1x128x128xbf16> to vector<128x128xbf16>
    %c19 = arith.constant 19 : index
    %c0_485 = arith.constant 0 : index
    %535 = vector.load %arg4[%c19, %c0_485] : memref<32x128xf32, #tpu.memory_space<vmem>>, vector<1x128xf32>
    %c20 = arith.constant 20 : index
    %c0_486 = arith.constant 0 : index
    %536 = vector.load %arg4[%c20, %c0_486] : memref<32x128xf32, #tpu.memory_space<vmem>>, vector<1x128xf32>
    %537 = arith.truncf %532 : vector<4x128xf32> to vector<4x128xbf16>
    %cst_487 = arith.constant dense<0.000000e+00> : vector<4x128xf32>
    %538 = tpu.matmul %537, %534, %cst_487 {dimension_numbers = #tpu.dot_dimension_numbers<[1], [0], [0], [1], [0, 0, 1, 1], [], []>} : vector<4x128xbf16>, vector<128x128xbf16>, vector<4x128xf32> -> vector<4x128xf32>
    %539 = arith.subf %532, %538 : vector<4x128xf32>
    %540 = arith.mulf %539, %539 : vector<4x128xf32>
    %541 = arith.truncf %540 : vector<4x128xf32> to vector<4x128xbf16>
    %cst_488 = arith.constant dense<0.000000e+00> : vector<4x128xf32>
    %542 = tpu.matmul %541, %534, %cst_488 {dimension_numbers = #tpu.dot_dimension_numbers<[1], [0], [0], [1], [0, 0, 1, 1], [], []>} : vector<4x128xbf16>, vector<128x128xbf16>, vector<4x128xf32> -> vector<4x128xf32>
    %cst_489 = arith.constant 9.99999997E-7 : f32
    %543 = vector.broadcast %cst_489 : f32 to vector<4x128xf32>
    %544 = arith.addf %542, %543 : vector<4x128xf32>
    %545 = math.rsqrt %544 : vector<4x128xf32>
    %546 = arith.mulf %539, %545 : vector<4x128xf32>
    %547 = vector.broadcast %535 : vector<1x128xf32> to vector<4x128xf32>
    %548 = arith.mulf %546, %547 : vector<4x128xf32>
    %549 = vector.broadcast %536 : vector<1x128xf32> to vector<4x128xf32>
    %550 = arith.addf %548, %549 : vector<4x128xf32>
    %c3_490 = arith.constant 3 : index
    %c0_491 = arith.constant 0 : index
    %c0_492 = arith.constant 0 : index
    %551 = vector.load %arg7[%c3_490, %c0_491, %c0_492] : memref<4x128x512xbf16, #tpu.memory_space<vmem>>, vector<1x128x512xbf16>
    %552 = vector.shape_cast %551 : vector<1x128x512xbf16> to vector<128x512xbf16>
    %553 = arith.truncf %550 : vector<4x128xf32> to vector<4x128xbf16>
    %cst_493 = arith.constant dense<0.000000e+00> : vector<4x512xf32>
    %554 = tpu.matmul %553, %552, %cst_493 {dimension_numbers = #tpu.dot_dimension_numbers<[1], [0], [0], [1], [0, 0, 1, 1], [], []>} : vector<4x128xbf16>, vector<128x512xbf16>, vector<4x512xf32> -> vector<4x512xf32>
    %c3_494 = arith.constant 3 : index
    %c0_495 = arith.constant 0 : index
    %555 = vector.load %arg5[%c3_494, %c0_495] : memref<4x512xf32, #tpu.memory_space<vmem>>, vector<1x512xf32>
    %556 = vector.broadcast %555 : vector<1x512xf32> to vector<4x512xf32>
    %557 = arith.addf %554, %556 : vector<4x512xf32>
    %cst_496 = arith.constant 5.000000e-01 : f32
    %558 = vector.broadcast %cst_496 : f32 to vector<4x512xf32>
    %559 = arith.mulf %558, %557 : vector<4x512xf32>
    %cst_497 = arith.constant 0.707106769 : f32
    %560 = vector.broadcast %cst_497 : f32 to vector<4x512xf32>
    %561 = arith.mulf %557, %560 : vector<4x512xf32>
    %cst_498 = arith.constant 0.000000e+00 : f32
    %562 = vector.broadcast %cst_498 : f32 to vector<4x512xf32>
    %563 = arith.cmpf oge, %561, %562 : vector<4x512xf32>
    %cst_499 = arith.constant 1.000000e+00 : f32
    %cst_500 = arith.constant -1.000000e+00 : f32
    %564 = vector.broadcast %cst_499 : f32 to vector<4x512xf32>
    %565 = vector.broadcast %cst_500 : f32 to vector<4x512xf32>
    %566 = arith.select %563, %564, %565 : vector<4x512xi1>, vector<4x512xf32>
    %567 = math.absf %561 : vector<4x512xf32>
    %cst_501 = arith.constant 0.327591091 : f32
    %568 = vector.broadcast %cst_501 : f32 to vector<4x512xf32>
    %569 = arith.mulf %568, %567 : vector<4x512xf32>
    %cst_502 = arith.constant 1.000000e+00 : f32
    %570 = vector.broadcast %cst_502 : f32 to vector<4x512xf32>
    %571 = arith.addf %570, %569 : vector<4x512xf32>
    %cst_503 = arith.constant 1.000000e+00 : f32
    %572 = vector.broadcast %cst_503 : f32 to vector<4x512xf32>
    %573 = arith.divf %572, %571 : vector<4x512xf32>
    %cst_504 = arith.constant 1.06140542 : f32
    %574 = vector.broadcast %cst_504 : f32 to vector<4x512xf32>
    %575 = arith.mulf %574, %573 : vector<4x512xf32>
    %cst_505 = arith.constant -1.45315206 : f32
    %576 = vector.broadcast %cst_505 : f32 to vector<4x512xf32>
    %577 = arith.addf %575, %576 : vector<4x512xf32>
    %578 = arith.mulf %577, %573 : vector<4x512xf32>
    %cst_506 = arith.constant 1.42141378 : f32
    %579 = vector.broadcast %cst_506 : f32 to vector<4x512xf32>
    %580 = arith.addf %578, %579 : vector<4x512xf32>
    %581 = arith.mulf %580, %573 : vector<4x512xf32>
    %cst_507 = arith.constant -0.284496725 : f32
    %582 = vector.broadcast %cst_507 : f32 to vector<4x512xf32>
    %583 = arith.addf %581, %582 : vector<4x512xf32>
    %584 = arith.mulf %583, %573 : vector<4x512xf32>
    %cst_508 = arith.constant 0.254829586 : f32
    %585 = vector.broadcast %cst_508 : f32 to vector<4x512xf32>
    %586 = arith.addf %584, %585 : vector<4x512xf32>
    %587 = arith.mulf %586, %573 : vector<4x512xf32>
    %cst_509 = arith.constant 0.000000e+00 : f32
    %588 = vector.broadcast %cst_509 : f32 to vector<4x512xf32>
    %589 = arith.subf %588, %567 : vector<4x512xf32>
    %590 = arith.mulf %589, %567 : vector<4x512xf32>
    %591 = math.exp %590 : vector<4x512xf32>
    %592 = arith.mulf %587, %591 : vector<4x512xf32>
    %cst_510 = arith.constant 1.000000e+00 : f32
    %593 = vector.broadcast %cst_510 : f32 to vector<4x512xf32>
    %594 = arith.subf %593, %592 : vector<4x512xf32>
    %595 = arith.mulf %566, %594 : vector<4x512xf32>
    %cst_511 = arith.constant 1.000000e+00 : f32
    %596 = vector.broadcast %cst_511 : f32 to vector<4x512xf32>
    %597 = arith.addf %596, %595 : vector<4x512xf32>
    %598 = arith.mulf %559, %597 : vector<4x512xf32>
    %c3_512 = arith.constant 3 : index
    %c0_513 = arith.constant 0 : index
    %c0_514 = arith.constant 0 : index
    %599 = vector.load %arg8[%c3_512, %c0_513, %c0_514] : memref<4x512x128xbf16, #tpu.memory_space<vmem>>, vector<1x512x128xbf16>
    %600 = vector.shape_cast %599 : vector<1x512x128xbf16> to vector<512x128xbf16>
    %601 = arith.truncf %598 : vector<4x512xf32> to vector<4x512xbf16>
    %cst_515 = arith.constant dense<0.000000e+00> : vector<4x128xf32>
    %602 = tpu.matmul %601, %600, %cst_515 {dimension_numbers = #tpu.dot_dimension_numbers<[1], [0], [0], [1], [0, 0, 1, 1], [], []>} : vector<4x512xbf16>, vector<512x128xbf16>, vector<4x128xf32> -> vector<4x128xf32>
    %c21 = arith.constant 21 : index
    %c0_516 = arith.constant 0 : index
    %603 = vector.load %arg4[%c21, %c0_516] : memref<32x128xf32, #tpu.memory_space<vmem>>, vector<1x128xf32>
    %604 = vector.broadcast %603 : vector<1x128xf32> to vector<4x128xf32>
    %605 = arith.addf %602, %604 : vector<4x128xf32>
    %c22 = arith.constant 22 : index
    %c0_517 = arith.constant 0 : index
    %606 = vector.load %arg4[%c22, %c0_517] : memref<32x128xf32, #tpu.memory_space<vmem>>, vector<1x128xf32>
    %607 = vector.broadcast %606 : vector<1x128xf32> to vector<4x128xf32>
    %608 = arith.mulf %607, %605 : vector<4x128xf32>
    %609 = arith.addf %488, %608 : vector<4x128xf32>
    %610 = vector.extract_strided_slice %609 {offsets = [0, 0], sizes = [1, 128], strides = [1, 1]} : vector<4x128xf32> to vector<1x128xf32>
    %611 = vector.extract_strided_slice %609 {offsets = [1, 0], sizes = [1, 128], strides = [1, 1]} : vector<4x128xf32> to vector<1x128xf32>
    %612 = arith.addf %610, %611 : vector<1x128xf32>
    %613 = vector.extract_strided_slice %609 {offsets = [2, 0], sizes = [1, 128], strides = [1, 1]} : vector<4x128xf32> to vector<1x128xf32>
    %614 = vector.extract_strided_slice %609 {offsets = [3, 0], sizes = [1, 128], strides = [1, 1]} : vector<4x128xf32> to vector<1x128xf32>
    %615 = arith.addf %613, %614 : vector<1x128xf32>
    %c0_518 = arith.constant 0 : index
    %c0_519 = arith.constant 0 : index
    %616 = vector.load %arg10[%c0_518, %c0_519] : memref<128x64xf32, #tpu.memory_space<vmem>>, vector<128x64xf32>
    %cst_520 = arith.constant dense<0.000000e+00> : vector<1x64xf32>
    %617 = tpu.matmul %612, %616, %cst_520 {dimension_numbers = #tpu.dot_dimension_numbers<[1], [0], [0], [1], [0, 0, 1, 1], [], []>} : vector<1x128xf32>, vector<128x64xf32>, vector<1x64xf32> -> vector<1x64xf32>
    %c0_521 = arith.constant 0 : index
    %c0_522 = arith.constant 0 : index
    %618 = vector.load %arg10[%c0_521, %c0_522] : memref<128x64xf32, #tpu.memory_space<vmem>>, vector<128x64xf32>
    %cst_523 = arith.constant dense<0.000000e+00> : vector<1x64xf32>
    %619 = tpu.matmul %615, %618, %cst_523 {dimension_numbers = #tpu.dot_dimension_numbers<[1], [0], [0], [1], [0, 0, 1, 1], [], []>} : vector<1x128xf32>, vector<128x64xf32>, vector<1x64xf32> -> vector<1x64xf32>
    %c0_524 = arith.constant 0 : index
    %c0_525 = arith.constant 0 : index
    %620 = vector.load %arg11[%c0_524, %c0_525] : memref<64x64xf32, #tpu.memory_space<vmem>>, vector<64x64xf32>
    %cst_526 = arith.constant dense<0.000000e+00> : vector<1x64xf32>
    %621 = tpu.matmul %617, %620, %cst_526 {dimension_numbers = #tpu.dot_dimension_numbers<[1], [0], [0], [1], [0, 0, 1, 1], [], []>} : vector<1x64xf32>, vector<64x64xf32>, vector<1x64xf32> -> vector<1x64xf32>
    %c0_527 = arith.constant 0 : index
    %c0_528 = arith.constant 0 : index
    %622 = vector.load %arg12[%c0_527, %c0_528] : memref<64x64xf32, #tpu.memory_space<vmem>>, vector<64x64xf32>
    %cst_529 = arith.constant dense<0.000000e+00> : vector<1x64xf32>
    %623 = tpu.matmul %619, %622, %cst_529 {dimension_numbers = #tpu.dot_dimension_numbers<[1], [0], [0], [1], [0, 0, 1, 1], [], []>} : vector<1x64xf32>, vector<64x64xf32>, vector<1x64xf32> -> vector<1x64xf32>
    %624 = arith.addf %621, %623 : vector<1x64xf32>
    %c0_530 = arith.constant 0 : index
    %c0_531 = arith.constant 0 : index
    %625 = vector.load %arg13[%c0_530, %c0_531] : memref<1x64xf32, #tpu.memory_space<vmem>>, vector<1x64xf32>
    %626 = arith.addf %624, %625 : vector<1x64xf32>
    %cst_532 = arith.constant 5.000000e-01 : f32
    %627 = vector.broadcast %cst_532 : f32 to vector<1x64xf32>
    %628 = arith.mulf %627, %626 : vector<1x64xf32>
    %cst_533 = arith.constant 0.707106769 : f32
    %629 = vector.broadcast %cst_533 : f32 to vector<1x64xf32>
    %630 = arith.mulf %626, %629 : vector<1x64xf32>
    %cst_534 = arith.constant 0.000000e+00 : f32
    %631 = vector.broadcast %cst_534 : f32 to vector<1x64xf32>
    %632 = arith.cmpf oge, %630, %631 : vector<1x64xf32>
    %cst_535 = arith.constant 1.000000e+00 : f32
    %cst_536 = arith.constant -1.000000e+00 : f32
    %633 = vector.broadcast %cst_535 : f32 to vector<1x64xf32>
    %634 = vector.broadcast %cst_536 : f32 to vector<1x64xf32>
    %635 = arith.select %632, %633, %634 : vector<1x64xi1>, vector<1x64xf32>
    %636 = math.absf %630 : vector<1x64xf32>
    %cst_537 = arith.constant 0.327591091 : f32
    %637 = vector.broadcast %cst_537 : f32 to vector<1x64xf32>
    %638 = arith.mulf %637, %636 : vector<1x64xf32>
    %cst_538 = arith.constant 1.000000e+00 : f32
    %639 = vector.broadcast %cst_538 : f32 to vector<1x64xf32>
    %640 = arith.addf %639, %638 : vector<1x64xf32>
    %cst_539 = arith.constant 1.000000e+00 : f32
    %641 = vector.broadcast %cst_539 : f32 to vector<1x64xf32>
    %642 = arith.divf %641, %640 : vector<1x64xf32>
    %cst_540 = arith.constant 1.06140542 : f32
    %643 = vector.broadcast %cst_540 : f32 to vector<1x64xf32>
    %644 = arith.mulf %643, %642 : vector<1x64xf32>
    %cst_541 = arith.constant -1.45315206 : f32
    %645 = vector.broadcast %cst_541 : f32 to vector<1x64xf32>
    %646 = arith.addf %644, %645 : vector<1x64xf32>
    %647 = arith.mulf %646, %642 : vector<1x64xf32>
    %cst_542 = arith.constant 1.42141378 : f32
    %648 = vector.broadcast %cst_542 : f32 to vector<1x64xf32>
    %649 = arith.addf %647, %648 : vector<1x64xf32>
    %650 = arith.mulf %649, %642 : vector<1x64xf32>
    %cst_543 = arith.constant -0.284496725 : f32
    %651 = vector.broadcast %cst_543 : f32 to vector<1x64xf32>
    %652 = arith.addf %650, %651 : vector<1x64xf32>
    %653 = arith.mulf %652, %642 : vector<1x64xf32>
    %cst_544 = arith.constant 0.254829586 : f32
    %654 = vector.broadcast %cst_544 : f32 to vector<1x64xf32>
    %655 = arith.addf %653, %654 : vector<1x64xf32>
    %656 = arith.mulf %655, %642 : vector<1x64xf32>
    %cst_545 = arith.constant 0.000000e+00 : f32
    %657 = vector.broadcast %cst_545 : f32 to vector<1x64xf32>
    %658 = arith.subf %657, %636 : vector<1x64xf32>
    %659 = arith.mulf %658, %636 : vector<1x64xf32>
    %660 = math.exp %659 : vector<1x64xf32>
    %661 = arith.mulf %656, %660 : vector<1x64xf32>
    %cst_546 = arith.constant 1.000000e+00 : f32
    %662 = vector.broadcast %cst_546 : f32 to vector<1x64xf32>
    %663 = arith.subf %662, %661 : vector<1x64xf32>
    %664 = arith.mulf %635, %663 : vector<1x64xf32>
    %cst_547 = arith.constant 1.000000e+00 : f32
    %665 = vector.broadcast %cst_547 : f32 to vector<1x64xf32>
    %666 = arith.addf %665, %664 : vector<1x64xf32>
    %667 = arith.mulf %628, %666 : vector<1x64xf32>
    %c0_548 = arith.constant 0 : index
    %c0_549 = arith.constant 0 : index
    %668 = vector.load %arg16[%c0_548, %c0_549] : memref<1x64xf32, #tpu.memory_space<vmem>>, vector<1x64xf32>
    %669 = arith.subf %667, %668 : vector<1x64xf32>
    %c0_550 = arith.constant 0 : index
    %c0_551 = arith.constant 0 : index
    %670 = vector.load %arg17[%c0_550, %c0_551] : memref<1x64xf32, #tpu.memory_space<vmem>>, vector<1x64xf32>
    %cst_552 = arith.constant 9.99999974E-6 : f32
    %671 = vector.broadcast %cst_552 : f32 to vector<1x64xf32>
    %672 = arith.addf %670, %671 : vector<1x64xf32>
    %673 = math.rsqrt %672 : vector<1x64xf32>
    %674 = arith.mulf %669, %673 : vector<1x64xf32>
    %c0_553 = arith.constant 0 : index
    %c0_554 = arith.constant 0 : index
    %675 = vector.load %arg14[%c0_553, %c0_554] : memref<1x64xf32, #tpu.memory_space<vmem>>, vector<1x64xf32>
    %676 = arith.mulf %674, %675 : vector<1x64xf32>
    %c0_555 = arith.constant 0 : index
    %c0_556 = arith.constant 0 : index
    %677 = vector.load %arg15[%c0_555, %c0_556] : memref<1x64xf32, #tpu.memory_space<vmem>>, vector<1x64xf32>
    %678 = arith.addf %676, %677 : vector<1x64xf32>
    %c0_557 = arith.constant 0 : index
    %c0_558 = arith.constant 0 : index
    %679 = vector.load %arg18[%c0_557, %c0_558] : memref<64x32xf32, #tpu.memory_space<vmem>>, vector<64x32xf32>
    %cst_559 = arith.constant dense<0.000000e+00> : vector<1x32xf32>
    %680 = tpu.matmul %678, %679, %cst_559 {dimension_numbers = #tpu.dot_dimension_numbers<[1], [0], [0], [1], [0, 0, 1, 1], [], []>} : vector<1x64xf32>, vector<64x32xf32>, vector<1x32xf32> -> vector<1x32xf32>
    %c0_560 = arith.constant 0 : index
    %c0_561 = arith.constant 0 : index
    %681 = vector.load %arg19[%c0_560, %c0_561] : memref<1x32xf32, #tpu.memory_space<vmem>>, vector<1x32xf32>
    %682 = arith.addf %680, %681 : vector<1x32xf32>
    %cst_562 = arith.constant 5.000000e-01 : f32
    %683 = vector.broadcast %cst_562 : f32 to vector<1x32xf32>
    %684 = arith.mulf %683, %682 : vector<1x32xf32>
    %cst_563 = arith.constant 0.707106769 : f32
    %685 = vector.broadcast %cst_563 : f32 to vector<1x32xf32>
    %686 = arith.mulf %682, %685 : vector<1x32xf32>
    %cst_564 = arith.constant 0.000000e+00 : f32
    %687 = vector.broadcast %cst_564 : f32 to vector<1x32xf32>
    %688 = arith.cmpf oge, %686, %687 : vector<1x32xf32>
    %cst_565 = arith.constant 1.000000e+00 : f32
    %cst_566 = arith.constant -1.000000e+00 : f32
    %689 = vector.broadcast %cst_565 : f32 to vector<1x32xf32>
    %690 = vector.broadcast %cst_566 : f32 to vector<1x32xf32>
    %691 = arith.select %688, %689, %690 : vector<1x32xi1>, vector<1x32xf32>
    %692 = math.absf %686 : vector<1x32xf32>
    %cst_567 = arith.constant 0.327591091 : f32
    %693 = vector.broadcast %cst_567 : f32 to vector<1x32xf32>
    %694 = arith.mulf %693, %692 : vector<1x32xf32>
    %cst_568 = arith.constant 1.000000e+00 : f32
    %695 = vector.broadcast %cst_568 : f32 to vector<1x32xf32>
    %696 = arith.addf %695, %694 : vector<1x32xf32>
    %cst_569 = arith.constant 1.000000e+00 : f32
    %697 = vector.broadcast %cst_569 : f32 to vector<1x32xf32>
    %698 = arith.divf %697, %696 : vector<1x32xf32>
    %cst_570 = arith.constant 1.06140542 : f32
    %699 = vector.broadcast %cst_570 : f32 to vector<1x32xf32>
    %700 = arith.mulf %699, %698 : vector<1x32xf32>
    %cst_571 = arith.constant -1.45315206 : f32
    %701 = vector.broadcast %cst_571 : f32 to vector<1x32xf32>
    %702 = arith.addf %700, %701 : vector<1x32xf32>
    %703 = arith.mulf %702, %698 : vector<1x32xf32>
    %cst_572 = arith.constant 1.42141378 : f32
    %704 = vector.broadcast %cst_572 : f32 to vector<1x32xf32>
    %705 = arith.addf %703, %704 : vector<1x32xf32>
    %706 = arith.mulf %705, %698 : vector<1x32xf32>
    %cst_573 = arith.constant -0.284496725 : f32
    %707 = vector.broadcast %cst_573 : f32 to vector<1x32xf32>
    %708 = arith.addf %706, %707 : vector<1x32xf32>
    %709 = arith.mulf %708, %698 : vector<1x32xf32>
    %cst_574 = arith.constant 0.254829586 : f32
    %710 = vector.broadcast %cst_574 : f32 to vector<1x32xf32>
    %711 = arith.addf %709, %710 : vector<1x32xf32>
    %712 = arith.mulf %711, %698 : vector<1x32xf32>
    %cst_575 = arith.constant 0.000000e+00 : f32
    %713 = vector.broadcast %cst_575 : f32 to vector<1x32xf32>
    %714 = arith.subf %713, %692 : vector<1x32xf32>
    %715 = arith.mulf %714, %692 : vector<1x32xf32>
    %716 = math.exp %715 : vector<1x32xf32>
    %717 = arith.mulf %712, %716 : vector<1x32xf32>
    %cst_576 = arith.constant 1.000000e+00 : f32
    %718 = vector.broadcast %cst_576 : f32 to vector<1x32xf32>
    %719 = arith.subf %718, %717 : vector<1x32xf32>
    %720 = arith.mulf %691, %719 : vector<1x32xf32>
    %cst_577 = arith.constant 1.000000e+00 : f32
    %721 = vector.broadcast %cst_577 : f32 to vector<1x32xf32>
    %722 = arith.addf %721, %720 : vector<1x32xf32>
    %723 = arith.mulf %684, %722 : vector<1x32xf32>
    %c0_578 = arith.constant 0 : index
    %c0_579 = arith.constant 0 : index
    %724 = vector.load %arg20[%c0_578, %c0_579] : memref<32x6xf32, #tpu.memory_space<vmem>>, vector<32x6xf32>
    %cst_580 = arith.constant dense<0.000000e+00> : vector<1x6xf32>
    %725 = tpu.matmul %723, %724, %cst_580 {dimension_numbers = #tpu.dot_dimension_numbers<[1], [0], [0], [1], [0, 0, 1, 1], [], []>} : vector<1x32xf32>, vector<32x6xf32>, vector<1x6xf32> -> vector<1x6xf32>
    %c0_581 = arith.constant 0 : index
    %c0_582 = arith.constant 0 : index
    %726 = vector.load %arg21[%c0_581, %c0_582] : memref<1x6xf32, #tpu.memory_space<vmem>>, vector<1x6xf32>
    %727 = arith.addf %725, %726 : vector<1x6xf32>
    %c0_583 = arith.constant 0 : index
    %c0_584 = arith.constant 0 : index
    %c0_585 = arith.constant 0 : index
    %728 = vector.load %arg22[%c0_583, %c0_584, %c0_585] : memref<1x1x6xf32, #tpu.memory_space<vmem>>, vector<1x1x6xf32>
    %729 = vector.shape_cast %728 : vector<1x1x6xf32> to vector<1x6xf32>
    %730 = vector.shape_cast %727 : vector<1x6xf32> to vector<1x1x6xf32>
    tpu.vector_store %arg22[%c0_583, %c0_584, %c0_585], %730 {strides = array<i32>} : memref<1x1x6xf32, #tpu.memory_space<vmem>>, vector<1x1x6xf32>,
    return
  }
  func.func @transform_0(%arg0: i32) -> (i32, i32, i32) {
    %c0_i32 = arith.constant 0 : i32
    %c0_i32_0 = arith.constant 0 : i32
    %c0_i32_1 = arith.constant 0 : i32
    return %arg0, %c0_i32, %c0_i32_0 : i32, i32, i32
  }
  func.func @transform_1(%arg0: i32) -> (i32, i32) {
    %c0_i32 = arith.constant 0 : i32
    %c0_i32_0 = arith.constant 0 : i32
    %c0_i32_1 = arith.constant 0 : i32
    return %c0_i32, %c0_i32_0 : i32, i32
  }
  func.func @transform_2(%arg0: i32) -> (i32, i32, i32) {
    %c0_i32 = arith.constant 0 : i32
    %c0_i32_0 = arith.constant 0 : i32
    %c0_i32_1 = arith.constant 0 : i32
    %c0_i32_2 = arith.constant 0 : i32
    return %c0_i32, %c0_i32_0, %c0_i32_1 : i32, i32, i32
  }
  func.func @transform_3(%arg0: i32) -> (i32, i32) {
    %c0_i32 = arith.constant 0 : i32
    %c0_i32_0 = arith.constant 0 : i32
    %c0_i32_1 = arith.constant 0 : i32
    return %c0_i32, %c0_i32_0 : i32, i32
  }
  func.func @transform_4(%arg0: i32) -> (i32, i32) {
    %c0_i32 = arith.constant 0 : i32
    %c0_i32_0 = arith.constant 0 : i32
    %c0_i32_1 = arith.constant 0 : i32
    return %c0_i32, %c0_i32_0 : i32, i32
  }
  func.func @transform_5(%arg0: i32) -> (i32, i32, i32) {
    %c0_i32 = arith.constant 0 : i32
    %c0_i32_0 = arith.constant 0 : i32
    %c0_i32_1 = arith.constant 0 : i32
    %c0_i32_2 = arith.constant 0 : i32
    return %c0_i32, %c0_i32_0, %c0_i32_1 : i32, i32, i32
  }
  func.func @transform_6(%arg0: i32) -> (i32, i32, i32) {
    %c0_i32 = arith.constant 0 : i32
    %c0_i32_0 = arith.constant 0 : i32
    %c0_i32_1 = arith.constant 0 : i32
    %c0_i32_2 = arith.constant 0 : i32
    return %c0_i32, %c0_i32_0, %c0_i32_1 : i32, i32, i32
  }
  func.func @transform_7(%arg0: i32) -> (i32, i32, i32) {
    %c0_i32 = arith.constant 0 : i32
    %c0_i32_0 = arith.constant 0 : i32
    %c0_i32_1 = arith.constant 0 : i32
    %c0_i32_2 = arith.constant 0 : i32
    return %c0_i32, %c0_i32_0, %c0_i32_1 : i32, i32, i32
  }
  func.func @transform_8(%arg0: i32) -> (i32, i32, i32, i32) {
    %c0_i32 = arith.constant 0 : i32
    %c0_i32_0 = arith.constant 0 : i32
    %c0_i32_1 = arith.constant 0 : i32
    %c0_i32_2 = arith.constant 0 : i32
    %c0_i32_3 = arith.constant 0 : i32
    return %c0_i32, %c0_i32_0, %c0_i32_1, %c0_i32_2 : i32, i32, i32, i32
  }
  func.func @transform_9(%arg0: i32) -> (i32, i32) {
    %c0_i32 = arith.constant 0 : i32
    %c0_i32_0 = arith.constant 0 : i32
    %c0_i32_1 = arith.constant 0 : i32
    return %c0_i32, %c0_i32_0 : i32, i32
  }
  func.func @transform_10(%arg0: i32) -> (i32, i32) {
    %c0_i32 = arith.constant 0 : i32
    %c0_i32_0 = arith.constant 0 : i32
    %c0_i32_1 = arith.constant 0 : i32
    return %c0_i32, %c0_i32_0 : i32, i32
  }
  func.func @transform_11(%arg0: i32) -> (i32, i32) {
    %c0_i32 = arith.constant 0 : i32
    %c0_i32_0 = arith.constant 0 : i32
    %c0_i32_1 = arith.constant 0 : i32
    return %c0_i32, %c0_i32_0 : i32, i32
  }
  func.func @transform_12(%arg0: i32) -> (i32, i32) {
    %c0_i32 = arith.constant 0 : i32
    %c0_i32_0 = arith.constant 0 : i32
    %c0_i32_1 = arith.constant 0 : i32
    return %c0_i32, %c0_i32_0 : i32, i32
  }
  func.func @transform_13(%arg0: i32) -> (i32, i32) {
    %c0_i32 = arith.constant 0 : i32
    %c0_i32_0 = arith.constant 0 : i32
    %c0_i32_1 = arith.constant 0 : i32
    return %c0_i32, %c0_i32_0 : i32, i32
  }
  func.func @transform_14(%arg0: i32) -> (i32, i32) {
    %c0_i32 = arith.constant 0 : i32
    %c0_i32_0 = arith.constant 0 : i32
    %c0_i32_1 = arith.constant 0 : i32
    return %c0_i32, %c0_i32_0 : i32, i32
  }
  func.func @transform_15(%arg0: i32) -> (i32, i32) {
    %c0_i32 = arith.constant 0 : i32
    %c0_i32_0 = arith.constant 0 : i32
    %c0_i32_1 = arith.constant 0 : i32
    return %c0_i32, %c0_i32_0 : i32, i32
  }
  func.func @transform_16(%arg0: i32) -> (i32, i32) {
    %c0_i32 = arith.constant 0 : i32
    %c0_i32_0 = arith.constant 0 : i32
    %c0_i32_1 = arith.constant 0 : i32
    return %c0_i32, %c0_i32_0 : i32, i32
  }
  func.func @transform_17(%arg0: i32) -> (i32, i32) {
    %c0_i32 = arith.constant 0 : i32
    %c0_i32_0 = arith.constant 0 : i32
    %c0_i32_1 = arith.constant 0 : i32
    return %c0_i32, %c0_i32_0 : i32, i32
  }
  func.func @transform_18(%arg0: i32) -> (i32, i32) {
    %c0_i32 = arith.constant 0 : i32
    %c0_i32_0 = arith.constant 0 : i32
    %c0_i32_1 = arith.constant 0 : i32
    return %c0_i32, %c0_i32_0 : i32, i32
  }
  func.func @transform_19(%arg0: i32) -> (i32, i32) {
    %c0_i32 = arith.constant 0 : i32
    %c0_i32_0 = arith.constant 0 : i32
    %c0_i32_1 = arith.constant 0 : i32
    return %c0_i32, %c0_i32_0 : i32, i32
  }
  func.func @transform_20(%arg0: i32) -> (i32, i32) {
    %c0_i32 = arith.constant 0 : i32
    %c0_i32_0 = arith.constant 0 : i32
    %c0_i32_1 = arith.constant 0 : i32
    return %c0_i32, %c0_i32_0 : i32, i32
  }
  func.func @transform_21(%arg0: i32) -> (i32, i32, i32) {
    %c0_i32 = arith.constant 0 : i32
    %c0_i32_0 = arith.constant 0 : i32
    %c0_i32_1 = arith.constant 0 : i32
    return %arg0, %c0_i32, %c0_i32_0 : i32, i32, i32
  }
}

</mosaic_0001>

<bundles_post_ra>
// kernel: forward.1
= control target key start
LH: loop header
LB: loop body
LE: loop exit
PB: predicated region body
PF: predicated region fallthrough
CT: control target
= control target key end

     0   :  { %s17647_s0 = inlined_call_operand.vmem [shape: f32[2,32,768], index: 0, kind: input, shape index: {}]   ;;  %s17648_s1 = inlined_call_operand.vmem [shape: bf16[768,128], index: 1, kind: input, shape index: {}]   ;;  %s17649_s2 = inlined_call_operand.vmem [shape: bf16[4,128,128], index: 2, kind: input, shape index: {}]   ;;  %s17650_s3 = inlined_call_operand.vmem [shape: f32[32,128], index: 3, kind: input, shape index: {}]   ;;  %s17651_s4 = inlined_call_operand.vmem [shape: f32[4,512], index: 4, kind: input, shape index: {}]   ;;  %s17652_s5 = inlined_call_operand.vmem [shape: bf16[4,896,128], index: 5, kind: input, shape index: {}]   ;;  %s17653_s6 = inlined_call_operand.vmem [shape: bf16[4,128,512], index: 6, kind: input, shape index: {}]   ;;  %s17654_s7 = inlined_call_operand.vmem [shape: bf16[4,512,128], index: 7, kind: input, shape index: {}]   ;;  %s17655_s8 = inlined_call_operand.vmem [shape: bf16[3,2,128,128], index: 8, kind: input, shape index: {}]   ;;  %s17656_s9 = inlined_call_operand.vmem [shape: f32[128,64], index: 9, kind: input, shape index: {}]   ;;  %s17657_s10 = inlined_call_operand.vmem [shape: f32[64,64], index: 10, kind: input, shape index: {}]   ;;  %s17658_s11 = inlined_call_operand.vmem [shape: f32[64,64], index: 11, kind: input, shape index: {}]   ;;  %s17659_s12 = inlined_call_operand.vmem [shape: f32[1,64], index: 12, kind: input, shape index: {}]   ;;  %s17660_s13 = inlined_call_operand.vmem [shape: f32[1,64], index: 13, kind: input, shape index: {}]   ;;  %s17661_s14 = inlined_call_operand.vmem [shape: f32[1,64], index: 14, kind: input, shape index: {}]   ;;  %s17662_s15 = inlined_call_operand.vmem [shape: f32[1,64], index: 15, kind: input, shape index: {}]   ;;  %s17663_s16 = inlined_call_operand.vmem [shape: f32[1,64], index: 16, kind: input, shape index: {}]   ;;  %s17664_s17 = inlined_call_operand.vmem [shape: f32[64,32], index: 17, kind: input, shape index: {}]   ;;  %s17665_s18 = inlined_call_operand.vmem [shape: f32[1,32], index: 18, kind: input, shape index: {}]   ;;  %s17666_s19 = inlined_call_operand.vmem [shape: f32[32,6], index: 19, kind: input, shape index: {}]   ;;  %s17667_s20 = inlined_call_operand.vmem [shape: f32[1,6], index: 20, kind: input, shape index: {}]   ;;  %s17668_s21 = inlined_call_operand.hbm [shape: f32[2,1,6], index: 21, kind: output, shape index: {}]  }
   0x1   :  { %17704 = sst [smem:[#allocation22_spill]] %s17647_s0 }
   0x2   :  { %17705 = sst [smem:[#allocation23_spill]] %s17648_s1 }
   0x3   :  { %17706 = sst [smem:[#allocation24_spill]] %s17649_s2 }
   0x4   :  { %17707 = sst [smem:[#allocation25_spill]] %s17650_s3 }
   0x5   :  { %17708 = sst [smem:[#allocation26_spill]] %s17651_s4 }
   0x6   :  { %17709 = sst [smem:[#allocation27_spill]] %s17652_s5 }
   0x7   :  { %17710 = sst [smem:[#allocation28_spill]] %s17667_s20 }
   0x8   :  { %17711 = sst [smem:[#allocation29_spill]] %s17668_s21 }
   0x9   :  { %26 = vsyncpa [#allocation6], 0 }
   0xa   :  { %28 = vsyncpa [#allocation6 + $0x1], 0  ;;  %s14223_s2 = smov 0   ;;  %s14225_s25 = smov 0  }
   0xb   :  { %s14227_s26 = smov 0   ;;  %s14229_s27 = smov 0  }
   0xc LB: > { %17712 = sst [smem:[#allocation8_spill]] %s14093_s2  ;;  %s14244_s3 = sadd.s32 4294967295, %s14105_s27   ;;  %s14105_s27 = sphi %s14229_s27, %s17751_s27   ;;  %s14101_s26 = sphi %s14227_s26, %s17753_s26   ;;  %s14097_s25 = sphi %s14225_s25, %s17755_s25   ;;  %s14093_s2 = sphi %s14223_s2, %s17754_s2  }
   0xd   : > { %17713 = sst [smem:[#allocation9_spill]] %s14101_s26  ;;  %s10089_s28 = sadd.s32 4294967294, %s14105_s27  }
   0xe   : > { %17714 = sst [smem:[#allocation10_spill]] %s14105_s27  ;;  %s14248_s29 = sadd.s32 1, %s14105_s27  }
   0xf   : > { %17715 = sst [smem:[#allocation11_spill]] %s14248_s29  ;;  %s487_s0 = sadd.s32 1, %s14101_s26 }
  0x10   : > { %s484_s4 = ssub.s32 %s14105_s27, %s14248_s29  ;;  %p497_p0 = scmp.ne.s32.totalorder %s14101_s26, %s14097_s25 }
  0x11   : > { %p485_p1 = scmp.eq.s32.totalorder %s484_s4, 0  ;;  %p498_p2 = scmp.eq.s32.totalorder %s14244_s3, 1 }
  0x12   : > { %p503_p3 = scmp.ne.s32.totalorder %s14097_s25, %s14093_s2  ;;  %p504_p4 = scmp.eq.s32.totalorder %s10089_s28, 1 }
  0x13   : > { %s14259_s30 = scalar_select %p485_p1, %s14101_s26, %s487_s0  }
  0x14   : > { %p14261_p5 = por %p498_p2, %p497_p0  ;;  %p14265_p6 = por %p504_p4, %p503_p3 }
  0x15   : > { %17716 = sst [smem:[#allocation12_spill]] %s14259_s30  ;;  %p10092_p7 = scmp.ge.s32.totalorder %s14105_s27, 1 }
  0x16   : > { %s17717_s5 = scalar_select %p14261_p5, 1, 0 }
  0x17   : > { %s17719_s22 = scalar_select %p14265_p6, 1, 0 }
  0x18   : > { %17718 = sst [smem:[#allocation13_spill]] %s17717_s5  ;;  %p590_p8 = scmp.lt.s32.totalorder %s14105_s27, 3 }
  0x19   : > { %17720 = sst [smem:[#allocation14_spill]] %s17719_s22 }
  0x1a   : > { %p591_p9 = pnand %p10092_p7, %p590_p8 }
  0x1c   : > { %594 = sbr.rel (%p591_p9) target bundleno = 8936 (0x22e8), region = 104 }
  0x23   : > { %s17721_s24 = sld [smem:[#allocation23_spill]]  ;;  %p649_p10 = scmp.lt.s32.totalorder %s14244_s3, 1 }
  0x24   : > { %s17722_s21 = sld [smem:[#allocation22_spill]]  ;;  %s17723_s2 = sld [smem:[#allocation24_spill]] }
  0x25   : > { %s650_s4 = scalar_select %p649_p10, %s14244_s3, 1 }
  0x26   : > { %s17725_s0 = sld [smem:[#allocation25_spill]]  ;;  %s17728_s20 = sld [smem:[#allocation26_spill]] }
  0x27   : > { %s13129_s1 = smul.u32 192, %s650_s4  ;;  %s647_s30 = sand.u32 1, %s14097_s25  }
  0x28   : > { %s17746_s29 = sld [smem:[#allocation28_spill]]  ;;  %s648_s4 = scalar_lea.vmem [#allocation5], %s647_s30 }
  0x29   : > { %v13174_v0 = vld [vmem:[%s17721_s24 + $0x40] sm:$0xff]   ;;  %v13178_v4 = vld [vmem:[%s17721_s24 + $0x48] sm:$0xff]   ;;  %v13182_v8 = vld [vmem:[%s17721_s24 + $0x50] sm:$0xff]   ;;  %s10034_s23 = sshll.u32 %s648_s4, 4  ;;  %s17747_s5 = sld [smem:[#allocation29_spill]]  ;;  %s17607_s23 = int_to_ptr.vmem [resolvable:$true] %s10034_s23 }
  0x2a   : > { %v13175_v1 = vld [vmem:[%s17721_s24] sm:$0xff]   ;;  %11504 = vmatprep.subr.bf16.mxu0 %v13174_v0  ;;  %v13179_v5 = vld [vmem:[%s17721_s24 + $0x8] sm:$0xff]   ;;  %v13183_v9 = vld [vmem:[%s17721_s24 + $0x10] sm:$0xff]   ;;  %s14363_s27 = scalar_lea.vmem %s17722_s21, %s13129_s1  ;;  %s17724_s22 = smov %s17723_s2 }
  0x2b   : > { %v13176_v2 = vld [vmem:[%s17721_s24 + $0xc0] sm:$0xff]   ;;  %11505 = vmatpush3.bf16.msra.mxu0 %v13175_v1  ;;  %v13180_v6 = vld [vmem:[%s17721_s24 + $0xc8] sm:$0xff]   ;;  %v13184_v10 = vld [vmem:[%s17721_s24 + $0xd0] sm:$0xff]   ;;  %s17726_s1 = sld [smem:[#allocation27_spill]]  ;;  %s10022_s26 = scalar_lea.sflag [#allocation6], %s647_s30 }
  0x2c   : > { %v13177_v3 = vld [vmem:[%s17721_s24 + $0x80] sm:$0xff]   ;;  %11532 = vmatprep.subr.bf16.mxu1 %v13176_v2  ;;  %11506 = vmatprep.subr.bf16.mxu0 %v13178_v4  ;;  %v13181_v7 = vld [vmem:[%s17721_s24 + $0x88] sm:$0xff]   ;;  %v13185_v11 = vld [vmem:[%s17721_s24 + $0x90] sm:$0xff]   ;;  %s14043_s21 = scalar_lea.vmem %s17607_s23, 16 }
  0x2d   : > { %11533 = vmatpush3.bf16.msra.mxu1 %v13177_v3  ;;  %v13186_v12 = vld [vmem:[%s17721_s24 + $0x58] sm:$0xff]   ;;  %v13190_v16 = vld [vmem:[%s17721_s24 + $0x60] sm:$0xff]   ;;  %v13194_v20 = vld [vmem:[%s17721_s24 + $0x68] sm:$0xff]   ;;  %p14044_p11 = scmp.ne.s32.totalorder %s17607_s23, %s14043_s21 }
  0x2e   : > { %11534 = vmatprep.subr.bf16.mxu1 %v13180_v6  ;;  %v13187_v13 = vld [vmem:[%s17721_s24 + $0x18] sm:$0xff]   ;;  %v13191_v17 = vld [vmem:[%s17721_s24 + $0x20] sm:$0xff]   ;;  %v13195_v21 = vld [vmem:[%s17721_s24 + $0x28] sm:$0xff]  }
  0x2f   : > { %11507 = vmatpush3.bf16.msra.mxu0 %v13179_v5  ;;  %v13188_v14 = vld [vmem:[%s17721_s24 + $0xd8] sm:$0xff]   ;;  %v13192_v18 = vld [vmem:[%s17721_s24 + $0xe0] sm:$0xff]   ;;  %v13196_v22 = vld [vmem:[%s17721_s24 + $0xe8] sm:$0xff]   ;;  %p14045_p12 = pnand %p14044_p11, %p14261_p5 }
  0x30   : > { %11508 = vmatprep.subr.bf16.mxu0 %v13182_v8  ;;  %v13189_v15 = vld [vmem:[%s17721_s24 + $0x98] sm:$0xff]   ;;  %v13193_v19 = vld [vmem:[%s17721_s24 + $0xa0] sm:$0xff]   ;;  %v13197_v23 = vld [vmem:[%s17721_s24 + $0xa8] sm:$0xff]  }
  0x31   : > { %11535 = vmatpush3.bf16.msra.mxu1 %v13181_v7  ;;  %v13198_v24 = vld [vmem:[%s17721_s24 + $0x70] sm:$0xff]   ;;  %v13202_v28 = vld [vmem:[%s17721_s24 + $0x78] sm:$0xff]   ;;  %v656_v31 = vld [vmem:[%s14363_s27 + $0x8] sm:$0xff]  ;;  %p14046_p13 = pneg %p14045_p12 }
  0x32   : > { %11536 = vmatprep.subr.bf16.mxu1 %v13184_v10  ;;  %v13199_v25 = vld [vmem:[%s17721_s24 + $0x30] sm:$0xff]   ;;  %v13203_v29 = vld [vmem:[%s17721_s24 + $0x38] sm:$0xff]   ;;  %v655_v35 = vld [vmem:[%s14363_s27] sm:$0xff] }
  0x33   : > { %11509 = vmatpush3.bf16.msra.mxu0 %v13183_v9  ;;  %v13200_v26 = vld [vmem:[%s17721_s24 + $0xf0] sm:$0xff]   ;;  %v13204_v30 = vld [vmem:[%s17721_s24 + $0xf8] sm:$0xff]   ;;  %v13206_v38 = vld [vmem:[%s17721_s24 + $0x140] sm:$0xff]  }
  0x34   : > { %11510 = vmatprep.subr.bf16.mxu0 %v13186_v12  ;;  %v13201_v27 = vld [vmem:[%s17721_s24 + $0xb0] sm:$0xff]   ;;  %v662_v32 = vld [vmem:[%s14363_s27 + $0x38] sm:$0xff]  ;;  %v664_v40 = vld [vmem:[%s14363_s27 + $0x48] sm:$0xff] }
  0x35   : > { %11537 = vmatpush3.bf16.msra.mxu1 %v13185_v11  ;;  %v776_v33 = vpack.c.bf16 %v662_v32, %v656_v31  ;;  %v13205_v34 = vld [vmem:[%s17721_s24 + $0xb8] sm:$0xff]   ;;  %v661_v36 = vld [vmem:[%s14363_s27 + $0x30] sm:$0xff]  ;;  %v13207_v42 = vld [vmem:[%s17721_s24 + $0x100] sm:$0xff]  }
  0x36   : > { %11538 = vmatprep.subr.bf16.mxu1 %v13188_v14  ;;  %v775_v37 = vpack.c.bf16 %v661_v36, %v655_v35  ;;  %v658_v39 = vld [vmem:[%s14363_s27 + $0x18] sm:$0xff]  ;;  %v657_v43 = vld [vmem:[%s14363_s27 + $0x10] sm:$0xff]  ;;  %v663_v44 = vld [vmem:[%s14363_s27 + $0x40] sm:$0xff] }
  0x37   : > { %11511 = vmatpush3.bf16.msra.mxu0 %v13187_v13  ;;  %1112 = vmatprep.mubr.bf16.mxu0 %v776_v33  ;;  %v778_v41 = vpack.c.bf16 %v664_v40, %v658_v39  ;;  %v777_v45 = vpack.c.bf16 %v663_v44, %v657_v43  ;;  %v13208_v46 = vld [vmem:[%s17721_s24 + $0x148] sm:$0xff]   ;;  %v13210_v48 = vld [vmem:[%s17721_s24 + $0x150] sm:$0xff]   ;;  %v13212_v50 = vld [vmem:[%s17721_s24 + $0x158] sm:$0xff]  }
  0x38   : > { %11512 = vmatprep.subr.bf16.mxu0 %v13190_v16  ;;  %v13209_v47 = vld [vmem:[%s17721_s24 + $0x108] sm:$0xff]   ;;  %v13211_v49 = vld [vmem:[%s17721_s24 + $0x110] sm:$0xff]   ;;  %v13213_v51 = vld [vmem:[%s17721_s24 + $0x118] sm:$0xff]  }
  0x39   : > { %11539 = vmatpush3.bf16.msra.mxu1 %v13189_v15  ;;  %1161 = vmatprep.mubr.bf16.mxu1 %v778_v41  ;;  %v668_v52 = vld [vmem:[%s14363_s27 + $0x68] sm:$0xff]  ;;  %v674_v53 = vld [vmem:[%s14363_s27 + $0x98] sm:$0xff]  ;;  %v13214_v54 = vld [vmem:[%s17721_s24 + $0x160] sm:$0xff]  }
  0x3a   : > { %11540 = vmatprep.subr.bf16.mxu1 %v13192_v18  ;;  %v782_v55 = vpack.c.bf16 %v674_v53, %v668_v52  ;;  %v667_v56 = vld [vmem:[%s14363_s27 + $0x60] sm:$0xff]  ;;  %v673_v57 = vld [vmem:[%s14363_s27 + $0x90] sm:$0xff]  ;;  %v670_v60 = vld [vmem:[%s14363_s27 + $0x78] sm:$0xff] }
  0x3b   : > { %11513 = vmatpush3.bf16.msra.mxu0 %v13191_v17  ;;  %v13215_v58 = vld [vmem:[%s17721_s24 + $0x120] sm:$0xff]   ;;  %v781_v59 = vpack.c.bf16 %v673_v57, %v667_v56  ;;  %v676_v61 = vld [vmem:[%s14363_s27 + $0xa8] sm:$0xff]  ;;  %v669_v62 = vld [vmem:[%s14363_s27 + $0x70] sm:$0xff] }
  0x3c   : > { %11514 = vmatprep.subr.bf16.mxu0 %v13194_v20  ;;  %v784_v63 = vpack.c.bf16 %v676_v61, %v670_v60  ;;  %v675_v0 = vld [vmem:[%s14363_s27 + $0xa0] sm:$0xff]  ;;  %v13216_v1 = vld [vmem:[%s17721_s24 + $0x168] sm:$0xff]   ;;  %v666_v5 = vld [vmem:[%s14363_s27 + $0x58] sm:$0xff] }
  0x3d   : > { %11541 = vmatpush3.bf16.msra.mxu1 %v13193_v19  ;;  %v783_v2 = vpack.c.bf16 %v675_v0, %v669_v62  ;;  %v13217_v3 = vld [vmem:[%s17721_s24 + $0x128] sm:$0xff]   ;;  %v13218_v6 = vld [vmem:[%s17721_s24 + $0x170] sm:$0xff]   ;;  %v13220_v9 = vld [vmem:[%s17721_s24 + $0x178] sm:$0xff]  }
  0x3e   : > { %11542 = vmatprep.subr.bf16.mxu1 %v13196_v22  ;;  %v660_v4 = vld [vmem:[%s14363_s27 + $0x28] sm:$0xff]  ;;  %v13219_v8 = vld [vmem:[%s17721_s24 + $0x130] sm:$0xff]   ;;  %v13221_v10 = vld [vmem:[%s17721_s24 + $0x138] sm:$0xff]  }
  0x3f   : > { %11515 = vmatpush3.bf16.msra.mxu0 %v13195_v21  ;;  %v780_v7 = vpack.c.bf16 %v666_v5, %v660_v4  ;;  %v659_v11 = vld [vmem:[%s14363_s27 + $0x20] sm:$0xff]  ;;  %v665_v12 = vld [vmem:[%s14363_s27 + $0x50] sm:$0xff]  ;;  %v672_v13 = vld [vmem:[%s14363_s27 + $0x88] sm:$0xff] }
  0x40   : > { %11516 = vmatprep.subr.bf16.mxu0 %v13198_v24  ;;  %v678_v14 = vld [vmem:[%s14363_s27 + $0xb8] sm:$0xff]  ;;  %v779_v15 = vpack.c.bf16 %v665_v12, %v659_v11  ;;  %v671_v17 = vld [vmem:[%s14363_s27 + $0x80] sm:$0xff]  ;;  %v677_v18 = vld [vmem:[%s14363_s27 + $0xb0] sm:$0xff] }
  0x41   : > { %11543 = vmatpush3.bf16.msra.mxu1 %v13197_v23  ;;  %v786_v16 = vpack.c.bf16 %v678_v14, %v672_v13  ;;  %v785_v19 = vpack.c.bf16 %v677_v18, %v671_v17  ;;  %v13222_v20 = vld [vmem:[%s17723_s2] sm:$0xff]   ;;  %v13223_v21 = vld [vmem:[%s17724_s22 + $0x8] sm:$0xff]   ;;  %v13224_v22 = vld [vmem:[%s17724_s22 + $0x10] sm:$0xff]   ;;  %s11501_s2 = sshll.u32 %s14244_s3, 4  ;;  %s14112_s3 = smov [#allocation5]  }
  0x42   : > { %11544 = vmatprep.subr.bf16.mxu1 %v13200_v26  ;;  %v13225_v23 = vld [vmem:[%s17724_s22 + $0x18] sm:$0xff]   ;;  %v13226_v24 = vld [vmem:[%s17724_s22 + $0x20] sm:$0xff]   ;;  %v13228_v26 = vld [vmem:[%s17724_s22 + $0x30] sm:$0xff]  }
  0x43   : > { %11517 = vmatpush3.bf16.msra.mxu0 %v13199_v25  ;;  %v13227_v25 = vld [vmem:[%s17724_s22 + $0x28] sm:$0xff]  }
  0x44   : > { %11518 = vmatprep.subr.bf16.mxu0 %v13202_v28  ;;  %v10094_v28 = vld [vmem:[%s17725_s0] ss:$0 sm:$0xff] }
  0x45   : > { %11545 = vmatpush3.bf16.msra.mxu1 %v13201_v27  ;;  %v13229_v27 = vld [vmem:[%s17724_s22 + $0x38] sm:$0xff]  }
  0x46   : > { %11546 = vmatprep.subr.bf16.mxu1 %v13204_v30 }
  0x47   : > { %11519 = vmatpush3.bf16.msra.mxu0 %v13203_v29 }
  0x48   : > { %11560 = vmatprep.subr.bf16.mxu0 %v13206_v38 }
  0x49   : > { %11547 = vmatpush3.bf16.msra.mxu1 %v13205_v34 }
  0x4a   : > { %1113 = vmatmul.mubr.bf16.vlgmr.msra.gmra.mrb[0].mxu0 %v775_v37  ;;  %12365 = vmatprep.subr.bf16.mxu1 %v13222_v20 }
  0x4b   : > { %11561 = vmatpush3.bf16.msra.mxu0 %v13207_v42  ;;  %1120 = vmatprep.mubr.bf16.mxu0 %v782_v55 }
  0x4c   : > { %1162 = vmatmul.mubr.bf16.vlgmr.msra.gmra.mrb[0].mxu1 %v777_v45  ;;  %11562 = vmatprep.subr.bf16.mxu0 %v13208_v46 }
  0x4d   : > { %1169 = vmatprep.mubr.bf16.mxu1 %v784_v63  ;;  %12366 = vmatpush3.bf16.msra.mxu1 %v13222_v20 }
  0x4e   : > { %12367 = vmatprep.subr.bf16.mxu1 %v13223_v21 }
  0x4f   : > { %11563 = vmatpush3.bf16.msra.mxu0 %v13209_v47 }
  0x50   : > { %11564 = vmatprep.subr.bf16.mxu0 %v13210_v48 }
  0x51   : > { %12368 = vmatpush3.bf16.msra.mxu1 %v13223_v21 }
  0x52   : > { %1121 = vmatmul.mubr.bf16.gmra.mrb[4].mxu0 %v781_v59  ;;  %12369 = vmatprep.subr.bf16.mxu1 %v13224_v22 }
  0x53   : > { %11565 = vmatpush3.bf16.msra.mxu0 %v13211_v49  ;;  %1210 = vmatprep.mubr.bf16.mxu0 %v780_v7 }
  0x54   : > { %11566 = vmatprep.subr.bf16.mxu0 %v13212_v50  ;;  %1170 = vmatmul.mubr.bf16.gmra.mrb[4].mxu1 %v783_v2 }
  0x55   : > { %12370 = vmatpush3.bf16.msra.mxu1 %v13224_v22 }
  0x56   : > { %12371 = vmatprep.subr.bf16.mxu1 %v13225_v23 }
  0x57   : > { %11567 = vmatpush3.bf16.msra.mxu0 %v13213_v51 }
  0x58   : > { %11568 = vmatprep.subr.bf16.mxu0 %v13214_v54 }
  0x59   : > { %12372 = vmatpush3.bf16.msra.mxu1 %v13225_v23 }
  0x5a   : > { %12373 = vmatprep.subr.bf16.mxu1 %v13226_v24 }
  0x5b   : > { %11569 = vmatpush3.bf16.msra.mxu0 %v13215_v58 }
  0x5c   : > { %11570 = vmatprep.subr.bf16.mxu0 %v13216_v1 }
  0x5d   : > { %12374 = vmatpush3.bf16.msra.mxu1 %v13226_v24 }
  0x5e   : > { %12375 = vmatprep.subr.bf16.mxu1 %v13227_v25 }
  0x5f   : > { %11571 = vmatpush3.bf16.msra.mxu0 %v13217_v3 }
  0x60   : > { %11572 = vmatprep.subr.bf16.mxu0 %v13218_v6 }
  0x61   : > { %12376 = vmatpush3.bf16.msra.mxu1 %v13227_v25 }
  0x62   : > { %12377 = vmatprep.subr.bf16.mxu1 %v13228_v26 }
  0x63   : > { %11573 = vmatpush3.bf16.msra.mxu0 %v13219_v8 }
  0x64   : > { %11574 = vmatprep.subr.bf16.mxu0 %v13220_v9 }
  0x65   : > { %12378 = vmatpush3.bf16.msra.mxu1 %v13228_v26 }
  0x66   : > { %12379 = vmatprep.subr.bf16.mxu1 %v13229_v27 }
  0x67   : > { %11575 = vmatpush3.bf16.msra.mxu0 %v13221_v10 }
  0x68   : > { %12385 = vmatprep.subr.bf16.mxu0 %v13222_v20 }
  0x69   : > { %12380 = vmatpush3.bf16.msra.mxu1 %v13229_v27 }
  0x6a   : > { %1211 = vmatmul.mubr.bf16.vlgmr.msra.gmra.mrb[8].mxu0 %v779_v15 }
  0x6b   : > { %1218 = vmatprep.mubr.bf16.mxu0 %v786_v16  ;;  %12386 = vmatpush3.bf16.msra.mxu0 %v13222_v20 }
  0x6c   : > { %12387 = vmatprep.subr.bf16.mxu0 %v13223_v21 }
  0x6f   : > { %12388 = vmatpush3.bf16.msra.mxu0 %v13223_v21 }
  0x70   : > { %12389 = vmatprep.subr.bf16.mxu0 %v13224_v22 }
  0x72   : > { %1219 = vmatmul.mubr.bf16.gmra.mrb[12].mxu0 %v785_v19 }
  0x73   : > { %12390 = vmatpush3.bf16.msra.mxu0 %v13224_v22 }
  0x74   : > { %12391 = vmatprep.subr.bf16.mxu0 %v13225_v23 }
  0x77   : > { %12392 = vmatpush3.bf16.msra.mxu0 %v13225_v23 }
  0x78   : > { %12393 = vmatprep.subr.bf16.mxu0 %v13226_v24 }
  0x7b   : > { %12394 = vmatpush3.bf16.msra.mxu0 %v13226_v24 }
  0x7c   : > { %12395 = vmatprep.subr.bf16.mxu0 %v13227_v25 }
  0x7f   : > { %12396 = vmatpush3.bf16.msra.mxu0 %v13227_v25 }
  0x80   : > { %12397 = vmatprep.subr.bf16.mxu0 %v13228_v26 }
  0x83   : > { %12398 = vmatpush3.bf16.msra.mxu0 %v13228_v26 }
  0x84   : > { %12399 = vmatprep.subr.bf16.mxu0 %v13229_v27 }
  0x87   : > { %12400 = vmatpush3.bf16.msra.mxu0 %v13229_v27 }
 0x11d   : > { %v11520_v29 = vpop.f32.mrb[0].mxu0 }
 0x11e   : > { %v11521_v30 = vpop.f32.mrb[1].mxu0 }
 0x11f   : > { %v11522_v31 = vadd.f32 %v11521_v30, %v11520_v29  ;;  %v11523_v32 = vpop.f32.mrb[2].mxu0  ;;  %v11548_v33 = vpop.f32.mrb[0].mxu1  ;;  %v13231_v29 = vld [vmem:[%s17726_s1 + $0xc0] sm:$0xff]  }
 0x120   : > { %v11524_v34 = vpop.f32.mrb[3].mxu0  ;;  %v11549_v37 = vpop.f32.mrb[1].mxu1  ;;  %v13230_v30 = vld [vmem:[%s17726_s1 + $0x40] sm:$0xff]   ;;  %11636 = vmatprep.subr.bf16.mxu0 %v13231_v29 }
 0x121   : > { %v1115_v35 = vadd.f32 %v11522_v31, %v10094_v28  ;;  %v11525_v36 = vadd.f32 %v11524_v34, %v11523_v32  ;;  %v11550_v38 = vadd.f32 %v11549_v37, %v11548_v33  ;;  %v11551_v39 = vpop.f32.mrb[2].mxu1  ;;  %v13233_v31 = vld [vmem:[%s17726_s1 + $0x80] sm:$0xff]   ;;  %11608 = vmatprep.subr.bf16.mxu1 %v13230_v30  ;;  %v13235_v33 = vld [vmem:[%s17726_s1 + $0xc8] sm:$0xff]   ;;  %v13239_v37 = vld [vmem:[%s17726_s1 + $0xd0] sm:$0xff]  }
 0x122   : > { %v11552_v41 = vpop.f32.mrb[3].mxu1  ;;  %v13232_v32 = vld [vmem:[%s17726_s1] sm:$0xff]   ;;  %v13234_v34 = vld [vmem:[%s17726_s1 + $0x48] sm:$0xff]  }
 0x123   : > { %v1118_v40 = vadd.f32 %v11525_v36, %v10094_v28  ;;  %v1164_v42 = vadd.f32 %v11550_v38, %v1115_v35  ;;  %v11553_v43 = vadd.f32 %v11552_v41, %v11551_v39  ;;  %v13237_v35 = vld [vmem:[%s17726_s1 + $0x88] sm:$0xff]   ;;  %v13238_v38 = vld [vmem:[%s17726_s1 + $0x50] sm:$0xff]   ;;  %v13243_v41 = vld [vmem:[%s17726_s1 + $0xd8] sm:$0xff]  }
 0x124   : > { %v13236_v36 = vld [vmem:[%s17726_s1 + $0x8] sm:$0xff]   ;;  %v13241_v39 = vld [vmem:[%s17726_s1 + $0x90] sm:$0xff]  }
 0x125   : > { %v1167_v44 = vadd.f32 %v11553_v43, %v1118_v40  ;;  %v11526_v45 = vpop.f32.mrb[4].mxu0  ;;  %v13240_v40 = vld [vmem:[%s17726_s1 + $0x10] sm:$0xff]   ;;  %v13245_v43 = vld [vmem:[%s17726_s1 + $0x98] sm:$0xff]  }
 0x126   : > { %v11527_v46 = vpop.f32.mrb[5].mxu0 }
 0x127   : > { %v11528_v47 = vadd.f32 %v11527_v46, %v11526_v45  ;;  %v11529_v48 = vpop.f32.mrb[6].mxu0  ;;  %v11554_v49 = vpop.f32.mrb[4].mxu1  ;;  %v13247_v45 = vld [vmem:[%s17726_s1 + $0xe0] sm:$0xff]  }
 0x128   : > { %v11530_v50 = vpop.f32.mrb[7].mxu0  ;;  %v11555_v51 = vpop.f32.mrb[5].mxu1  ;;  %v13246_v46 = vld [vmem:[%s17726_s1 + $0x60] sm:$0xff]  }
 0x129   : > { %v1123_v52 = vadd.f32 %v11528_v47, %v10094_v28  ;;  %v11531_v53 = vadd.f32 %v11530_v50, %v11529_v48  ;;  %v11556_v54 = vadd.f32 %v11555_v51, %v11554_v49  ;;  %v11557_v55 = vpop.f32.mrb[6].mxu1  ;;  %v13249_v47 = vld [vmem:[%s17726_s1 + $0xa0] sm:$0xff]   ;;  %v17684_v49 = vmov 0.0   ;;  %v13251_v50 = vld [vmem:[%s17726_s1 + $0xe8] sm:$0xff]  }
 0x12a   : > { %v11558_v56 = vpop.f32.mrb[7].mxu1  ;;  %v13248_v48 = vld [vmem:[%s17726_s1 + $0x20] sm:$0xff]   ;;  %1431 = vst [vmem:[#allocation2 + $0x25] sm:$0x7] %v17684_v49  ;;  %1427 = vst [vmem:[#allocation2 + $0x5] sm:$0x7] %v17684_v49 }
 0x12b   : > { %v1126_v57 = vadd.f32 %v11531_v53, %v10094_v28  ;;  %v1172_v58 = vadd.f32 %v11556_v54, %v1123_v52  ;;  %v11559_v59 = vadd.f32 %v11558_v56, %v11557_v55  ;;  %1428 = vst [vmem:[#allocation2 + $0x18] sm:$0x7] %v17684_v49  ;;  %1432 = vst [vmem:[#allocation2 + $0x38] sm:$0x7] %v17684_v49  ;;  %v13250_v51 = vld [vmem:[%s17726_s1 + $0x68] sm:$0xff]   ;;  %v13255_v54 = vld [vmem:[%s17726_s1 + $0xf0] sm:$0xff]  }
 0x12c   : > { %v13253_v52 = vld [vmem:[%s17726_s1 + $0xa8] sm:$0xff]   ;;  %v13254_v55 = vld [vmem:[%s17726_s1 + $0x70] sm:$0xff]  }
 0x12d   : > { %v1175_v60 = vadd.f32 %v11559_v59, %v1126_v57  ;;  %v13252_v53 = vld [vmem:[%s17726_s1 + $0x28] sm:$0xff]   ;;  %v13257_v56 = vld [vmem:[%s17726_s1 + $0xb0] sm:$0xff]   ;;  %v13258_v59 = vld [vmem:[%s17726_s1 + $0x78] sm:$0xff]  }
 0x12e   : > { %v13256_v57 = vld [vmem:[%s17726_s1 + $0x30] sm:$0xff]  }
 0x13d   : > { %v11576_v61 = vpop.f32.mrb[8].mxu0 }
 0x13e   : > { %v11577_v62 = vpop.f32.mrb[9].mxu0 }
 0x13f   : > { %v11578_v63 = vadd.f32 %v11577_v62, %v11576_v61  ;;  %v11579_v0 = vpop.f32.mrb[10].mxu0  ;;  %v13260_v61 = vld [vmem:[%s17726_s1 + $0x38] sm:$0xff]   ;;  %v14592_v62 = vld [vmem:[%s17726_s1 + $0x180] sm:$0xff]  }
 0x140   : > { %v11580_v1 = vpop.f32.mrb[11].mxu0 }
 0x141   : > { %v1213_v2 = vadd.f32 %v11578_v63, %v1164_v42  ;;  %v11581_v3 = vadd.f32 %v11580_v1, %v11579_v0  ;;  %v13242_v42 = vld [vmem:[%s17726_s1 + $0x58] sm:$0xff]   ;;  %v13262_v63 = vld [vmem:[%s17726_s1 + $0x140] sm:$0xff]  }
 0x143   : > { %v1216_v4 = vadd.f32 %v11581_v3, %v1167_v44  ;;  %v13244_v44 = vld [vmem:[%s17726_s1 + $0x18] sm:$0xff]  }
 0x145   : > { %v11582_v5 = vpop.f32.mrb[12].mxu0  ;;  %v1245_v6 = vpack.c.bf16 %v1216_v4, %v1213_v2 }
 0x146   : > { %v11583_v7 = vpop.f32.mrb[13].mxu0 }
 0x147   : > { %v11584_v8 = vadd.f32 %v11583_v7, %v11582_v5  ;;  %v11585_v9 = vpop.f32.mrb[14].mxu0  ;;  %12381 = vmatprep.mubr.bf16.mxu1 %v1245_v6 }
 0x148   : > { %v11586_v10 = vpop.f32.mrb[15].mxu0 }
 0x149   : > { %v1221_v11 = vadd.f32 %v11584_v8, %v1172_v58  ;;  %v11587_v12 = vadd.f32 %v11586_v10, %v11585_v9  ;;  %v13259_v58 = vld [vmem:[%s17726_s1 + $0xf8] sm:$0xff]   ;;  %v10151_v9 = vld [vmem:[%s17725_s0 + $0x1] ss:$0 sm:$0xff] }
 0x14b   : > { %v1224_v13 = vadd.f32 %v11587_v12, %v1175_v60  ;;  %v13261_v60 = vld [vmem:[%s17726_s1 + $0xb8] sm:$0xff]  }
 0x14d   : > { %v1246_v14 = vpack.c.bf16 %v1224_v13, %v1221_v11 }
 0x14f   : > { %12382 = vmatmul.mubr.bf16.vlgmr.msra.gmra.mrb[8].mxu1 %v1246_v14 }
 0x150   : > { %11609 = vmatpush3.bf16.msra.mxu1 %v13232_v32 }
 0x151   : > { %11610 = vmatprep.subr.bf16.mxu1 %v13234_v34 }
 0x154   : > { %11611 = vmatpush3.bf16.msra.mxu1 %v13236_v36 }
 0x155   : > { %11612 = vmatprep.subr.bf16.mxu1 %v13238_v38  ;;  %v13264_v38 = vld [vmem:[%s17726_s1 + $0x100] sm:$0xff]  }
 0x158   : > { %11613 = vmatpush3.bf16.msra.mxu1 %v13240_v40 }
 0x159   : > { %11614 = vmatprep.subr.bf16.mxu1 %v13242_v42 }
 0x15c   : > { %11615 = vmatpush3.bf16.msra.mxu1 %v13244_v44  ;;  %v13266_v44 = vld [vmem:[%s17726_s1 + $0x188] sm:$0xff]  }
 0x15d   : > { %11616 = vmatprep.subr.bf16.mxu1 %v13246_v46 }
 0x160   : > { %11617 = vmatpush3.bf16.msra.mxu1 %v13248_v48 }
 0x161   : > { %11618 = vmatprep.subr.bf16.mxu1 %v13250_v51 }
 0x164   : > { %11619 = vmatpush3.bf16.msra.mxu1 %v13252_v53 }
 0x165   : > { %11620 = vmatprep.subr.bf16.mxu1 %v13254_v55 }
 0x168   : > { %11621 = vmatpush3.bf16.msra.mxu1 %v13256_v57 }
 0x169   : > { %11622 = vmatprep.subr.bf16.mxu1 %v13258_v59  ;;  %v13267_v59 = vld [vmem:[%s17726_s1 + $0x108] sm:$0xff]  }
 0x16c   : > { %11623 = vmatpush3.bf16.msra.mxu1 %v13260_v61  ;;  %v13269_v61 = vld [vmem:[%s17726_s1 + $0x190] sm:$0xff]  }
 0x16d   : > { %11664 = vmatprep.subr.bf16.mxu1 %v13262_v63 }
 0x222   : > { %v12383_v15 = vpop.f32.mrb[8].mxu1 }
 0x223   : > { %v1329_v16 = vpop.f32.mrb[9].mxu1  ;;  %v14475_v19 = vsub.f32 %v1221_v11, %v12383_v15 }
 0x224   : > { %v14473_v17 = vsub.f32 %v1213_v2, %v1329_v16  ;;  %v12384_v18 = vpop.f32.mrb[10].mxu1 }
 0x225   : > { %v14477_v20 = vsub.f32 %v1224_v13, %v12384_v18  ;;  %v1332_v21 = vpop.f32.mrb[11].mxu1  ;;  %v1350_v26 = vmul.f32 %v14475_v19, %v14475_v19  ;;  %v10152_v13 = vld [vmem:[%s17725_s0 + $0x2] ss:$0 sm:$0xff] }
 0x226   : > { %v14479_v22 = vsub.f32 %v1216_v4, %v1332_v21  ;;  %v1348_v24 = vmul.f32 %v14473_v17, %v14473_v17 }
 0x227   : > { %v1351_v23 = vmul.f32 %v14477_v20, %v14477_v20 }
 0x228   : > { %v1349_v25 = vmul.f32 %v14479_v22, %v14479_v22 }
 0x229   : > { %v1353_v28 = vpack.c.bf16 %v1351_v23, %v1350_v26 }
 0x22a   : > { %v1352_v27 = vpack.c.bf16 %v1349_v25, %v1348_v24 }
 0x22c   : > { %12401 = vmatprep.mubr.bf16.mxu0 %v1352_v27 }
 0x22d   : > { %12402 = vmatmul.mubr.bf16.vlgmr.msra.gmra.mrb[16].mxu0 %v1353_v28 }
 0x22e   : > { %11637 = vmatpush3.bf16.msra.mxu0 %v13233_v31 }
 0x22f   : > { %11638 = vmatprep.subr.bf16.mxu0 %v13235_v33 }
 0x232   : > { %11639 = vmatpush3.bf16.msra.mxu0 %v13237_v35 }
 0x233   : > { %11640 = vmatprep.subr.bf16.mxu0 %v13239_v37 }
 0x236   : > { %11641 = vmatpush3.bf16.msra.mxu0 %v13241_v39 }
 0x237   : > { %11642 = vmatprep.subr.bf16.mxu0 %v13243_v41 }
 0x23a   : > { %11643 = vmatpush3.bf16.msra.mxu0 %v13245_v43  ;;  %v13265_v43 = vld [vmem:[%s17726_s1 + $0x148] sm:$0xff]  }
 0x23b   : > { %11644 = vmatprep.subr.bf16.mxu0 %v13247_v45 }
 0x23e   : > { %11645 = vmatpush3.bf16.msra.mxu0 %v13249_v47 }
 0x23f   : > { %11646 = vmatprep.subr.bf16.mxu0 %v13251_v50 }
 0x242   : > { %11647 = vmatpush3.bf16.msra.mxu0 %v13253_v52 }
 0x243   : > { %11648 = vmatprep.subr.bf16.mxu0 %v13255_v54 }
 0x246   : > { %11649 = vmatpush3.bf16.msra.mxu0 %v13257_v56 }
 0x247   : > { %11650 = vmatprep.subr.bf16.mxu0 %v13259_v58 }
 0x24a   : > { %11651 = vmatpush3.bf16.msra.mxu0 %v13261_v60  ;;  %v13268_v60 = vld [vmem:[%s17726_s1 + $0x150] sm:$0xff]  }
 0x24b   : > { %12405 = vmatprep.subr.bf16.mxu0 %v14592_v62 }
 0x300   : > { %v12403_v0 = vpop.f32.mrb[16].mxu0 }
 0x301   : > { %v1397_v1 = vadd.f32 1e-06, %v12403_v0  ;;  %v1388_v2 = vpop.f32.mrb[17].mxu0 }
 0x302   : > { %v1389_v3 = vadd.f32 1e-06, %v1388_v2  ;;  %v12404_v4 = vpop.f32.mrb[18].mxu0  ;;  %v13271_v2 = vld [vmem:[%s17726_s1 + $0x158] sm:$0xff]  }
 0x303   : > { %13854 = vrsqrt.f32 %v1397_v1  ;;  %v1400_v5 = vadd.f32 1e-06, %v12404_v4  ;;  %v1391_v6 = vpop.f32.mrb[19].mxu0 }
 0x304   : > { %13856 = vrsqrt.f32 %v1389_v3  ;;  %v1392_v7 = vadd.f32 1e-06, %v1391_v6  ;;  %v13272_v3 = vld [vmem:[%s17726_s1 + $0x198] sm:$0xff]  }
 0x305   : > { %13858 = vrsqrt.f32 %v1400_v5  ;;  %v13273_v6 = vld [vmem:[%s17726_s1 + $0x118] sm:$0xff]  }
 0x306   : > { %13860 = vrsqrt.f32 %v1392_v7  ;;  %v13274_v7 = vld [vmem:[%s17726_s1 + $0x160] sm:$0xff]  }
 0x30d   : > { %v13855_v8 = vpop.eup %13854 }
 0x30e   : > { %v13857_v10 = vpop.eup %13856  ;;  %v1409_v11 = vmul.f32 %v13855_v8, %v14475_v19  ;;  %v13275_v8 = vld [vmem:[%s17726_s1 + $0x1a0] sm:$0xff]  }
 0x30f   : > { %v13859_v12 = vpop.eup %13858  ;;  %v1407_v14 = vmul.f32 %v13857_v10, %v14473_v17  ;;  %v13277_v10 = vld [vmem:[%s17726_s1 + $0x168] sm:$0xff]  }
 0x310   : > { %v13861_v15 = vpop.eup %13860  ;;  %v1417_v16 = vmul.f32 %v10151_v9, %v1409_v11  ;;  %v1410_v18 = vmul.f32 %v13859_v12, %v14477_v20  ;;  %v13278_v11 = vld [vmem:[%s17726_s1 + $0x1a8] sm:$0xff]  }
 0x311   : > { %v1415_v21 = vmul.f32 %v10151_v9, %v1407_v14  ;;  %v1408_v23 = vmul.f32 %v13861_v15, %v14479_v22  ;;  %v13279_v12 = vld [vmem:[%s17726_s1 + $0x128] sm:$0xff]   ;;  %v13281_v14 = vld [vmem:[%s17726_s1 + $0x1b0] sm:$0xff]  }
 0x312   : > { %v1425_v24 = vadd.f32 %v10152_v13, %v1417_v16  ;;  %v1418_v25 = vmul.f32 %v10151_v9, %v1410_v18  ;;  %v13282_v15 = vld [vmem:[%s17726_s1 + $0x130] sm:$0xff]   ;;  %v13283_v16 = vld [vmem:[%s17726_s1 + $0x178] sm:$0xff]  }
 0x313   : > { %v1423_v26 = vadd.f32 %v10152_v13, %v1415_v21  ;;  %v1416_v27 = vmul.f32 %v10151_v9, %v1408_v23  ;;  %v13276_v9 = vld [vmem:[%s17726_s1 + $0x120] sm:$0xff]   ;;  %v13284_v18 = vld [vmem:[%s17726_s1 + $0x1b8] sm:$0xff]  }
 0x314   : > { %1433 = vst [vmem:[#allocation2 + $0x28] sm:$0xff] %v1425_v24  ;;  %v1426_v19 = vadd.f32 %v10152_v13, %v1418_v25  ;;  %v13285_v21 = vld [vmem:[%s17726_s1 + $0x138] sm:$0xff]  }
 0x315   : > { %1429 = vst [vmem:[#allocation2 + $0x8] sm:$0xff] %v1423_v26  ;;  %v14608_v28 = vadd.f32 %v10152_v13, %v1416_v27  ;;  %v13280_v13 = vld [vmem:[%s17726_s1 + $0x170] sm:$0xff]   ;;  %v14710_v27 = vld [vmem:[%s17724_s22] sm:$0xff]  }
 0x316   : > { %1434 = vst [vmem:[#allocation2 + $0x30] sm:$0xff] %v1426_v19  ;;  %1466 = vst [vmem:[#allocation4 + $0xc0] sm:$0xff] %v1426_v19  ;;  %v1641_v55 = vpack.c.bf16 %v1426_v19, %v1425_v24  ;;  %v13287_v19 = vld [vmem:[%s17724_s22 + $0x8] sm:$0xff]  }
 0x317   : > { %17727 = vst [vmem:[#allocation15_spill] sm:$0xff] %v14608_v28  ;;  %1430 = vst [vmem:[#allocation2 + $0x10] sm:$0xff] %v14608_v28  ;;  %v1634_v17 = vpack.c.bf16 %v14608_v28, %v1423_v26 }
 0x319   : > { %2067 = vmatprep.mubr.bf16.mxu0 %v1634_v17  ;;  %v13288_v17 = vld [vmem:[%s17724_s22 + $0x10] sm:$0xff]  }
 0x31b   : > { %v1439_v20 = vld [vmem:[#allocation2 + $0x25] sm:$0xff] }
 0x31c   : > { %v1447_v29 = vld [vmem:[#allocation2 + $0x26] sm:$0xff] }
 0x31d   : > { %v1455_v30 = vld [vmem:[#allocation2 + $0x27] sm:$0xff]  ;;  %v1456_v45 = vld [vmem:[#allocation2 + $0x2f] sm:$0xff] }
 0x31e   : > { %3888 = vst [vmem:[#allocation2 + $0x25] sm:$0x7] %v17684_v49  ;;  %v1435_v22 = vld [vmem:[#allocation2 + $0x5] sm:$0xff]  ;;  %v1448_v34 = vld [vmem:[#allocation2 + $0x2e] sm:$0xff]  ;;  %v1640_v1 = vpack.c.bf16 %v1456_v45, %v1455_v30 }
 0x31f   : > { %v1443_v31 = vld [vmem:[#allocation2 + $0x6] sm:$0xff]  ;;  %v1444_v36 = vld [vmem:[#allocation2 + $0xe] sm:$0xff]  ;;  %v1639_v54 = vpack.c.bf16 %v1448_v34, %v1447_v29  ;;  %v10153_v34 = vld [vmem:[%s17725_s0 + $0x3] ss:$0 sm:$0xff] }
 0x320   : > { %v1451_v32 = vld [vmem:[#allocation2 + $0x7] sm:$0xff]  ;;  %v1632_v40 = vpack.c.bf16 %v1444_v36, %v1443_v31  ;;  %v1452_v42 = vld [vmem:[#allocation2 + $0xf] sm:$0xff]  ;;  %v13293_v31 = vld [vmem:[%s17724_s22 + $0x38] sm:$0xff]  }
 0x321   : > { %3885 = vst [vmem:[#allocation2 + $0x5] sm:$0x7] %v17684_v49  ;;  %v14614_v33 = vld [vmem:[#allocation2 + $0x2b] sm:$0xff]  ;;  %v1633_v46 = vpack.c.bf16 %v1452_v42, %v1451_v32  ;;  %v14629_v52 = vld [vmem:[#allocation2 + $0x33] sm:$0xff]  ;;  %v13290_v29 = vld [vmem:[%s17724_s22 + $0x20] sm:$0xff]  }
 0x322   : > { %v1440_v35 = vld [vmem:[#allocation2 + $0x2d] sm:$0xff]  ;;  %2018 = vmatprep.mubr.bf16.mxu1 %v1632_v40  ;;  %v1644_v24 = vpack.c.bf16 %v14629_v52, %v14614_v33 }
 0x323   : > { %v1436_v37 = vld [vmem:[#allocation2 + $0xd] sm:$0xff]  ;;  %2068 = vmatmul.mubr.bf16.vlgmr.msra.gmra.mrb[20].mxu0 %v1633_v46  ;;  %v1638_v0 = vpack.c.bf16 %v1440_v35, %v1439_v20  ;;  %v13289_v20 = vld [vmem:[%s17724_s22 + $0x18] sm:$0xff]  }
 0x324   : > { %v14619_v39 = vld [vmem:[#allocation2 + $0x9] sm:$0xff]  ;;  %v1631_v41 = vpack.c.bf16 %v1436_v37, %v1435_v22  ;;  %v1476_v48 = vld [vmem:[#allocation2 + $0x12] sm:$0xff]  ;;  %12406 = vmatpush3.bf16.msra.mxu0 %v14592_v62  ;;  %2075 = vmatprep.mubr.bf16.mxu0 %v1641_v55 }
 0x325   : > { %v1475_v47 = vld [vmem:[#allocation2 + $0xa] sm:$0xff]  ;;  %v14634_v56 = vld [vmem:[#allocation2 + $0x32] sm:$0xff]  ;;  %12407 = vmatprep.subr.bf16.mxu0 %v13266_v44 }
 0x326   : > { %v1483_v50 = vld [vmem:[#allocation2 + $0xb] sm:$0xff]  ;;  %2019 = vmatmul.mubr.bf16.vlgmr.msra.gmra.mrb[12].mxu1 %v1631_v41  ;;  %v1484_v63 = vld [vmem:[#allocation2 + $0x13] sm:$0xff]  ;;  %v1636_v4 = vpack.c.bf16 %v1476_v48, %v1475_v47 }
 0x327   : > { %v14627_v51 = vld [vmem:[#allocation2 + $0x11] sm:$0xff]  ;;  %v14636_v57 = vld [vmem:[#allocation2 + $0x29] sm:$0xff]  ;;  %11665 = vmatpush3.bf16.msra.mxu1 %v13264_v38  ;;  %2026 = vmatprep.mubr.bf16.mxu1 %v1639_v54  ;;  %v1637_v5 = vpack.c.bf16 %v1484_v63, %v1483_v50 }
 0x328   : > { %v14631_v53 = vld [vmem:[#allocation2 + $0x2a] sm:$0xff]  ;;  %3886 = vst [vmem:[#allocation2 + $0x10] sm:$0x7] %v17684_v49  ;;  %11666 = vmatprep.subr.bf16.mxu1 %v13265_v43  ;;  %12408 = vmatpush3.bf16.msra.mxu0 %v13266_v44  ;;  %v1635_v23 = vpack.c.bf16 %v14627_v51, %v14619_v39 }
 0x329   : > { %v14638_v58 = vld [vmem:[#allocation2 + $0x31] sm:$0xff]  ;;  %12409 = vmatprep.subr.bf16.mxu0 %v13269_v61  ;;  %v1643_v25 = vpack.c.bf16 %v14634_v56, %v14631_v53  ;;  %v13291_v30 = vld [vmem:[%s17724_s22 + $0x28] sm:$0xff]  }
 0x32a   : > { %3889 = vst [vmem:[#allocation2 + $0x30] sm:$0x7] %v17684_v49  ;;  %v13270_v62 = vld [vmem:[%s17726_s1 + $0x110] sm:$0xff]   ;;  %v1642_v26 = vpack.c.bf16 %v14638_v58, %v14636_v57 }
 0x32b   : > { %11667 = vmatpush3.bf16.msra.mxu1 %v13267_v59  ;;  %2076 = vmatmul.mubr.bf16.gmra.mrb[24].mxu0 %v1640_v1  ;;  %v13292_v22 = vld [vmem:[%s17724_s22 + $0x30] sm:$0xff]  }
 0x32c   : > { %11668 = vmatprep.subr.bf16.mxu1 %v13268_v60  ;;  %12410 = vmatpush3.bf16.msra.mxu0 %v13269_v61 }
 0x32d   : > { %12421 = vmatprep.mubr.bf16.mxu0 %v1637_v5  ;;  %12411 = vmatprep.subr.bf16.mxu0 %v13272_v3 }
 0x32e   : > { %2027 = vmatmul.mubr.bf16.gmra.mrb[16].mxu1 %v1638_v0 }
 0x32f   : > { %11669 = vmatpush3.bf16.msra.mxu1 %v13270_v62  ;;  %2116 = vmatprep.mubr.bf16.mxu1 %v1636_v4 }
 0x330   : > { %11670 = vmatprep.subr.bf16.mxu1 %v13271_v2  ;;  %12412 = vmatpush3.bf16.msra.mxu0 %v13272_v3 }
 0x331   : > { %12413 = vmatprep.subr.bf16.mxu0 %v13275_v8 }
 0x333   : > { %11671 = vmatpush3.bf16.msra.mxu1 %v13273_v6 }
 0x334   : > { %11672 = vmatprep.subr.bf16.mxu1 %v13274_v7  ;;  %12414 = vmatpush3.bf16.msra.mxu0 %v13275_v8 }
 0x335   : > { %12415 = vmatprep.subr.bf16.mxu0 %v13278_v11 }
 0x337   : > { %11673 = vmatpush3.bf16.msra.mxu1 %v13276_v9 }
 0x338   : > { %11674 = vmatprep.subr.bf16.mxu1 %v13277_v10  ;;  %12416 = vmatpush3.bf16.msra.mxu0 %v13278_v11 }
 0x339   : > { %12417 = vmatprep.subr.bf16.mxu0 %v13281_v14 }
 0x33b   : > { %11675 = vmatpush3.bf16.msra.mxu1 %v13279_v12 }
 0x33c   : > { %11676 = vmatprep.subr.bf16.mxu1 %v13280_v13  ;;  %12418 = vmatpush3.bf16.msra.mxu0 %v13281_v14 }
 0x33d   : > { %12419 = vmatprep.subr.bf16.mxu0 %v13284_v18 }
 0x33f   : > { %11677 = vmatpush3.bf16.msra.mxu1 %v13282_v15 }
 0x340   : > { %11678 = vmatprep.subr.bf16.mxu1 %v13283_v16  ;;  %12420 = vmatpush3.bf16.msra.mxu0 %v13284_v18 }
 0x341   : > { %12445 = vmatprep.subr.bf16.mxu0 %v14710_v27 }
 0x343   : > { %11679 = vmatpush3.bf16.msra.mxu1 %v13285_v21  ;;  %12422 = vmatmul.mubr.bf16.vlgmr.msra.gmra.mrb[28].mxu0 %v1644_v24 }
 0x344   : > { %12425 = vmatprep.subr.bf16.mxu1 %v14710_v27  ;;  %12446 = vmatpush3.bf16.msra.mxu0 %v14710_v27 }
 0x345   : > { %12447 = vmatprep.subr.bf16.mxu0 %v13287_v19 }
 0x346   : > { %2117 = vmatmul.mubr.bf16.vlgmr.msra.gmra.mrb[20].mxu1 %v1635_v23 }
 0x347   : > { %2124 = vmatprep.mubr.bf16.mxu1 %v1643_v25  ;;  %12426 = vmatpush3.bf16.msra.mxu1 %v14710_v27 }
 0x348   : > { %12427 = vmatprep.subr.bf16.mxu1 %v13287_v19  ;;  %12448 = vmatpush3.bf16.msra.mxu0 %v13287_v19 }
 0x349   : > { %12449 = vmatprep.subr.bf16.mxu0 %v13288_v17 }
 0x34b   : > { %12428 = vmatpush3.bf16.msra.mxu1 %v13287_v19 }
 0x34c   : > { %12429 = vmatprep.subr.bf16.mxu1 %v13288_v17  ;;  %12450 = vmatpush3.bf16.msra.mxu0 %v13288_v17 }
 0x34d   : > { %12451 = vmatprep.subr.bf16.mxu0 %v13289_v20 }
 0x34e   : > { %2125 = vmatmul.mubr.bf16.gmra.mrb[24].mxu1 %v1642_v26 }
 0x34f   : > { %12430 = vmatpush3.bf16.msra.mxu1 %v13288_v17 }
 0x350   : > { %12431 = vmatprep.subr.bf16.mxu1 %v13289_v20  ;;  %12452 = vmatpush3.bf16.msra.mxu0 %v13289_v20 }
 0x351   : > { %12453 = vmatprep.subr.bf16.mxu0 %v13290_v29 }
 0x353   : > { %12432 = vmatpush3.bf16.msra.mxu1 %v13289_v20 }
 0x354   : > { %12433 = vmatprep.subr.bf16.mxu1 %v13290_v29  ;;  %12454 = vmatpush3.bf16.msra.mxu0 %v13290_v29 }
 0x355   : > { %12455 = vmatprep.subr.bf16.mxu0 %v13291_v30 }
 0x357   : > { %12434 = vmatpush3.bf16.msra.mxu1 %v13290_v29 }
 0x358   : > { %12435 = vmatprep.subr.bf16.mxu1 %v13291_v30  ;;  %12456 = vmatpush3.bf16.msra.mxu0 %v13291_v30 }
 0x359   : > { %12457 = vmatprep.subr.bf16.mxu0 %v13292_v22 }
 0x35b   : > { %12436 = vmatpush3.bf16.msra.mxu1 %v13291_v30 }
 0x35c   : > { %12437 = vmatprep.subr.bf16.mxu1 %v13292_v22  ;;  %12458 = vmatpush3.bf16.msra.mxu0 %v13292_v22 }
 0x35d   : > { %12459 = vmatprep.subr.bf16.mxu0 %v13293_v31 }
 0x35f   : > { %12438 = vmatpush3.bf16.msra.mxu1 %v13292_v22  ;;  %v13294_v22 = vld [vmem:[%s17653_s6] ss:$16 sps:$4 sm:$0xff]  }
 0x360   : > { %12439 = vmatprep.subr.bf16.mxu1 %v13293_v31  ;;  %12460 = vmatpush3.bf16.msra.mxu0 %v13293_v31 }
 0x363   : > { %12440 = vmatpush3.bf16.msra.mxu1 %v13293_v31  ;;  %v13296_v31 = vld [vmem:[%s17653_s6 + $0x4] ss:$16 sps:$4 sm:$0xff]  }
 0x364   : > { %2598 = vmatprep.subr.bf16.mxu1 %v13296_v31 }
 0x3f6   : > { %v11652_v33 = vpop.f32.mrb[20].mxu0 }
 0x3f7   : > { %v11653_v36 = vpop.f32.mrb[21].mxu0 }
 0x3f8   : > { %v11654_v38 = vadd.f32 %v11653_v36, %v11652_v33  ;;  %v11655_v40 = vpop.f32.mrb[22].mxu0  ;;  %v13302_v33 = vld [vmem:[%s17653_s6 + $0x24] ss:$16 sps:$4 sm:$0xff]  }
 0x3f9   : > { %v11624_v32 = vpop.f32.mrb[12].mxu1  ;;  %v11656_v42 = vpop.f32.mrb[23].mxu0 }
 0x3fa   : > { %v11625_v35 = vpop.f32.mrb[13].mxu1  ;;  %v11657_v45 = vadd.f32 %v11656_v42, %v11655_v40 }
 0x3fb   : > { %v11626_v37 = vadd.f32 %v11625_v35, %v11624_v32  ;;  %v11627_v39 = vpop.f32.mrb[14].mxu1  ;;  %v13299_v32 = vld [vmem:[%s17653_s6 + $0xc] ss:$16 sps:$4 sm:$0xff]  }
 0x3fc   : > { %v11628_v41 = vpop.f32.mrb[15].mxu1  ;;  %2651 = vmatprep.subr.bf16.mxu0 %v13299_v32 }
 0x3fd   : > { %v2021_v43 = vadd.f32 %v11626_v37, %v10153_v34  ;;  %v11629_v44 = vadd.f32 %v11628_v41, %v11627_v39 }
 0x3fe   : > { %v11658_v51 = vpop.f32.mrb[24].mxu0 }
 0x3ff   : > { %v2070_v46 = vadd.f32 %v11654_v38, %v2021_v43  ;;  %v2024_v47 = vadd.f32 %v11629_v44, %v10153_v34  ;;  %v11659_v53 = vpop.f32.mrb[25].mxu0 }
 0x400   : > { %v11660_v55 = vadd.f32 %v11659_v53, %v11658_v51  ;;  %v11661_v57 = vpop.f32.mrb[26].mxu0  ;;  %v13305_v51 = vld [vmem:[%s17653_s6 + $0x2c] ss:$16 sps:$4 sm:$0xff]   ;;  %v13308_v53 = vld [vmem:[%s17653_s6 + $0x44] ss:$16 sps:$4 sm:$0xff]  }
 0x401   : > { %v2073_v48 = vadd.f32 %v11657_v45, %v2024_v47  ;;  %v11630_v50 = vpop.f32.mrb[16].mxu1  ;;  %v11662_v59 = vpop.f32.mrb[27].mxu0 }
 0x402   : > { %v11631_v52 = vpop.f32.mrb[17].mxu1  ;;  %v11663_v62 = vadd.f32 %v11662_v59, %v11661_v57  ;;  %v13314_v57 = vld [vmem:[%s17653_s6 + $0x64] ss:$16 sps:$4 sm:$0xff]   ;;  %v13312_v59 = vld [vmem:[%s17653_s6 + $0x60] ss:$16 sps:$4 sm:$0xff]  }
 0x403   : > { %v11632_v54 = vadd.f32 %v11631_v52, %v11630_v50  ;;  %v11633_v56 = vpop.f32.mrb[18].mxu1  ;;  %v13303_v52 = vld [vmem:[%s17653_s6 + $0x28] ss:$16 sps:$4 sm:$0xff]  }
 0x404   : > { %v11634_v58 = vpop.f32.mrb[19].mxu1 }
 0x405   : > { %v2029_v60 = vadd.f32 %v11632_v54, %v10153_v34  ;;  %v11635_v61 = vadd.f32 %v11634_v58, %v11633_v56  ;;  %v13311_v54 = vld [vmem:[%s17653_s6 + $0x4c] ss:$16 sps:$4 sm:$0xff]   ;;  %v13309_v56 = vld [vmem:[%s17653_s6 + $0x48] ss:$16 sps:$4 sm:$0xff]  }
 0x406   : > { %v13317_v58 = vld [vmem:[%s17653_s6 + $0x6c] ss:$16 sps:$4 sm:$0xff]  }
 0x407   : > { %v2078_v63 = vadd.f32 %v11660_v55, %v2029_v60  ;;  %v2032_v0 = vadd.f32 %v11635_v61, %v10153_v34  ;;  %v13300_v34 = vld [vmem:[%s17653_s6 + $0x20] ss:$16 sps:$4 sm:$0xff]   ;;  %v13315_v60 = vld [vmem:[%s17653_s6 + $0x68] ss:$16 sps:$4 sm:$0xff]   ;;  %v13320_v61 = vld [vmem:[%s17653_s6 + $0x84] ss:$16 sps:$4 sm:$0xff]  }
 0x408   : > { %v13306_v55 = vld [vmem:[%s17653_s6 + $0x40] ss:$16 sps:$4 sm:$0xff]  }
 0x409   : > { %v2081_v1 = vadd.f32 %v11663_v62, %v2032_v0  ;;  %v13323_v62 = vld [vmem:[%s17653_s6 + $0x8c] ss:$16 sps:$4 sm:$0xff]   ;;  %v13321_v0 = vld [vmem:[%s17653_s6 + $0x88] ss:$16 sps:$4 sm:$0xff]  }
 0x416   : > { %v12423_v3 = vpop.f32.mrb[28].mxu0 }
 0x417   : > { %v2167_v5 = vpop.f32.mrb[29].mxu0 }
 0x418   : > { %v12424_v8 = vpop.f32.mrb[30].mxu0 }
 0x419   : > { %v11680_v2 = vpop.f32.mrb[20].mxu1  ;;  %v2170_v10 = vpop.f32.mrb[31].mxu0 }
 0x41a   : > { %v11681_v4 = vpop.f32.mrb[21].mxu1 }
 0x41b   : > { %v11682_v6 = vadd.f32 %v11681_v4, %v11680_v2  ;;  %v11683_v7 = vpop.f32.mrb[22].mxu1  ;;  %v13329_v2 = vld [vmem:[%s17653_s6 + $0xac] ss:$16 sps:$4 sm:$0xff]   ;;  %v13327_v4 = vld [vmem:[%s17653_s6 + $0xa8] ss:$16 sps:$4 sm:$0xff]  }
 0x41c   : > { %v11684_v9 = vpop.f32.mrb[23].mxu1 }
 0x41d   : > { %v2119_v11 = vadd.f32 %v11682_v6, %v2070_v46  ;;  %v11685_v12 = vadd.f32 %v11684_v9, %v11683_v7  ;;  %v13330_v6 = vld [vmem:[%s17653_s6 + $0xc0] ss:$16 sps:$4 sm:$0xff]   ;;  %v13333_v7 = vld [vmem:[%s17653_s6 + $0xc8] ss:$16 sps:$4 sm:$0xff]   ;;  %v13338_v9 = vld [vmem:[%s17653_s6 + $0xe4] ss:$16 sps:$4 sm:$0xff]  }
 0x41f   : > { %v2168_v13 = vadd.f32 %v2167_v5, %v2119_v11  ;;  %v2122_v14 = vadd.f32 %v11685_v12, %v2073_v48  ;;  %v13297_v48 = vld [vmem:[%s17653_s6 + $0x8] ss:$16 sps:$4 sm:$0xff]   ;;  %v13332_v5 = vld [vmem:[%s17653_s6 + $0xc4] ss:$16 sps:$4 sm:$0xff]   ;;  %v17682_v11 = vmov 0  }
 0x420   : > { %v13336_v12 = vld [vmem:[%s17653_s6 + $0xe0] ss:$16 sps:$4 sm:$0xff]  }
 0x421   : > { %v2171_v15 = vadd.f32 %v2170_v10, %v2122_v14  ;;  %v11686_v16 = vpop.f32.mrb[24].mxu1  ;;  %v13341_v10 = vld [vmem:[%s17653_s6 + $0xec] ss:$16 sps:$4 sm:$0xff]  }
 0x422   : > { %v11687_v18 = vpop.f32.mrb[25].mxu1 }
 0x423   : > { %v2200_v21 = vpack.c.bf16 %v2171_v15, %v2168_v13  ;;  %v11688_v23 = vadd.f32 %v11687_v18, %v11686_v16  ;;  %v11689_v24 = vpop.f32.mrb[26].mxu1 }
 0x424   : > { %v11690_v25 = vpop.f32.mrb[27].mxu1 }
 0x425   : > { %v2127_v26 = vadd.f32 %v11688_v23, %v2078_v63  ;;  %v11691_v19 = vadd.f32 %v11690_v25, %v11689_v24  ;;  %12441 = vmatprep.mubr.bf16.mxu1 %v2200_v21  ;;  %v13318_v63 = vld [vmem:[%s17653_s6 + $0x80] ss:$16 sps:$4 sm:$0xff]  }
 0x427   : > { %v2176_v17 = vadd.f32 %v12423_v3, %v2127_v26  ;;  %v2130_v20 = vadd.f32 %v11691_v19, %v2081_v1  ;;  %v13326_v1 = vld [vmem:[%s17653_s6 + $0xa4] ss:$16 sps:$4 sm:$0xff]   ;;  %v13324_v3 = vld [vmem:[%s17653_s6 + $0xa0] ss:$16 sps:$4 sm:$0xff]  }
 0x428   : > { %v10218_v19 = vld [vmem:[%s17725_s0 + $0x4] ss:$0 sm:$0xff] }
 0x429   : > { %v2179_v29 = vadd.f32 %v12424_v8, %v2130_v20  ;;  %v13335_v8 = vld [vmem:[%s17653_s6 + $0xcc] ss:$16 sps:$4 sm:$0xff]  }
 0x42b   : > { %v2201_v30 = vpack.c.bf16 %v2179_v29, %v2176_v17 }
 0x42d   : > { %12442 = vmatmul.mubr.bf16.vlgmr.msra.gmra.mrb[28].mxu1 %v2201_v30 }
 0x42e   : > { %2599 = vmatpush1.bf16.msra.mxu1 %v13294_v22  ;;  %2630 = vmatprep.mubr.bf16.mxu1 %v17682_v11 }
 0x42f   : > { %2600 = vmatprep.subr.bf16.mxu1 %v13302_v33 }
 0x432   : > { %2601 = vmatpush1.bf16.msra.mxu1 %v13300_v34  ;;  %v10219_v34 = vld [vmem:[%s17725_s0 + $0x5] ss:$0 sm:$0xff] }
 0x433   : > { %2602 = vmatprep.subr.bf16.mxu1 %v13308_v53  ;;  %v13350_v53 = vld [vmem:[%s17654_s7 + $0x50] sm:$0xff]  }
 0x436   : > { %2603 = vmatpush1.bf16.msra.mxu1 %v13306_v55  ;;  %v13352_v55 = vld [vmem:[%s17654_s7 + $0x10] sm:$0xff]  }
 0x437   : > { %2604 = vmatprep.subr.bf16.mxu1 %v13314_v57  ;;  %v13354_v57 = vld [vmem:[%s17654_s7 + $0x58] sm:$0xff]  }
 0x43a   : > { %2605 = vmatpush1.bf16.msra.mxu1 %v13312_v59  ;;  %v13356_v59 = vld [vmem:[%s17654_s7 + $0x18] sm:$0xff]  }
 0x43b   : > { %2606 = vmatprep.subr.bf16.mxu1 %v13320_v61  ;;  %v13358_v61 = vld [vmem:[%s17654_s7 + $0x60] sm:$0xff]  }
 0x43e   : > { %2607 = vmatpush1.bf16.msra.mxu1 %v13318_v63  ;;  %v13360_v63 = vld [vmem:[%s17654_s7 + $0x20] sm:$0xff]  }
 0x43f   : > { %2608 = vmatprep.subr.bf16.mxu1 %v13326_v1  ;;  %v2418_v1 = vlaneseq }
 0x442   : > { %2609 = vmatpush1.bf16.msra.mxu1 %v13324_v3  ;;  %v13363_v3 = vld [vmem:[%s17654_s7 + $0xe8] sm:$0xff]  }
 0x443   : > { %2610 = vmatprep.subr.bf16.mxu1 %v13332_v5  ;;  %v13365_v5 = vld [vmem:[%s17654_s7 + $0xa8] sm:$0xff]  }
 0x446   : > { %2611 = vmatpush1.bf16.msra.mxu1 %v13330_v6  ;;  %v2419_v6 = vshrl.u32 %v2418_v1, 7 }
 0x447   : > { %2612 = vmatprep.subr.bf16.mxu1 %v13338_v9  ;;  %v13368_v9 = vld [vmem:[%s17654_s7 + $0x30] sm:$0xff]  }
 0x44a   : > { %2613 = vmatpush1.bf16.msra.mxu1 %v13336_v12  ;;  %v2416_v12 = vld [vmem:[%s17728_s20] ss:$4 sm:$0xf] }
 0x500   : > { %v12443_v35 = vpop.f32.mrb[28].mxu1 }
 0x501   : > { %v2284_v36 = vpop.f32.mrb[29].mxu1  ;;  %v14757_v39 = vsub.f32 %v2176_v17, %v12443_v35 }
 0x502   : > { %v14755_v37 = vsub.f32 %v2168_v13, %v2284_v36  ;;  %v12444_v38 = vpop.f32.mrb[30].mxu1  ;;  %v13339_v13 = vld [vmem:[%s17653_s6 + $0xe8] ss:$16 sps:$4 sm:$0xff]  }
 0x503   : > { %v14759_v40 = vsub.f32 %v2179_v29, %v12444_v38  ;;  %v2287_v41 = vpop.f32.mrb[31].mxu1  ;;  %v2305_v46 = vmul.f32 %v14757_v39, %v14757_v39 }
 0x504   : > { %v14761_v42 = vsub.f32 %v2171_v15, %v2287_v41  ;;  %v2303_v44 = vmul.f32 %v14755_v37, %v14755_v37 }
 0x505   : > { %v2306_v43 = vmul.f32 %v14759_v40, %v14759_v40 }
 0x506   : > { %v2304_v45 = vmul.f32 %v14761_v42, %v14761_v42 }
 0x507   : > { %v2308_v50 = vpack.c.bf16 %v2306_v43, %v2305_v46 }
 0x508   : > { %v2307_v47 = vpack.c.bf16 %v2304_v45, %v2303_v44 }
 0x50a   : > { %12461 = vmatprep.mubr.bf16.mxu0 %v2307_v47  ;;  %v13345_v47 = vld [vmem:[%s17654_s7 + $0x80] sm:$0xff]  }
 0x50b   : > { %12462 = vmatmul.mubr.bf16.vlgmr.msra.gmra.mrb[32].mxu0 %v2308_v50  ;;  %v13347_v50 = vld [vmem:[%s17654_s7 + $0xc8] sm:$0xff]  }
 0x50c   : > { %2652 = vmatpush1.bf16.msra.mxu0 %v13297_v48  ;;  %2683 = vmatprep.mubr.bf16.mxu0 %v17682_v11  ;;  %v13346_v48 = vld [vmem:[%s17654_s7 + $0x48] sm:$0xff]  }
 0x50d   : > { %2653 = vmatprep.subr.bf16.mxu0 %v13305_v51  ;;  %v13348_v51 = vld [vmem:[%s17654_s7 + $0x8] sm:$0xff]  }
 0x510   : > { %2654 = vmatpush1.bf16.msra.mxu0 %v13303_v52  ;;  %v13349_v52 = vld [vmem:[%s17654_s7 + $0x88] sm:$0xff]  }
 0x511   : > { %2655 = vmatprep.subr.bf16.mxu0 %v13311_v54  ;;  %v13351_v54 = vld [vmem:[%s17654_s7 + $0xd0] sm:$0xff]  }
 0x514   : > { %2656 = vmatpush1.bf16.msra.mxu0 %v13309_v56  ;;  %v13353_v56 = vld [vmem:[%s17654_s7 + $0x90] sm:$0xff]  }
 0x515   : > { %2657 = vmatprep.subr.bf16.mxu0 %v13317_v58  ;;  %v13355_v58 = vld [vmem:[%s17654_s7 + $0xd8] sm:$0xff]  }
 0x518   : > { %2658 = vmatpush1.bf16.msra.mxu0 %v13315_v60  ;;  %v13357_v60 = vld [vmem:[%s17654_s7 + $0x98] sm:$0xff]  }
 0x519   : > { %2659 = vmatprep.subr.bf16.mxu0 %v13323_v62  ;;  %v13359_v62 = vld [vmem:[%s17654_s7 + $0xe0] sm:$0xff]  }
 0x51c   : > { %2660 = vmatpush1.bf16.msra.mxu0 %v13321_v0  ;;  %v13361_v0 = vld [vmem:[%s17654_s7 + $0xa0] sm:$0xff]  }
 0x51d   : > { %2661 = vmatprep.subr.bf16.mxu0 %v13329_v2  ;;  %v13362_v2 = vld [vmem:[%s17654_s7 + $0x68] sm:$0xff]  }
 0x520   : > { %2662 = vmatpush1.bf16.msra.mxu0 %v13327_v4  ;;  %v13364_v4 = vld [vmem:[%s17654_s7 + $0x28] sm:$0xff]  }
 0x521   : > { %2663 = vmatprep.subr.bf16.mxu0 %v13335_v8  ;;  %v13367_v8 = vld [vmem:[%s17654_s7 + $0xf0] sm:$0xff]  }
 0x524   : > { %2664 = vmatpush1.bf16.msra.mxu0 %v13333_v7  ;;  %v13366_v7 = vld [vmem:[%s17654_s7 + $0x70] sm:$0xff]  }
 0x525   : > { %2665 = vmatprep.subr.bf16.mxu0 %v13341_v10  ;;  %v13369_v10 = vld [vmem:[%s17654_s7 + $0xb0] sm:$0xff]  }
 0x528   : > { %2666 = vmatpush1.bf16.msra.mxu0 %v13339_v13  ;;  %v14953_v13 = vsub.s32 0, %v2419_v6 }
 0x52a   : > { %17729 = vst [vmem:[#allocation16_spill] sm:$0xff] %v14953_v13 }
 0x5de   : > { %v12463_v14 = vpop.f32.mrb[32].mxu0 }
 0x5df   : > { %v2352_v15 = vadd.f32 1e-06, %v12463_v14  ;;  %v2343_v16 = vpop.f32.mrb[33].mxu0  ;;  %v14955_v14 = vsub.s32 2, %v2419_v6 }
 0x5e0   : > { %v2344_v18 = vadd.f32 1e-06, %v2343_v16  ;;  %v12464_v21 = vpop.f32.mrb[34].mxu0  ;;  %v14959_v16 = vsub.s32 3, %v2419_v6 }
 0x5e1   : > { %13862 = vrsqrt.f32 %v2352_v15  ;;  %v2355_v23 = vadd.f32 1e-06, %v12464_v21  ;;  %v2346_v24 = vpop.f32.mrb[35].mxu0  ;;  %17730 = vst [vmem:[#allocation17_spill] sm:$0xff] %v14955_v14  ;;  %v14957_v15 = vsub.s32 1, %v2419_v6  ;;  %v13371_v21 = vld [vmem:[%s17654_s7 + $0xf8] sm:$0xff]  }
 0x5e2   : > { %13864 = vrsqrt.f32 %v2344_v18  ;;  %v2347_v25 = vadd.f32 1e-06, %v2346_v24  ;;  %17732 = vst [vmem:[#allocation19_spill] sm:$0xff] %v14959_v16  ;;  %v13370_v18 = vld [vmem:[%s17654_s7 + $0x78] sm:$0xff]  }
 0x5e3   : > { %13866 = vrsqrt.f32 %v2355_v23  ;;  %17731 = vst [vmem:[#allocation18_spill] sm:$0xff] %v14957_v15  ;;  %v13372_v23 = vld [vmem:[%s17654_s7 + $0x38] sm:$0xff]  }
 0x5e4   : > { %13868 = vrsqrt.f32 %v2347_v25  ;;  %v13373_v24 = vld [vmem:[%s17654_s7 + $0xb8] sm:$0xff]   ;;  %v14974_v25 = vrot.slane %v2416_v12, %v14953_v13 }
 0x5eb   : > { %v13863_v26 = vpop.eup %13862 }
 0x5ec   : > { %v13865_v17 = vpop.eup %13864  ;;  %v2364_v20 = vmul.f32 %v13863_v26, %v14757_v39  ;;  %v14977_v26 = vrot.slane %v2416_v12, %v14955_v14 }
 0x5ed   : > { %v13867_v29 = vpop.eup %13866  ;;  %v2362_v30 = vmul.f32 %v13865_v17, %v14755_v37  ;;  %v13342_v37 = vld [vmem:[%s17654_s7 + $0x40] sm:$0xff]   ;;  %v14983_v17 = vrot.slane %v2416_v12, %v14959_v16 }
 0x5ee   : > { %v13869_v22 = vpop.eup %13868  ;;  %v2365_v31 = vmul.f32 %v13867_v29, %v14759_v40  ;;  %v2372_v32 = vmul.f32 %v10218_v19, %v2364_v20  ;;  %v13343_v40 = vld [vmem:[%s17654_s7 + $0xc0] sm:$0xff]   ;;  %11722 = vmatprep.subr.bf16.mxu1 %v13342_v37 }
 0x5ef   : > { %v2363_v33 = vmul.f32 %v13869_v22, %v14761_v42  ;;  %v2370_v35 = vmul.f32 %v10218_v19, %v2362_v30  ;;  %v13344_v42 = vld [vmem:[%s17654_s7] sm:$0xff]   ;;  %11750 = vmatprep.subr.bf16.mxu0 %v13343_v40 }
 0x5f0   : > { %v2373_v36 = vmul.f32 %v10218_v19, %v2365_v31  ;;  %v2380_v41 = vadd.f32 %v10219_v34, %v2372_v32 }
 0x5f1   : > { %v2371_v38 = vmul.f32 %v10218_v19, %v2363_v33  ;;  %v2378_v44 = vadd.f32 %v10219_v34, %v2370_v35  ;;  %v14980_v19 = vrot.slane %v2416_v12, %v14957_v15 }
 0x5f2   : > { %v2381_v43 = vadd.f32 %v10219_v34, %v2373_v36 }
 0x5f3   : > { %v2379_v39 = vadd.f32 %v10219_v34, %v2371_v38 }
 0x5f4   : > { %v2415_v45 = vpack.c.bf16 %v2381_v43, %v2380_v41 }
 0x5f5   : > { %v2414_v46 = vpack.c.bf16 %v2379_v39, %v2378_v44 }
 0x5f7   : > { %2631 = vmatmul.mubr.bf16.vlgmr.msra.gmra.mrb[32].mxu1 %v2414_v46  ;;  %2684 = vmatmul.mubr.bf16.vlgmr.msra.gmra.mrb[36].mxu0 %v2414_v46 }
 0x5f8   : > { %2640 = vmatprep.mubr.bf16.mxu1 %v17682_v11  ;;  %2693 = vmatprep.mubr.bf16.mxu0 %v17682_v11 }
 0x5f9   : > { %11723 = vmatpush3.bf16.msra.mxu1 %v13344_v42  ;;  %11751 = vmatpush3.bf16.msra.mxu0 %v13345_v47 }
 0x5fa   : > { %11724 = vmatprep.subr.bf16.mxu1 %v13346_v48  ;;  %11752 = vmatprep.subr.bf16.mxu0 %v13347_v50 }
 0x5fd   : > { %11725 = vmatpush3.bf16.msra.mxu1 %v13348_v51  ;;  %11753 = vmatpush3.bf16.msra.mxu0 %v13349_v52 }
 0x5fe   : > { %11726 = vmatprep.subr.bf16.mxu1 %v13350_v53  ;;  %11754 = vmatprep.subr.bf16.mxu0 %v13351_v54 }
 0x5ff   : > { %2641 = vmatmul.mubr.bf16.gmra.mrb[36].mxu1 %v2415_v45  ;;  %2694 = vmatmul.mubr.bf16.gmra.mrb[40].mxu0 %v2415_v45 }
 0x601   : > { %11727 = vmatpush3.bf16.msra.mxu1 %v13352_v55  ;;  %11755 = vmatpush3.bf16.msra.mxu0 %v13353_v56 }
 0x602   : > { %11728 = vmatprep.subr.bf16.mxu1 %v13354_v57  ;;  %11756 = vmatprep.subr.bf16.mxu0 %v13355_v58 }
 0x605   : > { %11729 = vmatpush3.bf16.msra.mxu1 %v13356_v59  ;;  %11757 = vmatpush3.bf16.msra.mxu0 %v13357_v60 }
 0x606   : > { %11730 = vmatprep.subr.bf16.mxu1 %v13358_v61  ;;  %11758 = vmatprep.subr.bf16.mxu0 %v13359_v62 }
 0x609   : > { %11731 = vmatpush3.bf16.msra.mxu1 %v13360_v63  ;;  %11759 = vmatpush3.bf16.msra.mxu0 %v13361_v0 }
 0x60a   : > { %11732 = vmatprep.subr.bf16.mxu1 %v13362_v2  ;;  %11760 = vmatprep.subr.bf16.mxu0 %v13363_v3 }
 0x60d   : > { %11733 = vmatpush3.bf16.msra.mxu1 %v13364_v4  ;;  %11761 = vmatpush3.bf16.msra.mxu0 %v13365_v5 }
 0x60e   : > { %11734 = vmatprep.subr.bf16.mxu1 %v13366_v7  ;;  %11762 = vmatprep.subr.bf16.mxu0 %v13367_v8 }
 0x611   : > { %11735 = vmatpush3.bf16.msra.mxu1 %v13368_v9  ;;  %11763 = vmatpush3.bf16.msra.mxu0 %v13369_v10 }
 0x612   : > { %11736 = vmatprep.subr.bf16.mxu1 %v13370_v18  ;;  %11764 = vmatprep.subr.bf16.mxu0 %v13371_v21 }
 0x615   : > { %11737 = vmatpush3.bf16.msra.mxu1 %v13372_v23  ;;  %11765 = vmatpush3.bf16.msra.mxu0 %v13373_v24 }
 0x616   : > { %12465 = vmatprep.subr.bf16.mxu1 %v14710_v27  ;;  %12485 = vmatprep.subr.bf16.mxu0 %v14710_v27 }
 0x6ca   : > { %v2632_v20 = vpop.f32.mrb[32].mxu1  ;;  %v2685_v29 = vpop.f32.mrb[36].mxu0 }
 0x6cb   : > { %v2633_v30 = vadd.f32 %v2632_v20, %v14974_v25  ;;  %v14989_v22 = vadd.f32 %v2685_v29, %v14977_v26  ;;  %v2634_v31 = vpop.f32.mrb[33].mxu1  ;;  %v2687_v32 = vpop.f32.mrb[37].mxu0 }
 0x6cc   : > { %v14992_v33 = vadd.f32 %v2634_v31, %v14980_v19  ;;  %v14995_v34 = vadd.f32 %v2687_v32, %v14983_v17  ;;  %v2636_v35 = vpop.f32.mrb[34].mxu1  ;;  %v2689_v36 = vpop.f32.mrb[38].mxu0 }
 0x6cd   : > { %v14997_v38 = vmul.f32 0.70710677, %v2633_v30  ;;  %v15000_v27 = vmul.f32 0.70710677, %v14989_v22  ;;  %v2638_v46 = vpop.f32.mrb[35].mxu1  ;;  %v2691_v47 = vpop.f32.mrb[39].mxu0  ;;  %v15026_v57 = vadd.f32 %v2636_v35, %v14974_v25  ;;  %v15039_v63 = vadd.f32 %v2689_v36, %v14977_v26 }
 0x6ce   : > { %v15003_v41 = vmul.f32 0.70710677, %v14992_v33  ;;  %v15011_v45 = vmul.f32 0.70710677, %v14995_v34  ;;  %v15044_v2 = vadd.f32 %v2638_v46, %v14980_v19  ;;  %v15055_v10 = vadd.f32 %v2691_v47, %v14983_v17 }
 0x6cf   : > { %v2768_v43 = vand.u32 2147483647, %v14997_v38  ;;  %v2770_v44 = vand.u32 2147483647, %v15000_v27  ;;  %v15036_v62 = vmul.f32 0.70710677, %v15026_v57 }
 0x6d0   : > { %v15008_v39 = vand.u32 2147483647, %v15003_v41  ;;  %v15019_v53 = vand.u32 2147483647, %v15011_v45  ;;  %v15048_v4 = vmul.f32 0.70710677, %v15039_v63 }
 0x6d1   : > { %v2784_v37 = vmul.f32 0.3275911, %v2768_v43  ;;  %v2786_v40 = vmul.f32 0.3275911, %v2770_v44  ;;  %v2772_v3 = vand.u32 2147483647, %v15036_v62 }
 0x6d2   : > { %v2785_v42 = vmul.f32 0.3275911, %v15008_v39  ;;  %v15014_v51 = vpop.f32.mrb[36].mxu1  ;;  %v15016_v52 = vpop.f32.mrb[40].mxu0  ;;  %v2787_v60 = vmul.f32 0.3275911, %v15019_v53 }
 0x6d3   : > { %v2800_v48 = vadd.f32 1.0, %v2784_v37  ;;  %v2802_v50 = vadd.f32 1.0, %v2786_v40  ;;  %v15021_v54 = vpop.f32.mrb[37].mxu1  ;;  %v15023_v55 = vpop.f32.mrb[41].mxu0  ;;  %v2992_v5 = vsub.f32 0.0, %v2768_v43  ;;  %v2994_v12 = vsub.f32 0.0, %v2770_v44 }
 0x6d4   : > { %v2801_v56 = vadd.f32 1.0, %v2785_v42  ;;  %v15028_v58 = vpop.f32.mrb[38].mxu1  ;;  %v15030_v59 = vpop.f32.mrb[42].mxu0  ;;  %v2803_v1 = vadd.f32 1.0, %v2787_v60  ;;  %v2788_v6 = vmul.f32 0.3275911, %v2772_v3 }
 0x6d5   : > { %13870 = vrcp.f32 %v2800_v48  ;;  %v15033_v61 = vpop.f32.mrb[39].mxu1  ;;  %v15041_v0 = vpop.f32.mrb[43].mxu0  ;;  %v2774_v7 = vand.u32 2147483647, %v15048_v4  ;;  %v15052_v8 = vmul.f32 0.70710677, %v15044_v2  ;;  %v3008_v24 = vmul.f32 %v2992_v5, %v2768_v43 }
 0x6d6   : > { %13872 = vrcp.f32 %v2802_v50  ;;  %v2804_v9 = vadd.f32 1.0, %v2788_v6  ;;  %v15064_v29 = vmul.f32 0.5, %v2633_v30  ;;  %vm2736_vm0 = vcmp.ge.f32.partialorder %v14997_v38, 0.0 }
 0x6d7   : > { %13874 = vrcp.f32 %v2801_v56  ;;  %v2790_v18 = vmul.f32 0.3275911, %v2774_v7  ;;  %v15058_v21 = vand.u32 2147483647, %v15052_v8  ;;  %v2993_v46 = vsub.f32 0.0, %v15008_v39 }
 0x6d8   : > { %13876 = vrcp.f32 %v2803_v1  ;;  %v15072_v37 = vmul.f32 0.70710677, %v15055_v10  ;;  %v3010_v40 = vmul.f32 %v2994_v12, %v2770_v44  ;;  %v3024_v47 = vmul.f32 1.442695, %v3008_v24 }
 0x6d9   : > { %13878 = vrcp.f32 %v2804_v9  ;;  %v2806_v32 = vadd.f32 1.0, %v2790_v18  ;;  %v2789_v35 = vmul.f32 0.3275911, %v15058_v21  ;;  %v17686_v56 = vmov -1.0  }
 0x6da   : > { %v15077_v50 = vand.u32 2147483647, %v15072_v37  ;;  %v15080_v38 = vsel %vm2736_vm0, 1.0, %v17686_v56  ;;  %vm2738_vm1 = vcmp.ge.f32.partialorder %v15000_v27, 0.0  ;;  %v2996_v5 = vsub.f32 0.0, %v2772_v3 }
 0x6db   : > { %13880 = vrcp.f32 %v2806_v32  ;;  %v2805_v42 = vadd.f32 1.0, %v2789_v35  ;;  %v3028_v18 = vmul.f32 1.442695, %v3010_v40  ;;  %v3009_v24 = vmul.f32 %v2993_v46, %v15008_v39 }
 0x6dc   : > { %v2791_v6 = vmul.f32 0.3275911, %v15077_v50  ;;  %v2998_v35 = vsub.f32 0.0, %v2774_v7  ;;  %vm2740_vm2 = vcmp.ge.f32.partialorder %v15036_v62, 0.0  ;;  %vm2742_vm3 = vcmp.ge.f32.partialorder %v15048_v4, 0.0 }
 0x6dd   : > { %13882 = vrcp.f32 %v2805_v42  ;;  %v15095_v42 = vsel %vm2738_vm1, 1.0, %v17686_v56  ;;  %vm2737_vm4 = vcmp.ge.f32.partialorder %v15003_v41, 0.0  ;;  %vm2741_vm5 = vcmp.ge.f32.partialorder %v15052_v8, 0.0 }
 0x6de   : > { %13884 = vpow2.f32 %v3024_v47  ;;  %v3012_v47 = vmul.f32 %v2996_v5, %v2772_v3  ;;  %v15231_v41 = vmul.f32 0.5, %v14995_v34  ;;  %vm2743_vm6 = vcmp.ge.f32.partialorder %v15072_v37, 0.0 }
 0x6df   : > { %v15060_v23 = vpop.eup %13870  ;;  %vm2739_vm7 = vcmp.ge.f32.partialorder %v15011_v45, 0.0  ;;  %vm14110_vm0 = vmmov 0  }
 0x6e0   : > { %v15062_v20 = vpop.eup %13872  ;;  %v2848_v31 = vmul.f32 1.0614054, %v15060_v23 }
 0x6e1   : > { %v2850_v36 = vmul.f32 1.0614054, %v15062_v20  ;;  %v15074_v30 = vpop.eup %13874 }
 0x6e2   : > { %v2864_v43 = vadd.f32 -1.4531521, %v2848_v31  ;;  %v2849_v1 = vmul.f32 1.0614054, %v15074_v30  ;;  %v15087_v9 = vpop.eup %13876  ;;  %v2995_v31 = vsub.f32 0.0, %v15019_v53 }
 0x6e3   : > { %v2866_v48 = vadd.f32 -1.4531521, %v2850_v36  ;;  %v2807_v36 = vadd.f32 1.0, %v2791_v6  ;;  %v15101_v40 = vpop.eup %13878  ;;  %v2851_v46 = vmul.f32 1.0614054, %v15087_v9 }
 0x6e4   : > { %v2880_v60 = vmul.f32 %v15060_v23, %v2864_v43  ;;  %v3026_v6 = vmul.f32 1.442695, %v3009_v24  ;;  %v2852_v27 = vmul.f32 1.0614054, %v15101_v40 }
 0x6e5   : > { %v2882_v44 = vmul.f32 %v15062_v20, %v2866_v48  ;;  %v2865_v48 = vadd.f32 -1.4531521, %v2849_v1  ;;  %13886 = vrcp.f32 %v2807_v36  ;;  %v15108_v1 = vmul.f32 0.5, %v15026_v57  ;;  %v15110_v49 = vpop.eup %13880 }
 0x6e6   : > { %v2896_v12 = vadd.f32 1.4214138, %v2880_v60  ;;  %v15099_v60 = vadd.f32 %v15014_v51, %v14974_v25  ;;  %13888 = vpow2.f32 %v3028_v18  ;;  %v3014_v51 = vmul.f32 %v2998_v35, %v2774_v7 }
 0x6e7   : > { %v2898_v32 = vadd.f32 1.4214138, %v2882_v44  ;;  %v2881_v56 = vmul.f32 %v15074_v30, %v2865_v48  ;;  %v2868_v3 = vadd.f32 -1.4531521, %v2852_v27  ;;  %v2867_v24 = vadd.f32 -1.4531521, %v2851_v46  ;;  %v15121_v35 = vpop.eup %13882 }
 0x6e8   : > { %v2912_v43 = vmul.f32 %v15060_v23, %v2896_v12  ;;  %17733 = vst [vmem:[#allocation20_spill] sm:$0xff] %v15099_v60  ;;  %v3011_v12 = vmul.f32 %v2995_v31, %v15019_v53  ;;  %v15115_v5 = vmul.f32 0.70710677, %v15099_v60  ;;  %v3032_v31 = vmul.f32 1.442695, %v3012_v47  ;;  %v13885_v46 = vpop.eup %13884 }
 0x6e9   : > { %v2914_v39 = vmul.f32 %v15062_v20, %v2898_v32  ;;  %v2854_v18 = vmul.f32 1.0614054, %v15110_v49  ;;  %v2884_v7 = vmul.f32 %v15101_v40, %v2868_v3  ;;  %v2897_v27 = vadd.f32 1.4214138, %v2881_v56 }
 0x6ea   : > { %v2928_v44 = vadd.f32 -0.28449672, %v2912_v43  ;;  %17734 = vst [vmem:[#allocation21_spill] sm:$0xff] %v15115_v5  ;;  %v3030_v57 = vmul.f32 1.442695, %v3011_v12  ;;  %v2883_v47 = vmul.f32 %v15087_v9, %v2867_v24  ;;  %13890 = vpow2.f32 %v3032_v31 }
 0x6eb   : > { %v2930_v11 = vadd.f32 -0.28449672, %v2914_v39  ;;  %v2870_v48 = vadd.f32 -1.4531521, %v2854_v18  ;;  %v3036_v39 = vmul.f32 1.442695, %v3014_v51  ;;  %v2913_v31 = vmul.f32 %v15074_v30, %v2897_v27 }
 0x6ec   : > { %v2944_v32 = vmul.f32 %v15060_v23, %v2928_v44  ;;  %v2900_v16 = vadd.f32 1.4214138, %v2884_v7  ;;  %v17735_v18 = vmov -1.0  }
 0x6ed   : > { %v2946_v53 = vmul.f32 %v15062_v20, %v2930_v11  ;;  %v15125_v11 = vand.u32 2147483647, %v15115_v5  ;;  %v2886_v12 = vmul.f32 %v15110_v49, %v2870_v48  ;;  %13892 = vpow2.f32 %v3036_v39 }
 0x6ee   : > { %v2960_v36 = vadd.f32 0.2548296, %v2944_v32  ;;  %v2853_v32 = vmul.f32 1.0614054, %v15121_v35  ;;  %v2916_v51 = vmul.f32 %v15101_v40, %v2900_v16  ;;  %v2899_v16 = vadd.f32 1.4214138, %v2883_v47 }
 0x6ef   : > { %v2962_v43 = vadd.f32 0.2548296, %v2946_v53  ;;  %v15133_v56 = vpop.eup %13886  ;;  %v2902_v7 = vadd.f32 1.4214138, %v2886_v12  ;;  %13894 = vpow2.f32 %v3026_v6  ;;  %v2929_v28 = vadd.f32 -0.28449672, %v2913_v31 }
 0x6f0   : > { %v2976_v44 = vmul.f32 %v15060_v23, %v2960_v36  ;;  %v2997_v23 = vsub.f32 0.0, %v15058_v21  ;;  %v2756_v36 = vsel %vm2740_vm2, 1.0, %v17735_v18  ;;  %v2869_v24 = vadd.f32 -1.4531521, %v2853_v32 }
 0x6f1   : > { %v2978_v53 = vmul.f32 %v15062_v20, %v2962_v43  ;;  %v2932_v48 = vadd.f32 -0.28449672, %v2916_v51  ;;  %v2792_v20 = vmul.f32 0.3275911, %v15125_v11  ;;  %v13889_v43 = vpop.eup %13888  ;;  %v2855_v14 = vmul.f32 1.0614054, %v15133_v56 }
 0x6f2   : > { %v3056_v3 = vmul.f32 %v13885_v46, %v2976_v44  ;;  %v2999_v44 = vsub.f32 0.0, %v15077_v50  ;;  %v2918_v46 = vmul.f32 %v15110_v49, %v2902_v7  ;;  %v2885_v15 = vmul.f32 %v15121_v35, %v2869_v24 }
 0x6f3   : > { %v3058_v13 = vmul.f32 %v13889_v43, %v2978_v53  ;;  %v2948_v39 = vmul.f32 %v15101_v40, %v2932_v48  ;;  %v3013_v12 = vmul.f32 %v2997_v23, %v15058_v21  ;;  %v2871_v51 = vadd.f32 -1.4531521, %v2855_v14 }
 0x6f4   : > { %v3072_v62 = vsub.f32 1.0, %v3056_v3  ;;  %v2934_v27 = vadd.f32 -0.28449672, %v2918_v46  ;;  %v2901_v32 = vadd.f32 1.4214138, %v2885_v15  ;;  %v3015_v47 = vmul.f32 %v2999_v44, %v15077_v50  ;;  %v13891_v15 = vpop.eup %13890 }
 0x6f5   : > { %v2964_v5 = vadd.f32 0.2548296, %v2948_v39  ;;  %v2808_v60 = vadd.f32 1.0, %v2792_v20  ;;  %v2915_v7 = vmul.f32 %v15087_v9, %v2899_v16  ;;  %v2887_v53 = vmul.f32 %v15133_v56, %v2871_v51 }
 0x6f6   : > { %v2950_v24 = vmul.f32 %v15110_v49, %v2934_v27  ;;  %v2917_v3 = vmul.f32 %v15121_v35, %v2901_v32  ;;  %v3074_v48 = vsub.f32 1.0, %v3058_v13  ;;  %13896 = vpow2.f32 %v3030_v57 }
 0x6f7   : > { %v2980_v21 = vmul.f32 %v15101_v40, %v2964_v5  ;;  %v3034_v6 = vmul.f32 1.442695, %v3013_v12  ;;  %v3088_v14 = vmul.f32 %v3072_v62, %v15080_v38  ;;  %v2903_v50 = vadd.f32 1.4214138, %v2887_v53  ;;  %v13893_v16 = vpop.eup %13892 }
 0x6f8   : > { %v2966_v23 = vadd.f32 0.2548296, %v2950_v24  ;;  %v2933_v31 = vadd.f32 -0.28449672, %v2917_v3  ;;  %v3038_v20 = vmul.f32 1.442695, %v3015_v47  ;;  %13898 = vrcp.f32 %v2808_v60 }
 0x6f9   : > { %v3060_v44 = vmul.f32 %v13891_v15, %v2980_v21  ;;  %v15155_v43 = vadd.f32 %v15016_v52, %v14977_v26  ;;  %v2945_v13 = vmul.f32 %v15074_v30, %v2929_v28  ;;  %v2931_v57 = vadd.f32 -0.28449672, %v2915_v7  ;;  %v13895_v27 = vpop.eup %13894 }
 0x6fa   : > { %v2982_v40 = vmul.f32 %v15110_v49, %v2966_v23  ;;  %v2919_v5 = vmul.f32 %v15133_v56, %v2903_v50  ;;  %v2949_v38 = vmul.f32 %v15121_v35, %v2933_v31  ;;  %13900 = vpow2.f32 %v3034_v6 }
 0x6fb   : > { %v3076_v46 = vsub.f32 1.0, %v3060_v44  ;;  %v3104_v62 = vadd.f32 1.0, %v3088_v14  ;;  %v3090_v60 = vmul.f32 %v3074_v48, %v15095_v42  ;;  %13902 = vpow2.f32 %v3038_v20 }
 0x6fc   : > { %v3062_v39 = vmul.f32 %v13893_v16, %v2982_v40  ;;  %v2935_v52 = vadd.f32 -0.28449672, %v2919_v5  ;;  %v15164_v28 = vmul.f32 0.70710677, %v15155_v43  ;;  %v15168_v49 = vadd.f32 %v15021_v54, %v14980_v19 }
 0x6fd   : > { %v3092_v12 = vmul.f32 %v3076_v46, %v2756_v36  ;;  %v2961_v32 = vadd.f32 0.2548296, %v2945_v13  ;;  %v2947_v51 = vmul.f32 %v15087_v9, %v2931_v57  ;;  %v2758_v42 = vsel %vm2742_vm3, 1.0, %v17735_v18 }
 0x6fe   : > { %v3078_v47 = vsub.f32 1.0, %v3062_v39  ;;  %v2951_v7 = vmul.f32 %v15133_v56, %v2935_v52  ;;  %v2965_v36 = vadd.f32 0.2548296, %v2949_v38  ;;  %v15176_v3 = vand.u32 2147483647, %v15164_v28 }
 0x6ff   : > { %v3108_v24 = vadd.f32 1.0, %v3092_v12  ;;  %v15179_v53 = vmul.f32 %v3104_v62, %v15064_v29  ;;  %v2706_v54 = vmul.f32 0.5, %v14989_v22  ;;  %v3106_v48 = vadd.f32 1.0, %v3090_v60 }
 0x700   : > { %v3094_v21 = vmul.f32 %v3078_v47, %v2758_v42  ;;  %v13897_v6 = vpop.eup %13896  ;;  %v2967_v14 = vadd.f32 0.2548296, %v2951_v7  ;;  %v2794_v23 = vmul.f32 0.3275911, %v15176_v3  ;;  %v15187_v4 = vmul.f32 0.70710677, %v15168_v49 }
 0x701   : > { %v15183_v15 = vmul.f32 %v3108_v24, %v15108_v1  ;;  %v2977_v31 = vmul.f32 %v15074_v30, %v2961_v32  ;;  %v2963_v50 = vadd.f32 0.2548296, %v2947_v51  ;;  %v2710_v29 = vmul.f32 0.5, %v15039_v63 }
 0x702   : > { %v3110_v44 = vadd.f32 1.0, %v3094_v21  ;;  %v15191_v20 = vpop.eup %13898  ;;  %v2981_v1 = vmul.f32 %v15121_v35, %v2965_v36  ;;  %v2810_v16 = vadd.f32 1.0, %v2794_v23  ;;  %v15196_v13 = vmul.f32 %v3106_v48, %v2706_v54 }
 0x703   : > { %v3200_v22 = vpack.c.bf16 %v15183_v15, %v15179_v53  ;;  %v2856_v40 = vmul.f32 1.0614054, %v15191_v20  ;;  %v2983_v30 = vmul.f32 %v15133_v56, %v2967_v14  ;;  %v15203_v63 = vand.u32 2147483647, %v15187_v4 }
 0x704   : > { %v15198_v57 = vmul.f32 %v3110_v44, %v2710_v29  ;;  %v13901_v5 = vpop.eup %13900  ;;  %13904 = vrcp.f32 %v2810_v16  ;;  %v15207_v46 = vadd.f32 %v15023_v55, %v14983_v17  ;;  %v3057_v38 = vmul.f32 %v13895_v27, %v2977_v31 }
 0x705   : > { %v2979_v35 = vmul.f32 %v15087_v9, %v2963_v50  ;;  %v13903_v60 = vpop.eup %13902  ;;  %v3061_v39 = vmul.f32 %v13901_v5, %v2981_v1  ;;  %v2793_v52 = vmul.f32 0.3275911, %v15203_v63  ;;  %v2705_v56 = vmul.f32 0.5, %v14992_v33 }
 0x706   : > { %v3202_v62 = vpack.c.bf16 %v15198_v57, %v15196_v13  ;;  %v2872_v12 = vadd.f32 -1.4531521, %v2856_v40  ;;  %v15216_v32 = vmul.f32 0.70710677, %v15207_v46  ;;  %v3063_v55 = vmul.f32 %v13903_v60, %v2983_v30  ;;  %v14032_v13 = vld [vmem:[%s17724_s22 + $0x10] sm:$0xff]  }
 0x707   : > { %v2809_v51 = vadd.f32 1.0, %v2793_v52  ;;  %v15220_v9 = vadd.f32 %v15028_v58, %v14974_v25  ;;  %v15224_v27 = vadd.f32 %v15030_v59, %v14977_v26  ;;  %v3073_v47 = vsub.f32 1.0, %v3057_v38  ;;  %v17737_v57 = vld [vmem:[#allocation21_spill] sm:$0xff] }
 0x708   : > { %v3059_v7 = vmul.f32 %v13897_v6, %v2979_v35  ;;  %v15228_v33 = vand.u32 2147483647, %v15216_v32  ;;  %v3077_v24 = vsub.f32 1.0, %v3061_v39  ;;  %v2753_v25 = vsel %vm2737_vm4, 1.0, %v17735_v18 }
 0x709   : > { %13906 = vrcp.f32 %v2809_v51  ;;  %v2888_v26 = vmul.f32 %v15191_v20, %v2872_v12  ;;  %v2757_v59 = vsel %vm2741_vm5, 1.0, %v17735_v18  ;;  %v3079_v8 = vsub.f32 1.0, %v3063_v55 }
 0x70a   : > { %v2795_v58 = vmul.f32 0.3275911, %v15228_v33  ;;  %v15240_v42 = vmul.f32 0.70710677, %v15220_v9  ;;  %v15243_v34 = vmul.f32 0.70710677, %v15224_v27  ;;  %v3089_v36 = vmul.f32 %v3073_v47, %v2753_v25 }
 0x70b   : > { %v3075_v37 = vsub.f32 1.0, %v3059_v7  ;;  %v2759_v54 = vsel %vm2743_vm6, 1.0, %v17735_v18  ;;  %v3093_v6 = vmul.f32 %v3077_v24, %v2757_v59  ;;  %v3000_v14 = vsub.f32 0.0, %v15125_v11 }
 0x70c   : > { %v2811_v48 = vadd.f32 1.0, %v2795_v58  ;;  %v2780_v23 = vand.u32 2147483647, %v15240_v42  ;;  %v15251_v31 = vand.u32 2147483647, %v15243_v34  ;;  %v15256_v44 = vadd.f32 %v15033_v61, %v14980_v19 }
 0x70d   : > { %v2904_v50 = vadd.f32 1.4214138, %v2888_v26  ;;  %v2755_v1 = vsel %vm2739_vm7, 1.0, %v17735_v18  ;;  %v3095_v16 = vmul.f32 %v3079_v8, %v2759_v54  ;;  %v3002_v40 = vsub.f32 0.0, %v15176_v3 }
 0x70e   : > { %v15246_v21 = vpop.eup %13904  ;;  %13908 = vrcp.f32 %v2811_v48  ;;  %v2796_v5 = vmul.f32 0.3275911, %v2780_v23  ;;  %v3105_v30 = vadd.f32 1.0, %v3089_v36  ;;  %v2709_v38 = vmul.f32 0.5, %v15044_v2 }
 0x70f   : > { %v2858_v29 = vmul.f32 1.0614054, %v15246_v21  ;;  %v2798_v60 = vmul.f32 0.3275911, %v15251_v31  ;;  %v3091_v39 = vmul.f32 %v3075_v37, %v2755_v1  ;;  %v3109_v52 = vadd.f32 1.0, %v3093_v6 }
 0x710   : > { %v3016_v12 = vmul.f32 %v3000_v14, %v15125_v11  ;;  %v2812_v19 = vadd.f32 1.0, %v2796_v5  ;;  %v2920_v61 = vmul.f32 %v15191_v20, %v2904_v50  ;;  %v15268_v51 = vmul.f32 0.70710677, %v15256_v44 }
 0x711   : > { %v2874_v35 = vadd.f32 -1.4531521, %v2858_v29  ;;  %v2814_v55 = vadd.f32 1.0, %v2798_v60  ;;  %v3111_v7 = vadd.f32 1.0, %v3095_v16  ;;  %v3018_v2 = vmul.f32 %v3002_v40, %v15176_v3 }
 0x712   : > { %v3001_v24 = vsub.f32 0.0, %v15203_v63  ;;  %13910 = vrcp.f32 %v2812_v19  ;;  %v15277_v26 = vadd.f32 %v15041_v0, %v14983_v17  ;;  %v3121_v58 = vmul.f32 %v3105_v30, %v2705_v56 }
 0x713   : > { %v2890_v45 = vmul.f32 %v15246_v21, %v2874_v35  ;;  %v15270_v47 = vpop.eup %13906  ;;  %13912 = vrcp.f32 %v2814_v55  ;;  %v3125_v59 = vmul.f32 %v3109_v52, %v2709_v38  ;;  %v2711_v8 = vmul.f32 0.5, %v15055_v10 }
 0x714   : > { %v2857_v11 = vmul.f32 1.0614054, %v15270_v47  ;;  %v15281_v36 = vand.u32 2147483647, %v15268_v51  ;;  %v2936_v37 = vadd.f32 -0.28449672, %v2920_v61  ;;  %v3017_v10 = vmul.f32 %v3001_v24, %v15203_v63 }
 0x715   : > { %v2906_v25 = vadd.f32 1.4214138, %v2890_v45  ;;  %v3040_v3 = vmul.f32 1.442695, %v3016_v12  ;;  %v3107_v6 = vadd.f32 1.0, %v3091_v39  ;;  %v3004_v50 = vsub.f32 0.0, %v2780_v23 }
 0x716   : > { %v2873_v48 = vadd.f32 -1.4531521, %v2857_v11  ;;  %v3044_v14 = vmul.f32 1.442695, %v3018_v2  ;;  %v2797_v29 = vmul.f32 0.3275911, %v15281_v36  ;;  %v3127_v17 = vmul.f32 %v3111_v7, %v2711_v8 }
 0x717   : > { %v2922_v54 = vmul.f32 %v15246_v21, %v2906_v25  ;;  %v15290_v56 = vmul.f32 0.70710677, %v15277_v26  ;;  %v3201_v30 = vpack.c.bf16 %v3125_v59, %v3121_v58  ;;  %v2952_v38 = vmul.f32 %v15191_v20, %v2936_v37  ;;  %v14030_v2 = vld [vmem:[%s17724_s22] sm:$0xff]   ;;  %v14031_v11 = vld [vmem:[%s17724_s22 + $0x8] sm:$0xff]  }
 0x718   : > { %v15285_v1 = vpop.eup %13908  ;;  %v2889_v0 = vmul.f32 %v15270_v47, %v2873_v48  ;;  %v2813_v5 = vadd.f32 1.0, %v2797_v29  ;;  %13914 = vpow2.f32 %v3040_v3  ;;  %v3006_v60 = vsub.f32 0.0, %v15251_v31 }
 0x719   : > { %v2938_v16 = vadd.f32 -0.28449672, %v2922_v54  ;;  %v2859_v40 = vmul.f32 1.0614054, %v15285_v1  ;;  %v3123_v39 = vmul.f32 %v3107_v6, %v15231_v41  ;;  %v3020_v12 = vmul.f32 %v3004_v50, %v2780_v23  ;;  %3437 = vmatprep.mubr.bf16.mxu1 %v3201_v30 }
 0x71a   : > { %v2905_v35 = vadd.f32 1.4214138, %v2889_v0  ;;  %13916 = vrcp.f32 %v2813_v5  ;;  %v3042_v19 = vmul.f32 1.442695, %v3017_v10  ;;  %v15298_v61 = vand.u32 2147483647, %v15290_v56  ;;  %3438 = vmatmul.mubr.bf16.vlgmr.msra.gmra.mrb[40].mxu1 %v3200_v22 }
 0x71b   : > { %v2875_v52 = vadd.f32 -1.4531521, %v2859_v40  ;;  %13918 = vpow2.f32 %v3044_v14  ;;  %v2954_v55 = vmul.f32 %v15246_v21, %v2938_v16  ;;  %v3003_v23 = vsub.f32 0.0, %v15228_v33  ;;  %12466 = vmatpush3.bf16.msra.mxu1 %v14030_v2 }
 0x71c   : > { %v2921_v63 = vmul.f32 %v15270_v47, %v2905_v35  ;;  %v15303_v45 = vpop.eup %13910  ;;  %v3203_v7 = vpack.c.bf16 %v3127_v17, %v3123_v39  ;;  %v2968_v25 = vadd.f32 0.2548296, %v2952_v38  ;;  %v3022_v15 = vmul.f32 %v3006_v60, %v15251_v31  ;;  %12467 = vmatprep.subr.bf16.mxu1 %v14031_v11  ;;  %v17736_v31 = vld [vmem:[#allocation20_spill] sm:$0xff] }
 0x71d   : > { %v2891_v41 = vmul.f32 %v15285_v1, %v2875_v52  ;;  %v15311_v24 = vpop.eup %13912  ;;  %v2860_v53 = vmul.f32 1.0614054, %v15303_v45  ;;  %v2799_v22 = vmul.f32 0.3275911, %v15298_v61  ;;  %v3048_v59 = vmul.f32 1.442695, %v3020_v12 }
 0x71e   : > { %v2862_v8 = vmul.f32 1.0614054, %v15311_v24  ;;  %3486 = vmatprep.mubr.bf16.mxu0 %v3203_v7  ;;  %v2937_v37 = vadd.f32 -0.28449672, %v2921_v63  ;;  %v15324_v48 = vmul.f32 0.5, %v17736_v31  ;;  %v3005_v50 = vsub.f32 0.0, %v15281_v36 }
 0x71f   : > { %v2907_v58 = vadd.f32 1.4214138, %v2891_v41  ;;  %v2876_v3 = vadd.f32 -1.4531521, %v2860_v53  ;;  %v2815_v54 = vadd.f32 1.0, %v2799_v22  ;;  %3487 = vmatmul.mubr.bf16.vlgmr.msra.gmra.mrb[44].mxu0 %v3202_v62  ;;  %12468 = vmatpush3.bf16.msra.mxu1 %v14031_v11  ;;  %v3019_v29 = vmul.f32 %v3003_v23, %v15228_v33  ;;  %v14033_v63 = vld [vmem:[%s17724_s22 + $0x18] sm:$0xff]  }
 0x720   : > { %v2970_v6 = vadd.f32 0.2548296, %v2954_v55  ;;  %v2878_v14 = vadd.f32 -1.4531521, %v2862_v8  ;;  %12486 = vmatpush3.bf16.msra.mxu0 %v14030_v2  ;;  %v3052_v0 = vmul.f32 1.442695, %v3022_v15  ;;  %12469 = vmatprep.subr.bf16.mxu1 %v14032_v13  ;;  %v2984_v62 = vmul.f32 %v15191_v20, %v2968_v25 }
 0x721   : > { %v2892_v17 = vmul.f32 %v15303_v45, %v2876_v3  ;;  %13920 = vrcp.f32 %v2815_v54  ;;  %12487 = vmatprep.subr.bf16.mxu0 %v14031_v11  ;;  %vm2744_vm8 = vcmp.ge.f32.partialorder %v17737_v57, 0.0  ;;  %v2923_v10 = vmul.f32 %v15285_v1, %v2907_v58  ;;  %v14034_v8 = vld [vmem:[%s17724_s22 + $0x20] sm:$0xff]  }
 0x722   : > { %v2894_v16 = vmul.f32 %v15311_v24, %v2878_v14  ;;  %v13915_v40 = vpop.eup %13914  ;;  %vm2746_vm9 = vcmp.ge.f32.partialorder %v15164_v28, 0.0  ;;  %v2953_v33 = vmul.f32 %v15270_v47, %v2937_v37  ;;  %13922 = vpow2.f32 %v3042_v19 }
 0x723   : > { %v2908_v5 = vadd.f32 1.4214138, %v2892_v17  ;;  %v2986_v38 = vmul.f32 %v15246_v21, %v2970_v6  ;;  %13924 = vpow2.f32 %v3048_v59  ;;  %v3021_v60 = vmul.f32 %v3005_v50, %v15281_v36  ;;  %12470 = vmatpush3.bf16.msra.mxu1 %v14032_v13 }
 0x724   : > { %v15338_v30 = vpop.eup %13916  ;;  %v2910_v35 = vadd.f32 1.4214138, %v2894_v16  ;;  %12488 = vmatpush3.bf16.msra.mxu0 %v14031_v11  ;;  %v3046_v39 = vmul.f32 1.442695, %v3019_v29  ;;  %13926 = vpow2.f32 %v3052_v0  ;;  %12471 = vmatprep.subr.bf16.mxu1 %v14033_v63  ;;  %v3064_v21 = vmul.f32 %v13915_v40, %v2984_v62 }
 0x725   : > { %v13919_v20 = vpop.eup %13918  ;;  %v2924_v52 = vmul.f32 %v15303_v45, %v2908_v5  ;;  %v2861_v12 = vmul.f32 1.0614054, %v15338_v30  ;;  %12489 = vmatprep.subr.bf16.mxu0 %v14032_v13  ;;  %v2939_v19 = vadd.f32 -0.28449672, %v2923_v10  ;;  %v3007_v36 = vsub.f32 0.0, %v15298_v61 }
 0x726   : > { %v2926_v55 = vmul.f32 %v15311_v24, %v2910_v35  ;;  %v2969_v41 = vadd.f32 0.2548296, %v2953_v33  ;;  %v2760_v2 = vsel %vm2744_vm8, 1.0, %v17735_v18  ;;  %v3066_v25 = vmul.f32 %v13919_v20, %v2986_v38 }
 0x727   : > { %v2940_v23 = vadd.f32 -0.28449672, %v2924_v52  ;;  %v2877_v7 = vadd.f32 -1.4531521, %v2861_v12  ;;  %v3050_v15 = vmul.f32 1.442695, %v3021_v60  ;;  %12472 = vmatpush3.bf16.msra.mxu1 %v14033_v63  ;;  %v2955_v3 = vmul.f32 %v15285_v1, %v2939_v19 }
 0x728   : > { %v2942_v53 = vadd.f32 -0.28449672, %v2926_v55  ;;  %12490 = vmatpush3.bf16.msra.mxu0 %v14032_v13  ;;  %v15353_v22 = vmul.f32 0.5, %v15155_v43  ;;  %v2762_v11 = vsel %vm2746_vm9, 1.0, %v17735_v18  ;;  %12473 = vmatprep.subr.bf16.mxu1 %v14034_v8  ;;  %v3080_v37 = vsub.f32 1.0, %v3064_v21  ;;  %v14036_v21 = vld [vmem:[%s17724_s22 + $0x30] sm:$0xff]  }
 0x729   : > { %v2956_v58 = vmul.f32 %v15303_v45, %v2940_v23  ;;  %v2893_v59 = vmul.f32 %v15338_v30, %v2877_v7  ;;  %12491 = vmatprep.subr.bf16.mxu0 %v14033_v63  ;;  %13928 = vpow2.f32 %v3046_v39  ;;  %v2985_v28 = vmul.f32 %v15270_v47, %v2969_v41 }
 0x72a   : > { %v2958_v43 = vmul.f32 %v15311_v24, %v2942_v53  ;;  %v3023_v14 = vmul.f32 %v3007_v36, %v15298_v61  ;;  %v3082_v50 = vsub.f32 1.0, %v3066_v25  ;;  %13930 = vpow2.f32 %v3050_v15  ;;  %v14035_v61 = vld [vmem:[%s17724_s22 + $0x28] sm:$0xff]  }
 0x72b   : > { %v15365_v54 = vpop.eup %13920  ;;  %v2972_v31 = vadd.f32 0.2548296, %v2956_v58  ;;  %v2909_v6 = vadd.f32 1.4214138, %v2893_v59  ;;  %12474 = vmatpush3.bf16.msra.mxu1 %v14034_v8  ;;  %vm2748_vm10 = vcmp.ge.f32.partialorder %v15240_v42, 0.0  ;;  %vm2750_vm11 = vcmp.ge.f32.partialorder %v15243_v34, 0.0 }
 0x72c   : > { %v2974_v29 = vadd.f32 0.2548296, %v2958_v43  ;;  %v2863_v17 = vmul.f32 1.0614054, %v15365_v54  ;;  %12492 = vmatpush3.bf16.msra.mxu0 %v14033_v63  ;;  %v13923_v0 = vpop.eup %13922  ;;  %12475 = vmatprep.subr.bf16.mxu1 %v14035_v61  ;;  %v3096_v62 = vmul.f32 %v3080_v37, %v2760_v2  ;;  %v2971_v10 = vadd.f32 0.2548296, %v2955_v3 }
 0x72d   : > { %v2988_v13 = vmul.f32 %v15303_v45, %v2972_v31  ;;  %v2925_v47 = vmul.f32 %v15338_v30, %v2909_v6  ;;  %12493 = vmatprep.subr.bf16.mxu0 %v14034_v8  ;;  %v13925_v57 = vpop.eup %13924  ;;  %v3065_v5 = vmul.f32 %v13923_v0, %v2985_v28  ;;  %v3054_v35 = vmul.f32 1.442695, %v3023_v14 }
 0x72e   : > { %v2990_v16 = vmul.f32 %v15311_v24, %v2974_v29  ;;  %v2879_v40 = vadd.f32 -1.4531521, %v2863_v17  ;;  %v13927_v33 = vpop.eup %13926  ;;  %v3098_v60 = vmul.f32 %v3082_v50, %v2762_v11  ;;  %vm2745_vm12 = vcmp.ge.f32.partialorder %v15187_v4, 0.0 }
 0x72f   : > { %v3068_v38 = vmul.f32 %v13925_v57, %v2988_v13  ;;  %v2941_v45 = vadd.f32 -0.28449672, %v2925_v47  ;;  %12476 = vmatpush3.bf16.msra.mxu1 %v14035_v61  ;;  %v2764_v52 = vsel %vm2748_vm10, 1.0, %v17735_v18  ;;  %v2766_v24 = vsel %vm2750_vm11, 1.0, %v17735_v18 }
 0x730   : > { %v3070_v20 = vmul.f32 %v13927_v33, %v2990_v16  ;;  %v2895_v39 = vmul.f32 %v15365_v54, %v2879_v40  ;;  %12494 = vmatpush3.bf16.msra.mxu0 %v14034_v8  ;;  %12477 = vmatprep.subr.bf16.mxu1 %v14036_v21  ;;  %v3112_v19 = vadd.f32 1.0, %v3096_v62  ;;  %v2987_v55 = vmul.f32 %v15285_v1, %v2971_v10  ;;  %v14037_v8 = vld [vmem:[%s17724_s22 + $0x38] sm:$0xff]  }
 0x731   : > { %v3084_v12 = vsub.f32 1.0, %v3068_v38  ;;  %v2957_v63 = vmul.f32 %v15338_v30, %v2941_v45  ;;  %12495 = vmatprep.subr.bf16.mxu0 %v14035_v61  ;;  %v3081_v42 = vsub.f32 1.0, %v3065_v5  ;;  %13932 = vpow2.f32 %v3054_v35 }
 0x732   : > { %v3086_v36 = vsub.f32 1.0, %v3070_v20  ;;  %v2911_v41 = vadd.f32 1.4214138, %v2895_v39  ;;  %v3114_v34 = vadd.f32 1.0, %v3098_v60  ;;  %v2761_v25 = vsel %vm2745_vm12, 1.0, %v17735_v18 }
 0x733   : > { %v3100_v23 = vmul.f32 %v3084_v12, %v2764_v52  ;;  %v2973_v7 = vadd.f32 0.2548296, %v2957_v63  ;;  %v13929_v2 = vpop.eup %13928  ;;  %12478 = vmatpush3.bf16.msra.mxu1 %v14036_v21  ;;  %v2716_v11 = vmul.f32 0.5, %v15220_v9  ;;  %v2718_v58 = vmul.f32 0.5, %v15224_v27  ;;  %v10252_v63 = vld [vmem:[%s17725_s0 + $0x6] ss:$0 sm:$0xff] }
 0x734   : > { %v3102_v53 = vmul.f32 %v3086_v36, %v2766_v24  ;;  %v2927_v15 = vmul.f32 %v15365_v54, %v2911_v41  ;;  %12496 = vmatpush3.bf16.msra.mxu0 %v14035_v61  ;;  %12479 = vmatprep.subr.bf16.mxu1 %v14037_v8  ;;  %v13931_v4 = vpop.eup %13930  ;;  %v3067_v37 = vmul.f32 %v13929_v2, %v2987_v55  ;;  %vm2749_vm13 = vcmp.ge.f32.partialorder %v15268_v51, 0.0 }
 0x735   : > { %v3116_v1 = vadd.f32 1.0, %v3100_v23  ;;  %v2989_v59 = vmul.f32 %v15338_v30, %v2973_v7  ;;  %12497 = vmatprep.subr.bf16.mxu0 %v14036_v21  ;;  %v3128_v28 = vmul.f32 %v3112_v19, %v15324_v48  ;;  %v3097_v9 = vmul.f32 %v3081_v42, %v2761_v25 }
 0x736   : > { %v3118_v3 = vadd.f32 1.0, %v3102_v53  ;;  %v2943_v43 = vadd.f32 -0.28449672, %v2927_v15  ;;  %v3130_v27 = vmul.f32 %v3114_v34, %v15353_v22  ;;  %vm2747_vm14 = vcmp.ge.f32.partialorder %v15216_v32, 0.0  ;;  %v10285_v34 = vld [vmem:[%s17725_s0 + $0x7] ss:$0 sm:$0xff] }
 0x737   : > { %v3132_v31 = vmul.f32 %v3116_v1, %v2716_v11  ;;  %v3069_v6 = vmul.f32 %v13931_v4, %v2989_v59  ;;  %12480 = vmatpush3.bf16.msra.mxu1 %v14037_v8  ;;  %v17738_v17 = vmov 0.0   ;;  %v3083_v0 = vsub.f32 1.0, %v3067_v37  ;;  %v14038_v59 = vld [vmem:[#allocation2 + $0x8] sm:$0xff] }
 0x738   : > { %v3134_v30 = vmul.f32 %v3118_v3, %v2718_v58  ;;  %v2959_v14 = vmul.f32 %v15365_v54, %v2943_v43  ;;  %12498 = vmatpush3.bf16.msra.mxu0 %v14036_v21  ;;  %12505 = vmatprep.subr.bf16.mxu1 %v17738_v17  ;;  %v2765_v48 = vsel %vm2749_vm13, 1.0, %v17735_v18  ;;  %v3113_v22 = vadd.f32 1.0, %v3097_v9  ;;  %v17739_v4 = vld [vmem:[#allocation15_spill] sm:$0xff] }
 0x739   : > { %v3085_v50 = vsub.f32 1.0, %v3069_v6  ;;  %v3204_v29 = vpack.c.bf16 %v3132_v31, %v3128_v28  ;;  %12499 = vmatprep.subr.bf16.mxu0 %v14037_v8  ;;  %v2713_v32 = vmul.f32 0.5, %v15168_v49  ;;  %v2763_v10 = vsel %vm2747_vm14, 1.0, %v17735_v18 }
 0x73a   : > { %v2975_v13 = vadd.f32 0.2548296, %v2959_v14  ;;  %v3206_v47 = vpack.c.bf16 %v3134_v30, %v3130_v27  ;;  %v2717_v16 = vmul.f32 0.5, %v15256_v44  ;;  %v3099_v33 = vmul.f32 %v3083_v0, %v2763_v10 }
 0x73b   : > { %v3101_v61 = vmul.f32 %v3085_v50, %v2765_v48  ;;  %v13933_v62 = vpop.eup %13932  ;;  %vm2751_vm15 = vcmp.ge.f32.partialorder %v15290_v56, 0.0  ;;  %v3129_v5 = vmul.f32 %v3113_v22, %v2713_v32  ;;  %v2715_v49 = vmul.f32 0.5, %v15207_v46  ;;  %v14039_v32 = vld [vmem:[#allocation2 + $0x28] sm:$0xff] }
 0x73c   : > { %v2991_v57 = vmul.f32 %v15365_v54, %v2975_v13  ;;  %12500 = vmatpush3.bf16.msra.mxu0 %v14037_v8  ;;  %v2767_v35 = vsel %vm2751_vm15, 1.0, %v17735_v18  ;;  %v3115_v54 = vadd.f32 1.0, %v3099_v33  ;;  %v2719_v39 = vmul.f32 0.5, %v15277_v26 }
 0x73d   : > { %v3117_v40 = vadd.f32 1.0, %v3101_v61 }
 0x73e   : > { %v3071_v51 = vmul.f32 %v13933_v62, %v2991_v57  ;;  %v3131_v44 = vmul.f32 %v3115_v54, %v2715_v49 }
 0x73f   : > { %v3133_v38 = vmul.f32 %v3117_v40, %v2717_v16  ;;  %v14040_v16 = vld [vmem:[#allocation4 + $0xc0] sm:$0xff] }
 0x740   : > { %v3087_v45 = vsub.f32 1.0, %v3071_v51 }
 0x741   : > { %v3205_v60 = vpack.c.bf16 %v3133_v38, %v3129_v5 }
 0x742   : > { %v3103_v20 = vmul.f32 %v3087_v45, %v2767_v35 }
 0x743   : > { %3445 = vmatprep.mubr.bf16.mxu1 %v3205_v60 }
 0x744   : > { %v3119_v52 = vadd.f32 1.0, %v3103_v20  ;;  %3446 = vmatmul.mubr.bf16.gmra.mrb[44].mxu1 %v3204_v29 }
 0x746   : > { %v3135_v12 = vmul.f32 %v3119_v52, %v2719_v39 }
 0x748   : > { %v3207_v24 = vpack.c.bf16 %v3135_v12, %v3131_v44 }
 0x74a   : > { %3494 = vmatprep.mubr.bf16.mxu0 %v3207_v24 }
 0x74b   : > { %3495 = vmatmul.mubr.bf16.gmra.mrb[48].mxu0 %v3206_v47 }
 0x7ed   : > { %v11738_v56 = vpop.f32.mrb[40].mxu1 }
 0x7ee   : > { %v11739_v21 = vpop.f32.mrb[41].mxu1 }
 0x7ef   : > { %v11740_v19 = vadd.f32 %v11739_v21, %v11738_v56  ;;  %v11741_v55 = vpop.f32.mrb[42].mxu1  ;;  %v13374_v56 = vld [vmem:[%s17655_s8] sm:$0xff]   ;;  %v13376_v21 = vld [vmem:[%s17655_s8 + $0x10] sm:$0xff]  }
 0x7f0   : > { %v11742_v36 = vpop.f32.mrb[43].mxu1 }
 0x7f1   : > { %v3440_v46 = vadd.f32 %v11740_v19, %v10252_v63  ;;  %v11743_v42 = vadd.f32 %v11742_v36, %v11741_v55  ;;  %v13377_v19 = vld [vmem:[%s17655_s8 + $0x18] sm:$0xff]   ;;  %v13378_v55 = vld [vmem:[%s17655_s8 + $0x20] sm:$0xff]   ;;  %v13379_v36 = vld [vmem:[%s17655_s8 + $0x28] sm:$0xff]  }
 0x7f2   : > { %v11766_v41 = vpop.f32.mrb[44].mxu0 }
 0x7f3   : > { %v11767_v26 = vpop.f32.mrb[45].mxu0  ;;  %v3443_v2 = vadd.f32 %v11743_v42, %v10252_v63  ;;  %v13390_v42 = vld [vmem:[%s17726_s1 + $0x200] sm:$0xff]  }
 0x7f4   : > { %v11768_v23 = vadd.f32 %v11767_v26, %v11766_v41  ;;  %v11769_v7 = vpop.f32.mrb[46].mxu0  ;;  %v13380_v41 = vld [vmem:[%s17655_s8 + $0x30] sm:$0xff]   ;;  %v13391_v26 = vld [vmem:[%s17726_s1 + $0x1c0] sm:$0xff]   ;;  %11816 = vmatprep.subr.bf16.mxu0 %v13390_v42  ;;  %v13412_v42 = vld [vmem:[%s17726_s1 + $0x328] sm:$0xff]  }
 0x7f5   : > { %v11770_v25 = vpop.f32.mrb[47].mxu0 }
 0x7f6   : > { %v3489_v53 = vadd.f32 %v11768_v23, %v3440_v46  ;;  %v11771_v15 = vadd.f32 %v11770_v25, %v11769_v7  ;;  %v13381_v46 = vld [vmem:[%s17655_s8 + $0x38] sm:$0xff]   ;;  %v13394_v23 = vld [vmem:[%s17726_s1 + $0x208] sm:$0xff]  }
 0x7f7   : > { %v13395_v7 = vld [vmem:[%s17726_s1 + $0x1c8] sm:$0xff]  }
 0x7f8   : > { %v3508_v11 = vmul.f32 %v10285_v34, %v3489_v53  ;;  %v3492_v1 = vadd.f32 %v11771_v15, %v3443_v2  ;;  %v13398_v2 = vld [vmem:[%s17726_s1 + $0x210] sm:$0xff]  }
 0x7fa   : > { %v3509_v58 = vmul.f32 %v10285_v34, %v3492_v1  ;;  %v3512_v8 = vadd.f32 %v14038_v59, %v3508_v11 }
 0x7fc   : > { %v3513_v37 = vadd.f32 %v3509_v58, %v17739_v4  ;;  %v10286_v4 = vld [vmem:[%s17725_s0 + $0x17] ss:$0 sm:$0xff] }
 0x7fe   : > { %v3518_v3 = vpack.c.bf16 %v3513_v37, %v3512_v8 }
 0x800   : > { %12481 = vmatprep.mubr.bf16.mxu1 %v3518_v3 }
 0x817   : > { %v11744_v43 = vpop.f32.mrb[44].mxu1 }
 0x818   : > { %v11745_v28 = vpop.f32.mrb[45].mxu1 }
 0x819   : > { %v11746_v9 = vadd.f32 %v11745_v28, %v11744_v43  ;;  %v11747_v31 = vpop.f32.mrb[46].mxu1  ;;  %v10287_v28 = vld [vmem:[%s17725_s0 + $0x18] ss:$0 sm:$0xff] }
 0x81a   : > { %v11748_v6 = vpop.f32.mrb[47].mxu1 }
 0x81b   : > { %v11749_v27 = vadd.f32 %v11748_v6, %v11747_v31  ;;  %v3448_v14 = vadd.f32 %v11746_v9, %v10252_v63 }
 0x81d   : > { %v3451_v48 = vadd.f32 %v11749_v27, %v10252_v63  ;;  %v13375_v63 = vld [vmem:[%s17655_s8 + $0x8] sm:$0xff]  }
 0x81e   : > { %v11772_v30 = vpop.f32.mrb[48].mxu0 }
 0x81f   : > { %v11773_v50 = vpop.f32.mrb[49].mxu0 }
 0x820   : > { %v11774_v29 = vadd.f32 %v11773_v50, %v11772_v30  ;;  %v11775_v0 = vpop.f32.mrb[50].mxu0 }
 0x821   : > { %v11776_v13 = vpop.f32.mrb[51].mxu0 }
 0x822   : > { %v3497_v47 = vadd.f32 %v11774_v29, %v3448_v14  ;;  %v11777_v22 = vadd.f32 %v11776_v13, %v11775_v0 }
 0x824   : > { %v3510_v61 = vmul.f32 %v10285_v34, %v3497_v47  ;;  %v3500_v57 = vadd.f32 %v11777_v22, %v3451_v48 }
 0x826   : > { %v3511_v62 = vmul.f32 %v10285_v34, %v3500_v57  ;;  %v3514_v10 = vadd.f32 %v14039_v32, %v3510_v61  ;;  %v13382_v57 = vld [vmem:[%s17655_s8 + $0x40] sm:$0xff]   ;;  %v13383_v32 = vld [vmem:[%s17655_s8 + $0x48] sm:$0xff]  }
 0x828   : > { %v3515_v40 = vadd.f32 %v14040_v16, %v3511_v62  ;;  %v13385_v16 = vld [vmem:[%s17655_s8 + $0x58] sm:$0xff]  }
 0x82a   : > { %v3519_v33 = vpack.c.bf16 %v3515_v40, %v3514_v10 }
 0x82c   : > { %12482 = vmatmul.mubr.bf16.vlgmr.msra.gmra.mrb[48].mxu1 %v3519_v33  ;;  %v13387_v33 = vld [vmem:[%s17655_s8 + $0x68] sm:$0xff]  }
 0x82d   : > { %12506 = vmatpush3.bf16.msra.mxu1 %v13374_v56  ;;  %12521 = vmatprep.mubr.msk.bf16.mxu1 %vm14110_vm0, %v17738_v17  ;;  %v13404_v56 = vld [vmem:[%s17726_s1 + $0x318] sm:$0xff]  }
 0x82e   : > { %12507 = vmatprep.subr.bf16.mxu1 %v17738_v17 }
 0x831   : > { %12508 = vmatpush3.bf16.msra.mxu1 %v13375_v63  ;;  %v13405_v63 = vld [vmem:[%s17726_s1 + $0x2d8] sm:$0xff]  }
 0x832   : > { %12509 = vmatprep.subr.bf16.mxu1 %v17738_v17 }
 0x835   : > { %12510 = vmatpush3.bf16.msra.mxu1 %v13376_v21  ;;  %v13406_v21 = vld [vmem:[%s17726_s1 + $0x220] sm:$0xff]  }
 0x836   : > { %12511 = vmatprep.subr.bf16.mxu1 %v17738_v17 }
 0x839   : > { %12512 = vmatpush3.bf16.msra.mxu1 %v13377_v19  ;;  %v13407_v19 = vld [vmem:[%s17726_s1 + $0x1e0] sm:$0xff]  }
 0x83a   : > { %12513 = vmatprep.subr.bf16.mxu1 %v17738_v17 }
 0x83d   : > { %12514 = vmatpush3.bf16.msra.mxu1 %v13378_v55  ;;  %v13408_v55 = vld [vmem:[%s17726_s1 + $0x320] sm:$0xff]  }
 0x83e   : > { %12515 = vmatprep.subr.bf16.mxu1 %v17738_v17 }
 0x841   : > { %12516 = vmatpush3.bf16.msra.mxu1 %v13379_v36  ;;  %v13409_v36 = vld [vmem:[%s17726_s1 + $0x2e0] sm:$0xff]  }
 0x842   : > { %12517 = vmatprep.subr.bf16.mxu1 %v17738_v17 }
 0x845   : > { %12518 = vmatpush3.bf16.msra.mxu1 %v13380_v41  ;;  %v13410_v41 = vld [vmem:[%s17726_s1 + $0x228] sm:$0xff]  }
 0x846   : > { %12519 = vmatprep.subr.bf16.mxu1 %v17738_v17 }
 0x849   : > { %12520 = vmatpush3.bf16.msra.mxu1 %v13381_v46  ;;  %v13411_v46 = vld [vmem:[%s17726_s1 + $0x1e8] sm:$0xff]  }
 0x84a   : > { %12525 = vmatprep.subr.bf16.mxu1 %v17738_v17 }
 0x8ff   : > { %v12483_v51 = vpop.f32.mrb[48].mxu1 }
 0x900   : > { %v3554_v5 = vpop.f32.mrb[49].mxu1  ;;  %v15427_v35 = vsub.f32 %v3514_v10, %v12483_v51  ;;  %v13384_v10 = vld [vmem:[%s17655_s8 + $0x50] sm:$0xff]  }
 0x901   : > { %v15425_v38 = vsub.f32 %v3512_v8, %v3554_v5  ;;  %v12484_v45 = vpop.f32.mrb[50].mxu1  ;;  %v13388_v51 = vld [vmem:[%s17655_s8 + $0x70] sm:$0xff]   ;;  %v13389_v5 = vld [vmem:[%s17655_s8 + $0x78] sm:$0xff]  }
 0x902   : > { %v15429_v60 = vsub.f32 %v3515_v40, %v12484_v45  ;;  %v3557_v54 = vpop.f32.mrb[51].mxu1  ;;  %v3575_v44 = vmul.f32 %v15427_v35, %v15427_v35  ;;  %v13386_v40 = vld [vmem:[%s17655_s8 + $0x60] sm:$0xff]  }
 0x903   : > { %v15431_v20 = vsub.f32 %v3513_v37, %v3557_v54  ;;  %v3573_v39 = vmul.f32 %v15425_v38, %v15425_v38 }
 0x904   : > { %v3576_v49 = vmul.f32 %v15429_v60, %v15429_v60 }
 0x905   : > { %v3574_v52 = vmul.f32 %v15431_v20, %v15431_v20 }
 0x906   : > { %v3578_v24 = vpack.c.bf16 %v3576_v49, %v3575_v44  ;;  %v13397_v49 = vld [vmem:[%s17726_s1 + $0x2c8] sm:$0xff]   ;;  %v13401_v44 = vld [vmem:[%s17726_s1 + $0x2d0] sm:$0xff]  }
 0x907   : > { %v3577_v12 = vpack.c.bf16 %v3574_v52, %v3573_v39  ;;  %v13399_v39 = vld [vmem:[%s17726_s1 + $0x1d0] sm:$0xff]  }
 0x908   : > { %v13400_v52 = vld [vmem:[%s17726_s1 + $0x310] sm:$0xff]  }
 0x909   : > { %12501 = vmatprep.mubr.bf16.mxu0 %v3577_v12  ;;  %v13402_v12 = vld [vmem:[%s17726_s1 + $0x218] sm:$0xff]  }
 0x90a   : > { %12502 = vmatmul.mubr.bf16.vlgmr.msra.gmra.mrb[52].mxu0 %v3578_v24  ;;  %v13403_v24 = vld [vmem:[%s17726_s1 + $0x1d8] sm:$0xff]  }
 0x90b   : > { %11817 = vmatpush3.bf16.msra.mxu0 %v13391_v26  ;;  %v13413_v26 = vld [vmem:[%s17726_s1 + $0x2e8] sm:$0xff]  }
 0x90c   : > { %11818 = vmatprep.subr.bf16.mxu0 %v13394_v23  ;;  %v13414_v23 = vld [vmem:[%s17726_s1 + $0x230] sm:$0xff]  }
 0x90f   : > { %11819 = vmatpush3.bf16.msra.mxu0 %v13395_v7  ;;  %v13415_v7 = vld [vmem:[%s17726_s1 + $0x1f0] sm:$0xff]  }
 0x910   : > { %11820 = vmatprep.subr.bf16.mxu0 %v13398_v2  ;;  %v13416_v2 = vld [vmem:[%s17726_s1 + $0x330] sm:$0xff]  }
 0x913   : > { %11821 = vmatpush3.bf16.msra.mxu0 %v13399_v39  ;;  %v13437_v39 = vld [vmem:[%s17726_s1 + $0x278] sm:$0xff]  }
 0x914   : > { %11822 = vmatprep.subr.bf16.mxu0 %v13402_v12  ;;  %v13439_v12 = vld [vmem:[%s17726_s1 + $0x348] sm:$0xff]  }
 0x917   : > { %11823 = vmatpush3.bf16.msra.mxu0 %v13403_v24  ;;  %v13440_v24 = vld [vmem:[%s17726_s1 + $0x350] sm:$0xff]  }
 0x918   : > { %11824 = vmatprep.subr.bf16.mxu0 %v13406_v21  ;;  %v13443_v21 = vld [vmem:[%s17726_s1 + $0x368] sm:$0xff]  }
 0x91b   : > { %11825 = vmatpush3.bf16.msra.mxu0 %v13407_v19  ;;  %v13444_v19 = vld [vmem:[%s17726_s1 + $0x370] sm:$0xff]  }
 0x91c   : > { %11826 = vmatprep.subr.bf16.mxu0 %v13410_v41  ;;  %v15723_v41 = vld [vmem:[%s17724_s22 + $0x40] sm:$0xff]  }
 0x91f   : > { %11827 = vmatpush3.bf16.msra.mxu0 %v13411_v46  ;;  %v15729_v46 = vld [vmem:[%s17724_s22 + $0x48] sm:$0xff]  }
 0x920   : > { %11828 = vmatprep.subr.bf16.mxu0 %v13414_v23  ;;  %v15756_v23 = vld [vmem:[%s17724_s22 + $0x60] sm:$0xff]  }
 0x923   : > { %11829 = vmatpush3.bf16.msra.mxu0 %v13415_v7  ;;  %v15765_v7 = vld [vmem:[%s17724_s22 + $0x68] sm:$0xff]  }
 0x9dd   : > { %v12503_v34 = vpop.f32.mrb[52].mxu0 }
 0x9de   : > { %v3622_v25 = vadd.f32 1e-06, %v12503_v34  ;;  %v3613_v53 = vpop.f32.mrb[53].mxu0  ;;  %v13417_v34 = vld [vmem:[%s17726_s1 + $0x2f0] sm:$0xff]  }
 0x9df   : > { %v3614_v15 = vadd.f32 1e-06, %v3613_v53  ;;  %v12504_v11 = vpop.f32.mrb[54].mxu0  ;;  %v13419_v53 = vld [vmem:[%s17726_s1 + $0x1f8] sm:$0xff]  }
 0x9e0   : > { %13934 = vrsqrt.f32 %v3622_v25  ;;  %v3625_v1 = vadd.f32 1e-06, %v12504_v11  ;;  %v3616_v58 = vpop.f32.mrb[55].mxu0  ;;  %v13418_v25 = vld [vmem:[%s17726_s1 + $0x238] sm:$0xff]  }
 0x9e1   : > { %13936 = vrsqrt.f32 %v3614_v15  ;;  %v3617_v59 = vadd.f32 1e-06, %v3616_v58  ;;  %v13420_v15 = vld [vmem:[%s17726_s1 + $0x338] sm:$0xff]   ;;  %11830 = vmatprep.subr.bf16.mxu0 %v13418_v25 }
 0x9e2   : > { %13938 = vrsqrt.f32 %v3625_v1  ;;  %v13421_v11 = vld [vmem:[%s17726_s1 + $0x2f8] sm:$0xff]   ;;  %11831 = vmatpush3.bf16.msra.mxu0 %v13419_v53  ;;  %v13422_v1 = vld [vmem:[%s17726_s1 + $0x280] sm:$0xff]  }
 0x9e3   : > { %13940 = vrsqrt.f32 %v3617_v59  ;;  %11838 = vmatprep.subr.bf16.mxu0 %v13422_v1  ;;  %v10296_v58 = vld [vmem:[%s17725_s0 + $0x19] ss:$0 sm:$0xff] }
 0x9ea   : > { %v13935_v8 = vpop.eup %13934 }
 0x9eb   : > { %v13937_v37 = vpop.eup %13936  ;;  %v3634_v3 = vmul.f32 %v13935_v8, %v15427_v35 }
 0x9ec   : > { %v13939_v43 = vpop.eup %13938  ;;  %v3632_v9 = vmul.f32 %v13937_v37, %v15425_v38  ;;  %v13392_v38 = vld [vmem:[%s17726_s1 + $0x300] sm:$0xff]  }
 0x9ed   : > { %v13941_v31 = vpop.eup %13940  ;;  %v3642_v6 = vmul.f32 %v10286_v4, %v3634_v3  ;;  %v3635_v27 = vmul.f32 %v13939_v43, %v15429_v60  ;;  %v13393_v60 = vld [vmem:[%s17726_s1 + $0x2c0] sm:$0xff]  }
 0x9ee   : > { %v3640_v30 = vmul.f32 %v10286_v4, %v3632_v9  ;;  %v3633_v14 = vmul.f32 %v13941_v31, %v15431_v20  ;;  %v13396_v20 = vld [vmem:[%s17726_s1 + $0x308] sm:$0xff]  }
 0x9ef   : > { %v3650_v50 = vadd.f32 %v10287_v28, %v3642_v6  ;;  %v3643_v29 = vmul.f32 %v10286_v4, %v3635_v27 }
 0x9f0   : > { %v3648_v0 = vadd.f32 %v10287_v28, %v3640_v30  ;;  %v3641_v48 = vmul.f32 %v10286_v4, %v3633_v14  ;;  %v13423_v14 = vld [vmem:[%s17726_s1 + $0x240] sm:$0xff]  }
 0x9f1   : > { %3654 = vst [vmem:[#allocation3 + $0x10] sm:$0xff] %v3650_v50  ;;  %v3651_v13 = vadd.f32 %v10287_v28, %v3643_v29 }
 0x9f2   : > { %3652 = vst [vmem:[#allocation3] sm:$0xff] %v3648_v0  ;;  %v3649_v47 = vadd.f32 %v10287_v28, %v3641_v48 }
 0x9f3   : > { %3655 = vst [vmem:[#allocation3 + $0x18] sm:$0xff] %v3651_v13 }
 0x9f4   : > { %3653 = vst [vmem:[#allocation3 + $0x8] sm:$0xff] %v3649_v47 }
 0x9fa   : > { %v3659_v22 = vld [vmem:[#allocation3 + $0x10] ss:$2 sm:$0xff]  ;;  %v3775_v35 = vld [vmem:[#allocation3 + $0x11] ss:$2 sm:$0xff] }
 0x9fb   : > { %v3657_v61 = vld [vmem:[#allocation3] ss:$2 sm:$0xff]  ;;  %v3773_v45 = vld [vmem:[#allocation3 + $0x1] ss:$2 sm:$0xff] }
 0x9fc   : > { %v3676_v62 = vpack.c.bf16 %v3659_v22, %v3657_v61  ;;  %v3793_v54 = vpack.c.bf16 %v3775_v35, %v3773_v45  ;;  %v13431_v45 = vld [vmem:[%s17726_s1 + $0x260] sm:$0xff]   ;;  %v13432_v35 = vld [vmem:[%s17726_s1 + $0x2a8] sm:$0xff]  }
 0x9fe   : > { %12522 = vmatmul.mubr.bf16.vlgmr.msra.gmra.mrb[52].mxu1 %v3676_v62 }
 0x9ff   : > { %12526 = vmatpush3.bf16.msra.mxu1 %v13382_v57  ;;  %12541 = vmatprep.mubr.msk.bf16.mxu1 %vm14110_vm0, %v17738_v17 }
 0xa00   : > { %12527 = vmatprep.subr.bf16.mxu1 %v17738_v17 }
 0xa03   : > { %12528 = vmatpush3.bf16.msra.mxu1 %v13383_v32  ;;  %v13424_v32 = vld [vmem:[%s17726_s1 + $0x288] sm:$0xff]  }
 0xa04   : > { %12529 = vmatprep.subr.bf16.mxu1 %v17738_v17 }
 0xa07   : > { %12530 = vmatpush3.bf16.msra.mxu1 %v13384_v10 }
 0xa08   : > { %12531 = vmatprep.subr.bf16.mxu1 %v17738_v17 }
 0xa0b   : > { %12532 = vmatpush3.bf16.msra.mxu1 %v13385_v16  ;;  %v13425_v16 = vld [vmem:[%s17726_s1 + $0x248] sm:$0xff]  }
 0xa0c   : > { %12533 = vmatprep.subr.bf16.mxu1 %v17738_v17 }
 0xa0f   : > { %12534 = vmatpush3.bf16.msra.mxu1 %v13386_v40  ;;  %v13426_v40 = vld [vmem:[%s17726_s1 + $0x290] sm:$0xff]  }
 0xa10   : > { %12535 = vmatprep.subr.bf16.mxu1 %v17738_v17 }
 0xa13   : > { %12536 = vmatpush3.bf16.msra.mxu1 %v13387_v33  ;;  %v13427_v33 = vld [vmem:[%s17726_s1 + $0x250] sm:$0xff]  }
 0xa14   : > { %12537 = vmatprep.subr.bf16.mxu1 %v17738_v17 }
 0xa17   : > { %12538 = vmatpush3.bf16.msra.mxu1 %v13388_v51  ;;  %v13428_v51 = vld [vmem:[%s17726_s1 + $0x298] sm:$0xff]  }
 0xa18   : > { %12539 = vmatprep.subr.bf16.mxu1 %v17738_v17 }
 0xa1b   : > { %12540 = vmatpush3.bf16.msra.mxu1 %v13389_v5  ;;  %v13429_v5 = vld [vmem:[%s17726_s1 + $0x258] sm:$0xff]  }
 0xa1c   : > { %11860 = vmatprep.subr.bf16.mxu1 %v13392_v38  ;;  %v13430_v38 = vld [vmem:[%s17726_s1 + $0x2a0] sm:$0xff]  }
 0xa1e   : > { %12542 = vmatmul.mubr.bf16.vlgmr.msra.gmra.mrb[52].mxu1 %v3793_v54  ;;  %v13434_v54 = vld [vmem:[%s17726_s1 + $0x2b0] sm:$0xff]  }
 0xa1f   : > { %11861 = vmatpush3.bf16.msra.mxu1 %v13393_v60  ;;  %v13433_v60 = vld [vmem:[%s17726_s1 + $0x268] sm:$0xff]  }
 0xa20   : > { %11862 = vmatprep.subr.bf16.mxu1 %v13396_v20  ;;  %v13435_v20 = vld [vmem:[%s17726_s1 + $0x270] sm:$0xff]  }
 0xa23   : > { %11863 = vmatpush3.bf16.msra.mxu1 %v13397_v49  ;;  %v13436_v49 = vld [vmem:[%s17726_s1 + $0x2b8] sm:$0xff]  }
 0xa24   : > { %11864 = vmatprep.subr.bf16.mxu1 %v13400_v52  ;;  %v13438_v52 = vld [vmem:[%s17726_s1 + $0x340] sm:$0xff]  }
 0xa27   : > { %11865 = vmatpush3.bf16.msra.mxu1 %v13401_v44 }
 0xa28   : > { %11866 = vmatprep.subr.bf16.mxu1 %v13404_v56  ;;  %v13441_v56 = vld [vmem:[%s17726_s1 + $0x358] sm:$0xff]  }
 0xa2b   : > { %11867 = vmatpush3.bf16.msra.mxu1 %v13405_v63  ;;  %v13442_v63 = vld [vmem:[%s17726_s1 + $0x360] sm:$0xff]  }
 0xa2c   : > { %11868 = vmatprep.subr.bf16.mxu1 %v13408_v55  ;;  %v13445_v55 = vld [vmem:[%s17726_s1 + $0x378] sm:$0xff]  }
 0xa2f   : > { %11869 = vmatpush3.bf16.msra.mxu1 %v13409_v36 }
 0xa30   : > { %11870 = vmatprep.subr.bf16.mxu1 %v13412_v42  ;;  %v15738_v42 = vld [vmem:[%s17724_s22 + $0x50] sm:$0xff]  }
 0xa33   : > { %11871 = vmatpush3.bf16.msra.mxu1 %v13413_v26  ;;  %v15747_v26 = vld [vmem:[%s17724_s22 + $0x58] sm:$0xff]  }
 0xa34   : > { %11872 = vmatprep.subr.bf16.mxu1 %v13416_v2  ;;  %v15777_v2 = vld [vmem:[%s17724_s22 + $0x70] sm:$0xff]  }
 0xa37   : > { %11873 = vmatpush3.bf16.msra.mxu1 %v13417_v34  ;;  %v15786_v34 = vld [vmem:[%s17724_s22 + $0x78] sm:$0xff]  }
 0xa38   : > { %11874 = vmatprep.subr.bf16.mxu1 %v13420_v15 }
 0xa3b   : > { %11875 = vmatpush3.bf16.msra.mxu1 %v13421_v11 }
 0xa3c   : > { %12565 = vmatprep.subr.bf16.mxu1 %v17738_v17 }
 0xaf1   : > { %v3876_v59 = vpop.f32.mrb[52].mxu1 }
 0xaf2   : > { %v13113_v8 = vadd.f32 %v10296_v58, %v3876_v59  ;;  %v12543_v4 = vpop.f32.mrb[53].mxu1 }
 0xaf3   : > { %v3879_v37 = vpop.f32.mrb[54].mxu1 }
 0xaf4   : > { %3887 = vst [vmem:[#allocation2 + $0x8] sm:$0xff] %v13113_v8  ;;  %3904 = vst [vmem:[#allocation4 + $0x18] sm:$0xff] %v13113_v8  ;;  %v13114_v3 = vadd.f32 %v10296_v58, %v3879_v37  ;;  %v12544_v43 = vpop.f32.mrb[55].mxu1 }
 0xaf6   : > { %3890 = vst [vmem:[#allocation2 + $0x28] sm:$0xff] %v13114_v3  ;;  %3906 = vst [vmem:[#allocation4 + $0x50] sm:$0xff] %v13114_v3  ;;  %v4049_v10 = vpack.c.bf16 %v13114_v3, %v13113_v8 }
 0xafb   : > { %v3891_v28 = vld [vmem:[#allocation2 + $0x5] sm:$0xff] }
 0xafc   : > { %v15621_v9 = vld [vmem:[#allocation2 + $0x7] sm:$0xff]  ;;  %3892 = vst [vmem:[#allocation4] sm:$0xff] %v3891_v28 }
 0xafd   : > { %v3907_v31 = vld [vmem:[#allocation2 + $0x9] sm:$0xff]  ;;  %3900 = vst [vmem:[#allocation4 + $0x10] sm:$0xff] %v15621_v9 }
 0xafe   : > { %v15623_v6 = vld [vmem:[#allocation2 + $0xb] sm:$0xff]  ;;  %3908 = vst [vmem:[#allocation4 + $0x20] sm:$0xff] %v3907_v31 }
 0xaff   : > { %v3895_v27 = vld [vmem:[#allocation2 + $0x6] sm:$0xff]  ;;  %3916 = vst [vmem:[#allocation4 + $0x30] sm:$0xff] %v15623_v6 }
 0xb00   : > { %v3911_v30 = vld [vmem:[#allocation2 + $0xa] sm:$0xff]  ;;  %3896 = vst [vmem:[#allocation4 + $0x8] sm:$0xff] %v3895_v27  ;;  %5934 = vst [vmem:[#allocation2 + $0x5] sm:$0x7] %v17738_v17 }
 0xb01   : > { %v3897_v50 = vld [vmem:[#allocation2 + $0x26] sm:$0xff]  ;;  %3912 = vst [vmem:[#allocation4 + $0x28] sm:$0xff] %v3911_v30  ;;  %5935 = vst [vmem:[#allocation2 + $0xc] sm:$0x7] %v17738_v17 }
 0xb02   : > { %v3913_v29 = vld [vmem:[#allocation2 + $0x2a] sm:$0xff]  ;;  %v4047_v48 = vpack.c.bf16 %v3897_v50, %v3895_v27 }
 0xb03   : > { %v3893_v0 = vld [vmem:[#allocation2 + $0x25] sm:$0xff]  ;;  %v4051_v13 = vpack.c.bf16 %v3913_v29, %v3911_v30 }
 0xb04   : > { %v4046_v47 = vpack.c.bf16 %v3893_v0, %v3891_v28  ;;  %v3909_v22 = vld [vmem:[#allocation2 + $0x29] sm:$0xff]  ;;  %4426 = vmatprep.mubr.bf16.mxu0 %v4047_v48  ;;  %v10433_v28 = vld [vmem:[%s17725_s0 + $0x8] ss:$0 sm:$0xff] }
 0xb05   : > { %v3901_v61 = vld [vmem:[#allocation2 + $0x27] sm:$0xff]  ;;  %v4050_v62 = vpack.c.bf16 %v3909_v22, %v3907_v31  ;;  %4508 = vmatprep.mubr.bf16.mxu1 %v4051_v13 }
 0xb06   : > { %v15632_v57 = vld [vmem:[#allocation2 + $0x2b] sm:$0xff]  ;;  %5937 = vst [vmem:[#allocation2 + $0x25] sm:$0x7] %v17738_v17  ;;  %4427 = vmatmul.mubr.bf16.vlgmr.msra.gmra.mrb[56].mxu0 %v4046_v47  ;;  %v4048_v44 = vpack.c.bf16 %v3901_v61, %v15621_v9 }
 0xb07   : > { %5938 = vst [vmem:[#allocation2 + $0x2c] sm:$0x7] %v17738_v17  ;;  %4509 = vmatmul.mubr.bf16.vlgmr.msra.gmra.mrb[56].mxu1 %v4050_v62  ;;  %11839 = vmatpush3.bf16.msra.mxu0 %v13423_v14  ;;  %v4052_v36 = vpack.c.bf16 %v15632_v57, %v15623_v6 }
 0xb08   : > { %4467 = vmatprep.mubr.bf16.mxu0 %v4049_v10  ;;  %11840 = vmatprep.subr.bf16.mxu0 %v13424_v32 }
 0xb09   : > { %12581 = vmatprep.mubr.msk.bf16.mxu1 %vm14110_vm0, %v17738_v17  ;;  %12566 = vmatpush3.bf16.msra.mxu1 %v15723_v41 }
 0xb0a   : > { %12567 = vmatprep.subr.bf16.mxu1 %v17738_v17 }
 0xb0b   : > { %11841 = vmatpush3.bf16.msra.mxu0 %v13425_v16 }
 0xb0c   : > { %11842 = vmatprep.subr.bf16.mxu0 %v13426_v40  ;;  %v17740_v40 = vmov 0  }
 0xb0d   : > { %12568 = vmatpush3.bf16.msra.mxu1 %v15729_v46 }
 0xb0e   : > { %12569 = vmatprep.subr.bf16.mxu1 %v17738_v17 }
 0xb0f   : > { %11843 = vmatpush3.bf16.msra.mxu0 %v13427_v33  ;;  %v13454_v33 = vld [vmem:[%s17653_s6 + $0x100] ss:$16 sps:$4 sm:$0xff]  }
 0xb10   : > { %11844 = vmatprep.subr.bf16.mxu0 %v13428_v51  ;;  %v13456_v51 = vld [vmem:[%s17653_s6 + $0x104] ss:$16 sps:$4 sm:$0xff]  }
 0xb11   : > { %12570 = vmatpush3.bf16.msra.mxu1 %v15738_v42 }
 0xb12   : > { %12571 = vmatprep.subr.bf16.mxu1 %v17738_v17 }
 0xb13   : > { %11845 = vmatpush3.bf16.msra.mxu0 %v13429_v5  ;;  %v13459_v5 = vld [vmem:[%s17653_s6 + $0x10c] ss:$16 sps:$4 sm:$0xff]  }
 0xb14   : > { %11846 = vmatprep.subr.bf16.mxu0 %v13430_v38  ;;  %v13462_v38 = vld [vmem:[%s17653_s6 + $0x124] ss:$16 sps:$4 sm:$0xff]  }
 0xb15   : > { %12572 = vmatpush3.bf16.msra.mxu1 %v15747_v26 }
 0xb16   : > { %12573 = vmatprep.subr.bf16.mxu1 %v17738_v17 }
 0xb17   : > { %11847 = vmatpush3.bf16.msra.mxu0 %v13431_v45  ;;  %v13460_v45 = vld [vmem:[%s17653_s6 + $0x120] ss:$16 sps:$4 sm:$0xff]  }
 0xb18   : > { %11848 = vmatprep.subr.bf16.mxu0 %v13432_v35 }
 0xb19   : > { %12574 = vmatpush3.bf16.msra.mxu1 %v15756_v23 }
 0xb1a   : > { %12575 = vmatprep.subr.bf16.mxu1 %v17738_v17 }
 0xb1b   : > { %11849 = vmatpush3.bf16.msra.mxu0 %v13433_v60 }
 0xb1c   : > { %11850 = vmatprep.subr.bf16.mxu0 %v13434_v54 }
 0xb1d   : > { %12576 = vmatpush3.bf16.msra.mxu1 %v15765_v7 }
 0xb1e   : > { %12577 = vmatprep.subr.bf16.mxu1 %v17738_v17 }
 0xb1f   : > { %11851 = vmatpush3.bf16.msra.mxu0 %v13435_v20 }
 0xb20   : > { %11852 = vmatprep.subr.bf16.mxu0 %v13436_v49 }
 0xb21   : > { %12578 = vmatpush3.bf16.msra.mxu1 %v15777_v2 }
 0xb22   : > { %12579 = vmatprep.subr.bf16.mxu1 %v17738_v17 }
 0xb23   : > { %11853 = vmatpush3.bf16.msra.mxu0 %v13437_v39 }
 0xb24   : > { %12545 = vmatprep.subr.bf16.mxu0 %v17738_v17 }
 0xb25   : > { %12580 = vmatpush3.bf16.msra.mxu1 %v15786_v34 }
 0xb26   : > { %4468 = vmatmul.mubr.bf16.vlgmr.msra.gmra.mrb[60].mxu0 %v4048_v44  ;;  %4946 = vmatprep.subr.bf16.mxu1 %v13456_v51 }
 0xb27   : > { %12546 = vmatpush3.bf16.msra.mxu0 %v13438_v52  ;;  %12561 = vmatprep.mubr.msk.bf16.mxu0 %vm14110_vm0, %v17738_v17 }
 0xb28   : > { %12547 = vmatprep.subr.bf16.mxu0 %v17738_v17 }
 0xb2b   : > { %12548 = vmatpush3.bf16.msra.mxu0 %v13439_v12  ;;  %v13457_v12 = vld [vmem:[%s17653_s6 + $0x108] ss:$16 sps:$4 sm:$0xff]  }
 0xb2c   : > { %12549 = vmatprep.subr.bf16.mxu0 %v17738_v17 }
 0xb2f   : > { %12550 = vmatpush3.bf16.msra.mxu0 %v13440_v24 }
 0xb30   : > { %12551 = vmatprep.subr.bf16.mxu0 %v17738_v17 }
 0xb33   : > { %12552 = vmatpush3.bf16.msra.mxu0 %v13441_v56  ;;  %v13465_v56 = vld [vmem:[%s17653_s6 + $0x12c] ss:$16 sps:$4 sm:$0xff]  }
 0xb34   : > { %12553 = vmatprep.subr.bf16.mxu0 %v17738_v17 }
 0xb37   : > { %12554 = vmatpush3.bf16.msra.mxu0 %v13442_v63  ;;  %v13463_v63 = vld [vmem:[%s17653_s6 + $0x128] ss:$16 sps:$4 sm:$0xff]  }
 0xb38   : > { %12555 = vmatprep.subr.bf16.mxu0 %v17738_v17 }
 0xb3b   : > { %12556 = vmatpush3.bf16.msra.mxu0 %v13443_v21  ;;  %v13468_v21 = vld [vmem:[%s17653_s6 + $0x144] ss:$16 sps:$4 sm:$0xff]  }
 0xb3c   : > { %12557 = vmatprep.subr.bf16.mxu0 %v17738_v17 }
 0xb3f   : > { %12558 = vmatpush3.bf16.msra.mxu0 %v13444_v19  ;;  %v13471_v19 = vld [vmem:[%s17653_s6 + $0x14c] ss:$16 sps:$4 sm:$0xff]  }
 0xb40   : > { %12559 = vmatprep.subr.bf16.mxu0 %v17738_v17 }
 0xb43   : > { %12560 = vmatpush3.bf16.msra.mxu0 %v13445_v55  ;;  %v13466_v55 = vld [vmem:[%s17653_s6 + $0x140] ss:$16 sps:$4 sm:$0xff]  }
 0xb44   : > { %12585 = vmatprep.subr.bf16.mxu0 %v17738_v17 }
 0xb46   : > { %12562 = vmatmul.mubr.bf16.vlgmr.msra.gmra.mrb[64].mxu0 %v4052_v36  ;;  %v13469_v36 = vld [vmem:[%s17653_s6 + $0x148] ss:$16 sps:$4 sm:$0xff]  }
 0xb47   : > { %12601 = vmatprep.mubr.msk.bf16.mxu0 %vm14110_vm0, %v17738_v17  ;;  %12586 = vmatpush3.bf16.msra.mxu0 %v15723_v41 }
 0xb48   : > { %12587 = vmatprep.subr.bf16.mxu0 %v17738_v17 }
 0xb4b   : > { %12588 = vmatpush3.bf16.msra.mxu0 %v15729_v46 }
 0xb4c   : > { %12589 = vmatprep.subr.bf16.mxu0 %v17738_v17 }
 0xb4f   : > { %12590 = vmatpush3.bf16.msra.mxu0 %v15738_v42 }
 0xb50   : > { %12591 = vmatprep.subr.bf16.mxu0 %v17738_v17 }
 0xb53   : > { %12592 = vmatpush3.bf16.msra.mxu0 %v15747_v26 }
 0xb54   : > { %12593 = vmatprep.subr.bf16.mxu0 %v17738_v17 }
 0xb57   : > { %12594 = vmatpush3.bf16.msra.mxu0 %v15756_v23 }
 0xb58   : > { %12595 = vmatprep.subr.bf16.mxu0 %v17738_v17 }
 0xb5b   : > { %12596 = vmatpush3.bf16.msra.mxu0 %v15765_v7 }
 0xb5c   : > { %12597 = vmatprep.subr.bf16.mxu0 %v17738_v17 }
 0xb5f   : > { %12598 = vmatpush3.bf16.msra.mxu0 %v15777_v2 }
 0xb60   : > { %12599 = vmatprep.subr.bf16.mxu0 %v17738_v17 }
 0xb63   : > { %12600 = vmatpush3.bf16.msra.mxu0 %v15786_v34 }
 0xb64   : > { %4989 = vmatprep.subr.bf16.mxu0 %v13459_v5 }
 0xbd9   : > { %v11832_v25 = vpop.f32.mrb[56].mxu0 }
 0xbda   : > { %v11876_v53 = vpop.f32.mrb[56].mxu1  ;;  %v11833_v15 = vpop.f32.mrb[57].mxu0 }
 0xbdb   : > { %v11877_v11 = vpop.f32.mrb[57].mxu1  ;;  %v11834_v1 = vadd.f32 %v11833_v15, %v11832_v25  ;;  %v11835_v59 = vpop.f32.mrb[58].mxu0  ;;  %v13474_v25 = vld [vmem:[%s17653_s6 + $0x164] ss:$16 sps:$4 sm:$0xff]   ;;  %v13472_v15 = vld [vmem:[%s17653_s6 + $0x160] ss:$16 sps:$4 sm:$0xff]  }
 0xbdc   : > { %v11878_v58 = vadd.f32 %v11877_v11, %v11876_v53  ;;  %v11879_v8 = vpop.f32.mrb[58].mxu1  ;;  %v11836_v4 = vpop.f32.mrb[59].mxu0  ;;  %v13477_v53 = vld [vmem:[%s17653_s6 + $0x16c] ss:$16 sps:$4 sm:$0xff]   ;;  %v13475_v11 = vld [vmem:[%s17653_s6 + $0x168] ss:$16 sps:$4 sm:$0xff]  }
 0xbdd   : > { %v11880_v37 = vpop.f32.mrb[59].mxu1  ;;  %v11837_v3 = vadd.f32 %v11836_v4, %v11835_v59  ;;  %v4429_v6 = vadd.f32 %v11834_v1, %v10433_v28  ;;  %v13480_v1 = vld [vmem:[%s17653_s6 + $0x184] ss:$16 sps:$4 sm:$0xff]   ;;  %v13478_v59 = vld [vmem:[%s17653_s6 + $0x180] ss:$16 sps:$4 sm:$0xff]  }
 0xbde   : > { %v11881_v43 = vadd.f32 %v11880_v37, %v11879_v8  ;;  %v13481_v8 = vld [vmem:[%s17653_s6 + $0x188] ss:$16 sps:$4 sm:$0xff]   ;;  %v13486_v4 = vld [vmem:[%s17653_s6 + $0x1a4] ss:$16 sps:$4 sm:$0xff]   ;;  %v13489_v37 = vld [vmem:[%s17653_s6 + $0x1ac] ss:$16 sps:$4 sm:$0xff]  }
 0xbdf   : > { %v4432_v50 = vadd.f32 %v11837_v3, %v10433_v28  ;;  %v13484_v3 = vld [vmem:[%s17653_s6 + $0x1a0] ss:$16 sps:$4 sm:$0xff]   ;;  %v13492_v28 = vld [vmem:[%s17653_s6 + $0x1c4] ss:$16 sps:$4 sm:$0xff]  }
 0xbf9   : > { %v11854_v9 = vpop.f32.mrb[60].mxu0 }
 0xbfa   : > { %v11855_v31 = vpop.f32.mrb[61].mxu0 }
 0xbfb   : > { %v11856_v27 = vadd.f32 %v11855_v31, %v11854_v9  ;;  %v11857_v30 = vpop.f32.mrb[62].mxu0  ;;  %v13495_v9 = vld [vmem:[%s17653_s6 + $0x1cc] ss:$16 sps:$4 sm:$0xff]   ;;  %v13490_v31 = vld [vmem:[%s17653_s6 + $0x1c0] ss:$16 sps:$4 sm:$0xff]  }
 0xbfc   : > { %v11858_v14 = vpop.f32.mrb[63].mxu0 }
 0xbfd   : > { %v4470_v29 = vadd.f32 %v11856_v27, %v4429_v6  ;;  %v11859_v0 = vadd.f32 %v11858_v14, %v11857_v30  ;;  %v13493_v6 = vld [vmem:[%s17653_s6 + $0x1c8] ss:$16 sps:$4 sm:$0xff]   ;;  %v13498_v27 = vld [vmem:[%s17653_s6 + $0x1e4] ss:$16 sps:$4 sm:$0xff]   ;;  %v13501_v30 = vld [vmem:[%s17653_s6 + $0x1ec] ss:$16 sps:$4 sm:$0xff]  }
 0xbfe   : > { %v13496_v14 = vld [vmem:[%s17653_s6 + $0x1e0] ss:$16 sps:$4 sm:$0xff]  }
 0xbff   : > { %v4473_v48 = vadd.f32 %v11859_v0, %v4432_v50  ;;  %v4511_v13 = vadd.f32 %v11878_v58, %v4470_v29  ;;  %v13483_v58 = vld [vmem:[%s17653_s6 + $0x18c] ss:$16 sps:$4 sm:$0xff]   ;;  %v13499_v50 = vld [vmem:[%s17653_s6 + $0x1e8] ss:$16 sps:$4 sm:$0xff]  }
 0xc01   : > { %v4514_v47 = vadd.f32 %v11881_v43, %v4473_v48  ;;  %v13487_v43 = vld [vmem:[%s17653_s6 + $0x1a8] ss:$16 sps:$4 sm:$0xff]  }
 0xc19   : > { %v4551_v22 = vpop.f32.mrb[64].mxu0 }
 0xc1a   : > { %v4552_v61 = vadd.f32 %v4551_v22, %v4511_v13  ;;  %v12563_v57 = vpop.f32.mrb[65].mxu0 }
 0xc1b   : > { %v4554_v62 = vpop.f32.mrb[66].mxu0  ;;  %v10514_v57 = vld [vmem:[%s17725_s0 + $0x9] ss:$0 sm:$0xff] }
 0xc1c   : > { %v4555_v32 = vadd.f32 %v4554_v62, %v4514_v47  ;;  %v12564_v10 = vpop.f32.mrb[67].mxu0 }
 0xc1e   : > { %v4577_v16 = vpack.c.bf16 %v4555_v32, %v4552_v61 }
 0xc20   : > { %12582 = vmatmul.mubr.bf16.vlgmr.msra.gmra.mrb[60].mxu1 %v4577_v16 }
 0xc21   : > { %4978 = vmatprep.mubr.bf16.mxu1 %v17740_v40  ;;  %4947 = vmatpush1.bf16.msra.mxu1 %v13454_v33  ;;  %v10515_v33 = vld [vmem:[%s17725_s0 + $0xa] ss:$0 sm:$0xff] }
 0xc22   : > { %4948 = vmatprep.subr.bf16.mxu1 %v13462_v38 }
 0xc25   : > { %4949 = vmatpush1.bf16.msra.mxu1 %v13460_v45 }
 0xc26   : > { %4950 = vmatprep.subr.bf16.mxu1 %v13468_v21  ;;  %v13514_v21 = vld [vmem:[%s17654_s7 + $0x158] sm:$0xff]  }
 0xc29   : > { %4951 = vmatpush1.bf16.msra.mxu1 %v13466_v55  ;;  %v13516_v55 = vld [vmem:[%s17654_s7 + $0x118] sm:$0xff]  }
 0xc2a   : > { %4952 = vmatprep.subr.bf16.mxu1 %v13474_v25  ;;  %v13518_v25 = vld [vmem:[%s17654_s7 + $0x160] sm:$0xff]  }
 0xc2d   : > { %4953 = vmatpush1.bf16.msra.mxu1 %v13472_v15  ;;  %v13520_v15 = vld [vmem:[%s17654_s7 + $0x120] sm:$0xff]  }
 0xc2e   : > { %4954 = vmatprep.subr.bf16.mxu1 %v13480_v1  ;;  %v13522_v1 = vld [vmem:[%s17654_s7 + $0x168] sm:$0xff]  }
 0xc31   : > { %4955 = vmatpush1.bf16.msra.mxu1 %v13478_v59  ;;  %v13524_v59 = vld [vmem:[%s17654_s7 + $0x128] sm:$0xff]  }
 0xc32   : > { %4956 = vmatprep.subr.bf16.mxu1 %v13486_v4  ;;  %v13526_v4 = vld [vmem:[%s17654_s7 + $0x170] sm:$0xff]  }
 0xc35   : > { %4957 = vmatpush1.bf16.msra.mxu1 %v13484_v3  ;;  %v13528_v3 = vld [vmem:[%s17654_s7 + $0x130] sm:$0xff]  }
 0xc36   : > { %4958 = vmatprep.subr.bf16.mxu1 %v13492_v28  ;;  %v13530_v28 = vld [vmem:[%s17654_s7 + $0x178] sm:$0xff]  }
 0xc39   : > { %4959 = vmatpush1.bf16.msra.mxu1 %v13490_v31  ;;  %v13532_v31 = vld [vmem:[%s17654_s7 + $0x138] sm:$0xff]  }
 0xc3a   : > { %4960 = vmatprep.subr.bf16.mxu1 %v13498_v27  ;;  %v10548_v27 = vld [vmem:[%s17728_s20 + $0x1] ss:$4 sm:$0xf] }
 0xc3d   : > { %4961 = vmatpush1.bf16.msra.mxu1 %v13496_v14 }
 0xcf3   : > { %v4660_v35 = vpop.f32.mrb[60].mxu1 }
 0xcf4   : > { %v15809_v60 = vsub.f32 %v4552_v61, %v4660_v35  ;;  %v12583_v54 = vpop.f32.mrb[61].mxu1  ;;  %v13502_v35 = vld [vmem:[%s17654_s7 + $0x140] sm:$0xff]  }
 0xcf5   : > { %v4663_v20 = vpop.f32.mrb[62].mxu1  ;;  %v13504_v54 = vld [vmem:[%s17654_s7 + $0x100] sm:$0xff]   ;;  %11909 = vmatprep.subr.bf16.mxu1 %v13502_v35 }
 0xcf6   : > { %v15811_v49 = vsub.f32 %v4555_v32, %v4663_v20  ;;  %v12584_v39 = vpop.f32.mrb[63].mxu1  ;;  %v4669_v52 = vmul.f32 %v15809_v60, %v15809_v60  ;;  %v13505_v20 = vld [vmem:[%s17654_s7 + $0x180] sm:$0xff]  }
 0xcf7   : > { %v13507_v39 = vld [vmem:[%s17654_s7 + $0x1c8] sm:$0xff]  }
 0xcf8   : > { %v4670_v44 = vmul.f32 %v15811_v49, %v15811_v49 }
 0xcfa   : > { %v4671_v24 = vpack.c.bf16 %v4670_v44, %v4669_v52  ;;  %v13508_v52 = vld [vmem:[%s17654_s7 + $0x108] sm:$0xff]  }
 0xcfb   : > { %v13509_v44 = vld [vmem:[%s17654_s7 + $0x188] sm:$0xff]  }
 0xcfc   : > { %12602 = vmatmul.mubr.bf16.vlgmr.msra.gmra.mrb[68].mxu0 %v4671_v24  ;;  %v13511_v24 = vld [vmem:[%s17654_s7 + $0x1d0] sm:$0xff]  }
 0xcfd   : > { %4990 = vmatpush1.bf16.msra.mxu0 %v13457_v12  ;;  %5021 = vmatprep.mubr.bf16.mxu0 %v17740_v40  ;;  %v13510_v12 = vld [vmem:[%s17654_s7 + $0x150] sm:$0xff]  }
 0xcfe   : > { %4991 = vmatprep.subr.bf16.mxu0 %v13465_v56  ;;  %v13512_v56 = vld [vmem:[%s17654_s7 + $0x110] sm:$0xff]  }
 0xd01   : > { %4992 = vmatpush1.bf16.msra.mxu0 %v13463_v63  ;;  %v13513_v63 = vld [vmem:[%s17654_s7 + $0x190] sm:$0xff]  }
 0xd02   : > { %4993 = vmatprep.subr.bf16.mxu0 %v13471_v19  ;;  %v13515_v19 = vld [vmem:[%s17654_s7 + $0x1d8] sm:$0xff]  }
 0xd05   : > { %4994 = vmatpush1.bf16.msra.mxu0 %v13469_v36  ;;  %v13517_v36 = vld [vmem:[%s17654_s7 + $0x198] sm:$0xff]  }
 0xd06   : > { %4995 = vmatprep.subr.bf16.mxu0 %v13477_v53  ;;  %v13519_v53 = vld [vmem:[%s17654_s7 + $0x1e0] sm:$0xff]  }
 0xd09   : > { %4996 = vmatpush1.bf16.msra.mxu0 %v13475_v11  ;;  %v13521_v11 = vld [vmem:[%s17654_s7 + $0x1a0] sm:$0xff]  }
 0xd0a   : > { %4997 = vmatprep.subr.bf16.mxu0 %v13483_v58  ;;  %v13523_v58 = vld [vmem:[%s17654_s7 + $0x1e8] sm:$0xff]  }
 0xd0d   : > { %4998 = vmatpush1.bf16.msra.mxu0 %v13481_v8  ;;  %v13525_v8 = vld [vmem:[%s17654_s7 + $0x1a8] sm:$0xff]  }
 0xd0e   : > { %4999 = vmatprep.subr.bf16.mxu0 %v13489_v37  ;;  %v13527_v37 = vld [vmem:[%s17654_s7 + $0x1f0] sm:$0xff]  }
 0xd11   : > { %5000 = vmatpush1.bf16.msra.mxu0 %v13487_v43  ;;  %v13529_v43 = vld [vmem:[%s17654_s7 + $0x1b0] sm:$0xff]  }
 0xd12   : > { %5001 = vmatprep.subr.bf16.mxu0 %v13495_v9  ;;  %v13531_v9 = vld [vmem:[%s17654_s7 + $0x1f8] sm:$0xff]  }
 0xd15   : > { %5002 = vmatpush1.bf16.msra.mxu0 %v13493_v6  ;;  %v13533_v6 = vld [vmem:[%s17654_s7 + $0x1b8] sm:$0xff]  }
 0xd16   : > { %5003 = vmatprep.subr.bf16.mxu0 %v13501_v30  ;;  %v17741_v30 = vld [vmem:[#allocation16_spill] sm:$0xff] }
 0xd17   : > { %v4769_v14 = vrot.slane %v10548_v27, %v17741_v30 }
 0xd19   : > { %5004 = vmatpush1.bf16.msra.mxu0 %v13499_v50  ;;  %v17742_v50 = vld [vmem:[#allocation17_spill] sm:$0xff] }
 0xdcf   : > { %v4706_v29 = vpop.f32.mrb[68].mxu0 }
 0xdd0   : > { %v4707_v0 = vadd.f32 1e-06, %v4706_v29  ;;  %v12603_v48 = vpop.f32.mrb[69].mxu0  ;;  %v4777_v29 = vrot.slane %v10548_v27, %v17742_v50 }
 0xdd1   : > { %v4709_v13 = vpop.f32.mrb[70].mxu0 }
 0xdd2   : > { %13942 = vrsqrt.f32 %v4707_v0  ;;  %v4710_v47 = vadd.f32 1e-06, %v4709_v13  ;;  %v12604_v22 = vpop.f32.mrb[71].mxu0  ;;  %v17743_v0 = vld [vmem:[#allocation18_spill] sm:$0xff]  ;;  %v17744_v13 = vld [vmem:[#allocation19_spill] sm:$0xff] }
 0xdd3   : > { %v4773_v48 = vrot.slane %v10548_v27, %v17743_v0 }
 0xdd4   : > { %13944 = vrsqrt.f32 %v4710_v47  ;;  %v4781_v47 = vrot.slane %v10548_v27, %v17744_v13 }
 0xddc   : > { %v13943_v61 = vpop.eup %13942 }
 0xddd   : > { %v4715_v62 = vmul.f32 %v13943_v61, %v15809_v60  ;;  %v13503_v60 = vld [vmem:[%s17654_s7 + $0x1c0] sm:$0xff]  }
 0xdde   : > { %v13945_v32 = vpop.eup %13944  ;;  %11931 = vmatprep.subr.bf16.mxu0 %v13503_v60 }
 0xddf   : > { %v4716_v10 = vmul.f32 %v13945_v32, %v15811_v49  ;;  %v4721_v16 = vmul.f32 %v10514_v57, %v4715_v62  ;;  %v13506_v49 = vld [vmem:[%s17654_s7 + $0x148] sm:$0xff]  }
 0xde1   : > { %v4722_v51 = vmul.f32 %v10514_v57, %v4716_v10  ;;  %v4727_v5 = vadd.f32 %v10515_v33, %v4721_v16 }
 0xde3   : > { %v4728_v38 = vadd.f32 %v10515_v33, %v4722_v51 }
 0xde5   : > { %v4762_v45 = vpack.c.bf16 %v4728_v38, %v4727_v5 }
 0xde7   : > { %4979 = vmatmul.mubr.bf16.vlgmr.msra.gmra.mrb[64].mxu1 %v4762_v45  ;;  %5022 = vmatmul.mubr.bf16.vlgmr.msra.gmra.mrb[72].mxu0 %v4762_v45 }
 0xde8   : > { %11910 = vmatpush3.bf16.msra.mxu1 %v13504_v54  ;;  %11932 = vmatpush3.bf16.msra.mxu0 %v13505_v20 }
 0xde9   : > { %11911 = vmatprep.subr.bf16.mxu1 %v13506_v49  ;;  %11933 = vmatprep.subr.bf16.mxu0 %v13507_v39 }
 0xdec   : > { %11912 = vmatpush3.bf16.msra.mxu1 %v13508_v52  ;;  %11934 = vmatpush3.bf16.msra.mxu0 %v13509_v44 }
 0xded   : > { %11913 = vmatprep.subr.bf16.mxu1 %v13510_v12  ;;  %11935 = vmatprep.subr.bf16.mxu0 %v13511_v24 }
 0xdf0   : > { %11914 = vmatpush3.bf16.msra.mxu1 %v13512_v56  ;;  %11936 = vmatpush3.bf16.msra.mxu0 %v13513_v63 }
 0xdf1   : > { %11915 = vmatprep.subr.bf16.mxu1 %v13514_v21  ;;  %11937 = vmatprep.subr.bf16.mxu0 %v13515_v19 }
 0xdf4   : > { %11916 = vmatpush3.bf16.msra.mxu1 %v13516_v55  ;;  %11938 = vmatpush3.bf16.msra.mxu0 %v13517_v36 }
 0xdf5   : > { %11917 = vmatprep.subr.bf16.mxu1 %v13518_v25  ;;  %11939 = vmatprep.subr.bf16.mxu0 %v13519_v53 }
 0xdf8   : > { %11918 = vmatpush3.bf16.msra.mxu1 %v13520_v15  ;;  %11940 = vmatpush3.bf16.msra.mxu0 %v13521_v11 }
 0xdf9   : > { %11919 = vmatprep.subr.bf16.mxu1 %v13522_v1  ;;  %11941 = vmatprep.subr.bf16.mxu0 %v13523_v58 }
 0xdfc   : > { %11920 = vmatpush3.bf16.msra.mxu1 %v13524_v59  ;;  %11942 = vmatpush3.bf16.msra.mxu0 %v13525_v8 }
 0xdfd   : > { %11921 = vmatprep.subr.bf16.mxu1 %v13526_v4  ;;  %11943 = vmatprep.subr.bf16.mxu0 %v13527_v37 }
 0xe00   : > { %11922 = vmatpush3.bf16.msra.mxu1 %v13528_v3  ;;  %11944 = vmatpush3.bf16.msra.mxu0 %v13529_v43 }
 0xe01   : > { %11923 = vmatprep.subr.bf16.mxu1 %v13530_v28  ;;  %11945 = vmatprep.subr.bf16.mxu0 %v13531_v9 }
 0xe04   : > { %11924 = vmatpush3.bf16.msra.mxu1 %v13532_v31  ;;  %11946 = vmatpush3.bf16.msra.mxu0 %v13533_v6 }
 0xe05   : > { %12605 = vmatprep.subr.bf16.mxu1 %v17738_v17  ;;  %12625 = vmatprep.subr.bf16.mxu0 %v17738_v17 }
 0xeba   : > { %v4980_v22 = vpop.f32.mrb[64].mxu1  ;;  %v5023_v61 = vpop.f32.mrb[72].mxu0 }
 0xebb   : > { %v4981_v57 = vadd.f32 %v4980_v22, %v4769_v14  ;;  %v5024_v62 = vadd.f32 %v5023_v61, %v4777_v29  ;;  %v4982_v32 = vpop.f32.mrb[65].mxu1  ;;  %v5025_v10 = vpop.f32.mrb[73].mxu0 }
 0xebc   : > { %v16012_v16 = vadd.f32 %v4982_v32, %v4773_v48  ;;  %v16014_v33 = vadd.f32 %v5025_v10, %v4781_v47  ;;  %v4984_v51 = vpop.f32.mrb[66].mxu1  ;;  %v5027_v5 = vpop.f32.mrb[74].mxu0 }
 0xebd   : > { %v16016_v38 = vmul.f32 0.70710677, %v4981_v57  ;;  %v16018_v45 = vmul.f32 0.70710677, %v5024_v62  ;;  %v4986_v39 = vpop.f32.mrb[67].mxu1  ;;  %v5029_v24 = vpop.f32.mrb[75].mxu0  ;;  %v16030_v55 = vadd.f32 %v4984_v51, %v4769_v14  ;;  %v16035_v53 = vadd.f32 %v5027_v5, %v4777_v29 }
 0xebe   : > { %v16021_v35 = vmul.f32 0.70710677, %v16012_v16  ;;  %v16027_v49 = vmul.f32 0.70710677, %v16014_v33  ;;  %v16037_v11 = vadd.f32 %v4986_v39, %v4773_v48  ;;  %v16047_v9 = vadd.f32 %v5029_v24, %v4781_v47 }
 0xebf   : > { %v5064_v60 = vand.u32 2147483647, %v16016_v38  ;;  %v5066_v54 = vand.u32 2147483647, %v16018_v45  ;;  %v16033_v25 = vmul.f32 0.70710677, %v16030_v55 }
 0xec0   : > { %v5065_v20 = vand.u32 2147483647, %v16021_v35  ;;  %v5067_v21 = vand.u32 2147483647, %v16027_v49  ;;  %v16041_v59 = vmul.f32 0.70710677, %v16035_v53 }
 0xec1   : > { %v5072_v52 = vmul.f32 0.3275911, %v5064_v60  ;;  %v5074_v44 = vmul.f32 0.3275911, %v5066_v54  ;;  %v5068_v1 = vand.u32 2147483647, %v16033_v25 }
 0xec2   : > { %v5073_v12 = vmul.f32 0.3275911, %v5065_v20  ;;  %v5075_v36 = vmul.f32 0.3275911, %v5067_v21  ;;  %v5176_v58 = vsub.f32 0.0, %v5064_v60  ;;  %v5178_v8 = vsub.f32 0.0, %v5066_v54 }
 0xec3   : > { %v5080_v56 = vadd.f32 1.0, %v5072_v52  ;;  %v5082_v63 = vadd.f32 1.0, %v5074_v44  ;;  %v5076_v4 = vmul.f32 0.3275911, %v5068_v1  ;;  %v5177_v37 = vsub.f32 0.0, %v5065_v20 }
 0xec4   : > { %v5081_v19 = vadd.f32 1.0, %v5073_v12  ;;  %v5083_v15 = vadd.f32 1.0, %v5075_v36  ;;  %v5070_v3 = vand.u32 2147483647, %v16041_v59  ;;  %v16045_v43 = vmul.f32 0.70710677, %v16037_v11 }
 0xec5   : > { %13946 = vrcp.f32 %v5080_v56  ;;  %v5084_v28 = vadd.f32 1.0, %v5076_v4  ;;  %v5184_v31 = vmul.f32 %v5176_v58, %v5064_v60  ;;  %v5186_v29 = vmul.f32 %v5178_v8, %v5066_v54 }
 0xec6   : > { %13948 = vrcp.f32 %v5082_v63  ;;  %v5078_v6 = vmul.f32 0.3275911, %v5070_v3  ;;  %v16050_v27 = vand.u32 2147483647, %v16045_v43  ;;  %v5179_v48 = vsub.f32 0.0, %v5067_v21 }
 0xec7   : > { %13950 = vrcp.f32 %v5081_v19  ;;  %v5185_v32 = vmul.f32 %v5177_v37, %v5065_v20  ;;  %v16058_v47 = vmul.f32 0.5, %v4981_v57  ;;  %v16060_v5 = vmul.f32 0.5, %v5024_v62 }
 0xec8   : > { %13952 = vrcp.f32 %v5083_v15  ;;  %v5086_v10 = vadd.f32 1.0, %v5078_v6  ;;  %v5077_v51 = vmul.f32 0.3275911, %v16050_v27  ;;  %v16064_v39 = vmul.f32 0.70710677, %v16047_v9 }
 0xec9   : > { %13954 = vrcp.f32 %v5084_v28  ;;  %v5192_v52 = vmul.f32 1.442695, %v5184_v31  ;;  %v5196_v20 = vmul.f32 1.442695, %v5186_v29  ;;  %v5187_v56 = vmul.f32 %v5179_v48, %v5067_v21 }
 0xeca   : > { %13956 = vrcp.f32 %v5086_v10  ;;  %v5085_v44 = vadd.f32 1.0, %v5077_v51  ;;  %v16069_v63 = vand.u32 2147483647, %v16064_v39  ;;  %v5194_v19 = vmul.f32 1.442695, %v5185_v32 }
 0xecb   : > { %v5180_v36 = vsub.f32 0.0, %v5068_v1  ;;  %v5182_v8 = vsub.f32 0.0, %v5070_v3  ;;  %v5198_v6 = vmul.f32 1.442695, %v5187_v56  ;;  %vm5048_vm1 = vcmp.ge.f32.partialorder %v16016_v38, 0.0 }
 0xecc   : > { %13958 = vrcp.f32 %v5085_v44  ;;  %v5079_v4 = vmul.f32 0.3275911, %v16069_v63  ;;  %vm5050_vm2 = vcmp.ge.f32.partialorder %v16018_v45, 0.0  ;;  %vm5049_vm3 = vcmp.ge.f32.partialorder %v16021_v35, 0.0 }
 0xecd   : > { %13960 = vpow2.f32 %v5192_v52  ;;  %vm5052_vm4 = vcmp.ge.f32.partialorder %v16033_v25, 0.0  ;;  %v5057_v35 = vsel %vm5049_vm3, 1.0, %v17735_v18  ;;  %vm5054_vm5 = vcmp.ge.f32.partialorder %v16041_v59, 0.0 }
 0xece   : > { %13962 = vpow2.f32 %v5196_v20  ;;  %v5087_v29 = vadd.f32 1.0, %v5079_v4  ;;  %vm5051_vm6 = vcmp.ge.f32.partialorder %v16027_v49, 0.0  ;;  %vm5053_vm7 = vcmp.ge.f32.partialorder %v16045_v43, 0.0 }
 0xecf   : > { %v16052_v14 = vpop.eup %13946  ;;  %13964 = vpow2.f32 %v5194_v19  ;;  %vm5055_vm8 = vcmp.ge.f32.partialorder %v16064_v39, 0.0  ;;  %v5039_v39 = vmul.f32 0.5, %v16047_v9 }
 0xed0   : > { %v16054_v22 = vpop.eup %13948  ;;  %v5104_v61 = vmul.f32 1.0614054, %v16052_v14  ;;  %13966 = vrcp.f32 %v5087_v29 }
 0xed1   : > { %v5106_v60 = vmul.f32 1.0614054, %v16054_v22  ;;  %v16066_v12 = vpop.eup %13950  ;;  %13968 = vpow2.f32 %v5198_v6 }
 0xed2   : > { %v5112_v54 = vadd.f32 -1.4531521, %v5104_v61  ;;  %v5105_v62 = vmul.f32 1.0614054, %v16066_v12  ;;  %v16073_v15 = vpop.eup %13952 }
 0xed3   : > { %v5114_v24 = vadd.f32 -1.4531521, %v5106_v60  ;;  %v5107_v28 = vmul.f32 1.0614054, %v16073_v15  ;;  %v16080_v10 = vpop.eup %13954  ;;  %v5188_v60 = vmul.f32 %v5180_v36, %v5068_v1 }
 0xed4   : > { %v5120_v57 = vmul.f32 %v16052_v14, %v5112_v54  ;;  %v5113_v21 = vadd.f32 -1.4531521, %v5105_v62  ;;  %v5190_v54 = vmul.f32 %v5182_v8, %v5070_v3  ;;  %v5108_v20 = vmul.f32 1.0614054, %v16080_v10  ;;  %v16087_v62 = vpop.eup %13956 }
 0xed5   : > { %v5122_v58 = vmul.f32 %v16054_v22, %v5114_v24  ;;  %v5115_v32 = vadd.f32 -1.4531521, %v5107_v28  ;;  %v5200_v8 = vmul.f32 1.442695, %v5188_v60  ;;  %v5110_v4 = vmul.f32 1.0614054, %v16087_v62 }
 0xed6   : > { %v5128_v37 = vadd.f32 1.4214138, %v5120_v57  ;;  %v5121_v61 = vmul.f32 %v16066_v12, %v5113_v21  ;;  %v5181_v57 = vsub.f32 0.0, %v16050_v27  ;;  %v5116_v36 = vadd.f32 -1.4531521, %v5108_v20  ;;  %v16095_v29 = vpop.eup %13958 }
 0xed7   : > { %v5130_v31 = vadd.f32 1.4214138, %v5122_v58  ;;  %v5123_v24 = vmul.f32 %v16073_v15, %v5115_v32  ;;  %13970 = vpow2.f32 %v5200_v8 }
 0xed8   : > { %v5136_v48 = vmul.f32 %v16052_v14, %v5128_v37  ;;  %v5129_v44 = vadd.f32 1.4214138, %v5121_v61  ;;  %v5204_v37 = vmul.f32 1.442695, %v5190_v54  ;;  %v5124_v6 = vmul.f32 %v16080_v10, %v5116_v36 }
 0xed9   : > { %v5138_v51 = vmul.f32 %v16054_v22, %v5130_v31  ;;  %v5131_v3 = vadd.f32 1.4214138, %v5123_v24  ;;  %v5118_v61 = vadd.f32 -1.4531521, %v5110_v4  ;;  %v5189_v32 = vmul.f32 %v5181_v57, %v16050_v27 }
 0xeda   : > { %v5144_v52 = vadd.f32 -0.28449672, %v5136_v48  ;;  %v5137_v1 = vmul.f32 %v16066_v12, %v5129_v44  ;;  %v5132_v24 = vadd.f32 1.4214138, %v5124_v6  ;;  %13972 = vpow2.f32 %v5204_v37 }
 0xedb   : > { %v5146_v56 = vadd.f32 -0.28449672, %v5138_v51  ;;  %v5139_v31 = vmul.f32 %v16073_v15, %v5131_v3  ;;  %v5183_v51 = vsub.f32 0.0, %v16069_v63 }
 0xedc   : > { %v5152_v19 = vmul.f32 %v16052_v14, %v5144_v52  ;;  %v5145_v28 = vadd.f32 -0.28449672, %v5137_v1  ;;  %v13961_v52 = vpop.eup %13960 }
 0xedd   : > { %v5154_v58 = vmul.f32 %v16054_v22, %v5146_v56  ;;  %v5147_v54 = vadd.f32 -0.28449672, %v5139_v31  ;;  %v13963_v20 = vpop.eup %13962  ;;  %v5126_v56 = vmul.f32 %v16087_v62, %v5118_v61  ;;  %v5202_v31 = vmul.f32 1.442695, %v5189_v32 }
 0xede   : > { %v5160_v21 = vadd.f32 0.2548296, %v5152_v19  ;;  %v5153_v44 = vmul.f32 %v16066_v12, %v5145_v28  ;;  %v5109_v19 = vmul.f32 1.0614054, %v16095_v29  ;;  %v13965_v1 = vpop.eup %13964  ;;  %v5191_v6 = vmul.f32 %v5183_v51, %v16069_v63 }
 0xedf   : > { %v5162_v48 = vadd.f32 0.2548296, %v5154_v58  ;;  %v5155_v3 = vmul.f32 %v16073_v15, %v5147_v54  ;;  %v16107_v36 = vpop.eup %13966  ;;  %v5056_v58 = vsel %vm5048_vm1, 1.0, %v17735_v18  ;;  %v5134_v4 = vadd.f32 1.4214138, %v5126_v56 }
 0xee0   : > { %v5168_v60 = vmul.f32 %v16052_v14, %v5160_v21  ;;  %v5161_v57 = vadd.f32 0.2548296, %v5153_v44  ;;  %v5140_v14 = vmul.f32 %v16080_v10, %v5132_v24  ;;  %v5117_v8 = vadd.f32 -1.4531521, %v5109_v19 }
 0xee1   : > { %v5170_v27 = vmul.f32 %v16054_v22, %v5162_v48  ;;  %v13969_v22 = vpop.eup %13968  ;;  %v5058_v48 = vsel %vm5050_vm2, 1.0, %v17735_v18  ;;  %v5142_v61 = vmul.f32 %v16087_v62, %v5134_v4  ;;  %v5111_v38 = vmul.f32 1.0614054, %v16107_v36 }
 0xee2   : > { %v5208_v21 = vmul.f32 %v13961_v52, %v5168_v60  ;;  %v5148_v28 = vadd.f32 -0.28449672, %v5140_v14  ;;  %v5125_v44 = vmul.f32 %v16095_v29, %v5117_v8  ;;  %v5169_v37 = vmul.f32 %v16066_v12, %v5161_v57 }
 0xee3   : > { %v5210_v54 = vmul.f32 %v13963_v20, %v5170_v27  ;;  %v5163_v24 = vadd.f32 0.2548296, %v5155_v3  ;;  %v5150_v32 = vadd.f32 -0.28449672, %v5142_v61  ;;  %v5119_v63 = vadd.f32 -1.4531521, %v5111_v38  ;;  %v13971_v3 = vpop.eup %13970 }
 0xee4   : > { %v5156_v52 = vmul.f32 %v16080_v10, %v5148_v28  ;;  %v5133_v60 = vadd.f32 1.4214138, %v5125_v44  ;;  %v5216_v51 = vsub.f32 1.0, %v5208_v21  ;;  %13974 = vpow2.f32 %v5202_v31  ;;  %v13973_v61 = vpop.eup %13972 }
 0xee5   : > { %v5206_v45 = vmul.f32 1.442695, %v5191_v6  ;;  %v5158_v19 = vmul.f32 %v16087_v62, %v5150_v32  ;;  %v5127_v20 = vmul.f32 %v16107_v36, %v5119_v63  ;;  %v5218_v27 = vsub.f32 1.0, %v5210_v54 }
 0xee6   : > { %v5164_v56 = vadd.f32 0.2548296, %v5156_v52  ;;  %v5141_v14 = vmul.f32 %v16095_v29, %v5133_v60  ;;  %v5209_v12 = vmul.f32 %v13965_v1, %v5169_v37  ;;  %v5171_v4 = vmul.f32 %v16073_v15, %v5163_v24 }
 0xee7   : > { %v5166_v8 = vadd.f32 0.2548296, %v5158_v19  ;;  %v5135_v28 = vadd.f32 1.4214138, %v5127_v20  ;;  %v5224_v31 = vmul.f32 %v5216_v51, %v5056_v58  ;;  %13976 = vpow2.f32 %v5206_v45 }
 0xee8   : > { %v5172_v57 = vmul.f32 %v16080_v10, %v5164_v56  ;;  %v5149_v21 = vadd.f32 -0.28449672, %v5141_v14  ;;  %v5060_v44 = vsel %vm5052_vm4, 1.0, %v17735_v18  ;;  %v5226_v38 = vmul.f32 %v5218_v27, %v5058_v48 }
 0xee9   : > { %v5174_v1 = vmul.f32 %v16087_v62, %v5166_v8  ;;  %v5143_v10 = vmul.f32 %v16107_v36, %v5135_v28  ;;  %v5217_v54 = vsub.f32 1.0, %v5209_v12  ;;  %v5211_v37 = vmul.f32 %v13969_v22, %v5171_v4 }
 0xeea   : > { %v5212_v6 = vmul.f32 %v13971_v3, %v5172_v57  ;;  %v5157_v25 = vmul.f32 %v16095_v29, %v5149_v21  ;;  %v5232_v32 = vadd.f32 1.0, %v5224_v31  ;;  %v5036_v60 = vmul.f32 0.5, %v16030_v55 }
 0xeeb   : > { %v5214_v58 = vmul.f32 %v13973_v61, %v5174_v1  ;;  %v5151_v52 = vadd.f32 -0.28449672, %v5143_v10  ;;  %v5062_v62 = vsel %vm5054_vm5, 1.0, %v17735_v18  ;;  %v5234_v19 = vadd.f32 1.0, %v5226_v38 }
 0xeec   : > { %v5220_v15 = vsub.f32 1.0, %v5212_v6  ;;  %v5165_v24 = vadd.f32 0.2548296, %v5157_v25  ;;  %v5225_v59 = vmul.f32 %v5217_v54, %v5057_v35  ;;  %v5219_v14 = vsub.f32 1.0, %v5211_v37 }
 0xeed   : > { %v5222_v51 = vsub.f32 1.0, %v5214_v58  ;;  %v5159_v48 = vmul.f32 %v16107_v36, %v5151_v52  ;;  %v5240_v55 = vmul.f32 %v5232_v32, %v16058_v47  ;;  %v5059_v57 = vsel %vm5051_vm6, 1.0, %v17735_v18 }
 0xeee   : > { %v5228_v63 = vmul.f32 %v5220_v15, %v5060_v44  ;;  %v5173_v56 = vmul.f32 %v16095_v29, %v5165_v24  ;;  %v13975_v45 = vpop.eup %13974  ;;  %v5038_v29 = vmul.f32 0.5, %v16035_v53  ;;  %v5061_v8 = vsel %vm5053_vm7, 1.0, %v17735_v18 }
 0xeef   : > { %v5230_v20 = vmul.f32 %v5222_v51, %v5062_v62  ;;  %v5167_v12 = vadd.f32 0.2548296, %v5159_v48  ;;  %v5242_v31 = vmul.f32 %v5234_v19, %v16060_v5  ;;  %v5233_v35 = vadd.f32 1.0, %v5225_v59 }
 0xef0   : > { %v5236_v22 = vadd.f32 1.0, %v5228_v63  ;;  %v5213_v27 = vmul.f32 %v13975_v45, %v5173_v56  ;;  %v5227_v47 = vmul.f32 %v5219_v14, %v5059_v57  ;;  %v5033_v1 = vmul.f32 0.5, %v16012_v16  ;;  %v14041_v14 = vld [vmem:[#allocation4 + $0x18] sm:$0xff] }
 0xef1   : > { %v5238_v4 = vadd.f32 1.0, %v5230_v20  ;;  %v5175_v28 = vmul.f32 %v16107_v36, %v5167_v12  ;;  %v13977_v43 = vpop.eup %13976  ;;  %v5037_v25 = vmul.f32 0.5, %v16037_v11  ;;  %v5063_v36 = vsel %vm5055_vm8, 1.0, %v17735_v18 }
 0xef2   : > { %v5244_v3 = vmul.f32 %v5236_v22, %v5036_v60  ;;  %v5221_v21 = vsub.f32 1.0, %v5213_v27  ;;  %v5241_v54 = vmul.f32 %v5233_v35, %v5033_v1  ;;  %v5235_v15 = vadd.f32 1.0, %v5227_v47  ;;  %v14042_v27 = vld [vmem:[#allocation4 + $0x50] sm:$0xff]  ;;  %v13534_v35 = vld [vmem:[%s17655_s8 + $0x80] sm:$0xff]  }
 0xef3   : > { %v5246_v61 = vmul.f32 %v5238_v4, %v5038_v29  ;;  %v5215_v44 = vmul.f32 %v13977_v43, %v5175_v28  ;;  %v5035_v58 = vmul.f32 0.5, %v16014_v33  ;;  %v13536_v47 = vld [vmem:[%s17655_s8 + $0x90] sm:$0xff]   ;;  %vm9645_vm2 = vcmask 523264  }
 0xef4   : > { %v5313_v6 = vpack.c.bf16 %v5244_v3, %v5240_v55  ;;  %v5229_v49 = vmul.f32 %v5221_v21, %v5061_v8  ;;  %v13540_v1 = vld [vmem:[%s17655_s8 + $0xb0] sm:$0xff]   ;;  %vm9945_vm4 = vcmask 261120   ;;  %vm10019_vm5 = vcmask 40960  }
 0xef5   : > { %v5315_v53 = vpack.c.bf16 %v5246_v61, %v5242_v31  ;;  %v5223_v38 = vsub.f32 1.0, %v5215_v44  ;;  %v5243_v32 = vmul.f32 %v5235_v15, %v5035_v58  ;;  %v13537_v61 = vld [vmem:[%s17655_s8 + $0x98] sm:$0xff]   ;;  %v13539_v44 = vld [vmem:[%s17655_s8 + $0xa8] sm:$0xff]  }
 0xef6   : > { %v5237_v10 = vadd.f32 1.0, %v5229_v49  ;;  %v13538_v49 = vld [vmem:[%s17655_s8 + $0xa0] sm:$0xff]  }
 0xef7   : > { %v5231_v37 = vmul.f32 %v5223_v38, %v5063_v36  ;;  %v13554_v38 = vld [vmem:[%s17726_s1 + $0x3c8] sm:$0xff]  }
 0xef8   : > { %v5245_v5 = vmul.f32 %v5237_v10, %v5037_v25  ;;  %v13550_v25 = vld [vmem:[%s17726_s1 + $0x3c0] sm:$0xff]   ;;  %v13555_v36 = vld [vmem:[%s17726_s1 + $0x388] sm:$0xff]  }
 0xef9   : > { %v5239_v24 = vadd.f32 1.0, %v5231_v37  ;;  %v13551_v10 = vld [vmem:[%s17726_s1 + $0x380] sm:$0xff]  }
 0xefa   : > { %v5314_v52 = vpack.c.bf16 %v5245_v5, %v5241_v54  ;;  %v13558_v54 = vld [vmem:[%s17726_s1 + $0x3d0] sm:$0xff]  }
 0xefb   : > { %v5247_v60 = vmul.f32 %v5239_v24, %v5039_v39 }
 0xefc   : > { %5546 = vmatprep.mubr.bf16.mxu1 %v5314_v52 }
 0xefd   : > { %5547 = vmatmul.mubr.bf16.vlgmr.msra.gmra.mrb[68].mxu1 %v5313_v6  ;;  %v5316_v16 = vpack.c.bf16 %v5247_v60, %v5243_v32  ;;  %v13535_v6 = vld [vmem:[%s17655_s8 + $0x88] sm:$0xff]   ;;  %v10679_v32 = vld [vmem:[%s17725_s0 + $0x1a] ss:$0 sm:$0xff] }
 0xefe   : > { %12606 = vmatpush3.bf16.msra.mxu1 %v15723_v41  ;;  %12621 = vmatprep.mubr.msk.bf16.mxu1 %vm14110_vm0, %v17738_v17 }
 0xeff   : > { %12607 = vmatprep.subr.bf16.mxu1 %v17738_v17  ;;  %5587 = vmatprep.mubr.bf16.mxu0 %v5316_v16 }
 0xf00   : > { %5588 = vmatmul.mubr.bf16.vlgmr.msra.gmra.mrb[76].mxu0 %v5315_v53  ;;  %v13541_v53 = vld [vmem:[%s17655_s8 + $0xb8] sm:$0xff]  }
 0xf01   : > { %12626 = vmatpush3.bf16.msra.mxu0 %v15723_v41  ;;  %12641 = vmatprep.mubr.msk.bf16.mxu0 %vm14110_vm0, %v17738_v17 }
 0xf02   : > { %12608 = vmatpush3.bf16.msra.mxu1 %v15729_v46  ;;  %12627 = vmatprep.subr.bf16.mxu0 %v17738_v17 }
 0xf03   : > { %12609 = vmatprep.subr.bf16.mxu1 %v17738_v17 }
 0xf05   : > { %12628 = vmatpush3.bf16.msra.mxu0 %v15729_v46  ;;  %v10645_v46 = vld [vmem:[%s17725_s0 + $0xb] ss:$0 sm:$0xff] }
 0xf06   : > { %12610 = vmatpush3.bf16.msra.mxu1 %v15738_v42  ;;  %12629 = vmatprep.subr.bf16.mxu0 %v17738_v17 }
 0xf07   : > { %12611 = vmatprep.subr.bf16.mxu1 %v17738_v17 }
 0xf09   : > { %12630 = vmatpush3.bf16.msra.mxu0 %v15738_v42 }
 0xf0a   : > { %12612 = vmatpush3.bf16.msra.mxu1 %v15747_v26  ;;  %12631 = vmatprep.subr.bf16.mxu0 %v17738_v17 }
 0xf0b   : > { %12613 = vmatprep.subr.bf16.mxu1 %v17738_v17 }
 0xf0d   : > { %12632 = vmatpush3.bf16.msra.mxu0 %v15747_v26 }
 0xf0e   : > { %12614 = vmatpush3.bf16.msra.mxu1 %v15756_v23  ;;  %12633 = vmatprep.subr.bf16.mxu0 %v17738_v17 }
 0xf0f   : > { %12615 = vmatprep.subr.bf16.mxu1 %v17738_v17 }
 0xf11   : > { %12634 = vmatpush3.bf16.msra.mxu0 %v15756_v23 }
 0xf12   : > { %12616 = vmatpush3.bf16.msra.mxu1 %v15765_v7  ;;  %12635 = vmatprep.subr.bf16.mxu0 %v17738_v17 }
 0xf13   : > { %12617 = vmatprep.subr.bf16.mxu1 %v17738_v17 }
 0xf15   : > { %12636 = vmatpush3.bf16.msra.mxu0 %v15765_v7 }
 0xf16   : > { %12618 = vmatpush3.bf16.msra.mxu1 %v15777_v2  ;;  %12637 = vmatprep.subr.bf16.mxu0 %v17738_v17 }
 0xf17   : > { %12619 = vmatprep.subr.bf16.mxu1 %v17738_v17 }
 0xf19   : > { %12638 = vmatpush3.bf16.msra.mxu0 %v15777_v2 }
 0xf1a   : > { %12620 = vmatpush3.bf16.msra.mxu1 %v15786_v34  ;;  %12639 = vmatprep.subr.bf16.mxu0 %v17738_v17 }
 0xf1b   : > { %12645 = vmatprep.subr.bf16.mxu1 %v17738_v17 }
 0xf1d   : > { %12640 = vmatpush3.bf16.msra.mxu0 %v15786_v34  ;;  %v10678_v34 = vld [vmem:[%s17725_s0 + $0xc] ss:$0 sm:$0xff] }
 0xf1e   : > { %11989 = vmatprep.subr.bf16.mxu0 %v13550_v25  ;;  %v13580_v25 = vld [vmem:[%s17726_s1 + $0x4f8] sm:$0xff]  }
 0xfd0   : > { %v11925_v41 = vpop.f32.mrb[68].mxu1 }
 0xfd1   : > { %v11926_v42 = vpop.f32.mrb[69].mxu1 }
 0xfd2   : > { %v11927_v26 = vadd.f32 %v11926_v42, %v11925_v41  ;;  %v11928_v23 = vpop.f32.mrb[70].mxu1  ;;  %v10680_v41 = vld [vmem:[%s17725_s0 + $0x1b] ss:$0 sm:$0xff] }
 0xfd3   : > { %v11929_v7 = vpop.f32.mrb[71].mxu1  ;;  %v11947_v33 = vpop.f32.mrb[76].mxu0 }
 0xfd4   : > { %v5549_v11 = vadd.f32 %v11927_v26, %v10645_v46  ;;  %v11930_v9 = vadd.f32 %v11929_v7, %v11928_v23  ;;  %v11948_v63 = vpop.f32.mrb[77].mxu0 }
 0xfd5   : > { %v11949_v2 = vadd.f32 %v11948_v63, %v11947_v33  ;;  %v11950_v62 = vpop.f32.mrb[78].mxu0  ;;  %v13543_v63 = vld [vmem:[%s17655_s8 + $0xc8] sm:$0xff]  }
 0xfd6   : > { %v5552_v51 = vadd.f32 %v11930_v9, %v10645_v46  ;;  %v11951_v56 = vpop.f32.mrb[79].mxu0 }
 0xfd7   : > { %v5590_v48 = vadd.f32 %v11949_v2, %v5549_v11  ;;  %v11952_v45 = vadd.f32 %v11951_v56, %v11950_v62  ;;  %v13542_v11 = vld [vmem:[%s17655_s8 + $0xc0] sm:$0xff]   ;;  %v13544_v2 = vld [vmem:[%s17655_s8 + $0xd0] sm:$0xff]   ;;  %v13545_v62 = vld [vmem:[%s17655_s8 + $0xd8] sm:$0xff]  }
 0xfd8   : > { %v13548_v56 = vld [vmem:[%s17655_s8 + $0xf0] sm:$0xff]  }
 0xfd9   : > { %v5601_v19 = vmul.f32 %v10678_v34, %v5590_v48  ;;  %v5593_v59 = vadd.f32 %v11952_v45, %v5552_v51  ;;  %v13546_v51 = vld [vmem:[%s17655_s8 + $0xe0] sm:$0xff]   ;;  %v13549_v48 = vld [vmem:[%s17655_s8 + $0xf8] sm:$0xff]  }
 0xfda   : > { %v13552_v45 = vld [vmem:[%s17726_s1 + $0x4c0] sm:$0xff]  }
 0xfdb   : > { %v5602_v22 = vmul.f32 %v10678_v34, %v5593_v59  ;;  %v5603_v20 = vadd.f32 %v14041_v14, %v5601_v19  ;;  %v13547_v34 = vld [vmem:[%s17655_s8 + $0xe8] sm:$0xff]   ;;  %v13553_v59 = vld [vmem:[%s17726_s1 + $0x480] sm:$0xff]  }
 0xfdc   : > { %v13556_v14 = vld [vmem:[%s17726_s1 + $0x4c8] sm:$0xff]  }
 0xfdd   : > { %v5604_v12 = vadd.f32 %v14042_v27, %v5602_v22  ;;  %v13559_v27 = vld [vmem:[%s17726_s1 + $0x390] sm:$0xff]  }
 0xfdf   : > { %v5607_v55 = vpack.c.bf16 %v5604_v12, %v5603_v20 }
 0xfe1   : > { %12622 = vmatmul.mubr.bf16.vlgmr.msra.gmra.mrb[72].mxu1 %v5607_v55  ;;  %v13561_v55 = vld [vmem:[%s17726_s1 + $0x490] sm:$0xff]  }
 0xfe2   : > { %12661 = vmatprep.mubr.msk.bf16.mxu1 %vm14110_vm0, %v17738_v17  ;;  %12646 = vmatpush3.bf16.msra.mxu1 %v13534_v35  ;;  %v13571_v35 = vld [vmem:[%s17726_s1 + $0x3a8] sm:$0xff]  }
 0xfe3   : > { %12647 = vmatprep.subr.bf16.mxu1 %v17738_v17 }
 0xfe6   : > { %12648 = vmatpush3.bf16.msra.mxu1 %v13535_v6  ;;  %v13572_v6 = vld [vmem:[%s17726_s1 + $0x4e8] sm:$0xff]  }
 0xfe7   : > { %12649 = vmatprep.subr.bf16.mxu1 %v17738_v17 }
 0xfea   : > { %12650 = vmatpush3.bf16.msra.mxu1 %v13536_v47  ;;  %v13573_v47 = vld [vmem:[%s17726_s1 + $0x4a8] sm:$0xff]  }
 0xfeb   : > { %12651 = vmatprep.subr.bf16.mxu1 %v17738_v17 }
 0xfee   : > { %12652 = vmatpush3.bf16.msra.mxu1 %v13537_v61  ;;  %v13574_v61 = vld [vmem:[%s17726_s1 + $0x3f0] sm:$0xff]  }
 0xfef   : > { %12653 = vmatprep.subr.bf16.mxu1 %v17738_v17 }
 0xff2   : > { %12654 = vmatpush3.bf16.msra.mxu1 %v13538_v49  ;;  %v13576_v49 = vld [vmem:[%s17726_s1 + $0x4f0] sm:$0xff]  }
 0xff3   : > { %12655 = vmatprep.subr.bf16.mxu1 %v17738_v17 }
 0xff6   : > { %12656 = vmatpush3.bf16.msra.mxu1 %v13539_v44  ;;  %v13575_v44 = vld [vmem:[%s17726_s1 + $0x3b0] sm:$0xff]  }
 0xff7   : > { %12657 = vmatprep.subr.bf16.mxu1 %v17738_v17 }
 0xffa   : > { %12658 = vmatpush3.bf16.msra.mxu1 %v13540_v1  ;;  %v13577_v1 = vld [vmem:[%s17726_s1 + $0x4b0] sm:$0xff]  }
 0xffb   : > { %12659 = vmatprep.subr.bf16.mxu1 %v17738_v17 }
 0xffe   : > { %12660 = vmatpush3.bf16.msra.mxu1 %v13541_v53  ;;  %v13578_v53 = vld [vmem:[%s17726_s1 + $0x3f8] sm:$0xff]  }
 0xfff   : > { %12665 = vmatprep.subr.bf16.mxu1 %v17738_v17 }
0x10b4   : > { %v5642_v57 = vpop.f32.mrb[72].mxu1 }
0x10b5   : > { %v5649_v3 = vsub.f32 %v5603_v20, %v5642_v57  ;;  %v12623_v29 = vpop.f32.mrb[73].mxu1  ;;  %v13557_v20 = vld [vmem:[%s17726_s1 + $0x488] sm:$0xff]   ;;  %v13562_v57 = vld [vmem:[%s17726_s1 + $0x3d8] sm:$0xff]  }
0x10b6   : > { %v5645_v4 = vpop.f32.mrb[74].mxu1  ;;  %v13564_v29 = vld [vmem:[%s17726_s1 + $0x4d8] sm:$0xff]  }
0x10b7   : > { %v5650_v8 = vsub.f32 %v5604_v12, %v5645_v4  ;;  %v12624_v21 = vpop.f32.mrb[75].mxu1  ;;  %v5651_v28 = vmul.f32 %v5649_v3, %v5649_v3  ;;  %v13560_v12 = vld [vmem:[%s17726_s1 + $0x4d0] sm:$0xff]   ;;  %v13565_v4 = vld [vmem:[%s17726_s1 + $0x498] sm:$0xff]  }
0x10b8   : > { %v13567_v21 = vld [vmem:[%s17726_s1 + $0x3a0] sm:$0xff]  }
0x10b9   : > { %v5652_v43 = vmul.f32 %v5650_v8, %v5650_v8 }
0x10bb   : > { %v5653_v31 = vpack.c.bf16 %v5652_v43, %v5651_v28  ;;  %v13568_v28 = vld [vmem:[%s17726_s1 + $0x4e0] sm:$0xff]  }
0x10bc   : > { %v13569_v43 = vld [vmem:[%s17726_s1 + $0x4a0] sm:$0xff]  }
0x10bd   : > { %12642 = vmatmul.mubr.bf16.vlgmr.msra.gmra.mrb[80].mxu0 %v5653_v31  ;;  %v13570_v31 = vld [vmem:[%s17726_s1 + $0x3e8] sm:$0xff]  }
0x10be   : > { %11990 = vmatpush3.bf16.msra.mxu0 %v13551_v10  ;;  %v13579_v10 = vld [vmem:[%s17726_s1 + $0x3b8] sm:$0xff]  }
0x10bf   : > { %11991 = vmatprep.subr.bf16.mxu0 %v13554_v38  ;;  %v13581_v38 = vld [vmem:[%s17726_s1 + $0x4b8] sm:$0xff]  }
0x10c2   : > { %11992 = vmatpush3.bf16.msra.mxu0 %v13555_v36  ;;  %v13582_v36 = vld [vmem:[%s17726_s1 + $0x440] sm:$0xff]  }
0x10c3   : > { %11993 = vmatprep.subr.bf16.mxu0 %v13558_v54  ;;  %v10705_v54 = vld [vmem:[%s17725_s0 + $0x1c] ss:$0 sm:$0xff] }
0x10c6   : > { %11994 = vmatpush3.bf16.msra.mxu0 %v13559_v27  ;;  %v13583_v27 = vld [vmem:[%s17726_s1 + $0x400] sm:$0xff]  }
0x10c7   : > { %11995 = vmatprep.subr.bf16.mxu0 %v13562_v57 }
0x1190   : > { %v5688_v15 = vpop.f32.mrb[80].mxu0 }
0x1191   : > { %v5689_v5 = vadd.f32 1e-06, %v5688_v15  ;;  %v12643_v37 = vpop.f32.mrb[81].mxu0 }
0x1192   : > { %v5691_v58 = vpop.f32.mrb[82].mxu0 }
0x1193   : > { %13978 = vrsqrt.f32 %v5689_v5  ;;  %v5692_v39 = vadd.f32 1e-06, %v5691_v58  ;;  %v12644_v24 = vpop.f32.mrb[83].mxu0 }
0x1195   : > { %13980 = vrsqrt.f32 %v5692_v39 }
0x119d   : > { %v13979_v52 = vpop.eup %13978 }
0x119e   : > { %v5697_v60 = vmul.f32 %v13979_v52, %v5649_v3  ;;  %v13563_v3 = vld [vmem:[%s17726_s1 + $0x398] sm:$0xff]  }
0x119f   : > { %v13981_v16 = vpop.eup %13980  ;;  %11996 = vmatpush3.bf16.msra.mxu0 %v13563_v3 }
0x11a0   : > { %v5703_v46 = vmul.f32 %v10679_v32, %v5697_v60  ;;  %v5698_v42 = vmul.f32 %v13981_v16, %v5650_v8  ;;  %v13566_v8 = vld [vmem:[%s17726_s1 + $0x3e0] sm:$0xff]  }
0x11a1   : > { %11997 = vmatprep.subr.bf16.mxu0 %v13566_v8 }
0x11a2   : > { %v5709_v26 = vadd.f32 %v10680_v41, %v5703_v46  ;;  %v5704_v23 = vmul.f32 %v10679_v32, %v5698_v42 }
0x11a3   : > { %11998 = vmatpush3.bf16.msra.mxu0 %v13567_v21 }
0x11a4   : > { %5711 = vst [vmem:[#allocation3] sm:$0xff] %v5709_v26  ;;  %v5710_v7 = vadd.f32 %v10680_v41, %v5704_v23  ;;  %11999 = vmatprep.subr.bf16.mxu0 %v13570_v31 }
0x11a6   : > { %5712 = vst [vmem:[#allocation3 + $0x8] sm:$0xff] %v5710_v7 }
0x11a7   : > { %12000 = vmatpush3.bf16.msra.mxu0 %v13571_v35 }
0x11a8   : > { %12001 = vmatprep.subr.bf16.mxu0 %v13574_v61 }
0x11ab   : > { %12002 = vmatpush3.bf16.msra.mxu0 %v13575_v44 }
0x11ac   : > { %12003 = vmatprep.subr.bf16.mxu0 %v13578_v53  ;;  %v13585_v53 = vld [vmem:[%s17726_s1 + $0x408] sm:$0xff]  }
0x11ad   : > { %v5714_v33 = vld [vmem:[#allocation3] ss:$2 sm:$0xff]  ;;  %v5826_v19 = vld [vmem:[#allocation3 + $0x1] ss:$2 sm:$0xff] }
0x11ae   : > { %v5732_v9 = vpack.c.bf16 %v5714_v33, %v5714_v33  ;;  %v5844_v22 = vpack.c.bf16 %v5826_v19, %v5826_v19 }
0x11af   : > { %12004 = vmatpush3.bf16.msra.mxu0 %v13579_v10  ;;  %v13587_v10 = vld [vmem:[%s17726_s1 + $0x410] sm:$0xff]  }
0x11b0   : > { %12662 = vmatmul.mubr.bf16.vlgmr.msra.gmra.mrb[76].mxu1 %v5732_v9  ;;  %12011 = vmatprep.subr.bf16.mxu0 %v13582_v36  ;;  %v13589_v36 = vld [vmem:[%s17726_s1 + $0x418] sm:$0xff]  }
0x11b1   : > { %12666 = vmatpush3.bf16.msra.mxu1 %v13542_v11  ;;  %12681 = vmatprep.mubr.msk.bf16.mxu1 %vm14110_vm0, %v17738_v17 }
0x11b2   : > { %12667 = vmatprep.subr.bf16.mxu1 %v17738_v17 }
0x11b5   : > { %12668 = vmatpush3.bf16.msra.mxu1 %v13543_v63 }
0x11b6   : > { %12669 = vmatprep.subr.bf16.mxu1 %v17738_v17 }
0x11b9   : > { %12670 = vmatpush3.bf16.msra.mxu1 %v13544_v2 }
0x11ba   : > { %12671 = vmatprep.subr.bf16.mxu1 %v17738_v17 }
0x11bd   : > { %12672 = vmatpush3.bf16.msra.mxu1 %v13545_v62 }
0x11be   : > { %12673 = vmatprep.subr.bf16.mxu1 %v17738_v17 }
0x11c1   : > { %12674 = vmatpush3.bf16.msra.mxu1 %v13546_v51 }
0x11c2   : > { %12675 = vmatprep.subr.bf16.mxu1 %v17738_v17 }
0x11c5   : > { %12676 = vmatpush3.bf16.msra.mxu1 %v13547_v34 }
0x11c6   : > { %12677 = vmatprep.subr.bf16.mxu1 %v17738_v17 }
0x11c9   : > { %12678 = vmatpush3.bf16.msra.mxu1 %v13548_v56 }
0x11ca   : > { %12679 = vmatprep.subr.bf16.mxu1 %v17738_v17 }
0x11cd   : > { %12680 = vmatpush3.bf16.msra.mxu1 %v13549_v48 }
0x11ce   : > { %12033 = vmatprep.subr.bf16.mxu1 %v13552_v45 }
0x11d0   : > { %12682 = vmatmul.mubr.bf16.vlgmr.msra.gmra.mrb[76].mxu1 %v5844_v22 }
0x11d1   : > { %12034 = vmatpush3.bf16.msra.mxu1 %v13553_v59 }
0x11d2   : > { %12035 = vmatprep.subr.bf16.mxu1 %v13556_v14 }
0x11d5   : > { %12036 = vmatpush3.bf16.msra.mxu1 %v13557_v20 }
0x11d6   : > { %12037 = vmatprep.subr.bf16.mxu1 %v13560_v12 }
0x11d9   : > { %12038 = vmatpush3.bf16.msra.mxu1 %v13561_v55 }
0x11da   : > { %12039 = vmatprep.subr.bf16.mxu1 %v13564_v29 }
0x11dd   : > { %12040 = vmatpush3.bf16.msra.mxu1 %v13565_v4 }
0x11de   : > { %12041 = vmatprep.subr.bf16.mxu1 %v13568_v28 }
0x11e1   : > { %12042 = vmatpush3.bf16.msra.mxu1 %v13569_v43 }
0x11e2   : > { %12043 = vmatprep.subr.bf16.mxu1 %v13572_v6  ;;  %v13584_v6 = vld [vmem:[%s17726_s1 + $0x448] sm:$0xff]  }
0x11e5   : > { %12044 = vmatpush3.bf16.msra.mxu1 %v13573_v47 }
0x11e6   : > { %12045 = vmatprep.subr.bf16.mxu1 %v13576_v49 }
0x11e9   : > { %12046 = vmatpush3.bf16.msra.mxu1 %v13577_v1 }
0x11ea   : > { %12047 = vmatprep.subr.bf16.mxu1 %v13580_v25  ;;  %v13586_v25 = vld [vmem:[%s17726_s1 + $0x450] sm:$0xff]  }
0x11ed   : > { %12048 = vmatpush3.bf16.msra.mxu1 %v13581_v38  ;;  %v13588_v38 = vld [vmem:[%s17726_s1 + $0x458] sm:$0xff]  }
0x11ee   : > { %12705 = vmatprep.subr.bf16.mxu1 %v17738_v17 }
0x12a3   : > { %v5927_v15 = vpop.f32.mrb[76].mxu1 }
0x12a4   : > { %v16371_v5 = vadd.f32 %v10705_v54, %v5927_v15  ;;  %v12683_v37 = vpop.f32.mrb[77].mxu1  ;;  %v13590_v54 = vld [vmem:[%s17726_s1 + $0x460] sm:$0xff]  }
0x12a5   : > { %v5930_v58 = vpop.f32.mrb[78].mxu1  ;;  %v13591_v15 = vld [vmem:[%s17726_s1 + $0x420] sm:$0xff]   ;;  %v13592_v37 = vld [vmem:[%s17726_s1 + $0x468] sm:$0xff]  }
0x12a6   : > { %5936 = vst [vmem:[#allocation2 + $0x8] sm:$0xf] %v16371_v5  ;;  %5939 = vst [vmem:[#allocation2 + $0x24] sm:$0xf0] %v16371_v5  ;;  %v12684_v39 = vpop.f32.mrb[79].mxu1  ;;  %v13593_v58 = vld [vmem:[%s17726_s1 + $0x428] sm:$0xff]  }
0x12a7   : > { %v13594_v39 = vld [vmem:[%s17726_s1 + $0x470] sm:$0xff]  }
0x12ad   : > { %v5961_v24 = vld [vmem:[#allocation2 + $0x8] sm:$0xf] }
0x12ae   : > { %v5963_v52 = vld [vmem:[#allocation2 + $0x28] sm:$0xf]  ;;  %5962 = vst [vmem:[#allocation4 + $0x18] sm:$0xf] %v5961_v24  ;;  %v13595_v24 = vld [vmem:[%s17726_s1 + $0x430] sm:$0xff]  }
0x12af   : > { %v5968_v32 = vld [vmem:[#allocation2 + $0x9] sm:$0xf]  ;;  %v5940_v46 = vld [vmem:[#allocation2 + $0x5] sm:$0xf]  ;;  %v5965_v34 = vrot.slane %v5963_v52, 4  ;;  %v13596_v52 = vld [vmem:[%s17726_s1 + $0x478] sm:$0xff]  }
0x12b0   : > { %v5970_v60 = vld [vmem:[#allocation2 + $0x29] sm:$0xf]  ;;  %5969 = vst [vmem:[#allocation4 + $0x20] sm:$0xf] %v5968_v32  ;;  %v5942_v42 = vld [vmem:[#allocation2 + $0x25] sm:$0xf] }
0x12b1   : > { %v5982_v16 = vld [vmem:[#allocation2 + $0xb] sm:$0xf]  ;;  %v5947_v26 = vld [vmem:[#allocation2 + $0x6] sm:$0xf]  ;;  %5941 = vst [vmem:[#allocation4] sm:$0xf] %v5940_v46 }
0x12b2   : > { %v5984_v41 = vld [vmem:[#allocation2 + $0x2b] sm:$0xf]  ;;  %5983 = vst [vmem:[#allocation4 + $0x30] sm:$0xf] %v5982_v16  ;;  %5948 = vst [vmem:[#allocation4 + $0x8] sm:$0xf] %v5947_v26 }
0x12b3   : > { %v5949_v23 = vld [vmem:[#allocation2 + $0x26] sm:$0xf]  ;;  %v5975_v9 = vld [vmem:[#allocation2 + $0xa] sm:$0xf]  ;;  %v5944_v2 = vrot.slane %v5942_v42, 4  ;;  %v5972_v51 = vrot.slane %v5970_v60, 4 }
0x12b4   : > { %v5954_v7 = vld [vmem:[#allocation2 + $0x7] sm:$0xf]  ;;  %v5951_v11 = vrot.slane %v5949_v23, 4  ;;  %5976 = vst [vmem:[#allocation4 + $0x28] sm:$0xf] %v5975_v9  ;;  %v5986_v48 = vrot.slane %v5984_v41, 4 }
0x12b5   : > { %v5956_v33 = vld [vmem:[#allocation2 + $0x27] sm:$0xf]  ;;  %7860 = vst [vmem:[#allocation2 + $0x5] sm:$0x7] %v17738_v17  ;;  %5955 = vst [vmem:[#allocation4 + $0x10] sm:$0xf] %v5954_v7 }
0x12b6   : > { %7863 = vst [vmem:[#allocation2 + $0x25] sm:$0x7] %v17738_v17  ;;  %v5977_v63 = vld [vmem:[#allocation2 + $0x2a] sm:$0xf]  ;;  %7861 = vst [vmem:[#allocation2 + $0xa] sm:$0x7] %v17738_v17 }
0x12b7   : > { %v5979_v62 = vrot.slane %v5977_v63, 4  ;;  %7864 = vst [vmem:[#allocation2 + $0x2a] sm:$0x7] %v17738_v17  ;;  %v5958_v56 = vrot.slane %v5956_v33, 4  ;;  %5953 = vst [vmem:[#allocation4 + $0x8] sm:$0xf0] %v5951_v11 }
0x12b8   : > { %5946 = vst [vmem:[#allocation4] sm:$0xf0] %v5944_v2  ;;  %5974 = vst [vmem:[#allocation4 + $0x20] sm:$0xf0] %v5972_v51  ;;  %v13597_v32 = vld [vmem:[%s17726_s1 + $0x438] sm:$0xff]   ;;  %v13598_v16 = vld [vmem:[%s17726_s1 + $0x500] sm:$0xff]  }
0x12b9   : > { %5981 = vst [vmem:[#allocation4 + $0x28] sm:$0xf0] %v5979_v62  ;;  %5967 = vst [vmem:[#allocation4 + $0x18] sm:$0xf0] %v5965_v34  ;;  %v13599_v46 = vld [vmem:[%s17726_s1 + $0x508] sm:$0xff]   ;;  %v13600_v42 = vld [vmem:[%s17726_s1 + $0x510] sm:$0xff]  }
0x12ba   : > { %5960 = vst [vmem:[#allocation4 + $0x10] sm:$0xf0] %v5958_v56  ;;  %5988 = vst [vmem:[#allocation4 + $0x30] sm:$0xf0] %v5986_v48  ;;  %v13601_v26 = vld [vmem:[%s17726_s1 + $0x518] sm:$0xff]   ;;  %v13602_v23 = vld [vmem:[%s17726_s1 + $0x520] sm:$0xff]  }
0x12bb   : > { %v13603_v7 = vld [vmem:[%s17726_s1 + $0x528] sm:$0xff]   ;;  %v13604_v33 = vld [vmem:[%s17726_s1 + $0x530] sm:$0xff]   ;;  %v13605_v11 = vld [vmem:[%s17726_s1 + $0x538] sm:$0xff]  }
0x12bc   : > { %v7873_v45 = vld [vmem:[#allocation2 + $0x6] sm:$0x3]  ;;  %v16476_v2 = vld [vmem:[%s17724_s22 + $0x88] sm:$0xff]   ;;  %v16485_v62 = vld [vmem:[%s17724_s22 + $0x90] sm:$0xff]  }
0x12bd   : > { %v7875_v19 = vld [vmem:[#allocation2 + $0x26] sm:$0x3]  ;;  %v7901_v14 = vld [vmem:[#allocation2 + $0xa] sm:$0x3]  ;;  %v16494_v51 = vld [vmem:[%s17724_s22 + $0x98] sm:$0xff]  }
0x12be   : > { %v7866_v59 = vld [vmem:[#allocation2 + $0x5] sm:$0x3]  ;;  %v7877_v22 = vrot.slane %v7875_v19, 6  ;;  %v7903_v20 = vld [vmem:[#allocation2 + $0x2a] sm:$0x3]  ;;  %v16521_v48 = vld [vmem:[%s17724_s22 + $0xb0] sm:$0xff]  }
0x12bf   : > { %v5990_v12 = vld [vmem:[#allocation4 + $0x8] sm:$0xff]  ;;  %v7905_v55 = vrot.slane %v7903_v20, 6  ;;  %v5989_v57 = vld [vmem:[#allocation4] sm:$0xff] }
0x12c0   : > { %v7868_v3 = vld [vmem:[#allocation2 + $0x25] sm:$0x3]  ;;  %v6110_v29 = vpack.c.bf16 %v5990_v12, %v5990_v12  ;;  %7874 = vst [vmem:[#allocation4 + $0x8] sm:$0x3] %v7873_v45  ;;  %7879 = vst [vmem:[#allocation4 + $0x8] sm:$0xc] %v7877_v22  ;;  %v6109_v8 = vpack.c.bf16 %v5989_v57, %v5989_v57 }
0x12c1   : > { %v5994_v4 = vld [vmem:[#allocation4 + $0x28] sm:$0xff]  ;;  %7867 = vst [vmem:[#allocation4] sm:$0x3] %v7866_v59  ;;  %v7870_v21 = vrot.slane %v7868_v3, 6  ;;  %v5993_v28 = vld [vmem:[#allocation4 + $0x20] sm:$0xff]  ;;  %v5992_v43 = vld [vmem:[#allocation4 + $0x18] sm:$0xff] }
0x12c2   : > { %v6114_v31 = vpack.c.bf16 %v5994_v4, %v5994_v4  ;;  %7902 = vst [vmem:[#allocation4 + $0x28] sm:$0x3] %v7901_v14  ;;  %7907 = vst [vmem:[#allocation4 + $0x28] sm:$0xc] %v7905_v55  ;;  %v6113_v35 = vpack.c.bf16 %v5993_v28, %v5993_v28  ;;  %v16385_v47 = vld [vmem:[#allocation4 + $0x30] sm:$0xff]  ;;  %6489 = vmatprep.mubr.bf16.mxu0 %v6110_v29  ;;  %v6112_v44 = vpack.c.bf16 %v5992_v43, %v5992_v43  ;;  %v16470_v63 = vld [vmem:[%s17724_s22 + $0x80] sm:$0xff]  }
0x12c3   : > { %v7908_v61 = vld [vmem:[#allocation2 + $0xb] sm:$0x3]  ;;  %7872 = vst [vmem:[#allocation4] sm:$0xc] %v7870_v21  ;;  %6490 = vmatmul.mubr.bf16.vlgmr.msra.gmra.mrb[84].mxu0 %v6109_v8  ;;  %v5991_v60 = vld [vmem:[#allocation4 + $0x10] sm:$0xff]  ;;  %v6115_v9 = vpack.c.bf16 %v16385_v47, %v16385_v47  ;;  %v16503_v34 = vld [vmem:[%s17724_s22 + $0xa0] sm:$0xff]  }
0x12c4   : > { %7909 = vst [vmem:[#allocation4 + $0x30] sm:$0x3] %v7908_v61  ;;  %v7910_v49 = vld [vmem:[#allocation2 + $0x2b] sm:$0x3]  ;;  %6569 = vmatprep.mubr.bf16.mxu1 %v6114_v31  ;;  %12012 = vmatpush3.bf16.msra.mxu0 %v13583_v27  ;;  %v6111_v41 = vpack.c.bf16 %v5991_v60, %v5991_v60  ;;  %v16533_v45 = vld [vmem:[%s17724_s22 + $0xb8] sm:$0xff]  }
0x12c5   : > { %v7912_v1 = vrot.slane %v7910_v49, 6  ;;  %6570 = vmatmul.mubr.bf16.vlgmr.msra.gmra.mrb[80].mxu1 %v6113_v35  ;;  %6529 = vmatprep.mubr.bf16.mxu0 %v6112_v44  ;;  %v16512_v56 = vld [vmem:[%s17724_s22 + $0xa8] sm:$0xff]  }
0x12c6   : > { %12013 = vmatprep.subr.bf16.mxu0 %v13584_v6  ;;  %12721 = vmatprep.mubr.msk.bf16.mxu1 %vm14110_vm0, %v17738_v17  ;;  %v10842_v29 = vld [vmem:[%s17725_s0 + $0xd] ss:$0 sm:$0xff] }
0x12c7   : > { %7914 = vst [vmem:[#allocation4 + $0x30] sm:$0xc] %v7912_v1  ;;  %12706 = vmatpush3.bf16.msra.mxu1 %v16470_v63 }
0x12c8   : > { %12014 = vmatpush3.bf16.msra.mxu0 %v13585_v53  ;;  %12707 = vmatprep.subr.bf16.mxu1 %v17738_v17 }
0x12c9   : > { %12015 = vmatprep.subr.bf16.mxu0 %v13586_v25  ;;  %v13614_v25 = vld [vmem:[%s17653_s6 + $0x200] ss:$16 sps:$4 sm:$0xff]  }
0x12cb   : > { %12708 = vmatpush3.bf16.msra.mxu1 %v16476_v2 }
0x12cc   : > { %12016 = vmatpush3.bf16.msra.mxu0 %v13587_v10  ;;  %12709 = vmatprep.subr.bf16.mxu1 %v17738_v17  ;;  %v13616_v10 = vld [vmem:[%s17653_s6 + $0x204] ss:$16 sps:$4 sm:$0xff]  }
0x12cd   : > { %12017 = vmatprep.subr.bf16.mxu0 %v13588_v38  ;;  %v13619_v38 = vld [vmem:[%s17653_s6 + $0x20c] ss:$16 sps:$4 sm:$0xff]  }
0x12cf   : > { %12710 = vmatpush3.bf16.msra.mxu1 %v16485_v62 }
0x12d0   : > { %12018 = vmatpush3.bf16.msra.mxu0 %v13589_v36  ;;  %12711 = vmatprep.subr.bf16.mxu1 %v17738_v17  ;;  %v13622_v36 = vld [vmem:[%s17653_s6 + $0x224] ss:$16 sps:$4 sm:$0xff]  }
0x12d1   : > { %12019 = vmatprep.subr.bf16.mxu0 %v13590_v54  ;;  %v13620_v54 = vld [vmem:[%s17653_s6 + $0x220] ss:$16 sps:$4 sm:$0xff]  }
0x12d3   : > { %12712 = vmatpush3.bf16.msra.mxu1 %v16494_v51 }
0x12d4   : > { %12020 = vmatpush3.bf16.msra.mxu0 %v13591_v15  ;;  %12713 = vmatprep.subr.bf16.mxu1 %v17738_v17  ;;  %v13628_v15 = vld [vmem:[%s17653_s6 + $0x244] ss:$16 sps:$4 sm:$0xff]  }
0x12d5   : > { %12021 = vmatprep.subr.bf16.mxu0 %v13592_v37  ;;  %v13626_v37 = vld [vmem:[%s17653_s6 + $0x240] ss:$16 sps:$4 sm:$0xff]  }
0x12d7   : > { %12714 = vmatpush3.bf16.msra.mxu1 %v16503_v34 }
0x12d8   : > { %12022 = vmatpush3.bf16.msra.mxu0 %v13593_v58  ;;  %12715 = vmatprep.subr.bf16.mxu1 %v17738_v17 }
0x12d9   : > { %12023 = vmatprep.subr.bf16.mxu0 %v13594_v39 }
0x12db   : > { %12716 = vmatpush3.bf16.msra.mxu1 %v16512_v56 }
0x12dc   : > { %12024 = vmatpush3.bf16.msra.mxu0 %v13595_v24  ;;  %12717 = vmatprep.subr.bf16.mxu1 %v17738_v17 }
0x12dd   : > { %12025 = vmatprep.subr.bf16.mxu0 %v13596_v52 }
0x12df   : > { %12718 = vmatpush3.bf16.msra.mxu1 %v16521_v48 }
0x12e0   : > { %12026 = vmatpush3.bf16.msra.mxu0 %v13597_v32  ;;  %12719 = vmatprep.subr.bf16.mxu1 %v17738_v17 }
0x12e1   : > { %12685 = vmatprep.subr.bf16.mxu0 %v17738_v17 }
0x12e3   : > { %6530 = vmatmul.mubr.bf16.vlgmr.msra.gmra.mrb[88].mxu0 %v6111_v41  ;;  %12720 = vmatpush3.bf16.msra.mxu1 %v16533_v45 }
0x12e4   : > { %12686 = vmatpush3.bf16.msra.mxu0 %v13598_v16  ;;  %12701 = vmatprep.mubr.msk.bf16.mxu0 %vm14110_vm0, %v17738_v17  ;;  %v13617_v16 = vld [vmem:[%s17653_s6 + $0x208] ss:$16 sps:$4 sm:$0xff]  }
0x12e5   : > { %12687 = vmatprep.subr.bf16.mxu0 %v17738_v17  ;;  %6997 = vmatprep.subr.bf16.mxu1 %v13616_v10 }
0x12e8   : > { %12688 = vmatpush3.bf16.msra.mxu0 %v13599_v46  ;;  %v13625_v46 = vld [vmem:[%s17653_s6 + $0x22c] ss:$16 sps:$4 sm:$0xff]  }
0x12e9   : > { %12689 = vmatprep.subr.bf16.mxu0 %v17738_v17 }
0x12ec   : > { %12690 = vmatpush3.bf16.msra.mxu0 %v13600_v42  ;;  %v13623_v42 = vld [vmem:[%s17653_s6 + $0x228] ss:$16 sps:$4 sm:$0xff]  }
0x12ed   : > { %12691 = vmatprep.subr.bf16.mxu0 %v17738_v17 }
0x12f0   : > { %12692 = vmatpush3.bf16.msra.mxu0 %v13601_v26  ;;  %v13631_v26 = vld [vmem:[%s17653_s6 + $0x24c] ss:$16 sps:$4 sm:$0xff]  }
0x12f1   : > { %12693 = vmatprep.subr.bf16.mxu0 %v17738_v17 }
0x12f4   : > { %12694 = vmatpush3.bf16.msra.mxu0 %v13602_v23  ;;  %v13629_v23 = vld [vmem:[%s17653_s6 + $0x248] ss:$16 sps:$4 sm:$0xff]  }
0x12f5   : > { %12695 = vmatprep.subr.bf16.mxu0 %v17738_v17 }
0x12f8   : > { %12696 = vmatpush3.bf16.msra.mxu0 %v13603_v7  ;;  %v13634_v7 = vld [vmem:[%s17653_s6 + $0x264] ss:$16 sps:$4 sm:$0xff]  }
0x12f9   : > { %12697 = vmatprep.subr.bf16.mxu0 %v17738_v17 }
0x12fc   : > { %12698 = vmatpush3.bf16.msra.mxu0 %v13604_v33  ;;  %v13637_v33 = vld [vmem:[%s17653_s6 + $0x26c] ss:$16 sps:$4 sm:$0xff]  }
0x12fd   : > { %12699 = vmatprep.subr.bf16.mxu0 %v17738_v17 }
0x1300   : > { %12700 = vmatpush3.bf16.msra.mxu0 %v13605_v11  ;;  %v13632_v11 = vld [vmem:[%s17653_s6 + $0x260] ss:$16 sps:$4 sm:$0xff]  }
0x1301   : > { %12725 = vmatprep.subr.bf16.mxu0 %v17738_v17 }
0x1303   : > { %12702 = vmatmul.mubr.bf16.vlgmr.msra.gmra.mrb[92].mxu0 %v6115_v9  ;;  %v13635_v9 = vld [vmem:[%s17653_s6 + $0x268] ss:$16 sps:$4 sm:$0xff]  }
0x1304   : > { %12741 = vmatprep.mubr.msk.bf16.mxu0 %vm14110_vm0, %v17738_v17  ;;  %12726 = vmatpush3.bf16.msra.mxu0 %v16470_v63 }
0x1305   : > { %12727 = vmatprep.subr.bf16.mxu0 %v17738_v17 }
0x1308   : > { %12728 = vmatpush3.bf16.msra.mxu0 %v16476_v2 }
0x1309   : > { %12729 = vmatprep.subr.bf16.mxu0 %v17738_v17 }
0x130c   : > { %12730 = vmatpush3.bf16.msra.mxu0 %v16485_v62 }
0x130d   : > { %12731 = vmatprep.subr.bf16.mxu0 %v17738_v17 }
0x1310   : > { %12732 = vmatpush3.bf16.msra.mxu0 %v16494_v51 }
0x1311   : > { %12733 = vmatprep.subr.bf16.mxu0 %v17738_v17 }
0x1314   : > { %12734 = vmatpush3.bf16.msra.mxu0 %v16503_v34 }
0x1315   : > { %12735 = vmatprep.subr.bf16.mxu0 %v17738_v17 }
0x1318   : > { %12736 = vmatpush3.bf16.msra.mxu0 %v16512_v56 }
0x1319   : > { %12737 = vmatprep.subr.bf16.mxu0 %v17738_v17 }
0x131c   : > { %12738 = vmatpush3.bf16.msra.mxu0 %v16521_v48 }
0x131d   : > { %12739 = vmatprep.subr.bf16.mxu0 %v17738_v17 }
0x1320   : > { %12740 = vmatpush3.bf16.msra.mxu0 %v16533_v45 }
0x1321   : > { %7038 = vmatprep.subr.bf16.mxu0 %v13619_v38 }
0x1396   : > { %v12005_v19 = vpop.f32.mrb[84].mxu0 }
0x1397   : > { %v12006_v22 = vpop.f32.mrb[85].mxu0 }
0x1398   : > { %v12049_v59 = vpop.f32.mrb[80].mxu1  ;;  %v12007_v14 = vadd.f32 %v12006_v22, %v12005_v19  ;;  %v12008_v27 = vpop.f32.mrb[86].mxu0  ;;  %v13640_v19 = vld [vmem:[%s17653_s6 + $0x284] ss:$16 sps:$4 sm:$0xff]   ;;  %v13641_v22 = vld [vmem:[%s17653_s6 + $0x288] ss:$16 sps:$4 sm:$0xff]  }
0x1399   : > { %v12050_v20 = vpop.f32.mrb[81].mxu1  ;;  %v12009_v57 = vpop.f32.mrb[87].mxu0  ;;  %v13649_v27 = vld [vmem:[%s17653_s6 + $0x2ac] ss:$16 sps:$4 sm:$0xff]  }
0x139a   : > { %v12051_v12 = vadd.f32 %v12050_v20, %v12049_v59  ;;  %v12052_v55 = vpop.f32.mrb[82].mxu1  ;;  %v6492_v21 = vadd.f32 %v12007_v14, %v10842_v29  ;;  %v13638_v59 = vld [vmem:[%s17653_s6 + $0x280] ss:$16 sps:$4 sm:$0xff]   ;;  %v13643_v14 = vld [vmem:[%s17653_s6 + $0x28c] ss:$16 sps:$4 sm:$0xff]  }
0x139b   : > { %v12053_v3 = vpop.f32.mrb[83].mxu1  ;;  %v13646_v20 = vld [vmem:[%s17653_s6 + $0x2a4] ss:$16 sps:$4 sm:$0xff]   ;;  %v13647_v55 = vld [vmem:[%s17653_s6 + $0x2a8] ss:$16 sps:$4 sm:$0xff]  }
0x139c   : > { %v13652_v57 = vld [vmem:[%s17653_s6 + $0x2c4] ss:$16 sps:$4 sm:$0xff]   ;;  %v13655_v3 = vld [vmem:[%s17653_s6 + $0x2cc] ss:$16 sps:$4 sm:$0xff]   ;;  %v13650_v29 = vld [vmem:[%s17653_s6 + $0x2c0] ss:$16 sps:$4 sm:$0xff]  }
0x13b6   : > { %v12027_v4 = vpop.f32.mrb[88].mxu0 }
0x13b7   : > { %v12028_v8 = vpop.f32.mrb[89].mxu0 }
0x13b8   : > { %v12029_v28 = vadd.f32 %v12028_v8, %v12027_v4  ;;  %v12030_v43 = vpop.f32.mrb[90].mxu0  ;;  %v13653_v4 = vld [vmem:[%s17653_s6 + $0x2c8] ss:$16 sps:$4 sm:$0xff]   ;;  %v13658_v8 = vld [vmem:[%s17653_s6 + $0x2e4] ss:$16 sps:$4 sm:$0xff]  }
0x13b9   : > { %v12031_v31 = vpop.f32.mrb[91].mxu0  ;;  %v13659_v43 = vld [vmem:[%s17653_s6 + $0x2e8] ss:$16 sps:$4 sm:$0xff]  }
0x13ba   : > { %v6532_v35 = vadd.f32 %v12029_v28, %v6492_v21  ;;  %v13661_v21 = vld [vmem:[%s17653_s6 + $0x2ec] ss:$16 sps:$4 sm:$0xff]   ;;  %v13656_v28 = vld [vmem:[%s17653_s6 + $0x2e0] ss:$16 sps:$4 sm:$0xff]  }
0x13bc   : > { %v6572_v6 = vadd.f32 %v12051_v12, %v6532_v35  ;;  %v13644_v12 = vld [vmem:[%s17653_s6 + $0x2a0] ss:$16 sps:$4 sm:$0xff]  }
0x13d6   : > { %v6611_v47 = vpop.f32.mrb[92].mxu0 }
0x13d7   : > { %v6612_v61 = vadd.f32 %v6611_v47, %v6572_v6  ;;  %v12703_v49 = vpop.f32.mrb[93].mxu0 }
0x13d8   : > { %v6614_v44 = vpop.f32.mrb[94].mxu0 }
0x13d9   : > { %v6636_v1 = vpack.c.bf16 %v6612_v61, %v6612_v61  ;;  %v12704_v53 = vpop.f32.mrb[95].mxu0  ;;  %v10923_v44 = vld [vmem:[%s17725_s0 + $0xe] ss:$0 sm:$0xff] }
0x13da   : > { %v10924_v53 = vld [vmem:[%s17725_s0 + $0xf] ss:$0 sm:$0xff] }
0x13db   : > { %12722 = vmatmul.mubr.bf16.vlgmr.msra.gmra.mrb[84].mxu1 %v6636_v1 }
0x13dc   : > { %7029 = vmatprep.mubr.bf16.mxu1 %v17740_v40  ;;  %6998 = vmatpush1.bf16.msra.mxu1 %v13614_v25 }
0x13dd   : > { %6999 = vmatprep.subr.bf16.mxu1 %v13622_v36  ;;  %v13662_v36 = vld [vmem:[%s17654_s7 + $0x240] sm:$0xff]  }
0x13e0   : > { %7000 = vmatpush1.bf16.msra.mxu1 %v13620_v54  ;;  %v13663_v54 = vld [vmem:[%s17654_s7 + $0x2c0] sm:$0xff]  }
0x13e1   : > { %7001 = vmatprep.subr.bf16.mxu1 %v13628_v15  ;;  %v13664_v15 = vld [vmem:[%s17654_s7 + $0x200] sm:$0xff]  }
0x13e4   : > { %7002 = vmatpush1.bf16.msra.mxu1 %v13626_v37  ;;  %v13665_v37 = vld [vmem:[%s17654_s7 + $0x280] sm:$0xff]  }
0x13e5   : > { %7003 = vmatprep.subr.bf16.mxu1 %v13634_v7  ;;  %v13678_v7 = vld [vmem:[%s17654_s7 + $0x260] sm:$0xff]  }
0x13e8   : > { %7004 = vmatpush1.bf16.msra.mxu1 %v13632_v11  ;;  %v13680_v11 = vld [vmem:[%s17654_s7 + $0x220] sm:$0xff]  }
0x13e9   : > { %7005 = vmatprep.subr.bf16.mxu1 %v13640_v19  ;;  %v13682_v19 = vld [vmem:[%s17654_s7 + $0x268] sm:$0xff]  }
0x13ec   : > { %7006 = vmatpush1.bf16.msra.mxu1 %v13638_v59  ;;  %v13683_v59 = vld [vmem:[%s17654_s7 + $0x2e8] sm:$0xff]  }
0x13ed   : > { %7007 = vmatprep.subr.bf16.mxu1 %v13646_v20  ;;  %v13686_v20 = vld [vmem:[%s17654_s7 + $0x270] sm:$0xff]  }
0x13f0   : > { %7008 = vmatpush1.bf16.msra.mxu1 %v13644_v12  ;;  %v13688_v12 = vld [vmem:[%s17654_s7 + $0x230] sm:$0xff]  }
0x13f1   : > { %7009 = vmatprep.subr.bf16.mxu1 %v13652_v57  ;;  %v13690_v57 = vld [vmem:[%s17654_s7 + $0x278] sm:$0xff]  }
0x13f4   : > { %7010 = vmatpush1.bf16.msra.mxu1 %v13650_v29  ;;  %v13692_v29 = vld [vmem:[%s17654_s7 + $0x238] sm:$0xff]  }
0x13f5   : > { %7011 = vmatprep.subr.bf16.mxu1 %v13658_v8  ;;  %v10957_v8 = vld [vmem:[%s17728_s20 + $0x2] ss:$4 sm:$0xf] }
0x13f8   : > { %7012 = vmatpush1.bf16.msra.mxu1 %v13656_v28  ;;  %v6828_v28 = vrot.slane %v10957_v8, %v17742_v50 }
0x13f9   : > { %12082 = vmatprep.subr.bf16.mxu1 %v13662_v36 }
0x14ae   : > { %v6719_v58 = vpop.f32.mrb[84].mxu1 }
0x14af   : > { %v16562_v39 = vsub.f32 %v6612_v61, %v6719_v58  ;;  %v12723_v24 = vpop.f32.mrb[85].mxu1  ;;  %v13666_v58 = vld [vmem:[%s17654_s7 + $0x248] sm:$0xff]  }
0x14b0   : > { %v6722_v52 = vpop.f32.mrb[86].mxu1  ;;  %v13668_v24 = vld [vmem:[%s17654_s7 + $0x208] sm:$0xff]  }
0x14b1   : > { %v6726_v32 = vmul.f32 %v16562_v39, %v16562_v39  ;;  %v12724_v60 = vpop.f32.mrb[87].mxu1  ;;  %v13669_v52 = vld [vmem:[%s17654_s7 + $0x288] sm:$0xff]  }
0x14b2   : > { %v13671_v60 = vld [vmem:[%s17654_s7 + $0x2d0] sm:$0xff]  }
0x14b3   : > { %v6727_v41 = vpack.c.bf16 %v6726_v32, %v6726_v32  ;;  %v13670_v32 = vld [vmem:[%s17654_s7 + $0x250] sm:$0xff]  }
0x14b5   : > { %12742 = vmatmul.mubr.bf16.vlgmr.msra.gmra.mrb[96].mxu0 %v6727_v41  ;;  %v13673_v41 = vld [vmem:[%s17654_s7 + $0x290] sm:$0xff]  }
0x14b6   : > { %7039 = vmatpush1.bf16.msra.mxu0 %v13617_v16  ;;  %7070 = vmatprep.mubr.bf16.mxu0 %v17740_v40  ;;  %v13672_v16 = vld [vmem:[%s17654_s7 + $0x210] sm:$0xff]  }
0x14b7   : > { %7040 = vmatprep.subr.bf16.mxu0 %v13625_v46  ;;  %v13674_v46 = vld [vmem:[%s17654_s7 + $0x258] sm:$0xff]  }
0x14ba   : > { %7041 = vmatpush1.bf16.msra.mxu0 %v13623_v42  ;;  %v13675_v42 = vld [vmem:[%s17654_s7 + $0x2d8] sm:$0xff]  }
0x14bb   : > { %7042 = vmatprep.subr.bf16.mxu0 %v13631_v26  ;;  %v13676_v26 = vld [vmem:[%s17654_s7 + $0x218] sm:$0xff]  }
0x14be   : > { %7043 = vmatpush1.bf16.msra.mxu0 %v13629_v23  ;;  %v13677_v23 = vld [vmem:[%s17654_s7 + $0x298] sm:$0xff]  }
0x14bf   : > { %7044 = vmatprep.subr.bf16.mxu0 %v13637_v33  ;;  %v13679_v33 = vld [vmem:[%s17654_s7 + $0x2e0] sm:$0xff]  }
0x14c2   : > { %7045 = vmatpush1.bf16.msra.mxu0 %v13635_v9  ;;  %v13681_v9 = vld [vmem:[%s17654_s7 + $0x2a0] sm:$0xff]  }
0x14c3   : > { %7046 = vmatprep.subr.bf16.mxu0 %v13643_v14  ;;  %v13685_v14 = vld [vmem:[%s17654_s7 + $0x2a8] sm:$0xff]  }
0x14c6   : > { %7047 = vmatpush1.bf16.msra.mxu0 %v13641_v22  ;;  %v13684_v22 = vld [vmem:[%s17654_s7 + $0x228] sm:$0xff]  }
0x14c7   : > { %7048 = vmatprep.subr.bf16.mxu0 %v13649_v27  ;;  %v13687_v27 = vld [vmem:[%s17654_s7 + $0x2f0] sm:$0xff]  }
0x14ca   : > { %7049 = vmatpush1.bf16.msra.mxu0 %v13647_v55  ;;  %v13689_v55 = vld [vmem:[%s17654_s7 + $0x2b0] sm:$0xff]  }
0x14cb   : > { %7050 = vmatprep.subr.bf16.mxu0 %v13655_v3  ;;  %v13691_v3 = vld [vmem:[%s17654_s7 + $0x2f8] sm:$0xff]  }
0x14ce   : > { %7051 = vmatpush1.bf16.msra.mxu0 %v13653_v4  ;;  %v13693_v4 = vld [vmem:[%s17654_s7 + $0x2b8] sm:$0xff]  }
0x14cf   : > { %7052 = vmatprep.subr.bf16.mxu0 %v13661_v21  ;;  %v6820_v21 = vrot.slane %v10957_v8, %v17741_v30 }
0x14d2   : > { %7053 = vmatpush1.bf16.msra.mxu0 %v13659_v43  ;;  %v6824_v43 = vrot.slane %v10957_v8, %v17743_v0 }
0x14d3   : > { %12104 = vmatprep.subr.bf16.mxu0 %v13663_v54 }
0x1588   : > { %v6762_v31 = vpop.f32.mrb[96].mxu0 }
0x1589   : > { %v6763_v35 = vadd.f32 1e-06, %v6762_v31  ;;  %v12743_v6 = vpop.f32.mrb[97].mxu0  ;;  %v6832_v31 = vrot.slane %v10957_v8, %v17744_v13 }
0x158a   : > { %v6765_v47 = vpop.f32.mrb[98].mxu0 }
0x158b   : > { %13982 = vrsqrt.f32 %v6763_v35  ;;  %v12744_v61 = vpop.f32.mrb[99].mxu0 }
0x1595   : > { %v13983_v49 = vpop.eup %13982 }
0x1596   : > { %v6769_v1 = vmul.f32 %v13983_v49, %v16562_v39  ;;  %v13667_v39 = vld [vmem:[%s17654_s7 + $0x2c8] sm:$0xff]  }
0x1598   : > { %v6774_v25 = vmul.f32 %v10923_v44, %v6769_v1 }
0x159a   : > { %v6779_v10 = vadd.f32 %v10924_v53, %v6774_v25 }
0x159c   : > { %v6813_v38 = vpack.c.bf16 %v6779_v10, %v6779_v10 }
0x159e   : > { %7030 = vmatmul.mubr.bf16.vlgmr.msra.gmra.mrb[88].mxu1 %v6813_v38  ;;  %7071 = vmatmul.mubr.bf16.vlgmr.msra.gmra.mrb[100].mxu0 %v6813_v38 }
0x159f   : > { %12083 = vmatpush3.bf16.msra.mxu1 %v13664_v15  ;;  %12105 = vmatpush3.bf16.msra.mxu0 %v13665_v37 }
0x15a0   : > { %12084 = vmatprep.subr.bf16.mxu1 %v13666_v58  ;;  %12106 = vmatprep.subr.bf16.mxu0 %v13667_v39 }
0x15a3   : > { %12085 = vmatpush3.bf16.msra.mxu1 %v13668_v24  ;;  %12107 = vmatpush3.bf16.msra.mxu0 %v13669_v52 }
0x15a4   : > { %12086 = vmatprep.subr.bf16.mxu1 %v13670_v32  ;;  %12108 = vmatprep.subr.bf16.mxu0 %v13671_v60 }
0x15a7   : > { %12087 = vmatpush3.bf16.msra.mxu1 %v13672_v16  ;;  %12109 = vmatpush3.bf16.msra.mxu0 %v13673_v41 }
0x15a8   : > { %12088 = vmatprep.subr.bf16.mxu1 %v13674_v46  ;;  %12110 = vmatprep.subr.bf16.mxu0 %v13675_v42 }
0x15ab   : > { %12089 = vmatpush3.bf16.msra.mxu1 %v13676_v26  ;;  %12111 = vmatpush3.bf16.msra.mxu0 %v13677_v23 }
0x15ac   : > { %12090 = vmatprep.subr.bf16.mxu1 %v13678_v7  ;;  %12112 = vmatprep.subr.bf16.mxu0 %v13679_v33 }
0x15af   : > { %12091 = vmatpush3.bf16.msra.mxu1 %v13680_v11  ;;  %12113 = vmatpush3.bf16.msra.mxu0 %v13681_v9 }
0x15b0   : > { %12092 = vmatprep.subr.bf16.mxu1 %v13682_v19  ;;  %12114 = vmatprep.subr.bf16.mxu0 %v13683_v59 }
0x15b3   : > { %12093 = vmatpush3.bf16.msra.mxu1 %v13684_v22  ;;  %12115 = vmatpush3.bf16.msra.mxu0 %v13685_v14 }
0x15b4   : > { %12094 = vmatprep.subr.bf16.mxu1 %v13686_v20  ;;  %12116 = vmatprep.subr.bf16.mxu0 %v13687_v27 }
0x15b7   : > { %12095 = vmatpush3.bf16.msra.mxu1 %v13688_v12  ;;  %12117 = vmatpush3.bf16.msra.mxu0 %v13689_v55 }
0x15b8   : > { %12096 = vmatprep.subr.bf16.mxu1 %v13690_v57  ;;  %12118 = vmatprep.subr.bf16.mxu0 %v13691_v3 }
0x15bb   : > { %12097 = vmatpush3.bf16.msra.mxu1 %v13692_v29  ;;  %12119 = vmatpush3.bf16.msra.mxu0 %v13693_v4 }
0x15bc   : > { %12745 = vmatprep.subr.bf16.mxu1 %v17738_v17  ;;  %12765 = vmatprep.subr.bf16.mxu0 %v17738_v17 }
0x1671   : > { %v7031_v35 = vpop.f32.mrb[88].mxu1  ;;  %v7072_v6 = vpop.f32.mrb[100].mxu0 }
0x1672   : > { %v16754_v47 = vadd.f32 %v7031_v35, %v6820_v21  ;;  %v16756_v61 = vadd.f32 %v7072_v6, %v6828_v28  ;;  %v7033_v49 = vpop.f32.mrb[89].mxu1  ;;  %v7074_v44 = vpop.f32.mrb[101].mxu0 }
0x1673   : > { %v16758_v1 = vadd.f32 %v7033_v49, %v6824_v43  ;;  %v16760_v53 = vadd.f32 %v7074_v44, %v6832_v31  ;;  %v7035_v25 = vpop.f32.mrb[90].mxu1  ;;  %v7076_v10 = vpop.f32.mrb[102].mxu0 }
0x1674   : > { %v16763_v38 = vmul.f32 0.70710677, %v16754_v47  ;;  %v16766_v36 = vmul.f32 0.70710677, %v16756_v61  ;;  %v7036_v24 = vpop.f32.mrb[91].mxu1  ;;  %v7077_v16 = vpop.f32.mrb[103].mxu0 }
0x1675   : > { %v16769_v54 = vmul.f32 0.70710677, %v16758_v1  ;;  %v16775_v39 = vmul.f32 0.70710677, %v16760_v53 }
0x1676   : > { %v7095_v15 = vand.u32 2147483647, %v16763_v38  ;;  %v7097_v37 = vand.u32 2147483647, %v16766_v36  ;;  %vm7087_vm9 = vcmp.ge.f32.partialorder %v16763_v38, 0.0  ;;  %vm7089_vm10 = vcmp.ge.f32.partialorder %v16766_v36, 0.0 }
0x1677   : > { %v7096_v58 = vand.u32 2147483647, %v16769_v54  ;;  %v7098_v42 = vand.u32 2147483647, %v16775_v39  ;;  %vm7088_vm11 = vcmp.ge.f32.partialorder %v16769_v54, 0.0  ;;  %vm7090_vm12 = vcmp.ge.f32.partialorder %v16775_v39, 0.0 }
0x1678   : > { %v7099_v52 = vmul.f32 0.3275911, %v7095_v15  ;;  %v7101_v32 = vmul.f32 0.3275911, %v7097_v37  ;;  %v7151_v33 = vsub.f32 0.0, %v7095_v15  ;;  %v7153_v11 = vsub.f32 0.0, %v7097_v37 }
0x1679   : > { %v7100_v60 = vmul.f32 0.3275911, %v7096_v58  ;;  %v7102_v23 = vmul.f32 0.3275911, %v7098_v42  ;;  %v7152_v59 = vsub.f32 0.0, %v7096_v58  ;;  %v7154_v12 = vsub.f32 0.0, %v7098_v42 }
0x167a   : > { %v7103_v41 = vadd.f32 1.0, %v7099_v52  ;;  %v7105_v46 = vadd.f32 1.0, %v7101_v32  ;;  %v7155_v19 = vmul.f32 %v7151_v33, %v7095_v15  ;;  %v7157_v20 = vmul.f32 %v7153_v11, %v7097_v37 }
0x167b   : > { %v7104_v26 = vadd.f32 1.0, %v7100_v60  ;;  %v7106_v7 = vadd.f32 1.0, %v7102_v23  ;;  %v7156_v4 = vmul.f32 %v7152_v59, %v7096_v58  ;;  %v7158_v35 = vmul.f32 %v7154_v12, %v7098_v42 }
0x167c   : > { %13984 = vrcp.f32 %v7103_v41  ;;  %v7159_v3 = vmul.f32 1.442695, %v7155_v19  ;;  %v7163_v21 = vmul.f32 1.442695, %v7157_v20  ;;  %v7080_v54 = vmul.f32 0.5, %v16758_v1 }
0x167d   : > { %13986 = vrcp.f32 %v7105_v46  ;;  %v7161_v10 = vmul.f32 1.442695, %v7156_v4  ;;  %v7165_v32 = vmul.f32 1.442695, %v7158_v35  ;;  %v7082_v39 = vmul.f32 0.5, %v16760_v53 }
0x167e   : > { %13988 = vrcp.f32 %v7104_v26 }
0x167f   : > { %13990 = vrcp.f32 %v7106_v7 }
0x1680   : > { %13992 = vpow2.f32 %v7159_v3 }
0x1681   : > { %13994 = vpow2.f32 %v7163_v21 }
0x1682   : > { %13996 = vpow2.f32 %v7161_v10 }
0x1683   : > { %13998 = vpow2.f32 %v7165_v32  ;;  %v7079_v32 = vmul.f32 0.5, %v16754_v47 }
0x1686   : > { %v13985_v9 = vpop.eup %13984 }
0x1687   : > { %v13987_v22 = vpop.eup %13986  ;;  %v7115_v14 = vmul.f32 1.0614054, %v13985_v9 }
0x1688   : > { %v7117_v27 = vmul.f32 1.0614054, %v13987_v22  ;;  %v13989_v57 = vpop.eup %13988 }
0x1689   : > { %v7119_v55 = vadd.f32 -1.4531521, %v7115_v14  ;;  %v7116_v28 = vmul.f32 1.0614054, %v13989_v57  ;;  %v13991_v43 = vpop.eup %13990 }
0x168a   : > { %v7121_v29 = vadd.f32 -1.4531521, %v7117_v27  ;;  %v7118_v44 = vmul.f32 1.0614054, %v13991_v43  ;;  %v13993_v27 = vpop.eup %13992 }
0x168b   : > { %v7123_v8 = vmul.f32 %v13985_v9, %v7119_v55  ;;  %v7120_v49 = vadd.f32 -1.4531521, %v7116_v28  ;;  %v13995_v55 = vpop.eup %13994 }
0x168c   : > { %v7125_v31 = vmul.f32 %v13987_v22, %v7121_v29  ;;  %v7122_v24 = vadd.f32 -1.4531521, %v7118_v44  ;;  %v13997_v35 = vpop.eup %13996 }
0x168d   : > { %v7127_v6 = vadd.f32 1.4214138, %v7123_v8  ;;  %v7124_v37 = vmul.f32 %v13989_v57, %v7120_v49 }
0x168e   : > { %v7129_v25 = vadd.f32 1.4214138, %v7125_v31  ;;  %v7126_v16 = vmul.f32 %v13991_v43, %v7122_v24 }
0x168f   : > { %v7131_v15 = vmul.f32 %v13985_v9, %v7127_v6  ;;  %v7128_v58 = vadd.f32 1.4214138, %v7124_v37  ;;  %v7091_v6 = vsel %vm7087_vm9, 1.0, %v17735_v18 }
0x1690   : > { %v7133_v52 = vmul.f32 %v13987_v22, %v7129_v25  ;;  %v7130_v42 = vadd.f32 1.4214138, %v7126_v16  ;;  %v13999_v25 = vpop.eup %13998 }
0x1691   : > { %v7135_v60 = vadd.f32 -0.28449672, %v7131_v15  ;;  %v7132_v26 = vmul.f32 %v13989_v57, %v7128_v58  ;;  %v7094_v58 = vsel %vm7090_vm12, 1.0, %v17735_v18 }
0x1692   : > { %v7137_v41 = vadd.f32 -0.28449672, %v7133_v52  ;;  %v7134_v11 = vmul.f32 %v13991_v43, %v7130_v42 }
0x1693   : > { %v7139_v46 = vmul.f32 %v13985_v9, %v7135_v60  ;;  %v7136_v33 = vadd.f32 -0.28449672, %v7132_v26 }
0x1694   : > { %v7141_v23 = vmul.f32 %v13987_v22, %v7137_v41  ;;  %v7138_v20 = vadd.f32 -0.28449672, %v7134_v11 }
0x1695   : > { %v7143_v7 = vadd.f32 0.2548296, %v7139_v46  ;;  %v7140_v14 = vmul.f32 %v13989_v57, %v7136_v33  ;;  %v7081_v46 = vmul.f32 0.5, %v16756_v61 }
0x1696   : > { %v7145_v19 = vadd.f32 0.2548296, %v7141_v23  ;;  %v7142_v4 = vmul.f32 %v13991_v43, %v7138_v20 }
0x1697   : > { %v7147_v59 = vmul.f32 %v13985_v9, %v7143_v7  ;;  %v7144_v29 = vadd.f32 0.2548296, %v7140_v14  ;;  %v7093_v9 = vsel %vm7089_vm10, 1.0, %v17735_v18  ;;  %v11087_v14 = vld [vmem:[%s17725_s0 + $0x11] ss:$0 sm:$0xff] }
0x1698   : > { %v7149_v12 = vmul.f32 %v13987_v22, %v7145_v19  ;;  %v7146_v31 = vadd.f32 0.2548296, %v7142_v4 }
0x1699   : > { %v7167_v3 = vmul.f32 %v13993_v27, %v7147_v59  ;;  %v7148_v28 = vmul.f32 %v13989_v57, %v7144_v29  ;;  %v7092_v57 = vsel %vm7088_vm11, 1.0, %v17735_v18 }
0x169a   : > { %v7169_v8 = vmul.f32 %v13995_v55, %v7149_v12  ;;  %v7150_v22 = vmul.f32 %v13991_v43, %v7146_v31 }
0x169b   : > { %v7171_v21 = vsub.f32 1.0, %v7167_v3  ;;  %v7168_v38 = vmul.f32 %v13997_v35, %v7148_v28  ;;  %v13694_v3 = vld [vmem:[%s17655_s8 + $0x100] sm:$0xff]   ;;  %v13695_v35 = vld [vmem:[%s17655_s8 + $0x108] sm:$0xff]  }
0x169c   : > { %v7173_v49 = vsub.f32 1.0, %v7169_v8  ;;  %v7170_v15 = vmul.f32 %v13999_v25, %v7150_v22  ;;  %v13701_v22 = vld [vmem:[%s17655_s8 + $0x138] sm:$0xff]   ;;  %v13710_v25 = vld [vmem:[%s17726_s1 + $0x580] sm:$0xff]  }
0x169d   : > { %v7175_v44 = vmul.f32 %v7171_v21, %v7091_v6  ;;  %v7172_v36 = vsub.f32 1.0, %v7168_v38  ;;  %v13696_v6 = vld [vmem:[%s17655_s8 + $0x110] sm:$0xff]  }
0x169e   : > { %v7177_v10 = vmul.f32 %v7173_v49, %v7093_v9  ;;  %v7174_v52 = vsub.f32 1.0, %v7170_v15  ;;  %v13697_v9 = vld [vmem:[%s17655_s8 + $0x118] sm:$0xff]   ;;  %v13698_v49 = vld [vmem:[%s17655_s8 + $0x120] sm:$0xff]   ;;  %v13700_v38 = vld [vmem:[%s17655_s8 + $0x130] sm:$0xff]  }
0x169f   : > { %v7179_v37 = vadd.f32 1.0, %v7175_v44  ;;  %v7176_v24 = vmul.f32 %v7172_v36, %v7092_v57  ;;  %v13699_v44 = vld [vmem:[%s17655_s8 + $0x128] sm:$0xff]  }
0x16a0   : > { %v7181_v60 = vadd.f32 1.0, %v7177_v10  ;;  %v7178_v16 = vmul.f32 %v7174_v52, %v7094_v58  ;;  %v13711_v10 = vld [vmem:[%s17726_s1 + $0x540] sm:$0xff]   ;;  %v13712_v36 = vld [vmem:[%s17726_s1 + $0x588] sm:$0xff]   ;;  %v13715_v52 = vld [vmem:[%s17726_s1 + $0x550] sm:$0xff]  }
0x16a1   : > { %v7180_v43 = vadd.f32 1.0, %v7176_v24  ;;  %v7183_v41 = vmul.f32 %v7179_v37, %v7079_v32  ;;  %v13713_v15 = vld [vmem:[%s17726_s1 + $0x548] sm:$0xff]   ;;  %v13714_v37 = vld [vmem:[%s17726_s1 + $0x590] sm:$0xff]   ;;  %v13716_v32 = vld [vmem:[%s17726_s1 + $0x598] sm:$0xff]  }
0x16a2   : > { %v7182_v42 = vadd.f32 1.0, %v7178_v16  ;;  %v7185_v23 = vmul.f32 %v7181_v60, %v7081_v46  ;;  %v7916_v57 = vld [vmem:[#allocation4 + $0x8] sm:$0xf]  ;;  %v13717_v60 = vld [vmem:[%s17726_s1 + $0x558] sm:$0xff]   ;;  %v13718_v58 = vld [vmem:[%s17726_s1 + $0x5a0] sm:$0xff]  }
0x16a3   : > { %v7184_v26 = vmul.f32 %v7180_v43, %v7080_v54  ;;  %v7252_v11 = vpack.c.bf16 %v7183_v41, %v7183_v41  ;;  %v8036_v24 = vpack.c.bf16 %v7916_v57, %v7916_v57  ;;  %v13719_v54 = vld [vmem:[%s17726_s1 + $0x560] sm:$0xff]   ;;  %v13720_v16 = vld [vmem:[%s17726_s1 + $0x5a8] sm:$0xff]   ;;  %v13722_v41 = vld [vmem:[%s17726_s1 + $0x5b0] sm:$0xff]  }
0x16a4   : > { %v7186_v33 = vmul.f32 %v7182_v42, %v7082_v39  ;;  %v7254_v19 = vpack.c.bf16 %v7185_v23, %v7185_v23  ;;  %v13721_v43 = vld [vmem:[%s17726_s1 + $0x568] sm:$0xff]   ;;  %v13723_v46 = vld [vmem:[%s17726_s1 + $0x570] sm:$0xff]   ;;  %v13724_v39 = vld [vmem:[%s17726_s1 + $0x5b8] sm:$0xff]  }
0x16a5   : > { %v7253_v7 = vpack.c.bf16 %v7184_v26, %v7184_v26  ;;  %v13725_v26 = vld [vmem:[%s17726_s1 + $0x578] sm:$0xff]   ;;  %v7915_v42 = vld [vmem:[#allocation4] sm:$0xf] }
0x16a6   : > { %v7255_v47 = vpack.c.bf16 %v7186_v33, %v7186_v33  ;;  %v13726_v23 = vld [vmem:[%s17726_s1 + $0x600] sm:$0xff]  }
0x16a7   : > { %7485 = vmatprep.mubr.bf16.mxu1 %v7253_v7  ;;  %v8035_v7 = vpack.c.bf16 %v7915_v42, %v7915_v42  ;;  %v13728_v33 = vld [vmem:[%s17726_s1 + $0x5c0] sm:$0xff]   ;;  %v13756_v42 = vld [vmem:[%s17726_s1 + $0x5f8] sm:$0xff]  }
0x16a8   : > { %7486 = vmatmul.mubr.bf16.vlgmr.msra.gmra.mrb[92].mxu1 %v7252_v11  ;;  %7525 = vmatprep.mubr.bf16.mxu0 %v7255_v47  ;;  %v13730_v11 = vld [vmem:[%s17726_s1 + $0x608] sm:$0xff]   ;;  %v13745_v57 = vld [vmem:[%s17726_s1 + $0x660] sm:$0xff]  }
0x16a9   : > { %12746 = vmatpush3.bf16.msra.mxu1 %v16470_v63  ;;  %7526 = vmatmul.mubr.bf16.vlgmr.msra.gmra.mrb[104].mxu0 %v7254_v19  ;;  %v13732_v47 = vld [vmem:[%s17726_s1 + $0x5c8] sm:$0xff]   ;;  %v13734_v19 = vld [vmem:[%s17726_s1 + $0x610] sm:$0xff]  }
0x16aa   : > { %12747 = vmatprep.subr.bf16.mxu1 %v17738_v17  ;;  %12761 = vmatprep.mubr.msk.bf16.mxu1 %vm14110_vm0, %v17738_v17 }
0x16ab   : > { %12766 = vmatpush3.bf16.msra.mxu0 %v16470_v63  ;;  %12781 = vmatprep.mubr.msk.bf16.mxu0 %vm14110_vm0, %v17738_v17 }
0x16ac   : > { %12767 = vmatprep.subr.bf16.mxu0 %v17738_v17 }
0x16ad   : > { %12748 = vmatpush3.bf16.msra.mxu1 %v16476_v2 }
0x16ae   : > { %12749 = vmatprep.subr.bf16.mxu1 %v17738_v17 }
0x16af   : > { %12768 = vmatpush3.bf16.msra.mxu0 %v16476_v2  ;;  %v11054_v2 = vld [vmem:[%s17725_s0 + $0x10] ss:$0 sm:$0xff] }
0x16b0   : > { %12769 = vmatprep.subr.bf16.mxu0 %v17738_v17 }
0x16b1   : > { %12750 = vmatpush3.bf16.msra.mxu1 %v16485_v62 }
0x16b2   : > { %12751 = vmatprep.subr.bf16.mxu1 %v17738_v17 }
0x16b3   : > { %12770 = vmatpush3.bf16.msra.mxu0 %v16485_v62 }
0x16b4   : > { %12771 = vmatprep.subr.bf16.mxu0 %v17738_v17 }
0x16b5   : > { %12752 = vmatpush3.bf16.msra.mxu1 %v16494_v51 }
0x16b6   : > { %12753 = vmatprep.subr.bf16.mxu1 %v17738_v17 }
0x16b7   : > { %12772 = vmatpush3.bf16.msra.mxu0 %v16494_v51 }
0x16b8   : > { %12773 = vmatprep.subr.bf16.mxu0 %v17738_v17 }
0x16b9   : > { %12754 = vmatpush3.bf16.msra.mxu1 %v16503_v34 }
0x16ba   : > { %12755 = vmatprep.subr.bf16.mxu1 %v17738_v17 }
0x16bb   : > { %12774 = vmatpush3.bf16.msra.mxu0 %v16503_v34 }
0x16bc   : > { %12775 = vmatprep.subr.bf16.mxu0 %v17738_v17 }
0x16bd   : > { %12756 = vmatpush3.bf16.msra.mxu1 %v16512_v56 }
0x16be   : > { %12757 = vmatprep.subr.bf16.mxu1 %v17738_v17 }
0x16bf   : > { %12776 = vmatpush3.bf16.msra.mxu0 %v16512_v56 }
0x16c0   : > { %12777 = vmatprep.subr.bf16.mxu0 %v17738_v17 }
0x16c1   : > { %12758 = vmatpush3.bf16.msra.mxu1 %v16521_v48 }
0x16c2   : > { %12759 = vmatprep.subr.bf16.mxu1 %v17738_v17 }
0x16c3   : > { %12778 = vmatpush3.bf16.msra.mxu0 %v16521_v48 }
0x16c4   : > { %12779 = vmatprep.subr.bf16.mxu0 %v17738_v17 }
0x16c5   : > { %12760 = vmatpush3.bf16.msra.mxu1 %v16533_v45 }
0x16c6   : > { %12785 = vmatprep.subr.bf16.mxu1 %v17738_v17 }
0x16c7   : > { %12780 = vmatpush3.bf16.msra.mxu0 %v16533_v45 }
0x16c8   : > { %12162 = vmatprep.subr.bf16.mxu0 %v13710_v25  ;;  %v13740_v25 = vld [vmem:[%s17726_s1 + $0x5d8] sm:$0xff]  }
0x177b   : > { %v12098_v63 = vpop.f32.mrb[92].mxu1 }
0x177c   : > { %v12099_v62 = vpop.f32.mrb[93].mxu1  ;;  %v12120_v51 = vpop.f32.mrb[104].mxu0 }
0x177d   : > { %v12100_v34 = vadd.f32 %v12099_v62, %v12098_v63  ;;  %v12101_v56 = vpop.f32.mrb[94].mxu1  ;;  %v12121_v61 = vpop.f32.mrb[105].mxu0 }
0x177e   : > { %v12102_v1 = vpop.f32.mrb[95].mxu1  ;;  %v12122_v53 = vadd.f32 %v12121_v61, %v12120_v51  ;;  %v12123_v59 = vpop.f32.mrb[106].mxu0  ;;  %v11088_v61 = vld [vmem:[%s17725_s0 + $0x1d] ss:$0 sm:$0xff] }
0x177f   : > { %v7488_v48 = vadd.f32 %v12100_v34, %v11054_v2  ;;  %v12124_v20 = vpop.f32.mrb[107].mxu0 }
0x1780   : > { %v13702_v20 = vld [vmem:[%s17655_s8 + $0x140] sm:$0xff]  }
0x1781   : > { %v7528_v45 = vadd.f32 %v12122_v53, %v7488_v48  ;;  %v11089_v48 = vld [vmem:[%s17725_s0 + $0x1e] ss:$0 sm:$0xff] }
0x1783   : > { %v7538_v27 = vmul.f32 %v11087_v14, %v7528_v45 }
0x1785   : > { %v7539_v12 = vadd.f32 %v16371_v5, %v7538_v27  ;;  %v13703_v27 = vld [vmem:[%s17655_s8 + $0x148] sm:$0xff]  }
0x1787   : > { %v7542_v55 = vpack.c.bf16 %v7539_v12, %v7539_v12 }
0x1789   : > { %12762 = vmatmul.mubr.bf16.vlgmr.msra.gmra.mrb[96].mxu1 %v7542_v55  ;;  %v13705_v55 = vld [vmem:[%s17655_s8 + $0x158] sm:$0xff]  }
0x178a   : > { %12801 = vmatprep.mubr.msk.bf16.mxu1 %vm14110_vm0, %v17738_v17  ;;  %12786 = vmatpush3.bf16.msra.mxu1 %v13694_v3  ;;  %v13706_v3 = vld [vmem:[%s17655_s8 + $0x160] sm:$0xff]  }
0x178b   : > { %12787 = vmatprep.subr.bf16.mxu1 %v17738_v17 }
0x178e   : > { %12788 = vmatpush3.bf16.msra.mxu1 %v13695_v35  ;;  %v13731_v35 = vld [vmem:[%s17726_s1 + $0x688] sm:$0xff]  }
0x178f   : > { %12789 = vmatprep.subr.bf16.mxu1 %v17738_v17 }
0x1792   : > { %12790 = vmatpush3.bf16.msra.mxu1 %v13696_v6  ;;  %v13733_v6 = vld [vmem:[%s17726_s1 + $0x648] sm:$0xff]  }
0x1793   : > { %12791 = vmatprep.subr.bf16.mxu1 %v17738_v17 }
0x1796   : > { %12792 = vmatpush3.bf16.msra.mxu1 %v13697_v9  ;;  %v13735_v9 = vld [vmem:[%s17726_s1 + $0x690] sm:$0xff]  }
0x1797   : > { %12793 = vmatprep.subr.bf16.mxu1 %v17738_v17 }
0x179a   : > { %12794 = vmatpush3.bf16.msra.mxu1 %v13698_v49  ;;  %v13736_v49 = vld [vmem:[%s17726_s1 + $0x5d0] sm:$0xff]  }
0x179b   : > { %12795 = vmatprep.subr.bf16.mxu1 %v17738_v17 }
0x179e   : > { %12796 = vmatpush3.bf16.msra.mxu1 %v13699_v44  ;;  %v13737_v44 = vld [vmem:[%s17726_s1 + $0x650] sm:$0xff]  }
0x179f   : > { %12797 = vmatprep.subr.bf16.mxu1 %v17738_v17 }
0x17a2   : > { %12798 = vmatpush3.bf16.msra.mxu1 %v13700_v38  ;;  %v13738_v38 = vld [vmem:[%s17726_s1 + $0x618] sm:$0xff]  }
0x17a3   : > { %12799 = vmatprep.subr.bf16.mxu1 %v17738_v17 }
0x17a6   : > { %12800 = vmatpush3.bf16.msra.mxu1 %v13701_v22  ;;  %v13739_v22 = vld [vmem:[%s17726_s1 + $0x698] sm:$0xff]  }
0x17a7   : > { %12805 = vmatprep.subr.bf16.mxu1 %v17738_v17 }
0x185c   : > { %v7577_v29 = vpop.f32.mrb[96].mxu1 }
0x185d   : > { %v16838_v4 = vsub.f32 %v7539_v12, %v7577_v29  ;;  %v12763_v8 = vpop.f32.mrb[97].mxu1  ;;  %v13704_v12 = vld [vmem:[%s17655_s8 + $0x150] sm:$0xff]   ;;  %v13707_v29 = vld [vmem:[%s17655_s8 + $0x168] sm:$0xff]  }
0x185e   : > { %v7580_v21 = vpop.f32.mrb[98].mxu1  ;;  %v13709_v8 = vld [vmem:[%s17655_s8 + $0x178] sm:$0xff]  }
0x185f   : > { %v7584_v5 = vmul.f32 %v16838_v4, %v16838_v4  ;;  %v12764_v28 = vpop.f32.mrb[99].mxu1  ;;  %v13727_v21 = vld [vmem:[%s17726_s1 + $0x680] sm:$0xff]  }
0x1860   : > { %v13729_v28 = vld [vmem:[%s17726_s1 + $0x640] sm:$0xff]  }
0x1861   : > { %v7585_v31 = vpack.c.bf16 %v7584_v5, %v7584_v5 }
0x1863   : > { %12782 = vmatmul.mubr.bf16.vlgmr.msra.gmra.mrb[108].mxu0 %v7585_v31 }
0x1864   : > { %12163 = vmatpush3.bf16.msra.mxu0 %v13711_v10  ;;  %8415 = vmatprep.mubr.bf16.mxu0 %v8036_v24  ;;  %v13741_v10 = vld [vmem:[%s17726_s1 + $0x658] sm:$0xff]   ;;  %v13746_v24 = vld [vmem:[%s17726_s1 + $0x628] sm:$0xff]  }
0x1865   : > { %12164 = vmatprep.subr.bf16.mxu0 %v13712_v36  ;;  %v13742_v36 = vld [vmem:[%s17726_s1 + $0x620] sm:$0xff]  }
0x1868   : > { %12165 = vmatpush3.bf16.msra.mxu0 %v13713_v15  ;;  %v13743_v15 = vld [vmem:[%s17726_s1 + $0x6a0] sm:$0xff]  }
0x1869   : > { %12166 = vmatprep.subr.bf16.mxu0 %v13714_v37  ;;  %v13744_v37 = vld [vmem:[%s17726_s1 + $0x5e0] sm:$0xff]  }
0x186c   : > { %12167 = vmatpush3.bf16.msra.mxu0 %v13715_v52  ;;  %v13747_v52 = vld [vmem:[%s17726_s1 + $0x6a8] sm:$0xff]  }
0x186d   : > { %12168 = vmatprep.subr.bf16.mxu0 %v13716_v32  ;;  %v13748_v32 = vld [vmem:[%s17726_s1 + $0x5e8] sm:$0xff]  }
0x1870   : > { %12169 = vmatpush3.bf16.msra.mxu0 %v13717_v60  ;;  %v13749_v60 = vld [vmem:[%s17726_s1 + $0x668] sm:$0xff]  }
0x1871   : > { %12170 = vmatprep.subr.bf16.mxu0 %v13718_v58  ;;  %v7920_v58 = vld [vmem:[#allocation4 + $0x28] sm:$0xf] }
0x1874   : > { %12171 = vmatpush3.bf16.msra.mxu0 %v13719_v54  ;;  %v13750_v54 = vld [vmem:[%s17726_s1 + $0x630] sm:$0xff]  }
0x1875   : > { %12172 = vmatprep.subr.bf16.mxu0 %v13720_v16  ;;  %v13751_v16 = vld [vmem:[%s17726_s1 + $0x6b0] sm:$0xff]  }
0x1878   : > { %12173 = vmatpush3.bf16.msra.mxu0 %v13721_v43  ;;  %v8040_v43 = vpack.c.bf16 %v7920_v58, %v7920_v58 }
0x1879   : > { %12174 = vmatprep.subr.bf16.mxu0 %v13722_v41  ;;  %v13752_v41 = vld [vmem:[%s17726_s1 + $0x5f0] sm:$0xff]  }
0x187c   : > { %12175 = vmatpush3.bf16.msra.mxu0 %v13723_v46  ;;  %v13753_v46 = vld [vmem:[%s17726_s1 + $0x670] sm:$0xff]  }
0x187d   : > { %12176 = vmatprep.subr.bf16.mxu0 %v13724_v39  ;;  %v13754_v39 = vld [vmem:[%s17726_s1 + $0x638] sm:$0xff]  }
0x1880   : > { %12177 = vmatpush3.bf16.msra.mxu0 %v13725_v26  ;;  %v13755_v26 = vld [vmem:[%s17726_s1 + $0x6b8] sm:$0xff]  }
0x1881   : > { %12184 = vmatprep.subr.bf16.mxu0 %v13726_v23  ;;  %v13757_v23 = vld [vmem:[%s17726_s1 + $0x678] sm:$0xff]  }
0x1883   : > { %8416 = vmatmul.mubr.bf16.vlgmr.msra.gmra.mrb[112].mxu0 %v8035_v7 }
0x1884   : > { %12185 = vmatpush3.bf16.msra.mxu0 %v13728_v33 }
0x1885   : > { %12186 = vmatprep.subr.bf16.mxu0 %v13730_v11 }
0x1888   : > { %12187 = vmatpush3.bf16.msra.mxu0 %v13732_v47 }
0x1889   : > { %12188 = vmatprep.subr.bf16.mxu0 %v13734_v19 }
0x188c   : > { %12189 = vmatpush3.bf16.msra.mxu0 %v13736_v49  ;;  %v13765_v49 = vld [vmem:[%s17726_s1 + $0x6f8] sm:$0xff]  }
0x188d   : > { %12190 = vmatprep.subr.bf16.mxu0 %v13738_v38 }
0x1890   : > { %12191 = vmatpush3.bf16.msra.mxu0 %v13740_v25  ;;  %v13767_v25 = vld [vmem:[%s17724_s22 + $0xc8] sm:$0xff]  }
0x1891   : > { %12192 = vmatprep.subr.bf16.mxu0 %v13742_v36  ;;  %v13769_v36 = vld [vmem:[%s17724_s22 + $0xd8] sm:$0xff]  }
0x1894   : > { %12193 = vmatpush3.bf16.msra.mxu0 %v13744_v37  ;;  %v13771_v37 = vld [vmem:[%s17724_s22 + $0xe8] sm:$0xff]  }
0x1895   : > { %12194 = vmatprep.subr.bf16.mxu0 %v13746_v24  ;;  %v13773_v24 = vld [vmem:[%s17724_s22 + $0xf8] sm:$0xff]  }
0x1898   : > { %12195 = vmatpush3.bf16.msra.mxu0 %v13748_v32 }
0x1899   : > { %12196 = vmatprep.subr.bf16.mxu0 %v13750_v54 }
0x189c   : > { %12197 = vmatpush3.bf16.msra.mxu0 %v13752_v41 }
0x189d   : > { %12198 = vmatprep.subr.bf16.mxu0 %v13754_v39 }
0x18a0   : > { %12199 = vmatpush3.bf16.msra.mxu0 %v13756_v42 }
0x18a1   : > { %12825 = vmatprep.subr.bf16.mxu0 %v17738_v17 }
0x1936   : > { %v7620_v63 = vpop.f32.mrb[108].mxu0 }
0x1937   : > { %v7621_v2 = vadd.f32 1e-06, %v7620_v63  ;;  %v12783_v62 = vpop.f32.mrb[109].mxu0  ;;  %v11114_v63 = vld [vmem:[%s17725_s0 + $0x1f] ss:$0 sm:$0xff] }
0x1938   : > { %v7623_v51 = vpop.f32.mrb[110].mxu0 }
0x1939   : > { %14000 = vrsqrt.f32 %v7621_v2  ;;  %v12784_v34 = vpop.f32.mrb[111].mxu0 }
0x1943   : > { %v14001_v56 = vpop.eup %14000 }
0x1944   : > { %v7627_v1 = vmul.f32 %v14001_v56, %v16838_v4  ;;  %v13708_v4 = vld [vmem:[%s17655_s8 + $0x170] sm:$0xff]  }
0x1946   : > { %v7632_v53 = vmul.f32 %v11088_v61, %v7627_v1 }
0x1948   : > { %v7637_v59 = vadd.f32 %v11089_v48, %v7632_v53 }
0x194a   : > { %7638 = vst [vmem:[#allocation3] sm:$0xff] %v7637_v59 }
0x1951   : > { %v7640_v14 = vld [vmem:[#allocation3] ss:$2 sm:$0xf]  ;;  %v7752_v5 = vld [vmem:[#allocation3 + $0x1] ss:$2 sm:$0xf] }
0x1952   : > { %v7658_v45 = vpack.c.bf16 %v7640_v14, %v7640_v14  ;;  %v7770_v31 = vpack.c.bf16 %v7752_v5, %v7752_v5  ;;  %v13759_v5 = vld [vmem:[%s17726_s1 + $0x6c8] sm:$0xff]  }
0x1954   : > { %12802 = vmatmul.mubr.bf16.vlgmr.msra.gmra.mrb[100].mxu1 %v7658_v45 }
0x1955   : > { %12806 = vmatpush3.bf16.msra.mxu1 %v13702_v20  ;;  %12821 = vmatprep.mubr.msk.bf16.mxu1 %vm14110_vm0, %v17738_v17 }
0x1956   : > { %12807 = vmatprep.subr.bf16.mxu1 %v17738_v17  ;;  %v12178_v7 = vpop.f32.mrb[112].mxu0 }
0x1957   : > { %v12179_v33 = vpop.f32.mrb[113].mxu0 }
0x1958   : > { %v17056_v11 = vadd.f32 %v12179_v33, %v12178_v7  ;;  %v12181_v47 = vpop.f32.mrb[114].mxu0 }
0x1959   : > { %12808 = vmatpush3.bf16.msra.mxu1 %v13703_v27  ;;  %v12182_v19 = vpop.f32.mrb[115].mxu0 }
0x195a   : > { %12809 = vmatprep.subr.bf16.mxu1 %v17738_v17 }
0x195d   : > { %12810 = vmatpush3.bf16.msra.mxu1 %v13704_v12 }
0x195e   : > { %12811 = vmatprep.subr.bf16.mxu1 %v17738_v17 }
0x1961   : > { %12812 = vmatpush3.bf16.msra.mxu1 %v13705_v55 }
0x1962   : > { %12813 = vmatprep.subr.bf16.mxu1 %v17738_v17 }
0x1965   : > { %12814 = vmatpush3.bf16.msra.mxu1 %v13706_v3 }
0x1966   : > { %12815 = vmatprep.subr.bf16.mxu1 %v17738_v17 }
0x1969   : > { %12816 = vmatpush3.bf16.msra.mxu1 %v13707_v29 }
0x196a   : > { %12817 = vmatprep.subr.bf16.mxu1 %v17738_v17 }
0x196d   : > { %12818 = vmatpush3.bf16.msra.mxu1 %v13708_v4 }
0x196e   : > { %12819 = vmatprep.subr.bf16.mxu1 %v17738_v17 }
0x1971   : > { %12820 = vmatpush3.bf16.msra.mxu1 %v13709_v8  ;;  %v13758_v8 = vld [vmem:[%s17726_s1 + $0x6c0] sm:$0xff]  }
0x1972   : > { %12206 = vmatprep.subr.bf16.mxu1 %v13727_v21 }
0x1974   : > { %12822 = vmatmul.mubr.bf16.vlgmr.msra.gmra.mrb[100].mxu1 %v7770_v31  ;;  %v13761_v31 = vld [vmem:[%s17726_s1 + $0x6d8] sm:$0xff]  }
0x1975   : > { %12207 = vmatpush3.bf16.msra.mxu1 %v13729_v28  ;;  %8495 = vmatprep.mubr.bf16.mxu1 %v8040_v43  ;;  %v13760_v28 = vld [vmem:[%s17726_s1 + $0x6d0] sm:$0xff]  }
0x1976   : > { %12208 = vmatprep.subr.bf16.mxu1 %v13731_v35  ;;  %v13762_v35 = vld [vmem:[%s17726_s1 + $0x6e0] sm:$0xff]  }
0x1979   : > { %12209 = vmatpush3.bf16.msra.mxu1 %v13733_v6  ;;  %v13763_v6 = vld [vmem:[%s17726_s1 + $0x6e8] sm:$0xff]  }
0x197a   : > { %12210 = vmatprep.subr.bf16.mxu1 %v13735_v9  ;;  %v13764_v9 = vld [vmem:[%s17726_s1 + $0x6f0] sm:$0xff]  }
0x197d   : > { %12211 = vmatpush3.bf16.msra.mxu1 %v13737_v44  ;;  %v7921_v44 = vld [vmem:[#allocation4 + $0x30] sm:$0xf] }
0x197e   : > { %12212 = vmatprep.subr.bf16.mxu1 %v13739_v22  ;;  %v8041_v38 = vpack.c.bf16 %v7921_v44, %v7921_v44  ;;  %v13766_v22 = vld [vmem:[%s17724_s22 + $0xc0] sm:$0xff]  }
0x197f   : > { %v13806_v44 = vld [vmem:[%s17653_s6 + $0x3a4] ss:$16 sps:$4 sm:$0xff]  }
0x1981   : > { %12213 = vmatpush3.bf16.msra.mxu1 %v13741_v10  ;;  %v13768_v10 = vld [vmem:[%s17724_s22 + $0xd0] sm:$0xff]  }
0x1982   : > { %12214 = vmatprep.subr.bf16.mxu1 %v13743_v15  ;;  %v13770_v15 = vld [vmem:[%s17724_s22 + $0xe0] sm:$0xff]  }
0x1985   : > { %12215 = vmatpush3.bf16.msra.mxu1 %v13745_v57  ;;  %v13772_v57 = vld [vmem:[%s17724_s22 + $0xf0] sm:$0xff]  }
0x1986   : > { %12216 = vmatprep.subr.bf16.mxu1 %v13747_v52  ;;  %v11251_v52 = vld [vmem:[%s17725_s0 + $0x12] ss:$0 sm:$0xff] }
0x1987   : > { %v8418_v41 = vadd.f32 %v17056_v11, %v11251_v52  ;;  %v13776_v11 = vld [vmem:[%s17653_s6 + $0x304] ss:$16 sps:$4 sm:$0xff]   ;;  %v13816_v52 = vld [vmem:[%s17653_s6 + $0x3e0] ss:$16 sps:$4 sm:$0xff]  }
0x1989   : > { %12217 = vmatpush3.bf16.msra.mxu1 %v13749_v60 }
0x198a   : > { %12218 = vmatprep.subr.bf16.mxu1 %v13751_v16 }
0x198d   : > { %12219 = vmatpush3.bf16.msra.mxu1 %v13753_v46 }
0x198e   : > { %12220 = vmatprep.subr.bf16.mxu1 %v13755_v26 }
0x1991   : > { %12221 = vmatpush3.bf16.msra.mxu1 %v13757_v23 }
0x1992   : > { %12845 = vmatprep.subr.bf16.mxu1 %v17738_v17 }
0x1a47   : > { %v7853_v2 = vpop.f32.mrb[100].mxu1 }
0x1a48   : > { %v17061_v62 = vadd.f32 %v11114_v63, %v7853_v2  ;;  %v12823_v51 = vpop.f32.mrb[101].mxu1 }
0x1a49   : > { %v7856_v34 = vpop.f32.mrb[102].mxu1 }
0x1a4a   : > { %7862 = vst [vmem:[#allocation2 + $0x8] sm:$0x3] %v17061_v62  ;;  %7865 = vst [vmem:[#allocation2 + $0x26] sm:$0xc] %v17061_v62  ;;  %v12824_v56 = vpop.f32.mrb[103].mxu1 }
0x1a4b   : > { %v13774_v34 = vld [vmem:[%s17653_s6 + $0x300] ss:$16 sps:$4 sm:$0xff]   ;;  %v13779_v56 = vld [vmem:[%s17653_s6 + $0x30c] ss:$16 sps:$4 sm:$0xff]  }
0x1a51   : > { %v7887_v61 = vld [vmem:[#allocation2 + $0x8] sm:$0x3] }
0x1a52   : > { %v7889_v1 = vld [vmem:[#allocation2 + $0x28] sm:$0x3]  ;;  %7888 = vst [vmem:[#allocation4 + $0x18] sm:$0x3] %v7887_v61  ;;  %v13782_v61 = vld [vmem:[%s17653_s6 + $0x324] ss:$16 sps:$4 sm:$0xff]  }
0x1a53   : > { %v7894_v48 = vld [vmem:[#allocation2 + $0x9] sm:$0x3]  ;;  %v7891_v53 = vrot.slane %v7889_v1, 6  ;;  %v7880_v14 = vld [vmem:[#allocation2 + $0x7] sm:$0x3] }
0x1a54   : > { %7895 = vst [vmem:[#allocation4 + $0x20] sm:$0x3] %v7894_v48  ;;  %v7896_v59 = vld [vmem:[#allocation2 + $0x29] sm:$0x3]  ;;  %7881 = vst [vmem:[#allocation4 + $0x10] sm:$0x3] %v7880_v14 }
0x1a55   : > { %v7898_v20 = vrot.slane %v7896_v59, 6  ;;  %v7882_v45 = vld [vmem:[#allocation2 + $0x27] sm:$0x3]  ;;  %7893 = vst [vmem:[#allocation4 + $0x18] sm:$0xc] %v7891_v53 }
0x1a56   : > { %v7884_v27 = vrot.slane %v7882_v45, 6  ;;  %v13780_v1 = vld [vmem:[%s17653_s6 + $0x320] ss:$16 sps:$4 sm:$0xff]   ;;  %v13788_v48 = vld [vmem:[%s17653_s6 + $0x344] ss:$16 sps:$4 sm:$0xff]  }
0x1a57   : > { %7900 = vst [vmem:[#allocation4 + $0x20] sm:$0xc] %v7898_v20  ;;  %v13786_v53 = vld [vmem:[%s17653_s6 + $0x340] ss:$16 sps:$4 sm:$0xff]  }
0x1a58   : > { %7886 = vst [vmem:[#allocation4 + $0x10] sm:$0xc] %v7884_v27 }
0x1a5c   : > { %v7918_v12 = vld [vmem:[#allocation4 + $0x18] sm:$0xf] }
0x1a5d   : > { %v8038_v55 = vpack.c.bf16 %v7918_v12, %v7918_v12 }
0x1a5e   : > { %v7919_v3 = vld [vmem:[#allocation4 + $0x20] sm:$0xf] }
0x1a5f   : > { %v8039_v29 = vpack.c.bf16 %v7919_v3, %v7919_v3  ;;  %v7917_v4 = vld [vmem:[#allocation4 + $0x10] sm:$0xf]  ;;  %8455 = vmatprep.mubr.bf16.mxu0 %v8038_v55  ;;  %v13777_v55 = vld [vmem:[%s17653_s6 + $0x308] ss:$16 sps:$4 sm:$0xff]  }
0x1a60   : > { %v8037_v21 = vpack.c.bf16 %v7917_v4, %v7917_v4  ;;  %v13783_v4 = vld [vmem:[%s17653_s6 + $0x328] ss:$16 sps:$4 sm:$0xff]  }
0x1a61   : > { %8496 = vmatmul.mubr.bf16.vlgmr.msra.gmra.mrb[104].mxu1 %v8039_v29  ;;  %v13785_v29 = vld [vmem:[%s17653_s6 + $0x32c] ss:$16 sps:$4 sm:$0xff]  }
0x1a62   : > { %8456 = vmatmul.mubr.bf16.vlgmr.msra.gmra.mrb[116].mxu0 %v8037_v21  ;;  %12861 = vmatprep.mubr.msk.bf16.mxu1 %vm14110_vm0, %v17738_v17  ;;  %v13789_v21 = vld [vmem:[%s17653_s6 + $0x348] ss:$16 sps:$4 sm:$0xff]  }
0x1a63   : > { %12826 = vmatpush3.bf16.msra.mxu0 %v13758_v8  ;;  %12841 = vmatprep.mubr.msk.bf16.mxu0 %vm14110_vm0, %v17738_v17  ;;  %v13791_v8 = vld [vmem:[%s17653_s6 + $0x34c] ss:$16 sps:$4 sm:$0xff]  }
0x1a64   : > { %12827 = vmatprep.subr.bf16.mxu0 %v17738_v17  ;;  %12846 = vmatpush3.bf16.msra.mxu1 %v13766_v22 }
0x1a65   : > { %12847 = vmatprep.subr.bf16.mxu1 %v17738_v17 }
0x1a67   : > { %12828 = vmatpush3.bf16.msra.mxu0 %v13759_v5  ;;  %v13794_v5 = vld [vmem:[%s17653_s6 + $0x364] ss:$16 sps:$4 sm:$0xff]  }
0x1a68   : > { %12829 = vmatprep.subr.bf16.mxu0 %v17738_v17  ;;  %12848 = vmatpush3.bf16.msra.mxu1 %v13767_v25 }
0x1a69   : > { %12849 = vmatprep.subr.bf16.mxu1 %v17738_v17 }
0x1a6b   : > { %12830 = vmatpush3.bf16.msra.mxu0 %v13760_v28  ;;  %v13792_v28 = vld [vmem:[%s17653_s6 + $0x360] ss:$16 sps:$4 sm:$0xff]  }
0x1a6c   : > { %12831 = vmatprep.subr.bf16.mxu0 %v17738_v17  ;;  %12850 = vmatpush3.bf16.msra.mxu1 %v13768_v10 }
0x1a6d   : > { %12851 = vmatprep.subr.bf16.mxu1 %v17738_v17 }
0x1a6f   : > { %12832 = vmatpush3.bf16.msra.mxu0 %v13761_v31  ;;  %v13795_v31 = vld [vmem:[%s17653_s6 + $0x368] ss:$16 sps:$4 sm:$0xff]  }
0x1a70   : > { %12833 = vmatprep.subr.bf16.mxu0 %v17738_v17  ;;  %12852 = vmatpush3.bf16.msra.mxu1 %v13769_v36 }
0x1a71   : > { %12853 = vmatprep.subr.bf16.mxu1 %v17738_v17 }
0x1a73   : > { %12834 = vmatpush3.bf16.msra.mxu0 %v13762_v35  ;;  %v13798_v35 = vld [vmem:[%s17653_s6 + $0x380] ss:$16 sps:$4 sm:$0xff]  }
0x1a74   : > { %12835 = vmatprep.subr.bf16.mxu0 %v17738_v17  ;;  %12854 = vmatpush3.bf16.msra.mxu1 %v13770_v15 }
0x1a75   : > { %12855 = vmatprep.subr.bf16.mxu1 %v17738_v17 }
0x1a77   : > { %12836 = vmatpush3.bf16.msra.mxu0 %v13763_v6  ;;  %v13800_v6 = vld [vmem:[%s17653_s6 + $0x384] ss:$16 sps:$4 sm:$0xff]  }
0x1a78   : > { %12837 = vmatprep.subr.bf16.mxu0 %v17738_v17  ;;  %12856 = vmatpush3.bf16.msra.mxu1 %v13771_v37 }
0x1a79   : > { %12857 = vmatprep.subr.bf16.mxu1 %v17738_v17 }
0x1a7b   : > { %12838 = vmatpush3.bf16.msra.mxu0 %v13764_v9  ;;  %v13801_v9 = vld [vmem:[%s17653_s6 + $0x388] ss:$16 sps:$4 sm:$0xff]  }
0x1a7c   : > { %12839 = vmatprep.subr.bf16.mxu0 %v17738_v17  ;;  %12858 = vmatpush3.bf16.msra.mxu1 %v13772_v57 }
0x1a7d   : > { %12859 = vmatprep.subr.bf16.mxu1 %v17738_v17 }
0x1a7f   : > { %12840 = vmatpush3.bf16.msra.mxu0 %v13765_v49  ;;  %v13803_v49 = vld [vmem:[%s17653_s6 + $0x38c] ss:$16 sps:$4 sm:$0xff]  }
0x1a80   : > { %12865 = vmatprep.subr.bf16.mxu0 %v17738_v17  ;;  %12860 = vmatpush3.bf16.msra.mxu1 %v13773_v24 }
0x1a81   : > { %8923 = vmatprep.subr.bf16.mxu1 %v13776_v11  ;;  %v13829_v11 = vld [vmem:[%s17654_s7 + $0x388] sm:$0xff]  }
0x1a82   : > { %12842 = vmatmul.mubr.bf16.vlgmr.msra.gmra.mrb[120].mxu0 %v8041_v38  ;;  %v13809_v38 = vld [vmem:[%s17653_s6 + $0x3ac] ss:$16 sps:$4 sm:$0xff]  }
0x1a83   : > { %12881 = vmatprep.mubr.msk.bf16.mxu0 %vm14110_vm0, %v17738_v17  ;;  %12866 = vmatpush3.bf16.msra.mxu0 %v13766_v22  ;;  %v13804_v22 = vld [vmem:[%s17653_s6 + $0x3a0] ss:$16 sps:$4 sm:$0xff]  }
0x1a84   : > { %12867 = vmatprep.subr.bf16.mxu0 %v17738_v17 }
0x1a87   : > { %12868 = vmatpush3.bf16.msra.mxu0 %v13767_v25  ;;  %v13807_v25 = vld [vmem:[%s17653_s6 + $0x3a8] ss:$16 sps:$4 sm:$0xff]  }
0x1a88   : > { %12869 = vmatprep.subr.bf16.mxu0 %v17738_v17 }
0x1a8b   : > { %12870 = vmatpush3.bf16.msra.mxu0 %v13768_v10  ;;  %v13812_v10 = vld [vmem:[%s17653_s6 + $0x3c4] ss:$16 sps:$4 sm:$0xff]  }
0x1a8c   : > { %12871 = vmatprep.subr.bf16.mxu0 %v17738_v17 }
0x1a8f   : > { %12872 = vmatpush3.bf16.msra.mxu0 %v13769_v36  ;;  %v13815_v36 = vld [vmem:[%s17653_s6 + $0x3cc] ss:$16 sps:$4 sm:$0xff]  }
0x1a90   : > { %12873 = vmatprep.subr.bf16.mxu0 %v17738_v17 }
0x1a93   : > { %12874 = vmatpush3.bf16.msra.mxu0 %v13770_v15  ;;  %v13810_v15 = vld [vmem:[%s17653_s6 + $0x3c0] ss:$16 sps:$4 sm:$0xff]  }
0x1a94   : > { %12875 = vmatprep.subr.bf16.mxu0 %v17738_v17 }
0x1a97   : > { %12876 = vmatpush3.bf16.msra.mxu0 %v13771_v37  ;;  %v13813_v37 = vld [vmem:[%s17653_s6 + $0x3c8] ss:$16 sps:$4 sm:$0xff]  }
0x1a98   : > { %12877 = vmatprep.subr.bf16.mxu0 %v17738_v17 }
0x1a9b   : > { %12878 = vmatpush3.bf16.msra.mxu0 %v13772_v57  ;;  %v13818_v57 = vld [vmem:[%s17653_s6 + $0x3e4] ss:$16 sps:$4 sm:$0xff]  }
0x1a9c   : > { %12879 = vmatprep.subr.bf16.mxu0 %v17738_v17 }
0x1a9f   : > { %12880 = vmatpush3.bf16.msra.mxu0 %v13773_v24  ;;  %v13821_v24 = vld [vmem:[%s17653_s6 + $0x3ec] ss:$16 sps:$4 sm:$0xff]  }
0x1aa0   : > { %8964 = vmatprep.subr.bf16.mxu0 %v13779_v56  ;;  %v13830_v56 = vld [vmem:[%s17654_s7 + $0x350] sm:$0xff]  }
0x1b34   : > { %v12222_v32 = vpop.f32.mrb[104].mxu1 }
0x1b35   : > { %v12200_v60 = vpop.f32.mrb[116].mxu0  ;;  %v12223_v58 = vpop.f32.mrb[105].mxu1 }
0x1b36   : > { %v12224_v54 = vadd.f32 %v12223_v58, %v12222_v32  ;;  %v12201_v16 = vpop.f32.mrb[117].mxu0  ;;  %v12225_v43 = vpop.f32.mrb[106].mxu1  ;;  %v13819_v32 = vld [vmem:[%s17653_s6 + $0x3e8] ss:$16 sps:$4 sm:$0xff]  }
0x1b37   : > { %v12202_v46 = vadd.f32 %v12201_v16, %v12200_v60  ;;  %v12203_v39 = vpop.f32.mrb[118].mxu0  ;;  %v12226_v26 = vpop.f32.mrb[107].mxu1 }
0x1b38   : > { %v12204_v42 = vpop.f32.mrb[119].mxu0  ;;  %v11333_v26 = vld [vmem:[%s17725_s0 + $0x14] ss:$0 sm:$0xff] }
0x1b39   : > { %v8458_v23 = vadd.f32 %v12202_v46, %v8418_v41  ;;  %v11332_v46 = vld [vmem:[%s17725_s0 + $0x13] ss:$0 sm:$0xff] }
0x1b3b   : > { %v8498_v7 = vadd.f32 %v12224_v54, %v8458_v23 }
0x1b55   : > { %v8537_v33 = vpop.f32.mrb[120].mxu0 }
0x1b56   : > { %v8538_v47 = vadd.f32 %v8537_v33, %v8498_v7  ;;  %v12843_v19 = vpop.f32.mrb[121].mxu0  ;;  %v13822_v33 = vld [vmem:[%s17654_s7 + $0x340] sm:$0xff]  }
0x1b57   : > { %v8540_v63 = vpop.f32.mrb[122].mxu0  ;;  %v13824_v19 = vld [vmem:[%s17654_s7 + $0x300] sm:$0xff]  }
0x1b58   : > { %v8562_v2 = vpack.c.bf16 %v8538_v47, %v8538_v47  ;;  %v12844_v51 = vpop.f32.mrb[123].mxu0  ;;  %v13825_v63 = vld [vmem:[%s17654_s7 + $0x380] sm:$0xff]  }
0x1b59   : > { %v13827_v51 = vld [vmem:[%s17654_s7 + $0x3c8] sm:$0xff]  }
0x1b5a   : > { %12862 = vmatmul.mubr.bf16.vlgmr.msra.gmra.mrb[108].mxu1 %v8562_v2  ;;  %v13826_v2 = vld [vmem:[%s17654_s7 + $0x348] sm:$0xff]  }
0x1b5b   : > { %8955 = vmatprep.mubr.bf16.mxu1 %v17740_v40  ;;  %8924 = vmatpush1.bf16.msra.mxu1 %v13774_v34  ;;  %v13828_v34 = vld [vmem:[%s17654_s7 + $0x308] sm:$0xff]  }
0x1b5c   : > { %8925 = vmatprep.subr.bf16.mxu1 %v13782_v61  ;;  %v13831_v61 = vld [vmem:[%s17654_s7 + $0x3d0] sm:$0xff]  }
0x1b5f   : > { %8926 = vmatpush1.bf16.msra.mxu1 %v13780_v1  ;;  %v13832_v1 = vld [vmem:[%s17654_s7 + $0x310] sm:$0xff]  }
0x1b60   : > { %8927 = vmatprep.subr.bf16.mxu1 %v13788_v48  ;;  %v13833_v48 = vld [vmem:[%s17654_s7 + $0x390] sm:$0xff]  }
0x1b63   : > { %8928 = vmatpush1.bf16.msra.mxu1 %v13786_v53  ;;  %v13834_v53 = vld [vmem:[%s17654_s7 + $0x358] sm:$0xff]  }
0x1b64   : > { %8929 = vmatprep.subr.bf16.mxu1 %v13794_v5  ;;  %v13847_v5 = vld [vmem:[%s17654_s7 + $0x3f0] sm:$0xff]  }
0x1b67   : > { %8930 = vmatpush1.bf16.msra.mxu1 %v13792_v28  ;;  %v13849_v28 = vld [vmem:[%s17654_s7 + $0x3b0] sm:$0xff]  }
0x1b68   : > { %8931 = vmatprep.subr.bf16.mxu1 %v13800_v6  ;;  %v13852_v6 = vld [vmem:[%s17654_s7 + $0x338] sm:$0xff]  }
0x1b6b   : > { %8932 = vmatpush1.bf16.msra.mxu1 %v13798_v35  ;;  %v13851_v35 = vld [vmem:[%s17654_s7 + $0x3f8] sm:$0xff]  }
0x1b6c   : > { %8933 = vmatprep.subr.bf16.mxu1 %v13806_v44  ;;  %v11366_v44 = vld [vmem:[%s17728_s20 + $0x3] ss:$4 sm:$0xf] }
0x1b6f   : > { %8934 = vmatpush1.bf16.msra.mxu1 %v13804_v22  ;;  %v8754_v22 = vrot.slane %v11366_v44, %v17742_v50 }
0x1b70   : > { %8935 = vmatprep.subr.bf16.mxu1 %v13812_v10  ;;  %v8758_v10 = vrot.slane %v11366_v44, %v17744_v13 }
0x1b73   : > { %8936 = vmatpush1.bf16.msra.mxu1 %v13810_v15 }
0x1b74   : > { %8937 = vmatprep.subr.bf16.mxu1 %v13818_v57 }
0x1b77   : > { %8938 = vmatpush1.bf16.msra.mxu1 %v13816_v52 }
0x1b78   : > { %12255 = vmatprep.subr.bf16.mxu1 %v13822_v33 }
0x1c2d   : > { %v8645_v59 = vpop.f32.mrb[108].mxu1 }
0x1c2e   : > { %v17167_v14 = vsub.f32 %v8538_v47, %v8645_v59  ;;  %v12863_v20 = vpop.f32.mrb[109].mxu1  ;;  %v13823_v47 = vld [vmem:[%s17654_s7 + $0x3c0] sm:$0xff]   ;;  %v13835_v59 = vld [vmem:[%s17654_s7 + $0x3d8] sm:$0xff]  }
0x1c2f   : > { %v8648_v45 = vpop.f32.mrb[110].mxu1  ;;  %v13837_v20 = vld [vmem:[%s17654_s7 + $0x398] sm:$0xff]  }
0x1c30   : > { %v8652_v27 = vmul.f32 %v17167_v14, %v17167_v14  ;;  %v12864_v12 = vpop.f32.mrb[111].mxu1  ;;  %v13838_v45 = vld [vmem:[%s17654_s7 + $0x360] sm:$0xff]  }
0x1c31   : > { %v13840_v12 = vld [vmem:[%s17654_s7 + $0x320] sm:$0xff]  }
0x1c32   : > { %v8653_v3 = vpack.c.bf16 %v8652_v27, %v8652_v27  ;;  %v13839_v27 = vld [vmem:[%s17654_s7 + $0x3e0] sm:$0xff]  }
0x1c34   : > { %12882 = vmatmul.mubr.bf16.vlgmr.msra.gmra.mrb[124].mxu0 %v8653_v3  ;;  %v13842_v3 = vld [vmem:[%s17654_s7 + $0x368] sm:$0xff]  }
0x1c35   : > { %8965 = vmatpush1.bf16.msra.mxu0 %v13777_v55  ;;  %8996 = vmatprep.mubr.bf16.mxu0 %v17740_v40  ;;  %v13797_v40 = vld [vmem:[%s17653_s6 + $0x36c] ss:$16 sps:$4 sm:$0xff]   ;;  %v13841_v55 = vld [vmem:[%s17654_s7 + $0x3a0] sm:$0xff]  }
0x1c36   : > { %8966 = vmatprep.subr.bf16.mxu0 %v13785_v29  ;;  %v13843_v29 = vld [vmem:[%s17654_s7 + $0x3e8] sm:$0xff]  }
0x1c39   : > { %8967 = vmatpush1.bf16.msra.mxu0 %v13783_v4  ;;  %v13844_v4 = vld [vmem:[%s17654_s7 + $0x328] sm:$0xff]  }
0x1c3a   : > { %8968 = vmatprep.subr.bf16.mxu0 %v13791_v8  ;;  %v13845_v8 = vld [vmem:[%s17654_s7 + $0x3a8] sm:$0xff]  }
0x1c3d   : > { %8969 = vmatpush1.bf16.msra.mxu0 %v13789_v21  ;;  %v13846_v21 = vld [vmem:[%s17654_s7 + $0x370] sm:$0xff]  }
0x1c3e   : > { %8970 = vmatprep.subr.bf16.mxu0 %v13797_v40  ;;  %v13848_v40 = vld [vmem:[%s17654_s7 + $0x330] sm:$0xff]  }
0x1c41   : > { %8971 = vmatpush1.bf16.msra.mxu0 %v13795_v31  ;;  %v13850_v31 = vld [vmem:[%s17654_s7 + $0x378] sm:$0xff]  }
0x1c42   : > { %8972 = vmatprep.subr.bf16.mxu0 %v13803_v49  ;;  %v14111_v49 = vmov 0.0|0.0  }
0x1c45   : > { %8973 = vmatpush1.bf16.msra.mxu0 %v13801_v9  ;;  %v13853_v9 = vld [vmem:[%s17654_s7 + $0x3b8] sm:$0xff]  }
0x1c46   : > { %8974 = vmatprep.subr.bf16.mxu0 %v13809_v38  ;;  %v8746_v38 = vrot.slane %v11366_v44, %v17741_v30 }
0x1c49   : > { %8975 = vmatpush1.bf16.msra.mxu0 %v13807_v25  ;;  %v8750_v25 = vrot.slane %v11366_v44, %v17743_v0 }
0x1c4a   : > { %8976 = vmatprep.subr.bf16.mxu0 %v13815_v36 }
0x1c4d   : > { %8977 = vmatpush1.bf16.msra.mxu0 %v13813_v37 }
0x1c4e   : > { %8978 = vmatprep.subr.bf16.mxu0 %v13821_v24 }
0x1c51   : > { %8979 = vmatpush1.bf16.msra.mxu0 %v13819_v32 }
0x1c52   : > { %12277 = vmatprep.subr.bf16.mxu0 %v13823_v47 }
0x1d07   : > { %v8688_v60 = vpop.f32.mrb[124].mxu0 }
0x1d08   : > { %v8689_v58 = vadd.f32 1e-06, %v8688_v60  ;;  %v12883_v54 = vpop.f32.mrb[125].mxu0 }
0x1d09   : > { %v8691_v16 = vpop.f32.mrb[126].mxu0 }
0x1d0a   : > { %14002 = vrsqrt.f32 %v8689_v58  ;;  %v12884_v43 = vpop.f32.mrb[127].mxu0 }
0x1d14   : > { %v14003_v41 = vpop.eup %14002 }
0x1d15   : > { %v8695_v39 = vmul.f32 %v14003_v41, %v17167_v14  ;;  %v13836_v14 = vld [vmem:[%s17654_s7 + $0x318] sm:$0xff]  }
0x1d17   : > { %v8700_v42 = vmul.f32 %v11332_v46, %v8695_v39 }
0x1d19   : > { %v8705_v23 = vadd.f32 %v11333_v26, %v8700_v42 }
0x1d1b   : > { %v8739_v7 = vpack.c.bf16 %v8705_v23, %v8705_v23 }
0x1d1d   : > { %8956 = vmatmul.mubr.bf16.vlgmr.msra.gmra.mrb[112].mxu1 %v8739_v7  ;;  %8997 = vmatmul.mubr.bf16.vlgmr.msra.gmra.mrb[128].mxu0 %v8739_v7 }
0x1d1e   : > { %12256 = vmatpush3.bf16.msra.mxu1 %v13824_v19  ;;  %12278 = vmatpush3.bf16.msra.mxu0 %v13825_v63 }
0x1d1f   : > { %12257 = vmatprep.subr.bf16.mxu1 %v13826_v2  ;;  %12279 = vmatprep.subr.bf16.mxu0 %v13827_v51 }
0x1d22   : > { %12258 = vmatpush3.bf16.msra.mxu1 %v13828_v34  ;;  %12280 = vmatpush3.bf16.msra.mxu0 %v13829_v11 }
0x1d23   : > { %12259 = vmatprep.subr.bf16.mxu1 %v13830_v56  ;;  %12281 = vmatprep.subr.bf16.mxu0 %v13831_v61 }
0x1d26   : > { %12260 = vmatpush3.bf16.msra.mxu1 %v13832_v1  ;;  %12282 = vmatpush3.bf16.msra.mxu0 %v13833_v48 }
0x1d27   : > { %12261 = vmatprep.subr.bf16.mxu1 %v13834_v53  ;;  %12283 = vmatprep.subr.bf16.mxu0 %v13835_v59 }
0x1d2a   : > { %12262 = vmatpush3.bf16.msra.mxu1 %v13836_v14  ;;  %12284 = vmatpush3.bf16.msra.mxu0 %v13837_v20 }
0x1d2b   : > { %12263 = vmatprep.subr.bf16.mxu1 %v13838_v45  ;;  %12285 = vmatprep.subr.bf16.mxu0 %v13839_v27 }
0x1d2e   : > { %12264 = vmatpush3.bf16.msra.mxu1 %v13840_v12  ;;  %12286 = vmatpush3.bf16.msra.mxu0 %v13841_v55 }
0x1d2f   : > { %12265 = vmatprep.subr.bf16.mxu1 %v13842_v3  ;;  %12287 = vmatprep.subr.bf16.mxu0 %v13843_v29 }
0x1d32   : > { %12266 = vmatpush3.bf16.msra.mxu1 %v13844_v4  ;;  %12288 = vmatpush3.bf16.msra.mxu0 %v13845_v8 }
0x1d33   : > { %12267 = vmatprep.subr.bf16.mxu1 %v13846_v21  ;;  %12289 = vmatprep.subr.bf16.mxu0 %v13847_v5 }
0x1d36   : > { %12268 = vmatpush3.bf16.msra.mxu1 %v13848_v40  ;;  %12290 = vmatpush3.bf16.msra.mxu0 %v13849_v28 }
0x1d37   : > { %12269 = vmatprep.subr.bf16.mxu1 %v13850_v31  ;;  %12291 = vmatprep.subr.bf16.mxu0 %v13851_v35 }
0x1d3a   : > { %12270 = vmatpush3.bf16.msra.mxu1 %v13852_v6  ;;  %12292 = vmatpush3.bf16.msra.mxu0 %v13853_v9 }
0x1d3b   : > { %13023 = vmatprep.subr.bf16.mxu1 %v14111_v49  ;;  %13047 = vmatprep.subr.bf16.mxu0 %v14111_v49 }
0x1df0   : > { %v8957_v36 = vpop.f32.mrb[112].mxu1  ;;  %v8998_v15 = vpop.f32.mrb[128].mxu0 }
0x1df1   : > { %v17359_v37 = vadd.f32 %v8957_v36, %v8746_v38  ;;  %v17361_v57 = vadd.f32 %v8998_v15, %v8754_v22  ;;  %v8959_v24 = vpop.f32.mrb[113].mxu1  ;;  %v9000_v52 = vpop.f32.mrb[129].mxu0 }
0x1df2   : > { %v17363_v32 = vadd.f32 %v8959_v24, %v8750_v25  ;;  %v17365_v60 = vadd.f32 %v9000_v52, %v8758_v10  ;;  %v8961_v58 = vpop.f32.mrb[114].mxu1  ;;  %v9002_v30 = vpop.f32.mrb[130].mxu0 }
0x1df3   : > { %v17368_v50 = vmul.f32 0.70710677, %v17359_v37  ;;  %v17371_v0 = vmul.f32 0.70710677, %v17361_v57  ;;  %v8962_v46 = vpop.f32.mrb[115].mxu1  ;;  %v9003_v23 = vpop.f32.mrb[131].mxu0 }
0x1df4   : > { %v17374_v13 = vmul.f32 0.70710677, %v17363_v32  ;;  %v17380_v41 = vmul.f32 0.70710677, %v17365_v60 }
0x1df5   : > { %v9021_v54 = vand.u32 2147483647, %v17368_v50  ;;  %v9023_v16 = vand.u32 2147483647, %v17371_v0  ;;  %vm9013_vm13 = vcmp.ge.f32.partialorder %v17368_v50, 0.0  ;;  %vm9015_vm14 = vcmp.ge.f32.partialorder %v17371_v0, 0.0 }
0x1df6   : > { %v9022_v43 = vand.u32 2147483647, %v17374_v13  ;;  %v9024_v47 = vand.u32 2147483647, %v17380_v41  ;;  %vm9014_vm15 = vcmp.ge.f32.partialorder %v17374_v13, 0.0  ;;  %vm9016_vm1 = vcmp.ge.f32.partialorder %v17380_v41, 0.0 }
0x1df7   : > { %v9025_v39 = vmul.f32 0.3275911, %v9021_v54  ;;  %v9027_v26 = vmul.f32 0.3275911, %v9023_v16  ;;  %v9077_v51 = vsub.f32 0.0, %v9021_v54  ;;  %v9079_v34 = vsub.f32 0.0, %v9023_v16 }
0x1df8   : > { %v9026_v42 = vmul.f32 0.3275911, %v9022_v43  ;;  %v9028_v63 = vmul.f32 0.3275911, %v9024_v47  ;;  %v9078_v61 = vsub.f32 0.0, %v9022_v43  ;;  %v9080_v14 = vsub.f32 0.0, %v9024_v47 }
0x1df9   : > { %v9029_v7 = vadd.f32 1.0, %v9025_v39  ;;  %v9031_v33 = vadd.f32 1.0, %v9027_v26  ;;  %v9081_v56 = vmul.f32 %v9077_v51, %v9021_v54  ;;  %v9083_v53 = vmul.f32 %v9079_v34, %v9023_v16  ;;  %v9470_v41 = vld [vmem:[%s17656_s9] sm:$0xff] }
0x1dfa   : > { %v9030_v19 = vadd.f32 1.0, %v9026_v42  ;;  %v9032_v2 = vadd.f32 1.0, %v9028_v63  ;;  %v9082_v55 = vmul.f32 %v9078_v61, %v9022_v43  ;;  %v9084_v5 = vmul.f32 %v9080_v14, %v9024_v47 }
0x1dfb   : > { %14004 = vrcp.f32 %v9029_v7  ;;  %v9085_v27 = vmul.f32 1.442695, %v9081_v56  ;;  %v9089_v29 = vmul.f32 1.442695, %v9083_v53  ;;  %v9017_v53 = vsel %vm9013_vm13, 1.0, %v17735_v18 }
0x1dfc   : > { %14006 = vrcp.f32 %v9031_v33  ;;  %v9087_v6 = vmul.f32 1.442695, %v9082_v55  ;;  %v9091_v25 = vmul.f32 1.442695, %v9084_v5  ;;  %v9020_v5 = vsel %vm9016_vm1, 1.0, %v17735_v18 }
0x1dfd   : > { %14008 = vrcp.f32 %v9030_v19  ;;  %v9006_v13 = vmul.f32 0.5, %v17363_v32 }
0x1dfe   : > { %14010 = vrcp.f32 %v9032_v2 }
0x1dff   : > { %14012 = vpow2.f32 %v9085_v27 }
0x1e00   : > { %14014 = vpow2.f32 %v9089_v29 }
0x1e01   : > { %14016 = vpow2.f32 %v9087_v6 }
0x1e02   : > { %14018 = vpow2.f32 %v9091_v25 }
0x1e05   : > { %v14005_v11 = vpop.eup %14004 }
0x1e06   : > { %v14007_v1 = vpop.eup %14006  ;;  %v9041_v48 = vmul.f32 1.0614054, %v14005_v11 }
0x1e07   : > { %v9043_v59 = vmul.f32 1.0614054, %v14007_v1  ;;  %v14009_v45 = vpop.eup %14008 }
0x1e08   : > { %v9045_v20 = vadd.f32 -1.4531521, %v9041_v48  ;;  %v9042_v4 = vmul.f32 1.0614054, %v14009_v45  ;;  %v14011_v8 = vpop.eup %14010 }
0x1e09   : > { %v9047_v12 = vadd.f32 -1.4531521, %v9043_v59  ;;  %v9044_v31 = vmul.f32 1.0614054, %v14011_v8  ;;  %v14013_v7 = vpop.eup %14012 }
0x1e0a   : > { %v9049_v3 = vmul.f32 %v14005_v11, %v9045_v20  ;;  %v9046_v28 = vadd.f32 -1.4531521, %v9042_v4  ;;  %v14015_v47 = vpop.eup %14014  ;;  %v9005_v4 = vmul.f32 0.5, %v17359_v37  ;;  %v9008_v37 = vmul.f32 0.5, %v17365_v60 }
0x1e0b   : > { %v9051_v21 = vmul.f32 %v14007_v1, %v9047_v12  ;;  %v9048_v38 = vadd.f32 -1.4531521, %v9044_v31  ;;  %v14017_v48 = vpop.eup %14016  ;;  %v9007_v31 = vmul.f32 0.5, %v17361_v57  ;;  %v9472_v57 = vld [vmem:[%s17656_s9 + $0x10] sm:$0xff] }
0x1e0c   : > { %v9053_v40 = vadd.f32 1.4214138, %v9049_v3  ;;  %v9050_v44 = vmul.f32 %v14009_v45, %v9046_v28  ;;  %v14019_v20 = vpop.eup %14018 }
0x1e0d   : > { %v9055_v35 = vadd.f32 1.4214138, %v9051_v21  ;;  %v9052_v15 = vmul.f32 %v14011_v8, %v9048_v38 }
0x1e0e   : > { %v9057_v9 = vmul.f32 %v14005_v11, %v9053_v40  ;;  %v9054_v36 = vadd.f32 1.4214138, %v9050_v44 }
0x1e0f   : > { %v9059_v22 = vmul.f32 %v14007_v1, %v9055_v35  ;;  %v9056_v30 = vadd.f32 1.4214138, %v9052_v15  ;;  %v9471_v35 = vld [vmem:[%s17656_s9 + $0x8] sm:$0xff] }
0x1e10   : > { %v9061_v10 = vadd.f32 -0.28449672, %v9057_v9  ;;  %v9058_v58 = vmul.f32 %v14009_v45, %v9054_v36 }
0x1e11   : > { %v9063_v24 = vadd.f32 -0.28449672, %v9059_v22  ;;  %v9060_v46 = vmul.f32 %v14011_v8, %v9056_v30  ;;  %v13024_v22 = vpack.c.bf16 %v9471_v35, %v9470_v41  ;;  %v9476_v30 = vld [vmem:[%s17656_s9 + $0x30] sm:$0xff]  ;;  %v9644_v35 = vld [vmem:[%s17658_s11 + $0x38] sm:$0xff] }
0x1e12   : > { %v9065_v52 = vmul.f32 %v14005_v11, %v9061_v10  ;;  %v9062_v43 = vadd.f32 -0.28449672, %v9058_v58  ;;  %v9473_v10 = vld [vmem:[%s17656_s9 + $0x18] sm:$0xff]  ;;  %v9643_v41 = vld [vmem:[%s17658_s11 + $0x30] sm:$0xff] }
0x1e13   : > { %v9067_v54 = vmul.f32 %v14007_v1, %v9063_v24  ;;  %v9064_v23 = vadd.f32 -0.28449672, %v9060_v46  ;;  %v13027_v60 = vpack.c.bf16 %v9473_v10, %v9472_v57  ;;  %v9474_v24 = vld [vmem:[%s17656_s9 + $0x20] sm:$0xff]  ;;  %v9479_v46 = vld [vmem:[%s17656_s9 + $0x48] sm:$0xff] }
0x1e14   : > { %v9069_v16 = vadd.f32 0.2548296, %v9065_v52  ;;  %v9066_v42 = vmul.f32 %v14009_v45, %v9062_v43  ;;  %v9475_v52 = vld [vmem:[%s17656_s9 + $0x28] sm:$0xff]  ;;  %v9478_v43 = vld [vmem:[%s17656_s9 + $0x40] sm:$0xff] }
0x1e15   : > { %v9071_v39 = vadd.f32 0.2548296, %v9067_v54  ;;  %v9068_v2 = vmul.f32 %v14011_v8, %v9064_v23  ;;  %v13030_v58 = vpack.c.bf16 %v9475_v52, %v9474_v24  ;;  %v9477_v54 = vld [vmem:[%s17656_s9 + $0x38] sm:$0xff]  ;;  %v9635_v52 = vld [vmem:[%s17657_s10 + $0x30] sm:$0xff] }
0x1e16   : > { %v9073_v26 = vmul.f32 %v14005_v11, %v9069_v16  ;;  %v9070_v63 = vadd.f32 0.2548296, %v9066_v42  ;;  %v9019_v11 = vsel %vm9015_vm14, 1.0, %v17735_v18  ;;  %v13033_v16 = vpack.c.bf16 %v9477_v54, %v9476_v30  ;;  %v9481_v42 = vld [vmem:[%s17656_s9 + $0x58] sm:$0xff]  ;;  %v9831_v54 = vld [vmem:[%s17664_s17] sm:$0xff] }
0x1e17   : > { %v9075_v33 = vmul.f32 %v14007_v1, %v9071_v39  ;;  %v9072_v61 = vadd.f32 0.2548296, %v9068_v2  ;;  %v13036_v39 = vpack.c.bf16 %v9479_v46, %v9478_v43  ;;  %v9833_v46 = vld [vmem:[%s17664_s17 + $0x10] sm:$0xff] }
0x1e18   : > { %v9093_v19 = vmul.f32 %v14013_v7, %v9073_v26  ;;  %v9074_v56 = vmul.f32 %v14009_v45, %v9070_v63  ;;  %v9018_v45 = vsel %vm9014_vm15, 1.0, %v17735_v18  ;;  %v9480_v26 = vld [vmem:[%s17656_s9 + $0x50] sm:$0xff]  ;;  %v9482_v7 = vld [vmem:[%s17656_s9 + $0x60] sm:$0xff]  ;;  %v9485_v63 = vld [vmem:[%s17656_s9 + $0x78] sm:$0xff] }
0x1e19   : > { %v9095_v51 = vmul.f32 %v14015_v47, %v9075_v33  ;;  %v9076_v1 = vmul.f32 %v14011_v8, %v9072_v61  ;;  %v13039_v23 = vpack.c.bf16 %v9481_v42, %v9480_v26  ;;  %v9483_v33 = vld [vmem:[%s17656_s9 + $0x68] sm:$0xff]  ;;  %v9835_v26 = vld [vmem:[%s17664_s17 + $0x20] sm:$0xff] }
0x1e1a   : > { %v9097_v34 = vsub.f32 1.0, %v9093_v19  ;;  %v9094_v50 = vmul.f32 %v14017_v48, %v9074_v56  ;;  %v13042_v47 = vpack.c.bf16 %v9483_v33, %v9482_v7  ;;  %v9484_v19 = vld [vmem:[%s17656_s9 + $0x70] sm:$0xff]  ;;  %v9836_v42 = vld [vmem:[%s17664_s17 + $0x28] sm:$0xff]  ;;  %v9838_v33 = vld [vmem:[%s17664_s17 + $0x38] sm:$0xff] }
0x1e1b   : > { %v9099_v59 = vsub.f32 1.0, %v9095_v51  ;;  %v9096_v12 = vmul.f32 %v14019_v20, %v9076_v1  ;;  %v13045_v2 = vpack.c.bf16 %v9485_v63, %v9484_v19  ;;  %v11496_v20 = vld [vmem:[%s17725_s0 + $0x16] ss:$0 sm:$0xff] }
0x1e1c   : > { %v9101_v14 = vmul.f32 %v9097_v34, %v9017_v53  ;;  %v9098_v0 = vsub.f32 1.0, %v9094_v50  ;;  %v11463_v34 = vld [vmem:[%s17725_s0 + $0x15] ss:$0 sm:$0xff]  ;;  %s17605_s0 = scalar_lea.hbm %s17747_s5, %s11501_s2 }
0x1e1d   : > { %v9103_v27 = vmul.f32 %v9099_v59, %v9019_v11  ;;  %v9100_v29 = vsub.f32 1.0, %v9096_v12  ;;  %v9837_v7 = vld [vmem:[%s17664_s17 + $0x30] sm:$0xff] }
0x1e1e   : > { %v9105_v55 = vadd.f32 1.0, %v9101_v14  ;;  %v9102_v3 = vmul.f32 %v9098_v0, %v9018_v45  ;;  %v9637_v45 = vld [vmem:[%s17658_s11] sm:$0xff] }
0x1e1f   : > { %v9107_v21 = vadd.f32 1.0, %v9103_v27  ;;  %v9104_v40 = vmul.f32 %v9100_v29, %v9020_v5  ;;  %v9639_v5 = vld [vmem:[%s17658_s11 + $0x10] sm:$0xff] }
0x1e20   : > { %v9106_v8 = vadd.f32 1.0, %v9102_v3  ;;  %v9109_v28 = vmul.f32 %v9105_v55, %v9005_v4  ;;  %v9638_v3 = vld [vmem:[%s17658_s11 + $0x8] sm:$0xff] }
0x1e21   : > { %v9108_v9 = vadd.f32 1.0, %v9104_v40  ;;  %v9111_v44 = vmul.f32 %v9107_v21, %v9007_v31  ;;  %v13072_v4 = vpack.c.bf16 %v9638_v3, %v9637_v45 }
0x1e22   : > { %v9110_v6 = vmul.f32 %v9106_v8, %v9006_v13  ;;  %v9178_v25 = vpack.c.bf16 %v9109_v28, %v9109_v28  ;;  %v9640_v13 = vld [vmem:[%s17658_s11 + $0x18] sm:$0xff]  ;;  %v9641_v8 = vld [vmem:[%s17658_s11 + $0x20] sm:$0xff]  ;;  %v9642_v28 = vld [vmem:[%s17658_s11 + $0x28] sm:$0xff] }
0x1e23   : > { %v9112_v32 = vmul.f32 %v9108_v9, %v9008_v37  ;;  %v9180_v15 = vpack.c.bf16 %v9111_v44, %v9111_v44  ;;  %v13075_v40 = vpack.c.bf16 %v9640_v13, %v9639_v5  ;;  %v13078_v31 = vpack.c.bf16 %v9642_v28, %v9641_v8  ;;  %v9630_v9 = vld [vmem:[%s17657_s10 + $0x8] sm:$0xff] }
0x1e24   : > { %v9179_v38 = vpack.c.bf16 %v9110_v6, %v9110_v6  ;;  %v13081_v37 = vpack.c.bf16 %v9644_v35, %v9643_v41  ;;  %v9629_v6 = vld [vmem:[%s17657_s10] sm:$0xff] }
0x1e25   : > { %v9181_v36 = vpack.c.bf16 %v9112_v32, %v9112_v32 }
0x1e26   : > { %9411 = vmatprep.mubr.bf16.mxu1 %v9179_v38  ;;  %v13084_v38 = vpack.c.bf16 %v9630_v9, %v9629_v6 }
0x1e27   : > { %9412 = vmatmul.mubr.bf16.vlgmr.msra.gmra.mrb[116].mxu1 %v9178_v25  ;;  %9451 = vmatprep.mubr.bf16.mxu0 %v9181_v36  ;;  %v9632_v25 = vld [vmem:[%s17657_s10 + $0x18] sm:$0xff] }
0x1e28   : > { %13025 = vmatpush3.bf16.msra.mxu1 %v13024_v22  ;;  %9452 = vmatmul.mubr.bf16.vlgmr.msra.gmra.mrb[132].mxu0 %v9180_v15  ;;  %v9633_v15 = vld [vmem:[%s17657_s10 + $0x20] sm:$0xff] }
0x1e29   : > { %13026 = vmatprep.subr.bf16.mxu1 %v14111_v49  ;;  %13049 = vmatpush3.bf16.msra.mxu0 %v13024_v22  ;;  %v9631_v22 = vld [vmem:[%s17657_s10 + $0x10] sm:$0xff] }
0x1e2a   : > { %12917 = vmatprep.mubr.msk.f32.mxu1 %vm14110_vm0, %v17738_v17  ;;  %13050 = vmatprep.subr.bf16.mxu0 %v14111_v49  ;;  %v13087_v36 = vpack.c.bf16 %v9632_v25, %v9631_v22  ;;  %v9829_v22 = vld [vmem:[%s17661_s14] sm:$0x1] }
0x1e2b   : > { %12952 = vmatprep.mubr.msk.f32.mxu0 %vm14110_vm0, %v17738_v17 }
0x1e2c   : > { %13028 = vmatpush3.bf16.msra.mxu1 %v13027_v60 }
0x1e2d   : > { %13029 = vmatprep.subr.bf16.mxu1 %v14111_v49  ;;  %13052 = vmatpush3.bf16.msra.mxu0 %v13027_v60  ;;  %v9634_v60 = vld [vmem:[%s17657_s10 + $0x28] sm:$0xff] }
0x1e2e   : > { %13053 = vmatprep.subr.bf16.mxu0 %v14111_v49  ;;  %v13090_v24 = vpack.c.bf16 %v9634_v60, %v9633_v15  ;;  %v9942_v60 = vld [vmem:[%s17666_s19 + $0x10] sm:$0xff] }
0x1e30   : > { %13031 = vmatpush3.bf16.msra.mxu1 %v13030_v58 }
0x1e31   : > { %13032 = vmatprep.subr.bf16.mxu1 %v14111_v49  ;;  %13055 = vmatpush3.bf16.msra.mxu0 %v13030_v58  ;;  %v9636_v58 = vld [vmem:[%s17657_s10 + $0x38] sm:$0xff] }
0x1e32   : > { %13056 = vmatprep.subr.bf16.mxu0 %v14111_v49  ;;  %v13093_v30 = vpack.c.bf16 %v9636_v58, %v9635_v52  ;;  %v9839_v58 = vld [vmem:[%s17665_s18] sm:$0x1] }
0x1e34   : > { %13034 = vmatpush3.bf16.msra.mxu1 %v13033_v16 }
0x1e35   : > { %13035 = vmatprep.subr.bf16.mxu1 %v14111_v49  ;;  %13058 = vmatpush3.bf16.msra.mxu0 %v13033_v16  ;;  %v9832_v16 = vld [vmem:[%s17664_s17 + $0x8] sm:$0xff] }
0x1e36   : > { %13059 = vmatprep.subr.bf16.mxu0 %v14111_v49  ;;  %v13096_v43 = vpack.c.bf16 %v9832_v16, %v9831_v54 }
0x1e38   : > { %13037 = vmatpush3.bf16.msra.mxu1 %v13036_v39 }
0x1e39   : > { %13061 = vmatpush3.bf16.msra.mxu0 %v13036_v39  ;;  %13038 = vmatprep.subr.bf16.mxu1 %v14111_v49 }
0x1e3a   : > { %13062 = vmatprep.subr.bf16.mxu0 %v14111_v49 }
0x1e3c   : > { %13040 = vmatpush3.bf16.msra.mxu1 %v13039_v23 }
0x1e3d   : > { %13064 = vmatpush3.bf16.msra.mxu0 %v13039_v23  ;;  %13041 = vmatprep.subr.bf16.mxu1 %v14111_v49  ;;  %v13102_v23 = vpack.c.bf16 %v9836_v42, %v9835_v26 }
0x1e3e   : > { %13065 = vmatprep.subr.bf16.mxu0 %v14111_v49 }
0x1e40   : > { %13043 = vmatpush3.bf16.msra.mxu1 %v13042_v47 }
0x1e41   : > { %13067 = vmatpush3.bf16.msra.mxu0 %v13042_v47  ;;  %13044 = vmatprep.subr.bf16.mxu1 %v14111_v49  ;;  %v13105_v47 = vpack.c.bf16 %v9838_v33, %v9837_v7 }
0x1e42   : > { %13068 = vmatprep.subr.bf16.mxu0 %v14111_v49 }
0x1e44   : > { %13046 = vmatpush3.bf16.msra.mxu1 %v13045_v2 }
0x1e45   : > { %13070 = vmatpush3.bf16.msra.mxu0 %v13045_v2  ;;  %13071 = vmatprep.subr.bf16.mxu1 %v14111_v49 }
0x1e46   : > { %13095 = vmatprep.subr.bf16.mxu0 %v14111_v49 }
0x1efa   : > { %v12271_v51 = vpop.f32.mrb[116].mxu1 }
0x1efb   : > { %v12272_v56 = vpop.f32.mrb[117].mxu1  ;;  %v12293_v61 = vpop.f32.mrb[132].mxu0 }
0x1efc   : > { %v12273_v48 = vadd.f32 %v12272_v56, %v12271_v51  ;;  %v12274_v53 = vpop.f32.mrb[118].mxu1  ;;  %v12294_v11 = vpop.f32.mrb[133].mxu0  ;;  %v9792_v51 = vld [vmem:[%s17659_s12] sm:$0x1] }
0x1efd   : > { %v12275_v59 = vpop.f32.mrb[119].mxu1  ;;  %v12295_v50 = vadd.f32 %v12294_v11, %v12293_v61  ;;  %v12296_v1 = vpop.f32.mrb[134].mxu0 }
0x1efe   : > { %v9414_v14 = vadd.f32 %v12273_v48, %v11463_v34  ;;  %v12297_v27 = vpop.f32.mrb[135].mxu0 }
0x1f00   : > { %v9454_v0 = vadd.f32 %v12295_v50, %v9414_v14 }
0x1f02   : > { %v9464_v12 = vmul.f32 %v11496_v20, %v9454_v0 }
0x1f04   : > { %v9465_v55 = vadd.f32 %v17061_v62, %v9464_v12 }
0x1f06   : > { %v9467_v29 = vrot.slane %v9465_v55, 1 }
0x1f08   : > { %v9469_v21 = vadd.f32 %v9467_v29, %v9465_v55  ;;  %v9823_v29 = vld [vmem:[%s17663_s16] sm:$0x1] }
0x1f0a   : > { %12918 = vmatmul.mubr.f32.vlgmr.msra.gmra.mrb[120].mxu1 %v9469_v21  ;;  %v9557_v62 = vrot.slane %v9469_v21, 2  ;;  %v9824_v21 = vadd.f32 1e-05, %v9823_v29 }
0x1f0b   : > { %13073 = vmatpush3.bf16.msra.mxu1 %v13072_v4  ;;  %12971 = vmatprep.mubr.msk.f32.mxu1 %vm14110_vm0, %v17738_v17 }
0x1f0c   : > { %12953 = vmatmul.mubr.f32.vlgmr.msra.gmra.mrb[136].mxu0 %v9557_v62  ;;  %13074 = vmatprep.subr.bf16.mxu1 %v14111_v49 }
0x1f0d   : > { %13009 = vmatprep.mubr.msk.f32.mxu0 %vm14110_vm0, %v17738_v17  ;;  %13097 = vmatpush3.bf16.msra.mxu0 %v13096_v43 }
0x1f0e   : > { %13098 = vmatprep.subr.bf16.mxu0 %v14111_v49 }
0x1f0f   : > { %13076 = vmatpush3.bf16.msra.mxu1 %v13075_v40 }
0x1f10   : > { %13077 = vmatprep.subr.bf16.mxu1 %v14111_v49 }
0x1f13   : > { %13079 = vmatpush3.bf16.msra.mxu1 %v13078_v31 }
0x1f14   : > { %13080 = vmatprep.subr.bf16.mxu1 %v14111_v49 }
0x1f17   : > { %13082 = vmatpush3.bf16.msra.mxu1 %v13081_v37  ;;  %v9821_v37 = vld [vmem:[%s17662_s15] sm:$0x1] }
0x1f18   : > { %13083 = vmatprep.subr.bf16.mxu1 %v14111_v49 }
0x1fdd   : > { %v9552_v44 = vpop.f32.mrb[120].mxu1 }
0x1fde   : > { %v12919_v32 = vpop.f32.mrb[121].mxu1 }
0x1fdf   : > { %v9625_v57 = vpop.f32.mrb[136].mxu0 }
0x1fe0   : > { %v12954_v10 = vpop.f32.mrb[137].mxu0  ;;  %12972 = vmatmul.mubr.msk.f32.vlgmr.msra.gmra.mrb[122].mxu1 %vm9645_vm2, %v9625_v57 }
0x1fe1   : > { %13085 = vmatpush3.bf16.msra.mxu1 %v13084_v38  ;;  %12990 = vmatprep.mubr.msk.f32.mxu1 %vm14110_vm0, %v17738_v17  ;;  %v9827_v38 = vld [vmem:[%s17660_s13] sm:$0x1] }
0x1fe2   : > { %13086 = vmatprep.subr.bf16.mxu1 %v14111_v49  ;;  %v9940_v10 = vld [vmem:[%s17666_s19] sm:$0xff] }
0x1fe5   : > { %13088 = vmatpush3.bf16.msra.mxu1 %v13087_v36  ;;  %v9941_v36 = vld [vmem:[%s17666_s19 + $0x8] sm:$0xff] }
0x1fe6   : > { %13089 = vmatprep.subr.bf16.mxu1 %v14111_v49  ;;  %v13108_v15 = vpack.c.bf16 %v9941_v36, %v9940_v10 }
0x1fe9   : > { %13091 = vmatpush3.bf16.msra.mxu1 %v13090_v24  ;;  %v9943_v24 = vld [vmem:[%s17666_s19 + $0x18] sm:$0xff] }
0x1fea   : > { %13092 = vmatprep.subr.bf16.mxu1 %v14111_v49  ;;  %v13111_v52 = vpack.c.bf16 %v9943_v24, %v9942_v60 }
0x1fed   : > { %13094 = vmatpush3.bf16.msra.mxu1 %v13093_v30 }
0x1fee   : > { %13107 = vmatprep.subr.bf16.mxu1 %v14111_v49 }
0x1ff0   : > { %12991 = vmatmul.mubr.msk.f32.vlgmr.msra.gmra.mrb[124].mxu1 %vm9645_vm2, %v9552_v44 }
0x1ff1   : > { %13020 = vmatprep.mubr.msk.f32.mxu1 %vm14110_vm0, %v17738_v17  ;;  %v9834_v17 = vld [vmem:[%s17664_s17 + $0x18] sm:$0xff]  ;;  %13109 = vmatpush3.bf16.msra.mxu1 %v13108_v15 }
0x1ff2   : > { %v13099_v39 = vpack.c.bf16 %v9834_v17, %v9833_v46  ;;  %13110 = vmatprep.subr.bf16.mxu1 %v14111_v49 }
0x1ff4   : > { %13100 = vmatpush3.bf16.msra.mxu0 %v13099_v39 }
0x1ff5   : > { %13101 = vmatprep.subr.bf16.mxu0 %v14111_v49  ;;  %13112 = vmatpush3.bf16.msra.mxu1 %v13111_v52 }
0x1ff8   : > { %13103 = vmatpush3.bf16.msra.mxu0 %v13102_v23 }
0x1ff9   : > { %13104 = vmatprep.subr.bf16.mxu0 %v14111_v49 }
0x1ffc   : > { %13106 = vmatpush3.bf16.msra.mxu0 %v13105_v47 }
0x20b3   : > { %v9715_v19 = vpop.f32.mrb[122].mxu1 }
0x20b4   : > { %v12973_v63 = vpop.f32.mrb[123].mxu1 }
0x20c3   : > { %v9788_v2 = vpop.f32.mrb[124].mxu1 }
0x20c4   : > { %v9789_v34 = vadd.f32 %v9788_v2, %v9715_v19  ;;  %v12992_v56 = vpop.f32.mrb[125].mxu1 }
0x20c6   : > { %v9793_v61 = vadd.f32 %v9792_v51, %v9789_v34 }
0x20c8   : > { %v9795_v48 = vmul.f32 0.70710677, %v9793_v61  ;;  %v9794_v41 = vmul.f32 0.5, %v9793_v61 }
0x20ca   : > { %v9798_v53 = vand.u32 2147483647, %v9795_v48  ;;  %vm9796_vm0 = vcmp.ge.f32.partialorder %v9795_v48, 0.0 }
0x20cb   : > { %v9797_v28 = vsel %vm9796_vm0, 1.0, %v17735_v18 }
0x20cc   : > { %v9799_v11 = vmul.f32 0.3275911, %v9798_v53  ;;  %v9812_v14 = vsub.f32 0.0, %v9798_v53 }
0x20ce   : > { %v9800_v59 = vadd.f32 1.0, %v9799_v11  ;;  %v9813_v1 = vmul.f32 %v9812_v14, %v9798_v53 }
0x20d0   : > { %14020 = vrcp.f32 %v9800_v59  ;;  %v9814_v0 = vmul.f32 1.442695, %v9813_v1 }
0x20d2   : > { %14022 = vpow2.f32 %v9814_v0 }
0x20d3   : > { %14024 = vrsqrt.f32 %v9824_v21 }
0x20da   : > { %v14021_v50 = vpop.eup %14020 }
0x20db   : > { %v9803_v20 = vmul.f32 1.0614054, %v14021_v50 }
0x20dc   : > { %v14023_v62 = vpop.eup %14022 }
0x20dd   : > { %v9804_v27 = vadd.f32 -1.4531521, %v9803_v20  ;;  %v14025_v9 = vpop.eup %14024  ;;  %v9944_v20 = vld [vmem:[%s17746_s29] sm:$0x1]  ;;  %s14047_s29 = sshll.u32 %s14112_s3, 4  ;;  %s14048_s29 = int_to_ptr.vmem [resolvable:$false] %s14047_s29 }
0x20de   : > { %s14049_s1 = scalar_lea.vmem %s14048_s29, 32  ;;  %p14050_p0 = scmp.lt.s32.totalorder %s17607_s23, %s14048_s29 }
0x20df   : > { %v9805_v12 = vmul.f32 %v14021_v50, %v9804_v27  ;;  %p14051_p1 = scmp.lt.s32.totalorder %s14049_s1, %s14043_s21 }
0x20e1   : > { %v9806_v55 = vadd.f32 1.4214138, %v9805_v12  ;;  %p14052_p2 = por %p14051_p1, %p14050_p0 }
0x20e3   : > { %v9807_v45 = vmul.f32 %v14021_v50, %v9806_v55  ;;  %p14053_p3 = pnand %p14052_p2, %p14046_p13 }
0x20e5   : > { %v9808_v3 = vadd.f32 -0.28449672, %v9807_v45 }
0x20e7   : > { %v9809_v4 = vmul.f32 %v14021_v50, %v9808_v3 }
0x20e9   : > { %v9810_v5 = vadd.f32 0.2548296, %v9809_v4 }
0x20eb   : > { %v9811_v13 = vmul.f32 %v14021_v50, %v9810_v5 }
0x20ed   : > { %v9816_v40 = vmul.f32 %v14023_v62, %v9811_v13 }
0x20ef   : > { %v9817_v8 = vsub.f32 1.0, %v9816_v40 }
0x20f1   : > { %v9818_v31 = vmul.f32 %v9817_v8, %v9797_v28 }
0x20f3   : > { %v9819_v35 = vadd.f32 1.0, %v9818_v31 }
0x20f5   : > { %v9820_v6 = vmul.f32 %v9819_v35, %v9794_v41 }
0x20f7   : > { %v9822_v44 = vsub.f32 %v9820_v6, %v9821_v37 }
0x20f9   : > { %v9826_v32 = vmul.f32 %v14025_v9, %v9822_v44 }
0x20fb   : > { %v9828_v25 = vmul.f32 %v9827_v38, %v9826_v32 }
0x20fd   : > { %v9830_v57 = vadd.f32 %v9829_v22, %v9828_v25 }
0x20ff   : > { %13010 = vmatmul.mubr.msk.f32.vlgmr.msra.gmra.mrb[138].mxu0 %vm9645_vm2, %v9830_v57 }
0x21d2   : > { %v9909_v30 = vpop.f32.mrb[138].mxu0 }
0x21d3   : > { %v9910_v54 = vadd.f32 %v9909_v30, %v9839_v58  ;;  %v13011_v16 = vpop.f32.mrb[139].mxu0 }
0x21d5   : > { %v9914_v43 = vmul.f32 0.70710677, %v9910_v54  ;;  %v9913_v14 = vmul.f32 0.5, %v9910_v54 }
0x21d7   : > { %v9917_v46 = vand.u32 2147483647, %v9914_v43  ;;  %vm9915_vm3 = vcmp.ge.f32.partialorder %v9914_v43, 0.0 }
0x21d8   : > { %v9916_v11 = vsel %vm9915_vm3, 1.0, %v17735_v18 }
0x21d9   : > { %v9918_v49 = vmul.f32 0.3275911, %v9917_v46  ;;  %v9931_v39 = vsub.f32 0.0, %v9917_v46 }
0x21db   : > { %v9919_v17 = vadd.f32 1.0, %v9918_v49  ;;  %v9932_v42 = vmul.f32 %v9931_v39, %v9917_v46 }
0x21dd   : > { %14026 = vrcp.f32 %v9919_v17  ;;  %v9933_v33 = vmul.f32 1.442695, %v9932_v42 }
0x21df   : > { %14028 = vpow2.f32 %v9933_v33 }
0x21e7   : > { %v14027_v26 = vpop.eup %14026 }
0x21e8   : > { %v9922_v23 = vmul.f32 1.0614054, %v14027_v26 }
0x21e9   : > { %v14029_v61 = vpop.eup %14028 }
0x21ea   : > { %v9923_v7 = vadd.f32 -1.4531521, %v9922_v23 }
0x21ec   : > { %v9924_v47 = vmul.f32 %v14027_v26, %v9923_v7 }
0x21ee   : > { %v9925_v19 = vadd.f32 1.4214138, %v9924_v47 }
0x21f0   : > { %v9926_v63 = vmul.f32 %v14027_v26, %v9925_v19 }
0x21f2   : > { %v9927_v2 = vadd.f32 -0.28449672, %v9926_v63 }
0x21f4   : > { %v9928_v51 = vmul.f32 %v14027_v26, %v9927_v2 }
0x21f6   : > { %v9929_v34 = vadd.f32 0.2548296, %v9928_v51 }
0x21f8   : > { %v9930_v56 = vmul.f32 %v14027_v26, %v9929_v34 }
0x21fa   : > { %v9935_v48 = vmul.f32 %v14029_v61, %v9930_v56 }
0x21fc   : > { %v9936_v53 = vsub.f32 1.0, %v9935_v48 }
0x21fe   : > { %v9937_v59 = vmul.f32 %v9936_v53, %v9916_v11 }
0x2200   : > { %v9938_v50 = vadd.f32 1.0, %v9937_v59 }
0x2202   : > { %v9939_v1 = vmul.f32 %v9938_v50, %v9913_v14 }
0x2204   : > { %13021 = vmatmul.mubr.msk.f32.vlgmr.msra.gmra.mrb[126].mxu1 %vm9945_vm4, %v9939_v1 }
0x22d7   : > { %v10015_v27 = vpop.f32.mrb[126].mxu1 }
0x22d8   : > { %v10016_v0 = vadd.f32 %v10015_v27, %v9944_v20  ;;  %v13022_v12 = vpop.f32.mrb[127].mxu1 }
0x22da   : > { %10020 = vst.msk [vmem:[%s648_s4] sm:$0x1] %vm10019_vm5, %v10016_v0 }
0x22db   : > { %14056 = shalt.err (!%p14053_p3)
}
0x22dc   : > { %s14057_s30 = scalar_lea.hbm %s17605_s0, 16  ;;  %s14061_s27 = scalar_lea.hbm %s17747_s5, 32 }
0x22dd   : > { %p14058_p4 = scmp.ne.s32.totalorder %s17605_s0, %s14057_s30  ;;  %p14062_p9 = scmp.lt.u32.totalorder %s17605_s0, %s17747_s5 }
0x22de   : > { %p14063_p10 = scmp.lt.u32.totalorder %s14061_s27, %s14057_s30  ;;  %p14065_p12 = scmp.lt.u32.totalorder %s14057_s30, %s17605_s0 }
0x22df   : > { %p14059_p7 = pnand %p14058_p4, %p14261_p5 }
0x22e0   : > { %p14064_p11 = por %p14063_p10, %p14062_p9 }
0x22e1   : > { %p14060_p8 = pneg %p14059_p7 }
0x22e2   : > { %p14066_p13 = por %p14065_p12, %p14064_p11 }
0x22e4   : > { %p14067_p0 = pnand %p14066_p13, %p14060_p8 }
0x22e6   : > { %14070 = shalt.err (!%p14067_p0)
}
0x22e7   : > { %13130 = dma.vmem_to_hbm [thread:$0]  (%p14261_p5), %s17607_s23, 16, %s17605_s0, %s10022_s26  }
0x22e8 PF: > { %s17748_s1 = sld [smem:[#allocation10_spill]]  ;;  %s17749_s21 = sld [smem:[#allocation8_spill]] }
0x22ee   : > { %p13136_p1 = scmp.ge.s32.totalorder %s17748_s1, 2  ;;  %s10046_s2 = sand.u32 1, %s17749_s21  }
0x22ef   : > { %s10047_s4 = scalar_lea.sflag [#allocation6], %s10046_s2 }
0x22f0   : > { %p13133_p2 = pnand %p13136_p1, %p14265_p6 }
0x22f2   : > { %14088 = dma.done.wait (!%p13133_p2), %s10047_s4, 16  }
0x22f3   : > { %14090 = vsyncadd (!%p13133_p2), %s10047_s4, 4294967280  ;;  %s17751_s27 = sld [smem:[#allocation11_spill]]  ;;  %s17752_s30 = sld [smem:[#allocation9_spill]] }
0x22f4   : > { %s17753_s26 = sld [smem:[#allocation12_spill]]  ;;  %s17754_s2 = smov %s14097_s25 }
0x22f9   : > { %p31_p3 = scmp.ge.s32.totalorder %s17751_s27, 4   ;;  %s17755_s25 = smov %s17752_s30 }
0x22fb   :  { %33 = sbr.rel (!%p31_p3) target bundleno = 12 (0xc), region = 162 }
0x2302   :  { %10051 = vsyncpa [#allocation6], 1 }
0x2303   :  { %10053 = vsyncpa [#allocation6 + $0x1], 1 }

</bundles_post_ra>
